<compile_context>
chip_gen: v5e
topology: v5e:2x2
jax: 0.10.0
libtpu: 0.0.40
codegen_flags: <defaults>
</compile_context>

<pallas_src>
import functools

import jax
import jax.numpy as jnp
from jax.experimental import pallas as pl
from jax.experimental.pallas import tpu as pltpu


# ------------- Pallas kernel: matmul + fused BatchNorm(batch) + ReLU ---------

def _make_mm_bn_relu_kernel(phases, count, eps):
    """Kernel factory.  Columns of the matmul output are `phases` groups of
    C channels each (sub-pixel / spatial phases); BatchNorm statistics are per
    channel over all rows AND all phase groups (count = rows * phases)."""
    inv_count = 1.0 / float(count)

    def kernel(a_ref, b_ref, gamma_ref, beta_ref, o_ref):
        acc = jnp.dot(a_ref[...], b_ref[...],
                      preferred_element_type=jnp.float32)        # (M, Nc) f32
        nc = acc.shape[1]
        c = nc // phases

        # per-channel mean: reduce rows, then fold the phase column groups
        s1 = jnp.sum(acc, axis=0, keepdims=True)                 # (1, Nc)
        cs1 = s1[:, 0:c]
        for p in range(1, phases):
            cs1 = cs1 + s1[:, p * c:(p + 1) * c]
        mean = cs1 * inv_count                                   # (1, C)
        mean_full = jnp.concatenate([mean] * phases, axis=1)     # (1, Nc)

        # two-pass (centered) variance on the VMEM-resident accumulator
        centered = acc - mean_full
        s2 = jnp.sum(centered * centered, axis=0, keepdims=True) # (1, Nc)
        cs2 = s2[:, 0:c]
        for p in range(1, phases):
            cs2 = cs2 + s2[:, p * c:(p + 1) * c]
        var = cs2 * inv_count                                    # (1, C)

        scale = gamma_ref[...] * jax.lax.rsqrt(var + eps)        # (1, C)
        scale_full = jnp.concatenate([scale] * phases, axis=1)   # (1, Nc)
        beta_full = jnp.concatenate([beta_ref[...]] * phases, axis=1)

        y = centered * scale_full + beta_full                    # f32 math
        o_ref[...] = jnp.maximum(y, 0.0).astype(o_ref.dtype)     # bf16 store

    return kernel


def pallas_matmul_bn_relu(a, b, gamma_row, beta_row, phases, eps=1e-5,
                          out_dtype=jnp.bfloat16):
    """relu(batchnorm(a @ b)) in a single pallas_call (single grid step)."""
    M, K = a.shape
    Kb, Nc = b.shape
    assert Kb == K and Nc % phases == 0
    C = Nc // phases
    kernel = _make_mm_bn_relu_kernel(phases, M * phases, eps)
    return pl.pallas_call(
        kernel,
        out_shape=jax.ShapeDtypeStruct((M, Nc), out_dtype),
        grid=(1,),
        in_specs=[pl.BlockSpec((M, K), lambda i: (0, 0)),
                  pl.BlockSpec((K, Nc), lambda i: (0, 0)),
                  pl.BlockSpec((1, C), lambda i: (0, 0)),
                  pl.BlockSpec((1, C), lambda i: (0, 0))],
        out_specs=pl.BlockSpec((M, Nc), lambda i: (0, 0)),
        compiler_params=pltpu.CompilerParams(
            dimension_semantics=("arbitrary",)),
    )(a, b, gamma_row, beta_row)


# ---------------- Pallas kernel: matmul + bias + tanh (generator head) ------

def _mm_bias_tanh_kernel(a_ref, b_ref, bias_ref, o_ref):
    acc = jnp.dot(a_ref[...], b_ref[...], preferred_element_type=jnp.float32)
    o_ref[...] = jnp.tanh(acc + bias_ref[...])


def pallas_matmul_bias_tanh(a, b_padded, bias_padded):
    """tanh(a @ b + bias).  b/bias are zero-padded to a 128-lane-dense width."""
    M, K = a.shape
    _, Np = b_padded.shape
    # TODO(synk): on v7x, split M into 2 "parallel" row tiles to use both
    # TensorCores; kept single-step here since launch overhead dominates.
    return pl.pallas_call(
        _mm_bias_tanh_kernel,
        out_shape=jax.ShapeDtypeStruct((M, Np), jnp.float32),
        grid=(1,),
        in_specs=[pl.BlockSpec((M, K), lambda i: (0, 0)),
                  pl.BlockSpec((K, Np), lambda i: (0, 0)),
                  pl.BlockSpec((1, Np), lambda i: (0, 0))],
        out_specs=pl.BlockSpec((M, Np), lambda i: (0, 0)),
        compiler_params=pltpu.CompilerParams(
            dimension_semantics=("arbitrary",)),
    )(a, b_padded, bias_padded)


# -------------------- ConvTranspose2d (k4, s2, p1) building blocks ----------

def _patches_3x3(x):
    """x: (N,H,W,C) -> (N*H*W, 9*C) patches over a zero-padded 3x3 window.

    Column order (dh, dw, c) matches _subpixel_weight row order.
    """
    # TODO(synk): fold this gather into the matmul kernel (implicit GEMM with a
    # VMEM-resident padded input) so the 9x patch buffer never touches HBM.
    N, H, W, C = x.shape
    xp = jnp.pad(x, ((0, 0), (1, 1), (1, 1), (0, 0)))
    taps = [xp[:, dh:dh + H, dw:dw + W, :]
            for dh in range(3) for dw in range(3)]
    cols = jnp.stack(taps, axis=3)                      # (N, H, W, 9, C)
    return cols.reshape(N * H * W, 9 * C)


def _subpixel_weight(w_pt):
    """PyTorch ConvTranspose2d weight (Cin,Cout,4,4) -> (9*Cin, 4*Cout).

    Sub-pixel decomposition of stride-2 / pad-1 / k=4: output phase (rh, rw) at
    input offset (dh-1, dw-1) uses tap (kh, kw) = (rh+3-2*dh, rw+3-2*dw);
    invalid taps are zero.  Columns ordered (rh, rw, cout).
    """
    Cin, Cout, KH, KW = w_pt.shape
    wsub = jnp.zeros((3, 3, Cin, 2, 2, Cout), w_pt.dtype)
    for dh in range(3):
        for rh in range(2):
            kh = rh + 3 - 2 * dh
            if not 0 <= kh < KH:
                continue
            for dw in range(3):
                for rw in range(2):
                    kw = rw + 3 - 2 * dw
                    if not 0 <= kw < KW:
                        continue
                    wsub = wsub.at[dh, dw, :, rh, rw, :].set(w_pt[:, :, kh, kw])
    return wsub.reshape(9 * Cin, 4 * Cout)


def _pixel_shuffle(flat, N, H, W, C):
    """(N*H*W, 4*C) with columns (rh, rw, c) -> (N, 2H, 2W, C)."""
    y = flat.reshape(N, H, W, 2, 2, C)
    return y.transpose(0, 1, 3, 2, 4, 5).reshape(N, 2 * H, 2 * W, C)


# ------------------------------- Generator ---------------------------------

def init_generator_params(key, z_dim, img_channels, features_g):
    cs = [z_dim, features_g * 16, features_g * 8,
          features_g * 4, features_g * 2, img_channels]
    params = {}
    keys = jax.random.split(key, 16)
    ki = 0
    for i in range(5):
        # ConvTranspose2d weight layout: (in_ch, out_ch, 4, 4)
        params[f"w{i}"] = 0.02 * jax.random.normal(
            keys[ki], (cs[i], cs[i + 1], 4, 4), dtype=jnp.float32)
        ki += 1
    for i in range(4):  # BatchNorm affine params for the 4 deconv blocks
        params[f"gamma{i}"] = 1.0 + 0.02 * jax.random.normal(
            keys[ki], (cs[i + 1],), dtype=jnp.float32)
        ki += 1
        params[f"beta{i}"] = 0.02 * jax.random.normal(
            keys[ki], (cs[i + 1],), dtype=jnp.float32)
        ki += 1
    params["b4"] = 0.02 * jax.random.normal(
        keys[ki], (img_channels,), dtype=jnp.float32)  # final conv bias
    return params


def prepare_generator_params(params):
    """One-time weight reshuffling so the jitted forward contains no
    .at[].set chains / casts / tiling — only the Pallas matmuls and thin glue."""
    prep = {}
    w0 = params["w0"]
    z_dim, c0 = w0.shape[0], w0.shape[1]
    # block 0: 1x1 ConvT(k4,s1,p0) == matmul; columns ordered (kh, kw, c)
    prep["w0m"] = jnp.transpose(w0, (0, 2, 3, 1)).reshape(
        z_dim, 16 * c0).astype(jnp.float32)
    for i in range(4):
        c = params[f"gamma{i}"].shape[0]
        prep[f"gamma{i}"] = params[f"gamma{i}"].reshape(1, c).astype(jnp.float32)
        prep[f"beta{i}"] = params[f"beta{i}"].reshape(1, c).astype(jnp.float32)
    for i in (1, 2, 3):
        prep[f"wsub{i}"] = _subpixel_weight(params[f"w{i}"]).astype(jnp.bfloat16)
    # head: sub-pixel weight + bias, zero-padded to 128 lane-dense columns
    w4 = _subpixel_weight(params["w4"])                   # (72, 4*C_img) f32
    nc = w4.shape[1]
    pad_n = 128
    prep["w4p"] = jnp.zeros((w4.shape[0], pad_n), jnp.float32).at[
        :, :nc].set(w4).astype(jnp.bfloat16)
    bias_row = jnp.tile(params["b4"], 4).reshape(1, nc)
    prep["bias4p"] = jnp.zeros((1, pad_n), jnp.float32).at[:, :nc].set(bias_row)
    return prep


def generator_forward(prep, x_nchw, img_channels):
    """NCHW latent (N, z, 1, 1) -> NCHW image (N, C, 64, 64)."""
    N = x_nchw.shape[0]
    z = x_nchw.reshape(N, -1).astype(jnp.float32)

    # -- block 0: ConvT(z -> 16*fg, k4, s1, p0) with fused BN + ReLU ----------
    w0m = prep["w0m"]
    c0 = w0m.shape[1] // 16
    act = pallas_matmul_bn_relu(z, w0m, prep["gamma0"], prep["beta0"],
                                phases=16)                       # bf16 (N, 16*c0)
    x = act.reshape(N, 4, 4, c0)                                 # bf16 NHWC

    # -- blocks 1..3: sub-pixel ConvT(k4,s2,p1) + fused BN + ReLU -------------
    for i in (1, 2, 3):
        H, W = x.shape[1], x.shape[2]
        wsub = prep[f"wsub{i}"]
        cout = wsub.shape[1] // 4
        cols = _patches_3x3(x)                                   # bf16 (M, 9*Cin)
        act = pallas_matmul_bn_relu(cols, wsub, prep[f"gamma{i}"],
                                    prep[f"beta{i}"], phases=4)  # bf16 (M, 4*Cout)
        x = _pixel_shuffle(act, N, H, W, cout)                   # bf16 (N,2H,2W,Cout)

    # -- head: sub-pixel ConvT(k4,s2,p1), bias + tanh fused, bf16 operands ----
    H, W = x.shape[1], x.shape[2]
    cols = _patches_3x3(x)                                       # bf16 (M, 72)
    flat_padded = pallas_matmul_bias_tanh(cols, prep["w4p"], prep["bias4p"])
    flat = flat_padded[:, :4 * img_channels]                     # drop zero lanes
    y = _pixel_shuffle(flat, N, H, W, img_channels)              # (N, 64, 64, C)
    return jnp.transpose(y, (0, 3, 1, 2))                        # back to NCHW


# ------------------------- pure-JAX f32 reference ---------------------------

def reference_forward(params, x_nchw):
    """Plain XLA reference matching the PyTorch Generator.forward semantics."""
    x = jnp.transpose(x_nchw, (0, 2, 3, 1)).astype(jnp.float32)
    strides = [1, 2, 2, 2, 2]
    pads = [0, 1, 1, 1, 1]
    eps = 1e-5
    for i in range(5):
        w = params[f"w{i}"]                                   # (Cin, Cout, 4, 4)
        w_hwio = jnp.flip(w, (2, 3)).transpose(2, 3, 0, 1)    # (4, 4, Cin, Cout)
        p = 4 - 1 - pads[i]
        y = jax.lax.conv_general_dilated(
            x, w_hwio, window_strides=(1, 1),
            padding=[(p, p), (p, p)],
            lhs_dilation=(strides[i], strides[i]),
            dimension_numbers=("NHWC", "HWIO", "NHWC"),
            precision=jax.lax.Precision.HIGHEST)
        if i < 4:
            mean = y.mean(axis=(0, 1, 2))
            var = y.var(axis=(0, 1, 2))
            y = (y - mean) * (params[f"gamma{i}"] / jnp.sqrt(var + eps)) \
                + params[f"beta{i}"]
            x = jnp.maximum(y, 0.0)
        else:
            x = jnp.tanh(y + params["b4"])
    return jnp.transpose(x, (0, 3, 1, 2))


if __name__ == "__main__":
    z_dim, img_channels, features_g = 8, 3, 4
    key = jax.random.PRNGKey(0)
    kp, kx = jax.random.split(key)

    params = init_generator_params(kp, z_dim, img_channels, features_g)
    prep = prepare_generator_params(params)       # one-time weight reshuffle
    x = jax.random.normal(kx, (2, z_dim, 1, 1), dtype=jnp.float32)  # NCHW latent

    fwd = jax.jit(functools.partial(generator_forward, img_channels=img_channels))
    out = jax.block_until_ready(fwd(prep, x))

    assert out.shape == (2, img_channels, 64, 64), out.shape
    assert out.dtype == jnp.float32
    assert bool(jnp.all(jnp.isfinite(out)))
    assert bool(jnp.all(jnp.abs(out) <= 1.0 + 1e-6))                # tanh range

    ref = jax.block_until_ready(jax.jit(reference_forward)(params, x))
    max_err = float(jnp.max(jnp.abs(out - ref)))
    assert max_err < 5e-2, f"max abs error vs f32 reference: {max_err}"

    print("KERNEL_OK")
</pallas_src>

<mosaic_0001>
module attributes {stable_mosaic.version = 11 : i64} {
  func.func @kernel(%arg0: i32, %arg1: memref<2x8xf32, #tpu.memory_space<vmem>>, %arg2: memref<8x1024xf32, #tpu.memory_space<vmem>>, %arg3: memref<1x64xf32, #tpu.memory_space<vmem>>, %arg4: memref<1x64xf32, #tpu.memory_space<vmem>>, %arg5: memref<2x1024xbf16, #tpu.memory_space<vmem>>) attributes {dimension_semantics = [#tpu.dimension_semantics<arbitrary>], iteration_bounds = array<i64: 1>, scalar_prefetch = 0 : i64, scratch_operands = 0 : i64, tpu.core_type = #tpu.core_type<tc>, window_params = [{pipeline_mode = #tpu.pipeline_mode<synchronous>, transform_indices = @transform_0, window_bounds = array<i64: 2, 8>}, {pipeline_mode = #tpu.pipeline_mode<synchronous>, transform_indices = @transform_1, window_bounds = array<i64: 8, 1024>}, {pipeline_mode = #tpu.pipeline_mode<synchronous>, transform_indices = @transform_2, window_bounds = array<i64: 1, 64>}, {pipeline_mode = #tpu.pipeline_mode<synchronous>, transform_indices = @transform_3, window_bounds = array<i64: 1, 64>}, {pipeline_mode = #tpu.pipeline_mode<synchronous>, transform_indices = @transform_4, window_bounds = array<i64: 2, 1024>}]} {
    %c0 = arith.constant 0 : index
    %c0_0 = arith.constant 0 : index
    %0 = vector.load %arg1[%c0, %c0_0] : memref<2x8xf32, #tpu.memory_space<vmem>>, vector<2x8xf32>
    %c0_1 = arith.constant 0 : index
    %c0_2 = arith.constant 0 : index
    %1 = vector.load %arg2[%c0_1, %c0_2] : memref<8x1024xf32, #tpu.memory_space<vmem>>, vector<8x1024xf32>
    %cst = arith.constant dense<0.000000e+00> : vector<2x1024xf32>
    %2 = tpu.matmul %0, %1, %cst {dimension_numbers = #tpu.dot_dimension_numbers<[1], [0], [0], [1], [0, 0, 1, 1], [], []>} : vector<2x8xf32>, vector<8x1024xf32>, vector<2x1024xf32> -> vector<2x1024xf32>
    %cst_3 = arith.constant dense<0.000000e+00> : vector<1024xf32>
    %3 = vector.multi_reduction <add>, %2, %cst_3 [0] : vector<2x1024xf32> to vector<1024xf32>
    %4 = vector.shape_cast %3 : vector<1024xf32> to vector<1x1024xf32>
    %5 = vector.extract_strided_slice %4 {offsets = [0, 0], sizes = [1, 64], strides = [1, 1]} : vector<1x1024xf32> to vector<1x64xf32>
    %6 = vector.extract_strided_slice %4 {offsets = [0, 64], sizes = [1, 64], strides = [1, 1]} : vector<1x1024xf32> to vector<1x64xf32>
    %7 = arith.addf %5, %6 : vector<1x64xf32>
    %8 = vector.extract_strided_slice %4 {offsets = [0, 128], sizes = [1, 64], strides = [1, 1]} : vector<1x1024xf32> to vector<1x64xf32>
    %9 = arith.addf %7, %8 : vector<1x64xf32>
    %10 = vector.extract_strided_slice %4 {offsets = [0, 192], sizes = [1, 64], strides = [1, 1]} : vector<1x1024xf32> to vector<1x64xf32>
    %11 = arith.addf %9, %10 : vector<1x64xf32>
    %12 = vector.extract_strided_slice %4 {offsets = [0, 256], sizes = [1, 64], strides = [1, 1]} : vector<1x1024xf32> to vector<1x64xf32>
    %13 = arith.addf %11, %12 : vector<1x64xf32>
    %14 = vector.extract_strided_slice %4 {offsets = [0, 320], sizes = [1, 64], strides = [1, 1]} : vector<1x1024xf32> to vector<1x64xf32>
    %15 = arith.addf %13, %14 : vector<1x64xf32>
    %16 = vector.extract_strided_slice %4 {offsets = [0, 384], sizes = [1, 64], strides = [1, 1]} : vector<1x1024xf32> to vector<1x64xf32>
    %17 = arith.addf %15, %16 : vector<1x64xf32>
    %18 = vector.extract_strided_slice %4 {offsets = [0, 448], sizes = [1, 64], strides = [1, 1]} : vector<1x1024xf32> to vector<1x64xf32>
    %19 = arith.addf %17, %18 : vector<1x64xf32>
    %20 = vector.extract_strided_slice %4 {offsets = [0, 512], sizes = [1, 64], strides = [1, 1]} : vector<1x1024xf32> to vector<1x64xf32>
    %21 = arith.addf %19, %20 : vector<1x64xf32>
    %22 = vector.extract_strided_slice %4 {offsets = [0, 576], sizes = [1, 64], strides = [1, 1]} : vector<1x1024xf32> to vector<1x64xf32>
    %23 = arith.addf %21, %22 : vector<1x64xf32>
    %24 = vector.extract_strided_slice %4 {offsets = [0, 640], sizes = [1, 64], strides = [1, 1]} : vector<1x1024xf32> to vector<1x64xf32>
    %25 = arith.addf %23, %24 : vector<1x64xf32>
    %26 = vector.extract_strided_slice %4 {offsets = [0, 704], sizes = [1, 64], strides = [1, 1]} : vector<1x1024xf32> to vector<1x64xf32>
    %27 = arith.addf %25, %26 : vector<1x64xf32>
    %28 = vector.extract_strided_slice %4 {offsets = [0, 768], sizes = [1, 64], strides = [1, 1]} : vector<1x1024xf32> to vector<1x64xf32>
    %29 = arith.addf %27, %28 : vector<1x64xf32>
    %30 = vector.extract_strided_slice %4 {offsets = [0, 832], sizes = [1, 64], strides = [1, 1]} : vector<1x1024xf32> to vector<1x64xf32>
    %31 = arith.addf %29, %30 : vector<1x64xf32>
    %32 = vector.extract_strided_slice %4 {offsets = [0, 896], sizes = [1, 64], strides = [1, 1]} : vector<1x1024xf32> to vector<1x64xf32>
    %33 = arith.addf %31, %32 : vector<1x64xf32>
    %34 = vector.extract_strided_slice %4 {offsets = [0, 960], sizes = [1, 64], strides = [1, 1]} : vector<1x1024xf32> to vector<1x64xf32>
    %35 = arith.addf %33, %34 : vector<1x64xf32>
    %cst_4 = arith.constant 3.125000e-02 : f32
    %36 = vector.broadcast %cst_4 : f32 to vector<1x64xf32>
    %37 = arith.mulf %35, %36 : vector<1x64xf32>
    %38 = tpu.concatenate %37, %37, %37, %37, %37, %37, %37, %37, %37, %37, %37, %37, %37, %37, %37, %37 in 1 : vector<1x64xf32>, vector<1x64xf32>, vector<1x64xf32>, vector<1x64xf32>, vector<1x64xf32>, vector<1x64xf32>, vector<1x64xf32>, vector<1x64xf32>, vector<1x64xf32>, vector<1x64xf32>, vector<1x64xf32>, vector<1x64xf32>, vector<1x64xf32>, vector<1x64xf32>, vector<1x64xf32>, vector<1x64xf32> -> vector<1x1024xf32>
    %39 = vector.broadcast %38 : vector<1x1024xf32> to vector<2x1024xf32>
    %40 = arith.subf %2, %39 : vector<2x1024xf32>
    %41 = arith.mulf %40, %40 : vector<2x1024xf32>
    %cst_5 = arith.constant dense<0.000000e+00> : vector<1024xf32>
    %42 = vector.multi_reduction <add>, %41, %cst_5 [0] : vector<2x1024xf32> to vector<1024xf32>
    %43 = vector.shape_cast %42 : vector<1024xf32> to vector<1x1024xf32>
    %44 = vector.extract_strided_slice %43 {offsets = [0, 0], sizes = [1, 64], strides = [1, 1]} : vector<1x1024xf32> to vector<1x64xf32>
    %45 = vector.extract_strided_slice %43 {offsets = [0, 64], sizes = [1, 64], strides = [1, 1]} : vector<1x1024xf32> to vector<1x64xf32>
    %46 = arith.addf %44, %45 : vector<1x64xf32>
    %47 = vector.extract_strided_slice %43 {offsets = [0, 128], sizes = [1, 64], strides = [1, 1]} : vector<1x1024xf32> to vector<1x64xf32>
    %48 = arith.addf %46, %47 : vector<1x64xf32>
    %49 = vector.extract_strided_slice %43 {offsets = [0, 192], sizes = [1, 64], strides = [1, 1]} : vector<1x1024xf32> to vector<1x64xf32>
    %50 = arith.addf %48, %49 : vector<1x64xf32>
    %51 = vector.extract_strided_slice %43 {offsets = [0, 256], sizes = [1, 64], strides = [1, 1]} : vector<1x1024xf32> to vector<1x64xf32>
    %52 = arith.addf %50, %51 : vector<1x64xf32>
    %53 = vector.extract_strided_slice %43 {offsets = [0, 320], sizes = [1, 64], strides = [1, 1]} : vector<1x1024xf32> to vector<1x64xf32>
    %54 = arith.addf %52, %53 : vector<1x64xf32>
    %55 = vector.extract_strided_slice %43 {offsets = [0, 384], sizes = [1, 64], strides = [1, 1]} : vector<1x1024xf32> to vector<1x64xf32>
    %56 = arith.addf %54, %55 : vector<1x64xf32>
    %57 = vector.extract_strided_slice %43 {offsets = [0, 448], sizes = [1, 64], strides = [1, 1]} : vector<1x1024xf32> to vector<1x64xf32>
    %58 = arith.addf %56, %57 : vector<1x64xf32>
    %59 = vector.extract_strided_slice %43 {offsets = [0, 512], sizes = [1, 64], strides = [1, 1]} : vector<1x1024xf32> to vector<1x64xf32>
    %60 = arith.addf %58, %59 : vector<1x64xf32>
    %61 = vector.extract_strided_slice %43 {offsets = [0, 576], sizes = [1, 64], strides = [1, 1]} : vector<1x1024xf32> to vector<1x64xf32>
    %62 = arith.addf %60, %61 : vector<1x64xf32>
    %63 = vector.extract_strided_slice %43 {offsets = [0, 640], sizes = [1, 64], strides = [1, 1]} : vector<1x1024xf32> to vector<1x64xf32>
    %64 = arith.addf %62, %63 : vector<1x64xf32>
    %65 = vector.extract_strided_slice %43 {offsets = [0, 704], sizes = [1, 64], strides = [1, 1]} : vector<1x1024xf32> to vector<1x64xf32>
    %66 = arith.addf %64, %65 : vector<1x64xf32>
    %67 = vector.extract_strided_slice %43 {offsets = [0, 768], sizes = [1, 64], strides = [1, 1]} : vector<1x1024xf32> to vector<1x64xf32>
    %68 = arith.addf %66, %67 : vector<1x64xf32>
    %69 = vector.extract_strided_slice %43 {offsets = [0, 832], sizes = [1, 64], strides = [1, 1]} : vector<1x1024xf32> to vector<1x64xf32>
    %70 = arith.addf %68, %69 : vector<1x64xf32>
    %71 = vector.extract_strided_slice %43 {offsets = [0, 896], sizes = [1, 64], strides = [1, 1]} : vector<1x1024xf32> to vector<1x64xf32>
    %72 = arith.addf %70, %71 : vector<1x64xf32>
    %73 = vector.extract_strided_slice %43 {offsets = [0, 960], sizes = [1, 64], strides = [1, 1]} : vector<1x1024xf32> to vector<1x64xf32>
    %74 = arith.addf %72, %73 : vector<1x64xf32>
    %cst_6 = arith.constant 3.125000e-02 : f32
    %75 = vector.broadcast %cst_6 : f32 to vector<1x64xf32>
    %76 = arith.mulf %74, %75 : vector<1x64xf32>
    %c0_7 = arith.constant 0 : index
    %c0_8 = arith.constant 0 : index
    %77 = vector.load %arg3[%c0_7, %c0_8] : memref<1x64xf32, #tpu.memory_space<vmem>>, vector<1x64xf32>
    %cst_9 = arith.constant 9.99999974E-6 : f32
    %78 = vector.broadcast %cst_9 : f32 to vector<1x64xf32>
    %79 = arith.addf %76, %78 : vector<1x64xf32>
    %80 = math.rsqrt %79 : vector<1x64xf32>
    %81 = arith.mulf %77, %80 : vector<1x64xf32>
    %82 = tpu.concatenate %81, %81, %81, %81, %81, %81, %81, %81, %81, %81, %81, %81, %81, %81, %81, %81 in 1 : vector<1x64xf32>, vector<1x64xf32>, vector<1x64xf32>, vector<1x64xf32>, vector<1x64xf32>, vector<1x64xf32>, vector<1x64xf32>, vector<1x64xf32>, vector<1x64xf32>, vector<1x64xf32>, vector<1x64xf32>, vector<1x64xf32>, vector<1x64xf32>, vector<1x64xf32>, vector<1x64xf32>, vector<1x64xf32> -> vector<1x1024xf32>
    %c0_10 = arith.constant 0 : index
    %c0_11 = arith.constant 0 : index
    %83 = vector.load %arg4[%c0_10, %c0_11] : memref<1x64xf32, #tpu.memory_space<vmem>>, vector<1x64xf32>
    %84 = tpu.concatenate %83, %83, %83, %83, %83, %83, %83, %83, %83, %83, %83, %83, %83, %83, %83, %83 in 1 : vector<1x64xf32>, vector<1x64xf32>, vector<1x64xf32>, vector<1x64xf32>, vector<1x64xf32>, vector<1x64xf32>, vector<1x64xf32>, vector<1x64xf32>, vector<1x64xf32>, vector<1x64xf32>, vector<1x64xf32>, vector<1x64xf32>, vector<1x64xf32>, vector<1x64xf32>, vector<1x64xf32>, vector<1x64xf32> -> vector<1x1024xf32>
    %85 = vector.broadcast %82 : vector<1x1024xf32> to vector<2x1024xf32>
    %86 = arith.mulf %40, %85 : vector<2x1024xf32>
    %87 = vector.broadcast %84 : vector<1x1024xf32> to vector<2x1024xf32>
    %88 = arith.addf %86, %87 : vector<2x1024xf32>
    %cst_12 = arith.constant 0.000000e+00 : f32
    %89 = vector.broadcast %cst_12 : f32 to vector<2x1024xf32>
    %90 = arith.maximumf %88, %89 : vector<2x1024xf32>
    %91 = arith.truncf %90 : vector<2x1024xf32> to vector<2x1024xbf16>
    %c0_13 = arith.constant 0 : index
    %c0_14 = arith.constant 0 : index
    %92 = vector.load %arg5[%c0_13, %c0_14] : memref<2x1024xbf16, #tpu.memory_space<vmem>>, vector<2x1024xbf16>
    tpu.vector_store %arg5[%c0_13, %c0_14], %91 {strides = array<i32>} : memref<2x1024xbf16, #tpu.memory_space<vmem>>, vector<2x1024xbf16>,
    return
  }
  func.func @transform_0(%arg0: i32) -> (i32, i32) {
    %c0_i32 = arith.constant 0 : i32
    %c0_i32_0 = arith.constant 0 : i32
    %c0_i32_1 = arith.constant 0 : i32
    return %c0_i32, %c0_i32_0 : i32, i32
  }
  func.func @transform_1(%arg0: i32) -> (i32, i32) {
    %c0_i32 = arith.constant 0 : i32
    %c0_i32_0 = arith.constant 0 : i32
    %c0_i32_1 = arith.constant 0 : i32
    return %c0_i32, %c0_i32_0 : i32, i32
  }
  func.func @transform_2(%arg0: i32) -> (i32, i32) {
    %c0_i32 = arith.constant 0 : i32
    %c0_i32_0 = arith.constant 0 : i32
    %c0_i32_1 = arith.constant 0 : i32
    return %c0_i32, %c0_i32_0 : i32, i32
  }
  func.func @transform_3(%arg0: i32) -> (i32, i32) {
    %c0_i32 = arith.constant 0 : i32
    %c0_i32_0 = arith.constant 0 : i32
    %c0_i32_1 = arith.constant 0 : i32
    return %c0_i32, %c0_i32_0 : i32, i32
  }
  func.func @transform_4(%arg0: i32) -> (i32, i32) {
    %c0_i32 = arith.constant 0 : i32
    %c0_i32_0 = arith.constant 0 : i32
    %c0_i32_1 = arith.constant 0 : i32
    return %c0_i32, %c0_i32_0 : i32, i32
  }
}

module attributes {stable_mosaic.version = 11 : i64} {
  func.func @kernel(%arg0: i32, %arg1: memref<32x576xbf16, #tpu.memory_space<vmem>>, %arg2: memref<576x128xbf16, #tpu.memory_space<vmem>>, %arg3: memref<1x32xf32, #tpu.memory_space<vmem>>, %arg4: memref<1x32xf32, #tpu.memory_space<vmem>>, %arg5: memref<32x128xbf16, #tpu.memory_space<vmem>>) attributes {dimension_semantics = [#tpu.dimension_semantics<arbitrary>], iteration_bounds = array<i64: 1>, scalar_prefetch = 0 : i64, scratch_operands = 0 : i64, tpu.core_type = #tpu.core_type<tc>, window_params = [{pipeline_mode = #tpu.pipeline_mode<synchronous>, transform_indices = @transform_0, window_bounds = array<i64: 32, 576>}, {pipeline_mode = #tpu.pipeline_mode<synchronous>, transform_indices = @transform_1, window_bounds = array<i64: 576, 128>}, {pipeline_mode = #tpu.pipeline_mode<synchronous>, transform_indices = @transform_2, window_bounds = array<i64: 1, 32>}, {pipeline_mode = #tpu.pipeline_mode<synchronous>, transform_indices = @transform_3, window_bounds = array<i64: 1, 32>}, {pipeline_mode = #tpu.pipeline_mode<synchronous>, transform_indices = @transform_4, window_bounds = array<i64: 32, 128>}]} {
    %c0 = arith.constant 0 : index
    %c0_0 = arith.constant 0 : index
    %0 = vector.load %arg1[%c0, %c0_0] : memref<32x576xbf16, #tpu.memory_space<vmem>>, vector<32x576xbf16>
    %c0_1 = arith.constant 0 : index
    %c0_2 = arith.constant 0 : index
    %1 = vector.load %arg2[%c0_1, %c0_2] : memref<576x128xbf16, #tpu.memory_space<vmem>>, vector<576x128xbf16>
    %cst = arith.constant dense<0.000000e+00> : vector<32x128xf32>
    %2 = tpu.matmul %0, %1, %cst {dimension_numbers = #tpu.dot_dimension_numbers<[1], [0], [0], [1], [0, 0, 1, 1], [], []>} : vector<32x576xbf16>, vector<576x128xbf16>, vector<32x128xf32> -> vector<32x128xf32>
    %cst_3 = arith.constant dense<0.000000e+00> : vector<128xf32>
    %3 = vector.multi_reduction <add>, %2, %cst_3 [0] : vector<32x128xf32> to vector<128xf32>
    %4 = vector.shape_cast %3 : vector<128xf32> to vector<1x128xf32>
    %5 = vector.extract_strided_slice %4 {offsets = [0, 0], sizes = [1, 32], strides = [1, 1]} : vector<1x128xf32> to vector<1x32xf32>
    %6 = vector.extract_strided_slice %4 {offsets = [0, 32], sizes = [1, 32], strides = [1, 1]} : vector<1x128xf32> to vector<1x32xf32>
    %7 = arith.addf %5, %6 : vector<1x32xf32>
    %8 = vector.extract_strided_slice %4 {offsets = [0, 64], sizes = [1, 32], strides = [1, 1]} : vector<1x128xf32> to vector<1x32xf32>
    %9 = arith.addf %7, %8 : vector<1x32xf32>
    %10 = vector.extract_strided_slice %4 {offsets = [0, 96], sizes = [1, 32], strides = [1, 1]} : vector<1x128xf32> to vector<1x32xf32>
    %11 = arith.addf %9, %10 : vector<1x32xf32>
    %cst_4 = arith.constant 7.812500e-03 : f32
    %12 = vector.broadcast %cst_4 : f32 to vector<1x32xf32>
    %13 = arith.mulf %11, %12 : vector<1x32xf32>
    %14 = tpu.concatenate %13, %13, %13, %13 in 1 : vector<1x32xf32>, vector<1x32xf32>, vector<1x32xf32>, vector<1x32xf32> -> vector<1x128xf32>
    %15 = vector.broadcast %14 : vector<1x128xf32> to vector<32x128xf32>
    %16 = arith.subf %2, %15 : vector<32x128xf32>
    %17 = arith.mulf %16, %16 : vector<32x128xf32>
    %cst_5 = arith.constant dense<0.000000e+00> : vector<128xf32>
    %18 = vector.multi_reduction <add>, %17, %cst_5 [0] : vector<32x128xf32> to vector<128xf32>
    %19 = vector.shape_cast %18 : vector<128xf32> to vector<1x128xf32>
    %20 = vector.extract_strided_slice %19 {offsets = [0, 0], sizes = [1, 32], strides = [1, 1]} : vector<1x128xf32> to vector<1x32xf32>
    %21 = vector.extract_strided_slice %19 {offsets = [0, 32], sizes = [1, 32], strides = [1, 1]} : vector<1x128xf32> to vector<1x32xf32>
    %22 = arith.addf %20, %21 : vector<1x32xf32>
    %23 = vector.extract_strided_slice %19 {offsets = [0, 64], sizes = [1, 32], strides = [1, 1]} : vector<1x128xf32> to vector<1x32xf32>
    %24 = arith.addf %22, %23 : vector<1x32xf32>
    %25 = vector.extract_strided_slice %19 {offsets = [0, 96], sizes = [1, 32], strides = [1, 1]} : vector<1x128xf32> to vector<1x32xf32>
    %26 = arith.addf %24, %25 : vector<1x32xf32>
    %cst_6 = arith.constant 7.812500e-03 : f32
    %27 = vector.broadcast %cst_6 : f32 to vector<1x32xf32>
    %28 = arith.mulf %26, %27 : vector<1x32xf32>
    %c0_7 = arith.constant 0 : index
    %c0_8 = arith.constant 0 : index
    %29 = vector.load %arg3[%c0_7, %c0_8] : memref<1x32xf32, #tpu.memory_space<vmem>>, vector<1x32xf32>
    %cst_9 = arith.constant 9.99999974E-6 : f32
    %30 = vector.broadcast %cst_9 : f32 to vector<1x32xf32>
    %31 = arith.addf %28, %30 : vector<1x32xf32>
    %32 = math.rsqrt %31 : vector<1x32xf32>
    %33 = arith.mulf %29, %32 : vector<1x32xf32>
    %34 = tpu.concatenate %33, %33, %33, %33 in 1 : vector<1x32xf32>, vector<1x32xf32>, vector<1x32xf32>, vector<1x32xf32> -> vector<1x128xf32>
    %c0_10 = arith.constant 0 : index
    %c0_11 = arith.constant 0 : index
    %35 = vector.load %arg4[%c0_10, %c0_11] : memref<1x32xf32, #tpu.memory_space<vmem>>, vector<1x32xf32>
    %36 = tpu.concatenate %35, %35, %35, %35 in 1 : vector<1x32xf32>, vector<1x32xf32>, vector<1x32xf32>, vector<1x32xf32> -> vector<1x128xf32>
    %37 = vector.broadcast %34 : vector<1x128xf32> to vector<32x128xf32>
    %38 = arith.mulf %16, %37 : vector<32x128xf32>
    %39 = vector.broadcast %36 : vector<1x128xf32> to vector<32x128xf32>
    %40 = arith.addf %38, %39 : vector<32x128xf32>
    %cst_12 = arith.constant 0.000000e+00 : f32
    %41 = vector.broadcast %cst_12 : f32 to vector<32x128xf32>
    %42 = arith.maximumf %40, %41 : vector<32x128xf32>
    %43 = arith.truncf %42 : vector<32x128xf32> to vector<32x128xbf16>
    %c0_13 = arith.constant 0 : index
    %c0_14 = arith.constant 0 : index
    %44 = vector.load %arg5[%c0_13, %c0_14] : memref<32x128xbf16, #tpu.memory_space<vmem>>, vector<32x128xbf16>
    tpu.vector_store %arg5[%c0_13, %c0_14], %43 {strides = array<i32>} : memref<32x128xbf16, #tpu.memory_space<vmem>>, vector<32x128xbf16>,
    return
  }
  func.func @transform_0(%arg0: i32) -> (i32, i32) {
    %c0_i32 = arith.constant 0 : i32
    %c0_i32_0 = arith.constant 0 : i32
    %c0_i32_1 = arith.constant 0 : i32
    return %c0_i32, %c0_i32_0 : i32, i32
  }
  func.func @transform_1(%arg0: i32) -> (i32, i32) {
    %c0_i32 = arith.constant 0 : i32
    %c0_i32_0 = arith.constant 0 : i32
    %c0_i32_1 = arith.constant 0 : i32
    return %c0_i32, %c0_i32_0 : i32, i32
  }
  func.func @transform_2(%arg0: i32) -> (i32, i32) {
    %c0_i32 = arith.constant 0 : i32
    %c0_i32_0 = arith.constant 0 : i32
    %c0_i32_1 = arith.constant 0 : i32
    return %c0_i32, %c0_i32_0 : i32, i32
  }
  func.func @transform_3(%arg0: i32) -> (i32, i32) {
    %c0_i32 = arith.constant 0 : i32
    %c0_i32_0 = arith.constant 0 : i32
    %c0_i32_1 = arith.constant 0 : i32
    return %c0_i32, %c0_i32_0 : i32, i32
  }
  func.func @transform_4(%arg0: i32) -> (i32, i32) {
    %c0_i32 = arith.constant 0 : i32
    %c0_i32_0 = arith.constant 0 : i32
    %c0_i32_1 = arith.constant 0 : i32
    return %c0_i32, %c0_i32_0 : i32, i32
  }
}

module attributes {stable_mosaic.version = 11 : i64} {
  func.func @kernel(%arg0: i32, %arg1: memref<128x288xbf16, #tpu.memory_space<vmem>>, %arg2: memref<288x64xbf16, #tpu.memory_space<vmem>>, %arg3: memref<1x16xf32, #tpu.memory_space<vmem>>, %arg4: memref<1x16xf32, #tpu.memory_space<vmem>>, %arg5: memref<128x64xbf16, #tpu.memory_space<vmem>>) attributes {dimension_semantics = [#tpu.dimension_semantics<arbitrary>], iteration_bounds = array<i64: 1>, scalar_prefetch = 0 : i64, scratch_operands = 0 : i64, tpu.core_type = #tpu.core_type<tc>, window_params = [{pipeline_mode = #tpu.pipeline_mode<synchronous>, transform_indices = @transform_0, window_bounds = array<i64: 128, 288>}, {pipeline_mode = #tpu.pipeline_mode<synchronous>, transform_indices = @transform_1, window_bounds = array<i64: 288, 64>}, {pipeline_mode = #tpu.pipeline_mode<synchronous>, transform_indices = @transform_2, window_bounds = array<i64: 1, 16>}, {pipeline_mode = #tpu.pipeline_mode<synchronous>, transform_indices = @transform_3, window_bounds = array<i64: 1, 16>}, {pipeline_mode = #tpu.pipeline_mode<synchronous>, transform_indices = @transform_4, window_bounds = array<i64: 128, 64>}]} {
    %c0 = arith.constant 0 : index
    %c0_0 = arith.constant 0 : index
    %0 = vector.load %arg1[%c0, %c0_0] : memref<128x288xbf16, #tpu.memory_space<vmem>>, vector<128x288xbf16>
    %c0_1 = arith.constant 0 : index
    %c0_2 = arith.constant 0 : index
    %1 = vector.load %arg2[%c0_1, %c0_2] : memref<288x64xbf16, #tpu.memory_space<vmem>>, vector<288x64xbf16>
    %cst = arith.constant dense<0.000000e+00> : vector<128x64xf32>
    %2 = tpu.matmul %0, %1, %cst {dimension_numbers = #tpu.dot_dimension_numbers<[1], [0], [0], [1], [0, 0, 1, 1], [], []>} : vector<128x288xbf16>, vector<288x64xbf16>, vector<128x64xf32> -> vector<128x64xf32>
    %cst_3 = arith.constant dense<0.000000e+00> : vector<64xf32>
    %3 = vector.multi_reduction <add>, %2, %cst_3 [0] : vector<128x64xf32> to vector<64xf32>
    %4 = vector.shape_cast %3 : vector<64xf32> to vector<1x64xf32>
    %5 = vector.extract_strided_slice %4 {offsets = [0, 0], sizes = [1, 16], strides = [1, 1]} : vector<1x64xf32> to vector<1x16xf32>
    %6 = vector.extract_strided_slice %4 {offsets = [0, 16], sizes = [1, 16], strides = [1, 1]} : vector<1x64xf32> to vector<1x16xf32>
    %7 = arith.addf %5, %6 : vector<1x16xf32>
    %8 = vector.extract_strided_slice %4 {offsets = [0, 32], sizes = [1, 16], strides = [1, 1]} : vector<1x64xf32> to vector<1x16xf32>
    %9 = arith.addf %7, %8 : vector<1x16xf32>
    %10 = vector.extract_strided_slice %4 {offsets = [0, 48], sizes = [1, 16], strides = [1, 1]} : vector<1x64xf32> to vector<1x16xf32>
    %11 = arith.addf %9, %10 : vector<1x16xf32>
    %cst_4 = arith.constant 0.001953125 : f32
    %12 = vector.broadcast %cst_4 : f32 to vector<1x16xf32>
    %13 = arith.mulf %11, %12 : vector<1x16xf32>
    %14 = tpu.concatenate %13, %13, %13, %13 in 1 : vector<1x16xf32>, vector<1x16xf32>, vector<1x16xf32>, vector<1x16xf32> -> vector<1x64xf32>
    %15 = vector.broadcast %14 : vector<1x64xf32> to vector<128x64xf32>
    %16 = arith.subf %2, %15 : vector<128x64xf32>
    %17 = arith.mulf %16, %16 : vector<128x64xf32>
    %cst_5 = arith.constant dense<0.000000e+00> : vector<64xf32>
    %18 = vector.multi_reduction <add>, %17, %cst_5 [0] : vector<128x64xf32> to vector<64xf32>
    %19 = vector.shape_cast %18 : vector<64xf32> to vector<1x64xf32>
    %20 = vector.extract_strided_slice %19 {offsets = [0, 0], sizes = [1, 16], strides = [1, 1]} : vector<1x64xf32> to vector<1x16xf32>
    %21 = vector.extract_strided_slice %19 {offsets = [0, 16], sizes = [1, 16], strides = [1, 1]} : vector<1x64xf32> to vector<1x16xf32>
    %22 = arith.addf %20, %21 : vector<1x16xf32>
    %23 = vector.extract_strided_slice %19 {offsets = [0, 32], sizes = [1, 16], strides = [1, 1]} : vector<1x64xf32> to vector<1x16xf32>
    %24 = arith.addf %22, %23 : vector<1x16xf32>
    %25 = vector.extract_strided_slice %19 {offsets = [0, 48], sizes = [1, 16], strides = [1, 1]} : vector<1x64xf32> to vector<1x16xf32>
    %26 = arith.addf %24, %25 : vector<1x16xf32>
    %cst_6 = arith.constant 0.001953125 : f32
    %27 = vector.broadcast %cst_6 : f32 to vector<1x16xf32>
    %28 = arith.mulf %26, %27 : vector<1x16xf32>
    %c0_7 = arith.constant 0 : index
    %c0_8 = arith.constant 0 : index
    %29 = vector.load %arg3[%c0_7, %c0_8] : memref<1x16xf32, #tpu.memory_space<vmem>>, vector<1x16xf32>
    %cst_9 = arith.constant 9.99999974E-6 : f32
    %30 = vector.broadcast %cst_9 : f32 to vector<1x16xf32>
    %31 = arith.addf %28, %30 : vector<1x16xf32>
    %32 = math.rsqrt %31 : vector<1x16xf32>
    %33 = arith.mulf %29, %32 : vector<1x16xf32>
    %34 = tpu.concatenate %33, %33, %33, %33 in 1 : vector<1x16xf32>, vector<1x16xf32>, vector<1x16xf32>, vector<1x16xf32> -> vector<1x64xf32>
    %c0_10 = arith.constant 0 : index
    %c0_11 = arith.constant 0 : index
    %35 = vector.load %arg4[%c0_10, %c0_11] : memref<1x16xf32, #tpu.memory_space<vmem>>, vector<1x16xf32>
    %36 = tpu.concatenate %35, %35, %35, %35 in 1 : vector<1x16xf32>, vector<1x16xf32>, vector<1x16xf32>, vector<1x16xf32> -> vector<1x64xf32>
    %37 = vector.broadcast %34 : vector<1x64xf32> to vector<128x64xf32>
    %38 = arith.mulf %16, %37 : vector<128x64xf32>
    %39 = vector.broadcast %36 : vector<1x64xf32> to vector<128x64xf32>
    %40 = arith.addf %38, %39 : vector<128x64xf32>
    %cst_12 = arith.constant 0.000000e+00 : f32
    %41 = vector.broadcast %cst_12 : f32 to vector<128x64xf32>
    %42 = arith.maximumf %40, %41 : vector<128x64xf32>
    %43 = arith.truncf %42 : vector<128x64xf32> to vector<128x64xbf16>
    %c0_13 = arith.constant 0 : index
    %c0_14 = arith.constant 0 : index
    %44 = vector.load %arg5[%c0_13, %c0_14] : memref<128x64xbf16, #tpu.memory_space<vmem>>, vector<128x64xbf16>
    tpu.vector_store %arg5[%c0_13, %c0_14], %43 {strides = array<i32>} : memref<128x64xbf16, #tpu.memory_space<vmem>>, vector<128x64xbf16>,
    return
  }
  func.func @transform_0(%arg0: i32) -> (i32, i32) {
    %c0_i32 = arith.constant 0 : i32
    %c0_i32_0 = arith.constant 0 : i32
    %c0_i32_1 = arith.constant 0 : i32
    return %c0_i32, %c0_i32_0 : i32, i32
  }
  func.func @transform_1(%arg0: i32) -> (i32, i32) {
    %c0_i32 = arith.constant 0 : i32
    %c0_i32_0 = arith.constant 0 : i32
    %c0_i32_1 = arith.constant 0 : i32
    return %c0_i32, %c0_i32_0 : i32, i32
  }
  func.func @transform_2(%arg0: i32) -> (i32, i32) {
    %c0_i32 = arith.constant 0 : i32
    %c0_i32_0 = arith.constant 0 : i32
    %c0_i32_1 = arith.constant 0 : i32
    return %c0_i32, %c0_i32_0 : i32, i32
  }
  func.func @transform_3(%arg0: i32) -> (i32, i32) {
    %c0_i32 = arith.constant 0 : i32
    %c0_i32_0 = arith.constant 0 : i32
    %c0_i32_1 = arith.constant 0 : i32
    return %c0_i32, %c0_i32_0 : i32, i32
  }
  func.func @transform_4(%arg0: i32) -> (i32, i32) {
    %c0_i32 = arith.constant 0 : i32
    %c0_i32_0 = arith.constant 0 : i32
    %c0_i32_1 = arith.constant 0 : i32
    return %c0_i32, %c0_i32_0 : i32, i32
  }
}

module attributes {stable_mosaic.version = 11 : i64} {
  func.func @kernel(%arg0: i32, %arg1: memref<512x144xbf16, #tpu.memory_space<vmem>>, %arg2: memref<144x32xbf16, #tpu.memory_space<vmem>>, %arg3: memref<1x8xf32, #tpu.memory_space<vmem>>, %arg4: memref<1x8xf32, #tpu.memory_space<vmem>>, %arg5: memref<512x32xbf16, #tpu.memory_space<vmem>>) attributes {dimension_semantics = [#tpu.dimension_semantics<arbitrary>], iteration_bounds = array<i64: 1>, scalar_prefetch = 0 : i64, scratch_operands = 0 : i64, tpu.core_type = #tpu.core_type<tc>, window_params = [{pipeline_mode = #tpu.pipeline_mode<synchronous>, transform_indices = @transform_0, window_bounds = array<i64: 512, 144>}, {pipeline_mode = #tpu.pipeline_mode<synchronous>, transform_indices = @transform_1, window_bounds = array<i64: 144, 32>}, {pipeline_mode = #tpu.pipeline_mode<synchronous>, transform_indices = @transform_2, window_bounds = array<i64: 1, 8>}, {pipeline_mode = #tpu.pipeline_mode<synchronous>, transform_indices = @transform_3, window_bounds = array<i64: 1, 8>}, {pipeline_mode = #tpu.pipeline_mode<synchronous>, transform_indices = @transform_4, window_bounds = array<i64: 512, 32>}]} {
    %c0 = arith.constant 0 : index
    %c0_0 = arith.constant 0 : index
    %0 = vector.load %arg1[%c0, %c0_0] : memref<512x144xbf16, #tpu.memory_space<vmem>>, vector<512x144xbf16>
    %c0_1 = arith.constant 0 : index
    %c0_2 = arith.constant 0 : index
    %1 = vector.load %arg2[%c0_1, %c0_2] : memref<144x32xbf16, #tpu.memory_space<vmem>>, vector<144x32xbf16>
    %cst = arith.constant dense<0.000000e+00> : vector<512x32xf32>
    %2 = tpu.matmul %0, %1, %cst {dimension_numbers = #tpu.dot_dimension_numbers<[1], [0], [0], [1], [0, 0, 1, 1], [], []>} : vector<512x144xbf16>, vector<144x32xbf16>, vector<512x32xf32> -> vector<512x32xf32>
    %cst_3 = arith.constant dense<0.000000e+00> : vector<32xf32>
    %3 = vector.multi_reduction <add>, %2, %cst_3 [0] : vector<512x32xf32> to vector<32xf32>
    %4 = vector.shape_cast %3 : vector<32xf32> to vector<1x32xf32>
    %5 = vector.extract_strided_slice %4 {offsets = [0, 0], sizes = [1, 8], strides = [1, 1]} : vector<1x32xf32> to vector<1x8xf32>
    %6 = vector.extract_strided_slice %4 {offsets = [0, 8], sizes = [1, 8], strides = [1, 1]} : vector<1x32xf32> to vector<1x8xf32>
    %7 = arith.addf %5, %6 : vector<1x8xf32>
    %8 = vector.extract_strided_slice %4 {offsets = [0, 16], sizes = [1, 8], strides = [1, 1]} : vector<1x32xf32> to vector<1x8xf32>
    %9 = arith.addf %7, %8 : vector<1x8xf32>
    %10 = vector.extract_strided_slice %4 {offsets = [0, 24], sizes = [1, 8], strides = [1, 1]} : vector<1x32xf32> to vector<1x8xf32>
    %11 = arith.addf %9, %10 : vector<1x8xf32>
    %cst_4 = arith.constant 4.8828125E-4 : f32
    %12 = vector.broadcast %cst_4 : f32 to vector<1x8xf32>
    %13 = arith.mulf %11, %12 : vector<1x8xf32>
    %14 = tpu.concatenate %13, %13, %13, %13 in 1 : vector<1x8xf32>, vector<1x8xf32>, vector<1x8xf32>, vector<1x8xf32> -> vector<1x32xf32>
    %15 = vector.broadcast %14 : vector<1x32xf32> to vector<512x32xf32>
    %16 = arith.subf %2, %15 : vector<512x32xf32>
    %17 = arith.mulf %16, %16 : vector<512x32xf32>
    %cst_5 = arith.constant dense<0.000000e+00> : vector<32xf32>
    %18 = vector.multi_reduction <add>, %17, %cst_5 [0] : vector<512x32xf32> to vector<32xf32>
    %19 = vector.shape_cast %18 : vector<32xf32> to vector<1x32xf32>
    %20 = vector.extract_strided_slice %19 {offsets = [0, 0], sizes = [1, 8], strides = [1, 1]} : vector<1x32xf32> to vector<1x8xf32>
    %21 = vector.extract_strided_slice %19 {offsets = [0, 8], sizes = [1, 8], strides = [1, 1]} : vector<1x32xf32> to vector<1x8xf32>
    %22 = arith.addf %20, %21 : vector<1x8xf32>
    %23 = vector.extract_strided_slice %19 {offsets = [0, 16], sizes = [1, 8], strides = [1, 1]} : vector<1x32xf32> to vector<1x8xf32>
    %24 = arith.addf %22, %23 : vector<1x8xf32>
    %25 = vector.extract_strided_slice %19 {offsets = [0, 24], sizes = [1, 8], strides = [1, 1]} : vector<1x32xf32> to vector<1x8xf32>
    %26 = arith.addf %24, %25 : vector<1x8xf32>
    %cst_6 = arith.constant 4.8828125E-4 : f32
    %27 = vector.broadcast %cst_6 : f32 to vector<1x8xf32>
    %28 = arith.mulf %26, %27 : vector<1x8xf32>
    %c0_7 = arith.constant 0 : index
    %c0_8 = arith.constant 0 : index
    %29 = vector.load %arg3[%c0_7, %c0_8] : memref<1x8xf32, #tpu.memory_space<vmem>>, vector<1x8xf32>
    %cst_9 = arith.constant 9.99999974E-6 : f32
    %30 = vector.broadcast %cst_9 : f32 to vector<1x8xf32>
    %31 = arith.addf %28, %30 : vector<1x8xf32>
    %32 = math.rsqrt %31 : vector<1x8xf32>
    %33 = arith.mulf %29, %32 : vector<1x8xf32>
    %34 = tpu.concatenate %33, %33, %33, %33 in 1 : vector<1x8xf32>, vector<1x8xf32>, vector<1x8xf32>, vector<1x8xf32> -> vector<1x32xf32>
    %c0_10 = arith.constant 0 : index
    %c0_11 = arith.constant 0 : index
    %35 = vector.load %arg4[%c0_10, %c0_11] : memref<1x8xf32, #tpu.memory_space<vmem>>, vector<1x8xf32>
    %36 = tpu.concatenate %35, %35, %35, %35 in 1 : vector<1x8xf32>, vector<1x8xf32>, vector<1x8xf32>, vector<1x8xf32> -> vector<1x32xf32>
    %37 = vector.broadcast %34 : vector<1x32xf32> to vector<512x32xf32>
    %38 = arith.mulf %16, %37 : vector<512x32xf32>
    %39 = vector.broadcast %36 : vector<1x32xf32> to vector<512x32xf32>
    %40 = arith.addf %38, %39 : vector<512x32xf32>
    %cst_12 = arith.constant 0.000000e+00 : f32
    %41 = vector.broadcast %cst_12 : f32 to vector<512x32xf32>
    %42 = arith.maximumf %40, %41 : vector<512x32xf32>
    %43 = arith.truncf %42 : vector<512x32xf32> to vector<512x32xbf16>
    %c0_13 = arith.constant 0 : index
    %c0_14 = arith.constant 0 : index
    %44 = vector.load %arg5[%c0_13, %c0_14] : memref<512x32xbf16, #tpu.memory_space<vmem>>, vector<512x32xbf16>
    tpu.vector_store %arg5[%c0_13, %c0_14], %43 {strides = array<i32>} : memref<512x32xbf16, #tpu.memory_space<vmem>>, vector<512x32xbf16>,
    return
  }
  func.func @transform_0(%arg0: i32) -> (i32, i32) {
    %c0_i32 = arith.constant 0 : i32
    %c0_i32_0 = arith.constant 0 : i32
    %c0_i32_1 = arith.constant 0 : i32
    return %c0_i32, %c0_i32_0 : i32, i32
  }
  func.func @transform_1(%arg0: i32) -> (i32, i32) {
    %c0_i32 = arith.constant 0 : i32
    %c0_i32_0 = arith.constant 0 : i32
    %c0_i32_1 = arith.constant 0 : i32
    return %c0_i32, %c0_i32_0 : i32, i32
  }
  func.func @transform_2(%arg0: i32) -> (i32, i32) {
    %c0_i32 = arith.constant 0 : i32
    %c0_i32_0 = arith.constant 0 : i32
    %c0_i32_1 = arith.constant 0 : i32
    return %c0_i32, %c0_i32_0 : i32, i32
  }
  func.func @transform_3(%arg0: i32) -> (i32, i32) {
    %c0_i32 = arith.constant 0 : i32
    %c0_i32_0 = arith.constant 0 : i32
    %c0_i32_1 = arith.constant 0 : i32
    return %c0_i32, %c0_i32_0 : i32, i32
  }
  func.func @transform_4(%arg0: i32) -> (i32, i32) {
    %c0_i32 = arith.constant 0 : i32
    %c0_i32_0 = arith.constant 0 : i32
    %c0_i32_1 = arith.constant 0 : i32
    return %c0_i32, %c0_i32_0 : i32, i32
  }
}

module attributes {stable_mosaic.version = 11 : i64} {
  func.func @_mm_bias_tanh_kernel(%arg0: i32, %arg1: memref<2048x72xbf16, #tpu.memory_space<vmem>>, %arg2: memref<72x128xbf16, #tpu.memory_space<vmem>>, %arg3: memref<1x128xf32, #tpu.memory_space<vmem>>, %arg4: memref<2048x128xf32, #tpu.memory_space<vmem>>) attributes {dimension_semantics = [#tpu.dimension_semantics<arbitrary>], iteration_bounds = array<i64: 1>, scalar_prefetch = 0 : i64, scratch_operands = 0 : i64, tpu.core_type = #tpu.core_type<tc>, window_params = [{pipeline_mode = #tpu.pipeline_mode<synchronous>, transform_indices = @transform_0, window_bounds = array<i64: 2048, 72>}, {pipeline_mode = #tpu.pipeline_mode<synchronous>, transform_indices = @transform_1, window_bounds = array<i64: 72, 128>}, {pipeline_mode = #tpu.pipeline_mode<synchronous>, transform_indices = @transform_2, window_bounds = array<i64: 1, 128>}, {pipeline_mode = #tpu.pipeline_mode<synchronous>, transform_indices = @transform_3, window_bounds = array<i64: 2048, 128>}]} {
    %c0 = arith.constant 0 : index
    %c0_0 = arith.constant 0 : index
    %0 = vector.load %arg1[%c0, %c0_0] : memref<2048x72xbf16, #tpu.memory_space<vmem>>, vector<2048x72xbf16>
    %c0_1 = arith.constant 0 : index
    %c0_2 = arith.constant 0 : index
    %1 = vector.load %arg2[%c0_1, %c0_2] : memref<72x128xbf16, #tpu.memory_space<vmem>>, vector<72x128xbf16>
    %cst = arith.constant dense<0.000000e+00> : vector<2048x128xf32>
    %2 = tpu.matmul %0, %1, %cst {dimension_numbers = #tpu.dot_dimension_numbers<[1], [0], [0], [1], [0, 0, 1, 1], [], []>} : vector<2048x72xbf16>, vector<72x128xbf16>, vector<2048x128xf32> -> vector<2048x128xf32>
    %c0_3 = arith.constant 0 : index
    %c0_4 = arith.constant 0 : index
    %3 = vector.load %arg3[%c0_3, %c0_4] : memref<1x128xf32, #tpu.memory_space<vmem>>, vector<1x128xf32>
    %4 = vector.broadcast %3 : vector<1x128xf32> to vector<2048x128xf32>
    %5 = arith.addf %2, %4 : vector<2048x128xf32>
    %6 = math.tanh %5 : vector<2048x128xf32>
    %c0_5 = arith.constant 0 : index
    %c0_6 = arith.constant 0 : index
    %7 = vector.load %arg4[%c0_5, %c0_6] : memref<2048x128xf32, #tpu.memory_space<vmem>>, vector<2048x128xf32>
    tpu.vector_store %arg4[%c0_5, %c0_6], %6 {strides = array<i32>} : memref<2048x128xf32, #tpu.memory_space<vmem>>, vector<2048x128xf32>,
    return
  }
  func.func @transform_0(%arg0: i32) -> (i32, i32) {
    %c0_i32 = arith.constant 0 : i32
    %c0_i32_0 = arith.constant 0 : i32
    %c0_i32_1 = arith.constant 0 : i32
    return %c0_i32, %c0_i32_0 : i32, i32
  }
  func.func @transform_1(%arg0: i32) -> (i32, i32) {
    %c0_i32 = arith.constant 0 : i32
    %c0_i32_0 = arith.constant 0 : i32
    %c0_i32_1 = arith.constant 0 : i32
    return %c0_i32, %c0_i32_0 : i32, i32
  }
  func.func @transform_2(%arg0: i32) -> (i32, i32) {
    %c0_i32 = arith.constant 0 : i32
    %c0_i32_0 = arith.constant 0 : i32
    %c0_i32_1 = arith.constant 0 : i32
    return %c0_i32, %c0_i32_0 : i32, i32
  }
  func.func @transform_3(%arg0: i32) -> (i32, i32) {
    %c0_i32 = arith.constant 0 : i32
    %c0_i32_0 = arith.constant 0 : i32
    %c0_i32_1 = arith.constant 0 : i32
    return %c0_i32, %c0_i32_0 : i32, i32
  }
}

</mosaic_0001>

<bundles_post_ra>
// kernel: generator_forward.5
= control target key start
LH: loop header
LB: loop body
LE: loop exit
PB: predicated region body
PF: predicated region fallthrough
CT: control target
= control target key end

     0   :  { %9 = vsyncpa [#allocation3], 0  ;;  %s860_s0 = inlined_call_operand.hbm [shape: f32[2,8], index: 0, kind: input, shape index: {}]   ;;  %s861_s1 = inlined_call_operand.hbm [shape: f32[8,1024], index: 1, kind: input, shape index: {}]   ;;  %s862_s2 = inlined_call_operand.hbm [shape: f32[1,64], index: 2, kind: input, shape index: {}]   ;;  %s863_s3 = inlined_call_operand.hbm [shape: f32[1,64], index: 3, kind: input, shape index: {}]   ;;  %s864_s4 = inlined_call_operand.vmem [shape: bf16[2,1024], index: 4, kind: output, shape index: {}]  }
   0x1   :  { %10 = vsyncpa [#allocation5], 0  ;;  %s28_s17 = sshll.u32 %s861_s1, 4  ;;  %s29_s17 = int_to_ptr.hbm [resolvable:$true] %s28_s17 }
   0x2   :  { %11 = vsyncpa [#allocation8], 0  ;;  %s692_s18 = smov [#allocation4]   ;;  %s17_s22 = sshll.u32 %s860_s0, 4  ;;  %s18_s22 = int_to_ptr.hbm [resolvable:$true] %s17_s22 }
   0x3   :  { %s30_s19 = sshll.u32 %s692_s18, 4  ;;  %s693_s23 = smov [#allocation2]   ;;  %s31_s19 = int_to_ptr.vmem [resolvable:$true] %s30_s19 }
   0x4   :  { %33 = dma.hbm_to_vmem [thread:$0]  %s29_s17, 1024, %s31_s19, [#allocation5]  }
   0x5   :  { %s19_s24 = sshll.u32 %s693_s23, 4  ;;  %s39_s27 = sshll.u32 %s862_s2, 4  ;;  %s20_s24 = int_to_ptr.vmem [resolvable:$true] %s19_s24  ;;  %s40_s27 = int_to_ptr.hbm [resolvable:$true] %s39_s27 }
   0x6   :  { %22 = dma.hbm_to_vmem [thread:$0]  %s18_s22, 32, %s20_s24, [#allocation3]  }
   0x7   :  { %s50_s29 = sshll.u32 %s863_s3, 4  ;;  %s694_s30 = smov [#allocation6]   ;;  %s51_s29 = int_to_ptr.hbm [resolvable:$true] %s50_s29 }
   0x8   :  { %s41_s5 = sshll.u32 %s694_s30, 4  ;;  %s695_s0 = smov [#allocation7]   ;;  %s42_s5 = int_to_ptr.vmem [resolvable:$true] %s41_s5 }
   0x9   :  { %44 = dma.hbm_to_vmem [thread:$0]  %s40_s27, 16, %s42_s5, [#allocation5]  }
   0xa   :  { %s52_s6 = sshll.u32 %s695_s0, 4  ;;  %s53_s6 = int_to_ptr.vmem [resolvable:$true] %s52_s6 }
   0xb   :  { %55 = dma.hbm_to_vmem [thread:$0]  %s51_s29, 16, %s53_s6, [#allocation8]  }
   0xc   :  { %686 = dma.done.wait [#allocation3], 32  }
   0xd   :  { %687 = vsyncadd [#allocation3], 4294967264 }
   0xe   :  { %688 = dma.done.wait [#allocation5], 1040  }
   0xf   :  { %689 = vsyncadd [#allocation5], 4294966256 }
  0x10   :  { %690 = dma.done.wait [#allocation8], 16  }
  0x11   :  { %691 = vsyncadd [#allocation8], 4294967280  ;;  %vm81_vm0 = vcmask 64512   ;;  %v73_v0 = vld [vmem:[#allocation4] sm:$0xff]  ;;  %v75_v1 = vld [vmem:[#allocation4 + $0x10] sm:$0xff]  ;;  %vm245_vm1 = vcmask 1041408  }
  0x12   :  { %v72_v2 = vld [vmem:[#allocation2] sm:$0x3]  ;;  %100 = vmatpush.msra.mxu0 %v73_v0  ;;  %140 = vmatpush.msra.mxu2 %v75_v1  ;;  %v74_v3 = vld [vmem:[#allocation4 + $0x8] sm:$0xff]  ;;  %v79_v5 = vld [vmem:[#allocation4 + $0x30] sm:$0xff]  ;;  %s696_s2 = smov 64   ;;  %vm354_vm2 = vcmask 523264  }
  0x13   :  { %v76_v4 = vld [vmem:[#allocation4 + $0x18] sm:$0xff]  ;;  %574 = vmatmul.msk.f32.vlgmr.msra.gmra.mxu0 %vm81_vm0, %v72_v2  ;;  %576 = vmatmul.msk.f32.vlgmr.msra.gmra.mxu2 %vm81_vm0, %v72_v2  ;;  %v77_v7 = vld [vmem:[#allocation4 + $0x20] sm:$0xff]  ;;  %v78_v8 = vld [vmem:[#allocation4 + $0x28] sm:$0xff]  ;;  %vm544_vm6 = vcmask 1040384   ;;  %vm548_vm7 = vcmask 1042434   ;;  %vm553_vm8 = vcmask 1044484  }
  0x14   :  { %v80_v6 = vld [vmem:[#allocation4 + $0x38] sm:$0xff]  ;;  %120 = vmatpush.msra.mxu1 %v74_v3  ;;  %160 = vmatpush.msra.mxu3 %v76_v4  ;;  %vm557_vm9 = vcmask 1046534   ;;  %vm561_vm10 = vcmask 1045508   ;;  %vm563_vm11 = vcmask 1043456  }
  0x15   :  { %575 = vmatmul.msk.f32.vlgmr.msra.gmra.mxu1 %vm81_vm0, %v72_v2  ;;  %577 = vmatmul.msk.f32.vlgmr.msra.gmra.mxu3 %vm81_vm0, %v72_v2 }
  0x16   :  { %220 = vmatpush.msrb.mxu2 %v79_v5  ;;  %240 = vmatpush.msrb.mxu3 %v80_v6 }
  0x17   :  { %180 = vmatpush.msrb.mxu0 %v77_v7  ;;  %200 = vmatpush.msrb.mxu1 %v78_v8 }
  0x1b   :  { %580 = vmatmul.msk.f32.vlgmr.msrb.gmra.mxu2 %vm81_vm0, %v72_v2  ;;  %578 = vmatmul.msk.f32.vlgmr.msrb.gmra.mxu0 %vm81_vm0, %v72_v2 }
  0x1d   :  { %581 = vmatmul.msk.f32.vlgmr.msrb.gmra.mxu3 %vm81_vm0, %v72_v2  ;;  %579 = vmatmul.msk.f32.vlgmr.msrb.gmra.mxu1 %vm81_vm0, %v72_v2 }
  0x90   :  { %v742_v9 = vpop.f32.mrf.mxu0 }
  0x91   :  { %v246_v10 = vsel %vm245_vm1, %v742_v9, 0.0 }
  0x92   :  { %v247_v11 = vrot.slane %v246_v10, 4  ;;  %v746_v12 = vpop.f32.mrf.mxu1 }
  0x93   :  { %v253_v13 = vsel %vm245_vm1, %v746_v12, 0.0 }
  0x94   :  { %v248_v14 = vadd.f32 %v247_v11, %v246_v10  ;;  %v254_v15 = vrot.slane %v253_v13, 4 }
  0x96   :  { %v249_v16 = vrot.slane %v248_v14, 2  ;;  %v255_v17 = vadd.f32 %v254_v15, %v253_v13  ;;  %v750_v18 = vpop.f32.mrf.mxu2 }
  0x97   :  { %v260_v19 = vsel %vm245_vm1, %v750_v18, 0.0 }
  0x98   :  { %v256_v20 = vrot.slane %v255_v17, 2  ;;  %v261_v21 = vrot.slane %v260_v19, 4  ;;  %v754_v22 = vpop.f32.mrf.mxu3  ;;  %v250_v23 = vadd.f32 %v249_v16, %v248_v14  ;;  %v756_v24 = vpop.f32.mrf.mxu0 }
  0x99   :  { %v267_v25 = vsel %vm245_vm1, %v754_v22, 0.0  ;;  %v274_v26 = vsel %vm245_vm1, %v756_v24, 0.0 }
  0x9a   :  { %v262_v27 = vadd.f32 %v261_v21, %v260_v19  ;;  %v268_v28 = vrot.slane %v267_v25, 4  ;;  %v251_v29 = vrot.slane %v250_v23, 1  ;;  %v762_v30 = vpop.f32.mrf.mxu1  ;;  %v275_v31 = vrot.slane %v274_v26, 4 }
  0x9b   :  { %v281_v32 = vsel %vm245_vm1, %v762_v30, 0.0  ;;  %v257_v33 = vadd.f32 %v256_v20, %v255_v17 }
  0x9c   :  { %v263_v34 = vrot.slane %v262_v27, 2  ;;  %v269_v35 = vadd.f32 %v268_v28, %v267_v25  ;;  %v252_v36 = vadd.f32 %v251_v29, %v250_v23  ;;  %v276_v37 = vadd.f32 %v275_v31, %v274_v26 }
  0x9d   :  { %v282_v38 = vrot.slane %v281_v32, 4  ;;  %v258_v47 = vrot.slane %v257_v33, 1 }
  0x9e   :  { %v270_v39 = vrot.slane %v269_v35, 2  ;;  %303 = vrot.lane.b32.xlu0 %v252_v36, %s696_s2  ;;  %v264_v40 = vadd.f32 %v263_v34, %v262_v27  ;;  %v767_v41 = vpop.f32.mrf.mxu2  ;;  %v277_v43 = vrot.slane %v276_v37, 2 }
  0x9f   :  { %v288_v42 = vsel %vm245_vm1, %v767_v41, 0.0  ;;  %v283_v44 = vadd.f32 %v282_v38, %v281_v32  ;;  %v259_v59 = vadd.f32 %v258_v47, %v257_v33 }
  0xa0   :  { %v265_v45 = vrot.slane %v264_v40, 1  ;;  %v289_v46 = vrot.slane %v288_v42, 4  ;;  %v771_v48 = vpop.f32.mrf.mxu3  ;;  %v278_v51 = vadd.f32 %v277_v43, %v276_v37  ;;  %v271_v52 = vadd.f32 %v270_v39, %v269_v35 }
  0xa1   :  { %v295_v49 = vsel %vm245_vm1, %v771_v48, 0.0  ;;  %v284_v50 = vrot.slane %v283_v44, 2 }
  0xa2   :  { %v266_v53 = vadd.f32 %v265_v45, %v264_v40  ;;  %v290_v54 = vadd.f32 %v289_v46, %v288_v42  ;;  %v296_v55 = vrot.slane %v295_v49, 4  ;;  %v279_v57 = vrot.slane %v278_v51, 1 }
  0xa3   :  { %v285_v56 = vadd.f32 %v284_v50, %v283_v44  ;;  %v272_v0 = vrot.slane %v271_v52, 1 }
  0xa4   :  { %315 = vrot.lane.b32.xlu1 %v266_v53, %s696_s2  ;;  %v291_v58 = vrot.slane %v290_v54, 2  ;;  %v297_v60 = vadd.f32 %v296_v55, %v295_v49  ;;  %v280_v61 = vadd.f32 %v279_v57, %v278_v51 }
  0xa5   :  { %v286_v1 = vrot.slane %v285_v56, 1  ;;  %v273_v4 = vadd.f32 %v272_v0, %v271_v52 }
  0xa6   :  { %v292_v62 = vadd.f32 %v291_v58, %v290_v54  ;;  %309 = vrot.lane.b32.xlu0 %v259_v59, %s696_s2  ;;  %v298_v63 = vrot.slane %v297_v60, 2  ;;  %327 = vrot.lane.b32.xlu2 %v280_v61, %s696_s2 }
  0xa7   :  { %v287_v6 = vadd.f32 %v286_v1, %v285_v56 }
  0xa8   :  { %v293_v2 = vrot.slane %v292_v62, 1  ;;  %v299_v3 = vadd.f32 %v298_v63, %v297_v60 }
  0xaa   :  { %v294_v5 = vadd.f32 %v293_v2, %v292_v62  ;;  %v300_v7 = vrot.slane %v299_v3, 1 }
  0xac   :  { %321 = vrot.lane.b32.xlu1 %v273_v4, %s696_s2  ;;  %v301_v8 = vadd.f32 %v300_v7, %v299_v3 }
  0xae   :  { %339 = vrot.lane.b32.xlu0 %v294_v5, %s696_s2  ;;  %333 = vrot.lane.b32.xlu2 %v287_v6, %s696_s2 }
  0xb4   :  { %345 = vrot.lane.b32.xlu1 %v301_v8, %s696_s2 }
 0x100   :  { %v328_v20 = vpop.permute.xlu2 %327 }
 0x108   :  { %v334_v29 = vpop.permute.xlu2 %333 }
 0x110   :  { %v304_v10 = vpop.permute.xlu0 %303 }
 0x111   :  { %v306_v11 = vadd.f32 %v304_v10, %v252_v36 }
 0x113   :  { %v307_v14 = vadd.f32 %v306_v11, %v259_v59 }
 0x116   :  { %v316_v13 = vpop.permute.xlu1 %315 }
 0x118   :  { %v310_v15 = vpop.permute.xlu0 %309 }
 0x119   :  { %v312_v16 = vadd.f32 %v310_v15, %v307_v14 }
 0x11b   :  { %v313_v17 = vadd.f32 %v312_v16, %v266_v53 }
 0x11d   :  { %v318_v19 = vadd.f32 %v316_v13, %v313_v17 }
 0x11e   :  { %v322_v23 = vpop.permute.xlu1 %321 }
 0x11f   :  { %v319_v21 = vadd.f32 %v318_v19, %v273_v4 }
 0x120   :  { %v340_v33 = vpop.permute.xlu0 %339 }
 0x121   :  { %v324_v25 = vadd.f32 %v322_v23, %v319_v21 }
 0x123   :  { %v325_v26 = vadd.f32 %v324_v25, %v280_v61 }
 0x125   :  { %v330_v27 = vadd.f32 %v328_v20, %v325_v26 }
 0x126   :  { %v346_v36 = vpop.permute.xlu1 %345 }
 0x127   :  { %v331_v28 = vadd.f32 %v330_v27, %v287_v6 }
 0x129   :  { %v336_v31 = vadd.f32 %v334_v29, %v331_v28 }
 0x12b   :  { %v337_v32 = vadd.f32 %v336_v31, %v294_v5 }
 0x12d   :  { %v342_v34 = vadd.f32 %v340_v33, %v337_v32 }
 0x12f   :  { %v343_v35 = vadd.f32 %v342_v34, %v301_v8 }
 0x131   :  { %v348_v37 = vadd.f32 %v346_v36, %v343_v35 }
 0x133   :  { %v349_v38 = vmul.f32 0.03125, %v348_v37 }
 0x135   :  { %351 = vrot.lane.b32.xlu2 %v349_v38, %s696_s2 }
 0x18f   :  { %v352_v39 = vpop.permute.xlu2 %351 }
 0x190   :  { %v355_v40 = vsel %vm354_vm2, %v349_v38, %v352_v39 }
 0x191   :  { %v356_v42 = vperm.slane %v355_v40, 0 }
 0x193   :  { %v785_v43 = vsub.f32 %v750_v18, %v356_v42  ;;  %v788_v44 = vsub.f32 %v746_v12, %v356_v42  ;;  %v791_v45 = vsub.f32 %v742_v9, %v356_v42  ;;  %v794_v46 = vsub.f32 %v762_v30, %v356_v42 }
 0x194   :  { %v797_v47 = vsub.f32 %v756_v24, %v356_v42  ;;  %v800_v49 = vsub.f32 %v754_v22, %v356_v42  ;;  %v803_v50 = vsub.f32 %v771_v48, %v356_v42  ;;  %v806_v18 = vsub.f32 %v767_v41, %v356_v42 }
 0x195   :  { %v367_v12 = vmul.f32 %v785_v43, %v785_v43  ;;  %v366_v9 = vmul.f32 %v788_v44, %v788_v44  ;;  %v365_v30 = vmul.f32 %v791_v45, %v791_v45  ;;  %v370_v24 = vmul.f32 %v794_v46, %v794_v46 }
 0x196   :  { %v369_v22 = vmul.f32 %v797_v47, %v797_v47  ;;  %v368_v48 = vmul.f32 %v800_v49, %v800_v49  ;;  %v372_v41 = vmul.f32 %v803_v50, %v803_v50  ;;  %v371_v51 = vmul.f32 %v806_v18, %v806_v18 }
 0x197   :  { %v387_v52 = vsel %vm245_vm1, %v367_v12, 0.0  ;;  %v380_v53 = vsel %vm245_vm1, %v366_v9, 0.0  ;;  %v373_v54 = vsel %vm245_vm1, %v365_v30, 0.0  ;;  %v408_v55 = vsel %vm245_vm1, %v370_v24, 0.0 }
 0x198   :  { %v388_v56 = vrot.slane %v387_v52, 4  ;;  %v381_v57 = vrot.slane %v380_v53, 4  ;;  %v374_v58 = vrot.slane %v373_v54, 4  ;;  %v409_v59 = vrot.slane %v408_v55, 4 }
 0x199   :  { %v401_v60 = vsel %vm245_vm1, %v369_v22, 0.0  ;;  %v394_v61 = vsel %vm245_vm1, %v368_v48, 0.0  ;;  %v422_v62 = vsel %vm245_vm1, %v372_v41, 0.0  ;;  %v415_v8 = vsel %vm245_vm1, %v371_v51, 0.0 }
 0x19a   :  { %v389_v63 = vadd.f32 %v388_v56, %v387_v52  ;;  %v382_v0 = vadd.f32 %v381_v57, %v380_v53  ;;  %v375_v1 = vadd.f32 %v374_v58, %v373_v54  ;;  %v410_v2 = vadd.f32 %v409_v59, %v408_v55  ;;  %v587_v55 = vld [vmem:[#allocation7] ss:$0 sm:$0xff] }
 0x19b   :  { %v402_v3 = vrot.slane %v401_v60, 4  ;;  %v395_v4 = vrot.slane %v394_v61, 4  ;;  %v423_v14 = vrot.slane %v422_v62, 4  ;;  %v416_v21 = vrot.slane %v415_v8, 4 }
 0x19c   :  { %v390_v5 = vrot.slane %v389_v63, 2  ;;  %v383_v6 = vrot.slane %v382_v0, 2  ;;  %v376_v7 = vrot.slane %v375_v1, 2  ;;  %v411_v10 = vrot.slane %v410_v2, 2 }
 0x19d   :  { %v403_v11 = vadd.f32 %v402_v3, %v401_v60  ;;  %v396_v13 = vadd.f32 %v395_v4, %v394_v61  ;;  %v424_v28 = vadd.f32 %v423_v14, %v422_v62  ;;  %v417_v35 = vadd.f32 %v416_v21, %v415_v8 }
 0x19e   :  { %v391_v15 = vadd.f32 %v390_v5, %v389_v63  ;;  %v384_v16 = vadd.f32 %v383_v6, %v382_v0  ;;  %v377_v17 = vadd.f32 %v376_v7, %v375_v1  ;;  %v412_v27 = vadd.f32 %v411_v10, %v410_v2 }
 0x19f   :  { %v404_v19 = vrot.slane %v403_v11, 2  ;;  %v397_v20 = vrot.slane %v396_v13, 2  ;;  %v425_v38 = vrot.slane %v424_v28, 2  ;;  %v418_v40 = vrot.slane %v417_v35, 2 }
 0x1a0   :  { %v392_v23 = vrot.slane %v391_v15, 1  ;;  %v385_v25 = vrot.slane %v384_v16, 1  ;;  %v378_v26 = vrot.slane %v377_v17, 1  ;;  %v413_v36 = vrot.slane %v412_v27, 1 }
 0x1a1   :  { %v405_v33 = vadd.f32 %v404_v19, %v403_v11  ;;  %v398_v34 = vadd.f32 %v397_v20, %v396_v13  ;;  %v426_v9 = vadd.f32 %v425_v38, %v424_v28  ;;  %v419_v24 = vadd.f32 %v418_v40, %v417_v35 }
 0x1a2   :  { %v393_v29 = vadd.f32 %v392_v23, %v391_v15  ;;  %v386_v31 = vadd.f32 %v385_v25, %v384_v16  ;;  %v379_v32 = vadd.f32 %v378_v26, %v377_v17  ;;  %v414_v42 = vadd.f32 %v413_v36, %v412_v27  ;;  %v477_v23 = vld [vmem:[#allocation6] sm:$0x1] }
 0x1a3   :  { %v406_v37 = vrot.slane %v405_v33, 1  ;;  %v399_v39 = vrot.slane %v398_v34, 1  ;;  %v427_v22 = vrot.slane %v426_v9, 1  ;;  %v420_v48 = vrot.slane %v419_v24, 1 }
 0x1a4   :  { %442 = vrot.lane.b32.xlu2 %v393_v29, %s696_s2  ;;  %436 = vrot.lane.b32.xlu1 %v386_v31, %s696_s2 }
 0x1a5   :  { %430 = vrot.lane.b32.xlu0 %v379_v32, %s696_s2  ;;  %v407_v12 = vadd.f32 %v406_v37, %v405_v33  ;;  %v400_v30 = vadd.f32 %v399_v39, %v398_v34  ;;  %v428_v41 = vadd.f32 %v427_v22, %v426_v9  ;;  %v421_v51 = vadd.f32 %v420_v48, %v419_v24 }
 0x1ac   :  { %460 = vrot.lane.b32.xlu2 %v414_v42, %s696_s2  ;;  %454 = vrot.lane.b32.xlu1 %v407_v12, %s696_s2 }
 0x1ad   :  { %448 = vrot.lane.b32.xlu0 %v400_v30, %s696_s2 }
 0x1b4   :  { %472 = vrot.lane.b32.xlu1 %v428_v41, %s696_s2 }
 0x1b5   :  { %466 = vrot.lane.b32.xlu0 %v421_v51, %s696_s2 }
 0x1bd   :  { %499 = vrot.lane.b32.xlu0 %v587_v55, %s696_s2 }
 0x1fe   :  { %v443_v59 = vpop.permute.xlu2 %442 }
 0x206   :  { %v461_v4 = vpop.permute.xlu2 %460 }
 0x216   :  { %v437_v56 = vpop.permute.xlu1 %436 }
 0x217   :  { %v431_v52 = vpop.permute.xlu0 %430 }
 0x218   :  { %v433_v53 = vadd.f32 %v431_v52, %v379_v32 }
 0x21a   :  { %v434_v54 = vadd.f32 %v433_v53, %v386_v31 }
 0x21c   :  { %v439_v57 = vadd.f32 %v437_v56, %v434_v54 }
 0x21e   :  { %v440_v58 = vadd.f32 %v439_v57, %v393_v29  ;;  %v455_v1 = vpop.permute.xlu1 %454  ;;  %v496_v29 = vld [vmem:[#allocation7] sm:$0x1] }
 0x21f   :  { %v449_v62 = vpop.permute.xlu0 %448 }
 0x220   :  { %v445_v60 = vadd.f32 %v443_v59, %v440_v58 }
 0x222   :  { %v446_v61 = vadd.f32 %v445_v60, %v400_v30 }
 0x224   :  { %v451_v63 = vadd.f32 %v449_v62, %v446_v61 }
 0x226   :  { %v452_v0 = vadd.f32 %v451_v63, %v407_v12  ;;  %v473_v11 = vpop.permute.xlu1 %472 }
 0x227   :  { %v467_v7 = vpop.permute.xlu0 %466 }
 0x228   :  { %v457_v2 = vadd.f32 %v455_v1, %v452_v0 }
 0x22a   :  { %v458_v3 = vadd.f32 %v457_v2, %v414_v42 }
 0x22c   :  { %v463_v5 = vadd.f32 %v461_v4, %v458_v3 }
 0x22e   :  { %v464_v6 = vadd.f32 %v463_v5, %v421_v51 }
 0x22f   :  { %v500_v31 = vpop.permute.xlu0 %499 }
 0x230   :  { %v469_v8 = vadd.f32 %v467_v7, %v464_v6  ;;  %v502_v32 = vsel %vm354_vm2, %v496_v29, %v500_v31 }
 0x231   :  { %v512_v36 = vperm.slane %v502_v32, 0 }
 0x232   :  { %v470_v10 = vadd.f32 %v469_v8, %v428_v41 }
 0x234   :  { %v475_v13 = vadd.f32 %v473_v11, %v470_v10 }
 0x236   :  { %v476_v14 = vmul.f32 0.03125, %v475_v13 }
 0x238   :  { %v478_v15 = vadd.f32 1e-05, %v476_v14 }
 0x23a   :  { %588 = vrsqrt.f32 %v478_v15  ;;  %vm485_vm4 = vweird.f32 %v478_v15 }
 0x240   :  { %v589_v16 = vpop.eup %588 }
 0x241   :  { %v480_v17 = vmul.f32 %v589_v16, %v478_v15  ;;  %vm486_vm3 = vweird.f32 %v589_v16 }
 0x242   :  { %vm487_vm5 = vmor %vm485_vm4, %vm486_vm3 }
 0x243   :  { %v481_v19 = vmul.f32 %v589_v16, %v480_v17 }
 0x245   :  { %v482_v20 = vmul.f32 0.5, %v481_v19 }
 0x247   :  { %v483_v21 = vsub.f32 1.5, %v482_v20 }
 0x249   :  { %v484_v25 = vmul.f32 %v589_v16, %v483_v21 }
 0x24b   :  { %v488_v26 = vsel %vm487_vm5, %v589_v16, %v484_v25 }
 0x24c   :  { %v489_v27 = vmul.f32 %v488_v26, %v477_v23 }
 0x24e   :  { %v491_v28 = vperm.slane %v489_v27, 0 }
 0x250   :  { %492 = vrot.lane.b32.xlu2 %v491_v28, %s696_s2 }
 0x2aa   :  { %v493_v33 = vpop.permute.xlu2 %492 }
 0x2ab   :  { %v495_v34 = vsel %vm354_vm2, %v489_v27, %v493_v33 }
 0x2ac   :  { %v503_v35 = vperm.slane %v495_v34, 0 }
 0x2ae   :  { %v504_v37 = vmul.f32 %v503_v35, %v791_v45  ;;  %v505_v38 = vmul.f32 %v503_v35, %v788_v44  ;;  %v506_v39 = vmul.f32 %v503_v35, %v785_v43  ;;  %v507_v40 = vmul.f32 %v503_v35, %v800_v49 }
 0x2af   :  { %v508_v42 = vmul.f32 %v503_v35, %v797_v47  ;;  %v509_v12 = vmul.f32 %v503_v35, %v794_v46  ;;  %v510_v9 = vmul.f32 %v503_v35, %v806_v18  ;;  %v511_v30 = vmul.f32 %v503_v35, %v803_v50 }
 0x2b0   :  { %v513_v24 = vadd.f32 %v512_v36, %v504_v37  ;;  %v514_v22 = vadd.f32 %v512_v36, %v505_v38  ;;  %v515_v48 = vadd.f32 %v512_v36, %v506_v39  ;;  %v516_v41 = vadd.f32 %v512_v36, %v507_v40 }
 0x2b1   :  { %v517_v51 = vadd.f32 %v512_v36, %v508_v42  ;;  %v518_v45 = vadd.f32 %v512_v36, %v509_v12  ;;  %v519_v52 = vadd.f32 %v512_v36, %v510_v9  ;;  %v520_v44 = vadd.f32 %v512_v36, %v511_v30 }
 0x2b2   :  { %v521_v53 = vmax.f32 %v513_v24, 0.0  ;;  %v522_v43 = vmax.f32 %v514_v22, 0.0  ;;  %v523_v54 = vmax.f32 %v515_v48, 0.0  ;;  %v524_v49 = vmax.f32 %v516_v41, 0.0 }
 0x2b3   :  { %v525_v55 = vmax.f32 %v517_v51, 0.0  ;;  %v526_v47 = vmax.f32 %v518_v45, 0.0  ;;  %v527_v56 = vmax.f32 %v519_v52, 0.0  ;;  %v528_v46 = vmax.f32 %v520_v44, 0.0 }
 0x2b4   :  { %v529_v18 = vpack.c.bf16 %v522_v43, %v521_v53  ;;  %v530_v50 = vpack.c.bf16 %v524_v49, %v523_v54 }
 0x2b5   :  { %v531_v57 = vpack.c.bf16 %v526_v47, %v525_v55  ;;  %v532_v58 = vpack.c.bf16 %v528_v46, %v527_v56 }
 0x2b6   :  { %v537_v59 = vrot.slane %v529_v18, 3  ;;  %v538_v60 = vrot.slane %v530_v50, 6  ;;  %v539_v61 = vrot.slane %v530_v50, 1 }
 0x2b7   :  { %v540_v62 = vrot.slane %v531_v57, 4  ;;  %v541_v63 = vrot.slane %v531_v57, 7  ;;  %v542_v0 = vrot.slane %v532_v58, 2  ;;  %v543_v1 = vrot.slane %v532_v58, 5 }
 0x2b8   :  { %v547_v2 = vsel %vm544_vm6, %v529_v18, %v537_v59  ;;  %v551_v3 = vsel %vm548_vm7, %v538_v60, %v539_v61 }
 0x2b9   :  { %v552_v4 = vsel %vm245_vm1, %v547_v2, %v551_v3  ;;  %v556_v5 = vsel %vm553_vm8, %v540_v62, %v541_v63  ;;  %v560_v6 = vsel %vm557_vm9, %v542_v0, %v543_v1 }
 0x2ba   :  { %v562_v7 = vsel %vm561_vm10, %v556_v5, %v560_v6 }
 0x2bb   :  { %v564_v8 = vsel %vm563_vm11, %v552_v4, %v562_v7 }
 0x2bc   :  { %566 = vst [vmem:[%s864_s4] sm:$0xff] %v564_v8 }
 0x2bd   :  { %571 = vsyncpa [#allocation3], 1 }
 0x2be   :  { %572 = vsyncpa [#allocation5], 1 }
 0x2bf   :  { %573 = vsyncpa [#allocation8], 1 }

// kernel: generator_forward.6
= control target key start
LH: loop header
LB: loop body
LE: loop exit
PB: predicated region body
PF: predicated region fallthrough
CT: control target
= control target key end

     0   :  { %9 = vsyncpa [#allocation3], 0  ;;  %s1141_s0 = inlined_call_operand.vmem [shape: bf16[32,576], index: 0, kind: input, shape index: {}]   ;;  %s1142_s1 = inlined_call_operand.hbm [shape: bf16[576,128], index: 1, kind: input, shape index: {}]   ;;  %s1143_s2 = inlined_call_operand.hbm [shape: f32[1,32], index: 2, kind: input, shape index: {}]   ;;  %s1144_s3 = inlined_call_operand.hbm [shape: f32[1,32], index: 3, kind: input, shape index: {}]   ;;  %s1145_s4 = inlined_call_operand.vmem [shape: bf16[32,128], index: 4, kind: output, shape index: {}]  }
   0x1   :  { %10 = vsyncpa [#allocation5], 0  ;;  %s31_s17 = sshll.u32 %s1143_s2, 4  ;;  %s986_s18 = smov [#allocation4]   ;;  %s32_s17 = int_to_ptr.hbm [resolvable:$true] %s31_s17 }
   0x2   :  { %s33_s19 = sshll.u32 %s986_s18, 4  ;;  %s17_s22 = sshll.u32 %s1142_s1, 4  ;;  %s34_s19 = int_to_ptr.vmem [resolvable:$true] %s33_s19  ;;  %s18_s22 = int_to_ptr.hbm [resolvable:$true] %s17_s22 }
   0x3   :  { %36 = dma.hbm_to_vmem [thread:$0]  %s32_s17, 16, %s34_s19, [#allocation5]  }
   0x4   :  { %s987_s23 = smov [#allocation2]   ;;  %s988_s25 = smov 64  }
   0x5   :  { %s19_s24 = sshll.u32 %s987_s23, 4  ;;  %s989_s26 = smov 4   ;;  %s20_s24 = int_to_ptr.vmem [resolvable:$true] %s19_s24 }
   0x6   :  { %25 = dma.hbm_to_vmem [thread:$0]  %s18_s22, 4608, %s20_s24, [#allocation3], %s988_s25, %s988_s25, %s989_s26  }
   0x7   :  { %s42_s28 = sshll.u32 %s1144_s3, 4  ;;  %s990_s29 = smov [#allocation6]   ;;  %s43_s28 = int_to_ptr.hbm [resolvable:$true] %s42_s28 }
   0x8   :  { %s44_s30 = sshll.u32 %s990_s29, 4  ;;  %s45_s30 = int_to_ptr.vmem [resolvable:$true] %s44_s30 }
   0x9   :  { %47 = dma.hbm_to_vmem [thread:$0]  %s43_s28, 16, %s45_s30, [#allocation5]  }
   0xa   :  { %982 = dma.done.wait [#allocation3], 4608  }
   0xb   :  { %983 = vsyncadd [#allocation3], 4294962688 }
   0xc   :  { %984 = dma.done.wait [#allocation5], 32  }
   0xd   :  { %985 = vsyncadd [#allocation5], 4294967264  ;;  %v856_v0 = vld [vmem:[#allocation2 + $0x38] sm:$0xff]  ;;  %v855_v4 = vld [vmem:[#allocation2 + $0x30] sm:$0xff]  ;;  %vm411_vm0 = vcmask 523264   ;;  %s992_s15 = smov 96  }
   0xe   :  { %v864_v1 = vld [vmem:[#allocation2 + $0x78] sm:$0xff]  ;;  %418 = vmatpush.bf16.msra.mxu0 %v856_v0  ;;  %v863_v5 = vld [vmem:[#allocation2 + $0x70] sm:$0xff]  ;;  %v854_v8 = vld [vmem:[#allocation2 + $0x28] sm:$0xff]  ;;  %vm546_vm1 = vcmask 261120   ;;  %vm549_vm2 = vcmask 785408  }
   0xf   :  { %v872_v2 = vld [vmem:[#allocation2 + $0xb8] sm:$0xff]  ;;  %437 = vmatpush.bf16.msra.mxu1 %v864_v1  ;;  %v871_v6 = vld [vmem:[#allocation2 + $0xb0] sm:$0xff]  ;;  %v862_v9 = vld [vmem:[#allocation2 + $0x68] sm:$0xff] }
  0x10   :  { %v880_v3 = vld [vmem:[#allocation2 + $0xf8] sm:$0xff]  ;;  %456 = vmatpush.bf16.msra.mxu2 %v872_v2  ;;  %v879_v7 = vld [vmem:[#allocation2 + $0xf0] sm:$0xff]  ;;  %v870_v10 = vld [vmem:[#allocation2 + $0xa8] sm:$0xff] }
  0x11   :  { %475 = vmatpush.bf16.msra.mxu3 %v880_v3  ;;  %v878_v11 = vld [vmem:[#allocation2 + $0xe8] sm:$0xff]  ;;  %v853_v12 = vld [vmem:[#allocation2 + $0x20] sm:$0xff]  ;;  %v852_v16 = vld [vmem:[#allocation2 + $0x18] sm:$0xff] }
  0x12   :  { %419 = vmatpush.bf16.msra.mxu0 %v855_v4  ;;  %v861_v13 = vld [vmem:[#allocation2 + $0x60] sm:$0xff]  ;;  %v860_v17 = vld [vmem:[#allocation2 + $0x58] sm:$0xff]  ;;  %v851_v20 = vld [vmem:[#allocation2 + $0x10] sm:$0xff] }
  0x13   :  { %438 = vmatpush.bf16.msra.mxu1 %v863_v5  ;;  %v869_v14 = vld [vmem:[#allocation2 + $0xa0] sm:$0xff]  ;;  %v868_v18 = vld [vmem:[#allocation2 + $0x98] sm:$0xff]  ;;  %v859_v21 = vld [vmem:[#allocation2 + $0x50] sm:$0xff] }
  0x14   :  { %457 = vmatpush.bf16.msra.mxu2 %v871_v6  ;;  %v877_v15 = vld [vmem:[#allocation2 + $0xe0] sm:$0xff]  ;;  %v876_v19 = vld [vmem:[#allocation2 + $0xd8] sm:$0xff]  ;;  %v867_v22 = vld [vmem:[#allocation2 + $0x90] sm:$0xff] }
  0x15   :  { %476 = vmatpush.bf16.msra.mxu3 %v879_v7  ;;  %v875_v23 = vld [vmem:[#allocation2 + $0xd0] sm:$0xff]  ;;  %v850_v24 = vld [vmem:[#allocation2 + $0x8] sm:$0xff]  ;;  %v849_v28 = vld [vmem:[#allocation2] sm:$0xff] }
  0x16   :  { %420 = vmatpush.bf16.msra.mxu0 %v854_v8  ;;  %v858_v25 = vld [vmem:[#allocation2 + $0x48] sm:$0xff]  ;;  %v857_v29 = vld [vmem:[#allocation2 + $0x40] sm:$0xff]  ;;  %v841_v33 = vld [vmem:[%s1141_s0 + $0x10] sm:$0xf0] }
  0x17   :  { %439 = vmatpush.bf16.msra.mxu1 %v862_v9  ;;  %v866_v26 = vld [vmem:[#allocation2 + $0x88] sm:$0xff]  ;;  %v865_v30 = vld [vmem:[#allocation2 + $0x80] sm:$0xff]  ;;  %v657_v35 = vld [vmem:[%s1141_s0 + $0x14] sm:$0xf0] }
  0x18   :  { %458 = vmatpush.bf16.msra.mxu2 %v870_v10  ;;  %v874_v27 = vld [vmem:[#allocation2 + $0xc8] sm:$0xff]  ;;  %v873_v31 = vld [vmem:[#allocation2 + $0xc0] sm:$0xff]  ;;  %v842_v37 = vld [vmem:[%s1141_s0 + $0x18] sm:$0xf0] }
  0x19   :  { %477 = vmatpush.bf16.msra.mxu3 %v878_v11  ;;  %v655_v32 = vld [vmem:[%s1141_s0] sm:$0xf]  ;;  %v839_v34 = vld [vmem:[%s1141_s0 + $0x4] sm:$0xf]  ;;  %v663_v36 = vld [vmem:[%s1141_s0 + $0x8] sm:$0xf] }
  0x1a   :  { %421 = vmatpush.bf16.msra.mxu0 %v853_v12  ;;  %v840_v38 = vld [vmem:[%s1141_s0 + $0xc] sm:$0xf]  ;;  %v665_v39 = vld [vmem:[%s1141_s0 + $0x1c] sm:$0xf0]  ;;  %v884_v40 = vld [vmem:[#allocation2 + $0x118] sm:$0xff]  ;;  %v656_v41 = vor.u32 %v841_v33, %v655_v32  ;;  %v660_v42 = vor.u32 %v839_v34, %v657_v35  ;;  %v664_v43 = vor.u32 %v842_v37, %v663_v36 }
  0x1b   :  { %440 = vmatpush.bf16.msra.mxu1 %v861_v13  ;;  %v668_v44 = vor.u32 %v840_v38, %v665_v39  ;;  %v883_v45 = vld [vmem:[#allocation2 + $0x110] sm:$0xff]  ;;  %v882_v46 = vld [vmem:[#allocation2 + $0x108] sm:$0xff]  ;;  %v881_v47 = vld [vmem:[#allocation2 + $0x100] sm:$0xff] }
  0x1c   :  { %459 = vmatpush.bf16.msra.mxu2 %v869_v14  ;;  %v675_v48 = vld [vmem:[%s1141_s0 + $0x28] sm:$0xf]  ;;  %v846_v49 = vld [vmem:[%s1141_s0 + $0x38] sm:$0xf0]  ;;  %v844_v50 = vld [vmem:[%s1141_s0 + $0x2c] sm:$0xf] }
  0x1d   :  { %478 = vmatpush.bf16.msra.mxu3 %v877_v15  ;;  %v677_v51 = vld [vmem:[%s1141_s0 + $0x3c] sm:$0xf0]  ;;  %v683_v52 = vld [vmem:[%s1141_s0 + $0x30] sm:$0xf]  ;;  %v847_v53 = vld [vmem:[%s1141_s0 + $0x40] sm:$0xf0]  ;;  %v676_v56 = vor.u32 %v846_v49, %v675_v48 }
  0x1e   :  { %422 = vmatpush.bf16.msra.mxu0 %v852_v16  ;;  %v845_v54 = vld [vmem:[%s1141_s0 + $0x34] sm:$0xf]  ;;  %v685_v55 = vld [vmem:[%s1141_s0 + $0x44] sm:$0xf0]  ;;  %v680_v57 = vor.u32 %v844_v50, %v677_v51  ;;  %v684_v58 = vor.u32 %v847_v53, %v683_v52  ;;  %v671_v60 = vld [vmem:[%s1141_s0 + $0x10] sm:$0xf] }
  0x1f   :  { %441 = vmatpush.bf16.msra.mxu1 %v860_v17  ;;  %v688_v59 = vor.u32 %v845_v54, %v685_v55  ;;  %v843_v61 = vld [vmem:[%s1141_s0 + $0x20] sm:$0xf0]  ;;  %v691_v62 = vld [vmem:[%s1141_s0 + $0x38] sm:$0xf]  ;;  %v848_v63 = vld [vmem:[%s1141_s0 + $0x48] sm:$0xf0] }
  0x20   :  { %460 = vmatpush.bf16.msra.mxu2 %v868_v18  ;;  %v672_v0 = vor.u32 %v843_v61, %v671_v60  ;;  %v692_v1 = vor.u32 %v848_v63, %v691_v62  ;;  %s991_s0 = smov 32  }
  0x21   :  { %479 = vmatpush.bf16.msra.mxu3 %v876_v19 }
  0x22   :  { %423 = vmatpush.bf16.msra.mxu0 %v851_v20 }
  0x23   :  { %442 = vmatpush.bf16.msra.mxu1 %v859_v21 }
  0x24   :  { %461 = vmatpush.bf16.msra.mxu2 %v867_v22 }
  0x25   :  { %480 = vmatpush.bf16.msra.mxu3 %v875_v23 }
  0x26   :  { %424 = vmatpush.bf16.msra.mxu0 %v850_v24 }
  0x27   :  { %443 = vmatpush.bf16.msra.mxu1 %v858_v25 }
  0x28   :  { %462 = vmatpush.bf16.msra.mxu2 %v866_v26 }
  0x29   :  { %481 = vmatpush.bf16.msra.mxu3 %v874_v27 }
  0x2a   :  { %425 = vmatpush.bf16.msra.mxu0 %v849_v28 }
  0x2b   :  { %444 = vmatpush.bf16.msra.mxu1 %v857_v29 }
  0x2c   :  { %463 = vmatpush.bf16.msra.mxu2 %v865_v30 }
  0x2d   :  { %482 = vmatpush.bf16.msra.mxu3 %v873_v31  ;;  %426 = vmatmul.bf16.vlgmr.msra.gmra.mxu0 %v656_v41 }
  0x2e   :  { %498 = vmatpush.bf16.msrb.mxu0 %v884_v40  ;;  %445 = vmatmul.bf16.vlgmr.msra.gmra.mxu1 %v660_v42 }
  0x2f   :  { %896 = vmatpush.bf16.msrb.mxu1 %v884_v40  ;;  %464 = vmatmul.bf16.vlgmr.msra.gmra.mxu2 %v664_v43 }
  0x30   :  { %483 = vmatmul.bf16.vlgmr.msra.gmra.mxu3 %v668_v44 }
  0x32   :  { %499 = vmatpush.bf16.msrb.mxu0 %v883_v45 }
  0x33   :  { %897 = vmatpush.bf16.msrb.mxu1 %v883_v45 }
  0x36   :  { %500 = vmatpush.bf16.msrb.mxu0 %v882_v46 }
  0x37   :  { %898 = vmatpush.bf16.msrb.mxu1 %v882_v46 }
  0x3a   :  { %501 = vmatpush.bf16.msrb.mxu0 %v881_v47 }
  0x3b   :  { %899 = vmatpush.bf16.msrb.mxu1 %v881_v47 }
  0x3d   :  { %431 = vmatmul.bf16.gmra.mxu0 %v676_v56 }
  0x3e   :  { %450 = vmatmul.bf16.gmra.mxu1 %v680_v57 }
  0x3f   :  { %469 = vmatmul.bf16.gmra.mxu2 %v684_v58 }
  0x40   :  { %488 = vmatmul.bf16.gmra.mxu3 %v688_v59 }
  0x4d   :  { %837 = vmatmul.msk.bf16.vlgmr.msrb.gmra.mxu0 %vm411_vm0, %v672_v0 }
  0x4e   :  { %838 = vmatmul.msk.bf16.vlgmr.msrb.gmra.mxu1 %vm411_vm0, %v692_v1 }
  0xaa   :  { %v427_v2 = vpop.f32.mrf.mxu0 }
  0xab   :  { %v446_v3 = vpop.f32.mrf.mxu1 }
  0xac   :  { %v447_v18 = vadd.f32 %v446_v3, %v427_v2 }
  0xb2   :  { %v465_v4 = vpop.f32.mrf.mxu2  ;;  %v429_v5 = vpop.f32.mrf.mxu0 }
  0xb3   :  { %v448_v6 = vpop.f32.mrf.mxu1  ;;  %v484_v7 = vpop.f32.mrf.mxu3  ;;  %v466_v20 = vadd.f32 %v465_v4, %v447_v18 }
  0xb4   :  { %v449_v19 = vadd.f32 %v448_v6, %v429_v5 }
  0xb5   :  { %v485_v26 = vadd.f32 %v484_v7, %v466_v20 }
  0xba   :  { %v467_v8 = vpop.f32.mrf.mxu2  ;;  %v432_v9 = vpop.f32.mrf.mxu0 }
  0xbb   :  { %v451_v10 = vpop.f32.mrf.mxu1  ;;  %v486_v11 = vpop.f32.mrf.mxu3  ;;  %v468_v21 = vadd.f32 %v467_v8, %v449_v19 }
  0xbc   :  { %v452_v22 = vadd.f32 %v451_v10, %v432_v9 }
  0xbd   :  { %v487_v27 = vadd.f32 %v486_v11, %v468_v21 }
  0xc2   :  { %v434_v12 = vpop.f32.mrf.mxu0  ;;  %v470_v14 = vpop.f32.mrf.mxu2 }
  0xc3   :  { %v453_v13 = vpop.f32.mrf.mxu1  ;;  %v489_v15 = vpop.f32.mrf.mxu3  ;;  %v471_v24 = vadd.f32 %v470_v14, %v452_v22 }
  0xc4   :  { %v454_v25 = vadd.f32 %v453_v13, %v434_v12 }
  0xc5   :  { %v490_v31 = vadd.f32 %v489_v15, %v471_v24 }
  0xca   :  { %v503_v16 = vpop.f32.mrf.mxu0  ;;  %v472_v23 = vpop.f32.mrf.mxu2 }
  0xcb   :  { %v508_v17 = vpop.f32.mrf.mxu1  ;;  %v473_v28 = vadd.f32 %v472_v23, %v454_v25  ;;  %v491_v29 = vpop.f32.mrf.mxu3  ;;  %v504_v32 = vadd.f32 %v503_v16, %v485_v26 }
  0xcc   :  { %v509_v36 = vadd.f32 %v508_v17, %v490_v31 }
  0xcd   :  { %v492_v35 = vadd.f32 %v491_v29, %v473_v28 }
  0xd2   :  { %v505_v30 = vpop.f32.mrf.mxu0 }
  0xd3   :  { %v506_v33 = vadd.f32 %v505_v30, %v487_v27  ;;  %v510_v34 = vpop.f32.mrf.mxu1  ;;  %v583_v27 = vld [vmem:[#allocation4] sm:$0x1] }
  0xd4   :  { %v511_v38 = vadd.f32 %v510_v34, %v492_v35 }
  0xd5   :  { %v513_v37 = vadd.f32 %v506_v33, %v504_v32 }
  0xd7   :  { %v514_v39 = vadd.f32 %v513_v37, %v509_v36 }
  0xd9   :  { %v515_v40 = vadd.f32 %v514_v39, %v511_v38  ;;  %v610_v39 = vld [vmem:[#allocation6] sm:$0x1] }
  0xdb   :  { %v516_v41 = vrot.slane %v515_v40, 4 }
  0xdd   :  { %v517_v42 = vadd.f32 %v516_v41, %v515_v40 }
  0xdf   :  { %v518_v43 = vrot.slane %v517_v42, 2 }
  0xe1   :  { %v519_v44 = vadd.f32 %v518_v43, %v517_v42 }
  0xe3   :  { %v520_v45 = vrot.slane %v519_v44, 1 }
  0xe5   :  { %v521_v46 = vadd.f32 %v520_v45, %v519_v44 }
  0xe7   :  { %531 = vrot.lane.b32.xlu1 %v521_v46, %s991_s0  ;;  %523 = vrot.lane.b32.xlu0 %v521_v46, %s992_s15 }
  0xef   :  { %527 = vrot.lane.b32.xlu0 %v521_v46, %s988_s25 }
 0x159   :  { %v524_v47 = vpop.permute.xlu0 %523  ;;  %v532_v51 = vpop.permute.xlu1 %531 }
 0x15a   :  { %v526_v48 = vadd.f32 %v524_v47, %v521_v46 }
 0x161   :  { %v528_v49 = vpop.permute.xlu0 %527 }
 0x162   :  { %v530_v50 = vadd.f32 %v528_v49, %v526_v48 }
 0x164   :  { %v534_v52 = vadd.f32 %v532_v51, %v530_v50 }
 0x166   :  { %v535_v53 = vmul.f32 0.0078125, %v534_v52 }
 0x168   :  { %540 = vrot.lane.b32.xlu2 %v535_v53, %s988_s25  ;;  %537 = vrot.lane.b32.xlu1 %v535_v53, %s991_s0 }
 0x170   :  { %543 = vrot.lane.b32.xlu2 %v535_v53, %s992_s15 }
 0x1c2   :  { %v541_v54 = vpop.permute.xlu2 %540 }
 0x1ca   :  { %v544_v57 = vpop.permute.xlu2 %543 }
 0x1da   :  { %v538_v55 = vpop.permute.xlu1 %537 }
 0x1db   :  { %v547_v56 = vsel %vm546_vm1, %v535_v53, %v538_v55 }
 0x1dc   :  { %v548_v58 = vsel %vm411_vm0, %v547_v56, %v541_v54 }
 0x1dd   :  { %v550_v59 = vsel %vm549_vm2, %v548_v58, %v544_v57 }
 0x1de   :  { %v551_v60 = vperm.slane %v550_v59, 0 }
 0x1e0   :  { %v1100_v61 = vsub.f32 %v504_v32, %v551_v60  ;;  %v1102_v62 = vsub.f32 %v506_v33, %v551_v60  ;;  %v1104_v63 = vsub.f32 %v509_v36, %v551_v60  ;;  %v1106_v0 = vsub.f32 %v511_v38, %v551_v60  ;;  %v907_v32 = vld [vmem:[#allocation6] ss:$0 sm:$0xff] }
 0x1e2   :  { %v556_v1 = vmul.f32 %v1100_v61, %v1100_v61  ;;  %v557_v2 = vmul.f32 %v1102_v62, %v1102_v62  ;;  %v558_v3 = vmul.f32 %v1104_v63, %v1104_v63  ;;  %v559_v5 = vmul.f32 %v1106_v0, %v1106_v0 }
 0x1e4   :  { %v560_v4 = vadd.f32 %v557_v2, %v556_v1 }
 0x1e6   :  { %v561_v6 = vadd.f32 %v560_v4, %v558_v3 }
 0x1e8   :  { %v562_v7 = vadd.f32 %v561_v6, %v559_v5 }
 0x1ea   :  { %v563_v8 = vrot.slane %v562_v7, 4 }
 0x1ec   :  { %v564_v9 = vadd.f32 %v563_v8, %v562_v7 }
 0x1ee   :  { %v565_v10 = vrot.slane %v564_v9, 2 }
 0x1f0   :  { %v566_v11 = vadd.f32 %v565_v10, %v564_v9 }
 0x1f2   :  { %v567_v12 = vrot.slane %v566_v11, 1 }
 0x1f4   :  { %v568_v13 = vadd.f32 %v567_v12, %v566_v11 }
 0x1f6   :  { %578 = vrot.lane.b32.xlu2 %v568_v13, %s991_s0  ;;  %574 = vrot.lane.b32.xlu1 %v568_v13, %s988_s25 }
 0x1f7   :  { %570 = vrot.lane.b32.xlu0 %v568_v13, %s992_s15 }
 0x250   :  { %v579_v18 = vpop.permute.xlu2 %578 }
 0x268   :  { %v575_v16 = vpop.permute.xlu1 %574 }
 0x269   :  { %v571_v14 = vpop.permute.xlu0 %570 }
 0x26a   :  { %v573_v15 = vadd.f32 %v571_v14, %v568_v13 }
 0x26c   :  { %v577_v17 = vadd.f32 %v575_v16, %v573_v15 }
 0x26e   :  { %v581_v19 = vadd.f32 %v579_v18, %v577_v17 }
 0x270   :  { %v582_v20 = vmul.f32 0.0078125, %v581_v19 }
 0x272   :  { %v584_v21 = vadd.f32 1e-05, %v582_v20 }
 0x274   :  { %908 = vrsqrt.f32 %v584_v21  ;;  %vm591_vm4 = vweird.f32 %v584_v21 }
 0x27a   :  { %v909_v22 = vpop.eup %908 }
 0x27b   :  { %v586_v23 = vmul.f32 %v909_v22, %v584_v21  ;;  %vm592_vm3 = vweird.f32 %v909_v22 }
 0x27c   :  { %vm593_vm5 = vmor %vm591_vm4, %vm592_vm3 }
 0x27d   :  { %v587_v24 = vmul.f32 %v909_v22, %v586_v23 }
 0x27f   :  { %v588_v25 = vmul.f32 0.5, %v587_v24 }
 0x281   :  { %v589_v26 = vsub.f32 1.5, %v588_v25 }
 0x283   :  { %v590_v28 = vmul.f32 %v909_v22, %v589_v26 }
 0x285   :  { %v594_v29 = vsel %vm593_vm5, %v909_v22, %v590_v28 }
 0x286   :  { %v595_v30 = vmul.f32 %v594_v29, %v583_v27 }
 0x288   :  { %v597_v31 = vperm.slane %v595_v30, 0 }
 0x28a   :  { %604 = vrot.lane.b32.xlu2 %v597_v31, %s992_s15  ;;  %601 = vrot.lane.b32.xlu1 %v597_v31, %s988_s25 }
 0x28b   :  { %598 = vrot.lane.b32.xlu0 %v597_v31, %s991_s0 }
 0x292   :  { %616 = vrot.lane.b32.xlu1 %v907_v32, %s988_s25  ;;  %619 = vrot.lane.b32.xlu2 %v907_v32, %s992_s15 }
 0x293   :  { %613 = vrot.lane.b32.xlu0 %v907_v32, %s991_s0 }
 0x2e4   :  { %v605_v34 = vpop.permute.xlu2 %604 }
 0x2ec   :  { %v620_v43 = vpop.permute.xlu2 %619 }
 0x2fc   :  { %v602_v33 = vpop.permute.xlu1 %601 }
 0x2fd   :  { %v599_v35 = vpop.permute.xlu0 %598 }
 0x2fe   :  { %v607_v36 = vsel %vm546_vm1, %v595_v30, %v599_v35 }
 0x2ff   :  { %v608_v37 = vsel %vm411_vm0, %v607_v36, %v602_v33 }
 0x300   :  { %v609_v38 = vsel %vm549_vm2, %v608_v37, %v605_v34 }
 0x301   :  { %v625_v40 = vperm.slane %v609_v38, 0 }
 0x303   :  { %v626_v47 = vmul.f32 %v625_v40, %v1100_v61  ;;  %v627_v48 = vmul.f32 %v625_v40, %v1102_v62  ;;  %v628_v49 = vmul.f32 %v625_v40, %v1104_v63  ;;  %v629_v50 = vmul.f32 %v625_v40, %v1106_v0 }
 0x304   :  { %v617_v41 = vpop.permute.xlu1 %616 }
 0x305   :  { %v614_v42 = vpop.permute.xlu0 %613 }
 0x306   :  { %v622_v44 = vsel %vm546_vm1, %v610_v39, %v614_v42 }
 0x307   :  { %v623_v45 = vsel %vm411_vm0, %v622_v44, %v617_v41 }
 0x308   :  { %v624_v46 = vsel %vm549_vm2, %v623_v45, %v620_v43 }
 0x309   :  { %v630_v51 = vperm.slane %v624_v46, 0 }
 0x30b   :  { %v631_v52 = vadd.f32 %v630_v51, %v626_v47  ;;  %v632_v53 = vadd.f32 %v630_v51, %v627_v48  ;;  %v633_v54 = vadd.f32 %v630_v51, %v628_v49  ;;  %v634_v55 = vadd.f32 %v630_v51, %v629_v50 }
 0x30d   :  { %v635_v56 = vmax.f32 %v631_v52, 0.0  ;;  %v636_v57 = vmax.f32 %v632_v53, 0.0  ;;  %v637_v58 = vmax.f32 %v633_v54, 0.0  ;;  %v638_v59 = vmax.f32 %v634_v55, 0.0 }
 0x30f   :  { %v888_v60 = vpack.c.bf16 %v636_v57, %v635_v56  ;;  %v893_v1 = vpack.c.bf16 %v638_v59, %v637_v58 }
 0x311   :  { %889 = vst [vmem:[%s1145_s4] sm:$0xff] %v888_v60  }
 0x312   :  { %895 = vst [vmem:[%s1145_s4 + $0x8] sm:$0xff] %v893_v1  }
 0x313   :  { %651 = vsyncpa [#allocation3], 1 }
 0x314   :  { %652 = vsyncpa [#allocation5], 1 }

// kernel: generator_forward.7
= control target key start
LH: loop header
LB: loop body
LE: loop exit
PB: predicated region body
PF: predicated region fallthrough
CT: control target
= control target key end

     0   :  { %vm314_vm0 = vcmask 261120   ;;  %vm486_vm1 = vcmask 523264   ;;  %s1010_s14 = smov 112   ;;  %s1012_s15 = smov 32   ;;  %vm548_vm2 = vcmask 130048   ;;  %vm551_vm3 = vcmask 392192   ;;  %s1531_s1 = inlined_call_operand.vmem [shape: bf16[288,64], index: 1, kind: input, shape index: {}]   ;;  %s1532_s0 = inlined_call_operand.vmem [shape: bf16[128,288], index: 0, kind: input, shape index: {}]   ;;  %s1533_s2 = inlined_call_operand.vmem [shape: f32[1,16], index: 2, kind: input, shape index: {}]   ;;  %s1534_s3 = inlined_call_operand.vmem [shape: f32[1,16], index: 3, kind: input, shape index: {}]   ;;  %s1535_s4 = inlined_call_operand.vmem [shape: bf16[128,64], index: 4, kind: output, shape index: {}]  }
   0x1   :  { %v973_v0 = vld [vmem:[%s1531_s1 + $0x38] sm:$0xff]  ;;  %v983_v2 = vld [vmem:[%s1531_s1 + $0x88] sm:$0xff]  ;;  %v972_v3 = vld [vmem:[%s1531_s1 + $0x30] sm:$0xff]  ;;  %s1013_s16 = smov 16   ;;  %s1014_s17 = smov 48   ;;  %vm745_vm7 = vcmask 519168  }
   0x2   :  { %v981_v1 = vld [vmem:[%s1531_s1 + $0x78] sm:$0xff]  ;;  %339 = vmatpush.bf16.msra.mxu0 %v973_v0  ;;  %984 = vmatpush.bf16.msra.mxu3 %v973_v0  ;;  %v980_v4 = vld [vmem:[%s1531_s1 + $0x70] sm:$0xff]  ;;  %v982_v5 = vld [vmem:[%s1531_s1 + $0x80] sm:$0xff] }
   0x3   :  { %388 = vmatpush.bf16.msra.mxu1 %v981_v1  ;;  %443 = vmatpush.bf16.msra.mxu2 %v983_v2  ;;  %v776_v6 = vld [vmem:[%s1532_s0 + $0x8] sm:$0xf]  ;;  %v944_v7 = vld [vmem:[%s1532_s0 + $0x10] sm:$0xf0]  ;;  %v970_v11 = vld [vmem:[%s1531_s1 + $0x20] sm:$0xff] }
   0x4   :  { %v777_v8 = vor.u32 %v944_v7, %v776_v6  ;;  %v971_v9 = vld [vmem:[%s1531_s1 + $0x28] sm:$0xff]  ;;  %v978_v12 = vld [vmem:[%s1531_s1 + $0x60] sm:$0xff]  ;;  %v969_v13 = vld [vmem:[%s1531_s1 + $0x18] sm:$0xff] }
   0x5   :  { %v979_v10 = vld [vmem:[%s1531_s1 + $0x68] sm:$0xff]  ;;  %v977_v14 = vld [vmem:[%s1531_s1 + $0x58] sm:$0xff]  ;;  %v968_v15 = vld [vmem:[%s1531_s1 + $0x10] sm:$0xff] }
   0x6   :  { %340 = vmatpush.bf16.msra.mxu0 %v972_v3  ;;  %985 = vmatpush.bf16.msra.mxu3 %v972_v3  ;;  %v976_v16 = vld [vmem:[%s1531_s1 + $0x50] sm:$0xff]  ;;  %v788_v17 = vld [vmem:[%s1532_s0 + $0x20] sm:$0xf]  ;;  %v947_v18 = vld [vmem:[%s1532_s0 + $0x28] sm:$0xf0] }
   0x7   :  { %389 = vmatpush.bf16.msra.mxu1 %v980_v4  ;;  %444 = vmatpush.bf16.msra.mxu2 %v982_v5  ;;  %v789_v19 = vor.u32 %v947_v18, %v788_v17  ;;  %v967_v20 = vld [vmem:[%s1531_s1 + $0x8] sm:$0xff]  ;;  %v966_v22 = vld [vmem:[%s1531_s1] sm:$0xff]  ;;  %v840_v26 = vld [vmem:[%s1532_s0 + $0x90] sm:$0xf] }
   0x8   :  { %v975_v21 = vld [vmem:[%s1531_s1 + $0x48] sm:$0xff]  ;;  %v974_v23 = vld [vmem:[%s1531_s1 + $0x40] sm:$0xff]  ;;  %v961_v27 = vld [vmem:[%s1532_s0 + $0x98] sm:$0xf0]  ;;  %s1011_s1 = smov 96  }
   0x9   :  { %v768_v24 = vld [vmem:[%s1532_s0] sm:$0xf]  ;;  %v943_v25 = vld [vmem:[%s1532_s0 + $0x8] sm:$0xf0]  ;;  %v942_v28 = vld [vmem:[%s1532_s0 + $0x4] sm:$0xf]  ;;  %v841_v31 = vor.u32 %v961_v27, %v840_v26 }
   0xa   :  { %934 = vmatmul.msk.bf16.vlgmr.msra.gmra.mxu2 %vm314_vm0, %v777_v8  ;;  %341 = vmatpush.bf16.msra.mxu0 %v971_v9  ;;  %v770_v29 = vld [vmem:[%s1532_s0 + $0xc] sm:$0xf0]  ;;  %v769_v30 = vor.u32 %v943_v25, %v768_v24  ;;  %v800_v33 = vld [vmem:[%s1532_s0 + $0x38] sm:$0xf]  ;;  %v950_v34 = vld [vmem:[%s1532_s0 + $0x40] sm:$0xf0] }
   0xb   :  { %986 = vmatpush.bf16.msra.mxu3 %v971_v9  ;;  %390 = vmatpush.bf16.msra.mxu1 %v979_v10  ;;  %v773_v32 = vor.u32 %v942_v28, %v770_v29  ;;  %v801_v35 = vor.u32 %v950_v34, %v800_v33  ;;  %v780_v36 = vld [vmem:[%s1532_s0 + $0x18] sm:$0xf]  ;;  %v946_v37 = vld [vmem:[%s1532_s0 + $0x20] sm:$0xf0]  ;;  %v852_v38 = vld [vmem:[%s1532_s0 + $0xa8] sm:$0xf] }
   0xc   :  { %v964_v39 = vld [vmem:[%s1532_s0 + $0xb0] sm:$0xf0]  ;;  %v945_v40 = vld [vmem:[%s1532_s0 + $0x1c] sm:$0xf]  ;;  %v782_v41 = vld [vmem:[%s1532_s0 + $0x24] sm:$0xf0]  ;;  %v781_v42 = vor.u32 %v946_v37, %v780_v36 }
   0xd   :  { %v853_v43 = vor.u32 %v964_v39, %v852_v38  ;;  %v785_v44 = vor.u32 %v945_v40, %v782_v41  ;;  %v812_v45 = vld [vmem:[%s1532_s0 + $0x50] sm:$0xf]  ;;  %v953_v46 = vld [vmem:[%s1532_s0 + $0x58] sm:$0xf0]  ;;  %v948_v50 = vld [vmem:[%s1532_s0 + $0x34] sm:$0xf] }
   0xe   :  { %342 = vmatpush.bf16.msra.mxu0 %v970_v11  ;;  %v813_v47 = vor.u32 %v953_v46, %v812_v45  ;;  %v792_v48 = vld [vmem:[%s1532_s0 + $0x30] sm:$0xf]  ;;  %v949_v49 = vld [vmem:[%s1532_s0 + $0x38] sm:$0xf0]  ;;  %v794_v51 = vld [vmem:[%s1532_s0 + $0x3c] sm:$0xf0] }
   0xf   :  { %987 = vmatpush.bf16.msra.mxu3 %v970_v11  ;;  %391 = vmatpush.bf16.msra.mxu1 %v978_v12  ;;  %v960_v52 = vld [vmem:[%s1532_s0 + $0x94] sm:$0xf]  ;;  %v842_v53 = vld [vmem:[%s1532_s0 + $0x9c] sm:$0xf0]  ;;  %v793_v54 = vor.u32 %v949_v49, %v792_v48  ;;  %v797_v55 = vor.u32 %v948_v50, %v794_v51  ;;  %v824_v57 = vld [vmem:[%s1532_s0 + $0x68] sm:$0xf] }
  0x10   :  { %v845_v56 = vor.u32 %v960_v52, %v842_v53  ;;  %v956_v58 = vld [vmem:[%s1532_s0 + $0x70] sm:$0xf0]  ;;  %v804_v60 = vld [vmem:[%s1532_s0 + $0x48] sm:$0xf]  ;;  %v951_v62 = vld [vmem:[%s1532_s0 + $0x4c] sm:$0xf] }
  0x11   :  { %v825_v59 = vor.u32 %v956_v58, %v824_v57  ;;  %v952_v61 = vld [vmem:[%s1532_s0 + $0x50] sm:$0xf0]  ;;  %v806_v63 = vld [vmem:[%s1532_s0 + $0x54] sm:$0xf0]  ;;  %v963_v0 = vld [vmem:[%s1532_s0 + $0xac] sm:$0xf] }
  0x12   :  { %343 = vmatpush.bf16.msra.mxu0 %v969_v13  ;;  %v805_v2 = vor.u32 %v952_v61, %v804_v60  ;;  %v809_v3 = vor.u32 %v951_v62, %v806_v63  ;;  %v836_v5 = vld [vmem:[%s1532_s0 + $0x80] sm:$0xf]  ;;  %v959_v6 = vld [vmem:[%s1532_s0 + $0x88] sm:$0xf0]  ;;  %v818_v11 = vld [vmem:[%s1532_s0 + $0x6c] sm:$0xf0] }
  0x13   :  { %988 = vmatpush.bf16.msra.mxu3 %v969_v13  ;;  %392 = vmatpush.bf16.msra.mxu1 %v977_v14  ;;  %v837_v7 = vor.u32 %v959_v6, %v836_v5  ;;  %v816_v8 = vld [vmem:[%s1532_s0 + $0x60] sm:$0xf]  ;;  %v955_v9 = vld [vmem:[%s1532_s0 + $0x68] sm:$0xf0]  ;;  %v828_v17 = vld [vmem:[%s1532_s0 + $0x78] sm:$0xf] }
  0x14   :  { %v958_v18 = vld [vmem:[%s1532_s0 + $0x80] sm:$0xf0]  ;;  %v965_v24 = vld [vmem:[%s1532_s0 + $0xb8] sm:$0xf0] }
  0x16   :  { %344 = vmatpush.bf16.msra.mxu0 %v968_v15 }
  0x17   :  { %989 = vmatpush.bf16.msra.mxu3 %v968_v15  ;;  %393 = vmatpush.bf16.msra.mxu1 %v976_v16  ;;  %v962_v15 = vld [vmem:[%s1532_s0 + $0xa0] sm:$0xf0] }
  0x1a   :  { %935 = vmatmul.msk.bf16.gmra.mxu2 %vm314_vm0, %v789_v19  ;;  %345 = vmatpush.bf16.msra.mxu0 %v967_v20  ;;  %v957_v19 = vld [vmem:[%s1532_s0 + $0x7c] sm:$0xf] }
  0x1b   :  { %990 = vmatpush.bf16.msra.mxu3 %v967_v20  ;;  %394 = vmatpush.bf16.msra.mxu1 %v975_v21  ;;  %v830_v20 = vld [vmem:[%s1532_s0 + $0x84] sm:$0xf0] }
  0x1e   :  { %346 = vmatpush.bf16.msra.mxu0 %v966_v22 }
  0x1f   :  { %991 = vmatpush.bf16.msra.mxu3 %v966_v22  ;;  %395 = vmatpush.bf16.msra.mxu1 %v974_v23  ;;  %v833_v22 = vor.u32 %v957_v19, %v830_v20 }
  0x21   :  { %347 = vmatmul.bf16.vlgmr.msra.gmra.mxu0 %v769_v30 }
  0x22   :  { %377 = vmatmul.bf16.vlgmr.msra.gmra.mxu3 %v841_v31  ;;  %396 = vmatmul.bf16.vlgmr.msra.gmra.mxu1 %v773_v32 }
  0x23   :  { %992 = vmatpush.bf16.msrb.mxu3 %v981_v1  ;;  %v854_v1 = vld [vmem:[%s1532_s0 + $0xb4] sm:$0xf0] }
  0x27   :  { %993 = vmatpush.bf16.msrb.mxu3 %v980_v4  ;;  %v857_v4 = vor.u32 %v963_v0, %v854_v1 }
  0x2a   :  { %936 = vmatmul.msk.bf16.gmra.mxu2 %vm314_vm0, %v801_v35 }
  0x2b   :  { %994 = vmatpush.bf16.msrb.mxu3 %v979_v10  ;;  %v954_v10 = vld [vmem:[%s1532_s0 + $0x64] sm:$0xf] }
  0x2c   :  { %v821_v13 = vor.u32 %v954_v10, %v818_v11 }
  0x2f   :  { %995 = vmatpush.bf16.msrb.mxu3 %v978_v12  ;;  %v817_v12 = vor.u32 %v955_v9, %v816_v8 }
  0x31   :  { %352 = vmatmul.bf16.gmra.mxu0 %v781_v42 }
  0x32   :  { %382 = vmatmul.bf16.gmra.mxu3 %v853_v43  ;;  %401 = vmatmul.bf16.gmra.mxu1 %v785_v44 }
  0x33   :  { %996 = vmatpush.bf16.msrb.mxu3 %v977_v14  ;;  %v848_v14 = vld [vmem:[%s1532_s0 + $0x98] sm:$0xf] }
  0x37   :  { %997 = vmatpush.bf16.msrb.mxu3 %v976_v16  ;;  %v849_v16 = vor.u32 %v962_v15, %v848_v14 }
  0x3a   :  { %937 = vmatmul.msk.bf16.gmra.mxu2 %vm314_vm0, %v813_v47 }
  0x3b   :  { %998 = vmatpush.bf16.msrb.mxu3 %v975_v21  ;;  %v829_v21 = vor.u32 %v958_v18, %v828_v17 }
  0x3f   :  { %999 = vmatpush.bf16.msrb.mxu3 %v974_v23  ;;  %v860_v23 = vld [vmem:[%s1532_s0 + $0xb0] sm:$0xf]  ;;  %s1009_s0 = smov 80  }
  0x40   :  { %v861_v25 = vor.u32 %v965_v24, %v860_v23 }
  0x41   :  { %357 = vmatmul.bf16.gmra.mxu0 %v793_v54 }
  0x42   :  { %406 = vmatmul.bf16.gmra.mxu1 %v797_v55  ;;  %426 = vmatmul.bf16.vlgmr.msrb.gmra.mxu3 %v845_v56 }
  0x4a   :  { %938 = vmatmul.msk.bf16.gmra.mxu2 %vm314_vm0, %v825_v59 }
  0x51   :  { %362 = vmatmul.bf16.gmra.mxu0 %v805_v2 }
  0x52   :  { %411 = vmatmul.bf16.gmra.mxu1 %v809_v3  ;;  %431 = vmatmul.bf16.gmra.mxu3 %v857_v4 }
  0x5a   :  { %939 = vmatmul.msk.bf16.gmra.mxu2 %vm314_vm0, %v837_v7 }
  0x61   :  { %367 = vmatmul.bf16.gmra.mxu0 %v817_v12 }
  0x62   :  { %416 = vmatmul.bf16.gmra.mxu1 %v821_v13 }
  0x6a   :  { %940 = vmatmul.msk.bf16.gmra.mxu2 %vm314_vm0, %v849_v16 }
  0x71   :  { %372 = vmatmul.bf16.gmra.mxu0 %v829_v21 }
  0x72   :  { %421 = vmatmul.bf16.gmra.mxu1 %v833_v22 }
  0x7a   :  { %941 = vmatmul.msk.bf16.gmra.mxu2 %vm314_vm0, %v861_v25 }
  0x8d   :  { %v446_v26 = vpop.f32.mrf.mxu2 }
  0x95   :  { %v448_v27 = vpop.f32.mrf.mxu2 }
  0x9d   :  { %v451_v28 = vpop.f32.mrf.mxu2 }
  0x9e   :  { %v348_v29 = vpop.f32.mrf.mxu0 }
  0x9f   :  { %v397_v30 = vpop.f32.mrf.mxu1 }
  0xa0   :  { %v398_v31 = vadd.f32 %v397_v30, %v348_v29 }
  0xa2   :  { %v1246_v32 = vadd.f32 %v446_v26, %v398_v31 }
  0xa4   :  { %v487_v10 = vsel %vm486_vm1, %v1246_v32, 0.0 }
  0xa5   :  { %v453_v33 = vpop.f32.mrf.mxu2  ;;  %v1248_v42 = vpop.f32.mrf.mxu3 }
  0xa6   :  { %v350_v34 = vpop.f32.mrf.mxu0 }
  0xa7   :  { %v399_v35 = vpop.f32.mrf.mxu1 }
  0xa8   :  { %v400_v59 = vadd.f32 %v399_v35, %v350_v34 }
  0xaa   :  { %v1256_v63 = vadd.f32 %v448_v27, %v400_v59 }
  0xac   :  { %v488_v5 = vsel %vm486_vm1, %v1256_v63, 0.0 }
  0xad   :  { %v456_v36 = vpop.f32.mrf.mxu2  ;;  %v1250_v46 = vpop.f32.mrf.mxu3  ;;  %v489_v14 = vadd.f32 %v488_v5, %v487_v10 }
  0xae   :  { %v353_v37 = vpop.f32.mrf.mxu0 }
  0xaf   :  { %v402_v38 = vpop.f32.mrf.mxu1 }
  0xb0   :  { %v403_v62 = vadd.f32 %v402_v38, %v353_v37 }
  0xb2   :  { %v1258_v2 = vadd.f32 %v451_v28, %v403_v62 }
  0xb4   :  { %v490_v11 = vsel %vm486_vm1, %v1258_v2, 0.0 }
  0xb5   :  { %v458_v39 = vpop.f32.mrf.mxu2  ;;  %v1252_v52 = vpop.f32.mrf.mxu3  ;;  %v491_v18 = vadd.f32 %v490_v11, %v489_v14 }
  0xb6   :  { %v355_v40 = vpop.f32.mrf.mxu0 }
  0xb7   :  { %v404_v41 = vpop.f32.mrf.mxu1 }
  0xb8   :  { %v405_v0 = vadd.f32 %v404_v41, %v355_v40 }
  0xba   :  { %v1262_v6 = vadd.f32 %v453_v33, %v405_v0 }
  0xbc   :  { %v492_v15 = vsel %vm486_vm1, %v1262_v6, 0.0 }
  0xbd   :  { %v461_v43 = vpop.f32.mrf.mxu2  ;;  %v1254_v57 = vpop.f32.mrf.mxu3  ;;  %v493_v22 = vadd.f32 %v492_v15, %v491_v18 }
  0xbe   :  { %v358_v44 = vpop.f32.mrf.mxu0 }
  0xbf   :  { %v407_v45 = vpop.f32.mrf.mxu1 }
  0xc0   :  { %v408_v3 = vadd.f32 %v407_v45, %v358_v44 }
  0xc2   :  { %v1268_v12 = vadd.f32 %v456_v36, %v408_v3 }
  0xc4   :  { %v494_v19 = vsel %vm486_vm1, %v1268_v12, 0.0 }
  0xc5   :  { %v463_v47 = vpop.f32.mrf.mxu2  ;;  %v427_v1 = vpop.f32.mrf.mxu3  ;;  %v495_v29 = vadd.f32 %v494_v19, %v493_v22 }
  0xc6   :  { %v360_v48 = vpop.f32.mrf.mxu0 }
  0xc7   :  { %v409_v49 = vpop.f32.mrf.mxu1 }
  0xc8   :  { %v410_v7 = vadd.f32 %v409_v49, %v360_v48 }
  0xca   :  { %v1272_v16 = vadd.f32 %v458_v39, %v410_v7 }
  0xcc   :  { %v496_v25 = vsel %vm486_vm1, %v1272_v16, 0.0 }
  0xcd   :  { %v466_v50 = vpop.f32.mrf.mxu2  ;;  %v429_v23 = vpop.f32.mrf.mxu3  ;;  %v497_v35 = vadd.f32 %v496_v25, %v495_v29 }
  0xce   :  { %v363_v51 = vpop.f32.mrf.mxu0  ;;  %v430_v59 = vadd.f32 %v429_v23, %v1250_v46 }
  0xcf   :  { %v412_v53 = vpop.f32.mrf.mxu1 }
  0xd0   :  { %v413_v13 = vadd.f32 %v412_v53, %v363_v51 }
  0xd2   :  { %v1276_v20 = vadd.f32 %v461_v43, %v413_v13 }
  0xd4   :  { %v498_v31 = vsel %vm486_vm1, %v1276_v20, 0.0 }
  0xd5   :  { %v468_v54 = vpop.f32.mrf.mxu2  ;;  %v499_v38 = vadd.f32 %v498_v31, %v497_v35 }
  0xd6   :  { %v365_v55 = vpop.f32.mrf.mxu0 }
  0xd7   :  { %v414_v56 = vpop.f32.mrf.mxu1 }
  0xd8   :  { %v415_v17 = vadd.f32 %v414_v56, %v365_v55 }
  0xda   :  { %v1280_v26 = vadd.f32 %v463_v47, %v415_v17  ;;  %v432_v47 = vpop.f32.mrf.mxu3 }
  0xdb   :  { %v433_v3 = vadd.f32 %v432_v47, %v1252_v52 }
  0xdc   :  { %v500_v36 = vsel %vm486_vm1, %v1280_v26, 0.0 }
  0xdd   :  { %v471_v58 = vpop.f32.mrf.mxu2  ;;  %v501_v41 = vadd.f32 %v500_v36, %v499_v38 }
  0xde   :  { %v368_v60 = vpop.f32.mrf.mxu0 }
  0xdf   :  { %v417_v61 = vpop.f32.mrf.mxu1 }
  0xe0   :  { %v418_v21 = vadd.f32 %v417_v61, %v368_v60 }
  0xe2   :  { %v1284_v33 = vadd.f32 %v466_v50, %v418_v21  ;;  %v428_v50 = vadd.f32 %v427_v1, %v1248_v42  ;;  %v434_v5 = vpop.f32.mrf.mxu3 }
  0xe4   :  { %v502_v39 = vsel %vm486_vm1, %v1284_v33, 0.0 }
  0xe5   :  { %v473_v4 = vpop.f32.mrf.mxu2  ;;  %v503_v48 = vadd.f32 %v502_v39, %v501_v41 }
  0xe6   :  { %v370_v8 = vpop.f32.mrf.mxu0 }
  0xe7   :  { %v419_v9 = vpop.f32.mrf.mxu1 }
  0xe8   :  { %v420_v27 = vadd.f32 %v419_v9, %v370_v8  ;;  %v435_v8 = vadd.f32 %v434_v5, %v1254_v57 }
  0xea   :  { %v1288_v37 = vadd.f32 %v468_v54, %v420_v27 }
  0xec   :  { %v504_v44 = vsel %vm486_vm1, %v1288_v37, 0.0 }
  0xed   :  { %v476_v24 = vpop.f32.mrf.mxu2  ;;  %v505_v54 = vadd.f32 %v504_v44, %v503_v48 }
  0xee   :  { %v373_v28 = vpop.f32.mrf.mxu0  ;;  %v1299_v55 = vadd.f32 %v476_v24, %v428_v50 }
  0xef   :  { %v422_v30 = vpop.f32.mrf.mxu1 }
  0xf0   :  { %v423_v34 = vadd.f32 %v422_v30, %v373_v28  ;;  %v510_v42 = vsel %vm486_vm1, %v1299_v55, 0.0 }
  0xf2   :  { %v1292_v40 = vadd.f32 %v471_v58, %v423_v34 }
  0xf4   :  { %v506_v51 = vsel %vm486_vm1, %v1292_v40, 0.0 }
  0xf5   :  { %v478_v43 = vpop.f32.mrf.mxu2  ;;  %v507_v58 = vadd.f32 %v506_v51, %v505_v54 }
  0xf6   :  { %v375_v45 = vpop.f32.mrf.mxu0  ;;  %v1308_v0 = vadd.f32 %v478_v43, %v430_v59 }
  0xf7   :  { %v424_v49 = vpop.f32.mrf.mxu1 }
  0xf8   :  { %v425_v53 = vadd.f32 %v424_v49, %v375_v45 }
  0xfa   :  { %v1301_v56 = vadd.f32 %v473_v4, %v425_v53  ;;  %v512_v4 = vsel %vm486_vm1, %v1308_v0, 0.0 }
  0xfc   :  { %v508_v60 = vsel %vm486_vm1, %v1301_v56, 0.0 }
  0xfd   :  { %v509_v61 = vadd.f32 %v508_v60, %v507_v58  ;;  %v481_v62 = vpop.f32.mrf.mxu2 }
  0xfe   :  { %v1313_v7 = vadd.f32 %v481_v62, %v433_v3 }
  0xff   :  { %v511_v1 = vadd.f32 %v510_v42, %v509_v61 }
 0x100   :  { %v514_v10 = vsel %vm486_vm1, %v1313_v7, 0.0 }
 0x101   :  { %v513_v46 = vadd.f32 %v512_v4, %v511_v1 }
 0x103   :  { %v515_v13 = vadd.f32 %v514_v10, %v513_v46 }
 0x105   :  { %v483_v9 = vpop.f32.mrf.mxu2 }
 0x106   :  { %v1318_v11 = vadd.f32 %v483_v9, %v435_v8 }
 0x108   :  { %v516_v14 = vsel %vm486_vm1, %v1318_v11, 0.0 }
 0x109   :  { %v517_v52 = vadd.f32 %v516_v14, %v515_v13 }
 0x10b   :  { %v518_v15 = vrot.slane %v517_v52, 4 }
 0x10d   :  { %v519_v17 = vadd.f32 %v518_v15, %v517_v52 }
 0x10f   :  { %v520_v18 = vrot.slane %v519_v17, 2 }
 0x111   :  { %v521_v19 = vadd.f32 %v520_v18, %v519_v17 }
 0x113   :  { %v522_v21 = vrot.slane %v521_v19, 1 }
 0x115   :  { %v523_v22 = vadd.f32 %v522_v21, %v521_v19 }
 0x117   :  { %533 = vrot.lane.b32.xlu1 %v523_v22, %s1009_s0  ;;  %525 = vrot.lane.b32.xlu0 %v523_v22, %s1010_s14 }
 0x11f   :  { %529 = vrot.lane.b32.xlu0 %v523_v22, %s1011_s1 }
 0x189   :  { %v526_v57 = vpop.permute.xlu0 %525  ;;  %v534_v27 = vpop.permute.xlu1 %533 }
 0x18a   :  { %v528_v23 = vadd.f32 %v526_v57, %v523_v22 }
 0x191   :  { %v530_v24 = vpop.permute.xlu0 %529 }
 0x192   :  { %v532_v25 = vadd.f32 %v530_v24, %v528_v23 }
 0x194   :  { %v536_v28 = vadd.f32 %v534_v27, %v532_v25 }
 0x196   :  { %v537_v29 = vmul.f32 0.001953125, %v536_v28 }
 0x198   :  { %542 = vrot.lane.b32.xlu2 %v537_v29, %s1012_s15  ;;  %539 = vrot.lane.b32.xlu1 %v537_v29, %s1013_s16 }
 0x1a0   :  { %545 = vrot.lane.b32.xlu2 %v537_v29, %s1014_s17 }
 0x1f2   :  { %v543_v30 = vpop.permute.xlu2 %542 }
 0x1fa   :  { %v546_v35 = vpop.permute.xlu2 %545 }
 0x20a   :  { %v540_v31 = vpop.permute.xlu1 %539 }
 0x20b   :  { %v549_v34 = vsel %vm548_vm2, %v537_v29, %v540_v31 }
 0x20c   :  { %v550_v36 = vsel %vm314_vm0, %v549_v34, %v543_v30 }
 0x20d   :  { %v552_v38 = vsel %vm551_vm3, %v550_v36, %v546_v35 }
 0x20e   :  { %v553_v39 = vperm.slane %v552_v38, 0 }
 0x210   :  { %v1332_v41 = vsub.f32 %v1246_v32, %v553_v39  ;;  %v1335_v43 = vsub.f32 %v1256_v63, %v553_v39  ;;  %v1338_v44 = vsub.f32 %v1258_v2, %v553_v39  ;;  %v1341_v45 = vsub.f32 %v1262_v6, %v553_v39 }
 0x211   :  { %v1348_v49 = vsub.f32 %v1268_v12, %v553_v39  ;;  %v1353_v63 = vsub.f32 %v1272_v16, %v553_v39  ;;  %v1360_v53 = vsub.f32 %v1276_v20, %v553_v39  ;;  %v1366_v16 = vsub.f32 %v1280_v26, %v553_v39 }
 0x212   :  { %v570_v47 = vmul.f32 %v1332_v41, %v1332_v41  ;;  %v571_v48 = vmul.f32 %v1335_v43, %v1335_v43  ;;  %v572_v32 = vmul.f32 %v1338_v44, %v1338_v44  ;;  %v573_v2 = vmul.f32 %v1341_v45, %v1341_v45 }
 0x213   :  { %v574_v12 = vmul.f32 %v1348_v49, %v1348_v49  ;;  %v575_v59 = vmul.f32 %v1353_v63, %v1353_v63  ;;  %v1372_v62 = vsub.f32 %v1284_v33, %v553_v39  ;;  %v576_v20 = vmul.f32 %v1360_v53, %v1360_v53 }
 0x214   :  { %v586_v6 = vsel %vm486_vm1, %v570_v47, 0.0  ;;  %v587_v50 = vsel %vm486_vm1, %v571_v48, 0.0  ;;  %v589_v54 = vsel %vm486_vm1, %v572_v32, 0.0  ;;  %v591_v60 = vsel %vm486_vm1, %v573_v2, 0.0 }
 0x215   :  { %v588_v51 = vadd.f32 %v587_v50, %v586_v6  ;;  %v593_v42 = vsel %vm486_vm1, %v574_v12, 0.0  ;;  %v1378_v3 = vsub.f32 %v1288_v37, %v553_v39  ;;  %v577_v26 = vmul.f32 %v1366_v16, %v1366_v16 }
 0x216   :  { %v595_v5 = vsel %vm486_vm1, %v575_v59, 0.0  ;;  %v1384_v46 = vsub.f32 %v1292_v40, %v553_v39  ;;  %v578_v33 = vmul.f32 %v1372_v62, %v1372_v62  ;;  %v597_v8 = vsel %vm486_vm1, %v576_v20, 0.0 }
 0x217   :  { %v590_v58 = vadd.f32 %v589_v54, %v588_v51  ;;  %v1390_v10 = vsub.f32 %v1301_v56, %v553_v39  ;;  %v579_v37 = vmul.f32 %v1378_v3, %v1378_v3  ;;  %v599_v13 = vsel %vm486_vm1, %v577_v26, 0.0 }
 0x218   :  { %v1396_v52 = vsub.f32 %v1299_v55, %v553_v39  ;;  %v580_v40 = vmul.f32 %v1384_v46, %v1384_v46  ;;  %v601_v15 = vsel %vm486_vm1, %v578_v33, 0.0  ;;  %v1402_v18 = vsub.f32 %v1308_v0, %v553_v39 }
 0x219   :  { %v592_v61 = vadd.f32 %v591_v60, %v590_v58  ;;  %v581_v56 = vmul.f32 %v1390_v10, %v1390_v10  ;;  %v603_v19 = vsel %vm486_vm1, %v579_v37, 0.0  ;;  %v1408_v22 = vsub.f32 %v1313_v7, %v553_v39 }
 0x21a   :  { %v582_v55 = vmul.f32 %v1396_v52, %v1396_v52  ;;  %v605_v57 = vsel %vm486_vm1, %v580_v40, 0.0  ;;  %v1414_v24 = vsub.f32 %v1318_v11, %v553_v39  ;;  %v583_v0 = vmul.f32 %v1402_v18, %v1402_v18 }
 0x21b   :  { %v594_v1 = vadd.f32 %v593_v42, %v592_v61  ;;  %v607_v25 = vsel %vm486_vm1, %v581_v56, 0.0  ;;  %v584_v28 = vmul.f32 %v1408_v22, %v1408_v22 }
 0x21c   :  { %v609_v7 = vsel %vm486_vm1, %v582_v55, 0.0  ;;  %v585_v30 = vmul.f32 %v1414_v24, %v1414_v24  ;;  %v611_v31 = vsel %vm486_vm1, %v583_v0, 0.0 }
 0x21d   :  { %v596_v4 = vadd.f32 %v595_v5, %v594_v1  ;;  %v613_v11 = vsel %vm486_vm1, %v584_v28, 0.0 }
 0x21e   :  { %v615_v36 = vsel %vm486_vm1, %v585_v30, 0.0 }
 0x21f   :  { %v598_v9 = vadd.f32 %v597_v8, %v596_v4  ;;  %v637_v4 = vld [vmem:[%s1533_s2] sm:$0x1] }
 0x221   :  { %v600_v14 = vadd.f32 %v599_v13, %v598_v9  ;;  %v1006_v13 = vld [vmem:[%s1534_s3] ss:$0 sm:$0xff] }
 0x223   :  { %v602_v17 = vadd.f32 %v601_v15, %v600_v14 }
 0x225   :  { %v604_v21 = vadd.f32 %v603_v19, %v602_v17 }
 0x227   :  { %v606_v23 = vadd.f32 %v605_v57, %v604_v21  ;;  %v664_v21 = vld [vmem:[%s1534_s3] sm:$0x1] }
 0x229   :  { %v608_v27 = vadd.f32 %v607_v25, %v606_v23 }
 0x22b   :  { %v610_v29 = vadd.f32 %v609_v7, %v608_v27 }
 0x22d   :  { %v612_v34 = vadd.f32 %v611_v31, %v610_v29 }
 0x22f   :  { %v614_v35 = vadd.f32 %v613_v11, %v612_v34 }
 0x231   :  { %v616_v38 = vadd.f32 %v615_v36, %v614_v35 }
 0x233   :  { %v617_v39 = vrot.slane %v616_v38, 4 }
 0x235   :  { %v618_v47 = vadd.f32 %v617_v39, %v616_v38 }
 0x237   :  { %v619_v48 = vrot.slane %v618_v47, 2 }
 0x239   :  { %v620_v32 = vadd.f32 %v619_v48, %v618_v47 }
 0x23b   :  { %v621_v2 = vrot.slane %v620_v32, 1 }
 0x23d   :  { %v622_v6 = vadd.f32 %v621_v2, %v620_v32 }
 0x23f   :  { %632 = vrot.lane.b32.xlu2 %v622_v6, %s1009_s0  ;;  %628 = vrot.lane.b32.xlu1 %v622_v6, %s1011_s1 }
 0x240   :  { %624 = vrot.lane.b32.xlu0 %v622_v6, %s1010_s14 }
 0x299   :  { %v633_v58 = vpop.permute.xlu2 %632 }
 0x2b1   :  { %v629_v12 = vpop.permute.xlu1 %628 }
 0x2b2   :  { %v625_v50 = vpop.permute.xlu0 %624 }
 0x2b3   :  { %v627_v51 = vadd.f32 %v625_v50, %v622_v6 }
 0x2b5   :  { %v631_v54 = vadd.f32 %v629_v12, %v627_v51 }
 0x2b7   :  { %v635_v59 = vadd.f32 %v633_v58, %v631_v54 }
 0x2b9   :  { %v636_v60 = vmul.f32 0.001953125, %v635_v59 }
 0x2bb   :  { %v638_v61 = vadd.f32 1e-05, %v636_v60 }
 0x2bd   :  { %1007 = vrsqrt.f32 %v638_v61  ;;  %vm645_vm5 = vweird.f32 %v638_v61 }
 0x2c3   :  { %v1008_v20 = vpop.eup %1007 }
 0x2c4   :  { %v640_v42 = vmul.f32 %v1008_v20, %v638_v61  ;;  %vm646_vm4 = vweird.f32 %v1008_v20 }
 0x2c5   :  { %vm647_vm6 = vmor %vm645_vm5, %vm646_vm4 }
 0x2c6   :  { %v641_v1 = vmul.f32 %v1008_v20, %v640_v42 }
 0x2c8   :  { %v642_v26 = vmul.f32 0.5, %v641_v1 }
 0x2ca   :  { %v643_v5 = vsub.f32 1.5, %v642_v26 }
 0x2cc   :  { %v644_v33 = vmul.f32 %v1008_v20, %v643_v5 }
 0x2ce   :  { %v648_v8 = vsel %vm647_vm6, %v1008_v20, %v644_v33 }
 0x2cf   :  { %v649_v9 = vmul.f32 %v648_v8, %v637_v4 }
 0x2d1   :  { %v651_v37 = vperm.slane %v649_v9, 0 }
 0x2d3   :  { %658 = vrot.lane.b32.xlu2 %v651_v37, %s1014_s17  ;;  %655 = vrot.lane.b32.xlu1 %v651_v37, %s1012_s15 }
 0x2d4   :  { %652 = vrot.lane.b32.xlu0 %v651_v37, %s1013_s16 }
 0x2db   :  { %670 = vrot.lane.b32.xlu1 %v1006_v13, %s1012_s15  ;;  %673 = vrot.lane.b32.xlu2 %v1006_v13, %s1014_s17 }
 0x2dc   :  { %667 = vrot.lane.b32.xlu0 %v1006_v13, %s1013_s16 }
 0x32d   :  { %v659_v40 = vpop.permute.xlu2 %658 }
 0x335   :  { %v674_v0 = vpop.permute.xlu2 %673 }
 0x345   :  { %v656_v14 = vpop.permute.xlu1 %655 }
 0x346   :  { %v653_v15 = vpop.permute.xlu0 %652 }
 0x347   :  { %v661_v17 = vsel %vm548_vm2, %v649_v9, %v653_v15 }
 0x348   :  { %v662_v56 = vsel %vm314_vm0, %v661_v17, %v656_v14 }
 0x349   :  { %v663_v19 = vsel %vm551_vm3, %v662_v56, %v659_v40 }
 0x34a   :  { %v679_v57 = vperm.slane %v663_v19, 0 }
 0x34c   :  { %v680_v7 = vmul.f32 %v679_v57, %v1332_v41  ;;  %v681_v29 = vmul.f32 %v679_v57, %v1335_v43  ;;  %v682_v30 = vmul.f32 %v679_v57, %v1338_v44  ;;  %v683_v34 = vmul.f32 %v679_v57, %v1341_v45 }
 0x34d   :  { %v671_v55 = vpop.permute.xlu1 %670  ;;  %v684_v11 = vmul.f32 %v679_v57, %v1348_v49  ;;  %v685_v39 = vmul.f32 %v679_v57, %v1353_v63  ;;  %v686_v48 = vmul.f32 %v679_v57, %v1360_v53  ;;  %v687_v41 = vmul.f32 %v679_v57, %v1366_v16 }
 0x34e   :  { %v668_v23 = vpop.permute.xlu0 %667  ;;  %v688_v43 = vmul.f32 %v679_v57, %v1372_v62  ;;  %v689_v49 = vmul.f32 %v679_v57, %v1378_v3  ;;  %v690_v51 = vmul.f32 %v679_v57, %v1384_v46  ;;  %v691_v63 = vmul.f32 %v679_v57, %v1390_v10 }
 0x34f   :  { %v676_v25 = vsel %vm548_vm2, %v664_v21, %v668_v23  ;;  %v692_v16 = vmul.f32 %v679_v57, %v1396_v52  ;;  %v693_v3 = vmul.f32 %v679_v57, %v1402_v18  ;;  %v694_v4 = vmul.f32 %v679_v57, %v1408_v22 }
 0x350   :  { %v677_v27 = vsel %vm314_vm0, %v676_v25, %v671_v55  ;;  %v695_v52 = vmul.f32 %v679_v57, %v1414_v24 }
 0x351   :  { %v678_v28 = vsel %vm551_vm3, %v677_v27, %v674_v0 }
 0x352   :  { %v696_v31 = vperm.slane %v678_v28, 0 }
 0x354   :  { %v697_v35 = vadd.f32 %v696_v31, %v680_v7  ;;  %v698_v36 = vadd.f32 %v696_v31, %v681_v29  ;;  %v699_v38 = vadd.f32 %v696_v31, %v682_v30  ;;  %v700_v47 = vadd.f32 %v696_v31, %v683_v34 }
 0x355   :  { %v701_v32 = vadd.f32 %v696_v31, %v684_v11  ;;  %v702_v2 = vadd.f32 %v696_v31, %v685_v39  ;;  %v703_v44 = vadd.f32 %v696_v31, %v686_v48  ;;  %v704_v12 = vadd.f32 %v696_v31, %v687_v41 }
 0x356   :  { %v713_v6 = vmax.f32 %v697_v35, 0.0  ;;  %v714_v50 = vmax.f32 %v698_v36, 0.0  ;;  %v715_v45 = vmax.f32 %v699_v38, 0.0  ;;  %v716_v54 = vmax.f32 %v700_v47, 0.0 }
 0x357   :  { %v705_v53 = vadd.f32 %v696_v31, %v688_v43  ;;  %v717_v58 = vmax.f32 %v701_v32, 0.0  ;;  %v706_v59 = vadd.f32 %v696_v31, %v689_v49  ;;  %v707_v62 = vadd.f32 %v696_v31, %v690_v51 }
 0x358   :  { %v718_v60 = vmax.f32 %v702_v2, 0.0  ;;  %v719_v61 = vmax.f32 %v703_v44, 0.0  ;;  %v729_v20 = vpack.c.bf16 %v713_v6, %v713_v6  ;;  %v730_v42 = vpack.c.bf16 %v714_v50, %v714_v50 }
 0x359   :  { %v731_v1 = vpack.c.bf16 %v715_v45, %v715_v45  ;;  %v708_v26 = vadd.f32 %v696_v31, %v691_v63  ;;  %v720_v46 = vmax.f32 %v704_v12, 0.0  ;;  %v732_v5 = vpack.c.bf16 %v716_v54, %v716_v54 }
 0x35a   :  { %v709_v33 = vadd.f32 %v696_v31, %v692_v16  ;;  %v721_v10 = vmax.f32 %v705_v53, 0.0  ;;  %v733_v8 = vpack.c.bf16 %v717_v58, %v717_v58  ;;  %746 = vst.msk [vmem:[%s1535_s4] sm:$0xf] %vm745_vm7, %v729_v20  ;;  %v710_v9 = vadd.f32 %v696_v31, %v693_v3 }
 0x35b   :  { %v722_v37 = vmax.f32 %v706_v59, 0.0  ;;  %v734_v13 = vpack.c.bf16 %v718_v60, %v718_v60  ;;  %747 = vst.msk [vmem:[%s1535_s4 + $0x4] sm:$0xf] %vm745_vm7, %v730_v42  ;;  %v711_v18 = vadd.f32 %v696_v31, %v694_v4  ;;  %v723_v22 = vmax.f32 %v707_v62, 0.0 }
 0x35c   :  { %v735_v14 = vpack.c.bf16 %v719_v61, %v719_v61  ;;  %748 = vst.msk [vmem:[%s1535_s4 + $0x8] sm:$0xf] %vm745_vm7, %v731_v1  ;;  %v712_v40 = vadd.f32 %v696_v31, %v695_v52  ;;  %v724_v15 = vmax.f32 %v708_v26, 0.0  ;;  %v736_v17 = vpack.c.bf16 %v720_v46, %v720_v46 }
 0x35d   :  { %749 = vst.msk [vmem:[%s1535_s4 + $0xc] sm:$0xf] %vm745_vm7, %v732_v5  ;;  %v725_v24 = vmax.f32 %v709_v33, 0.0  ;;  %v737_v56 = vpack.c.bf16 %v721_v10, %v721_v10  ;;  %v726_v19 = vmax.f32 %v710_v9, 0.0  ;;  %v738_v21 = vpack.c.bf16 %v722_v37, %v722_v37 }
 0x35e   :  { %750 = vst.msk [vmem:[%s1535_s4 + $0x10] sm:$0xf] %vm745_vm7, %v733_v8  ;;  %v727_v55 = vmax.f32 %v711_v18, 0.0  ;;  %v739_v57 = vpack.c.bf16 %v723_v22, %v723_v22  ;;  %v728_v23 = vmax.f32 %v712_v40, 0.0  ;;  %v740_v0 = vpack.c.bf16 %v724_v15, %v724_v15 }
 0x35f   :  { %751 = vst.msk [vmem:[%s1535_s4 + $0x14] sm:$0xf] %vm745_vm7, %v734_v13  ;;  %v741_v25 = vpack.c.bf16 %v725_v24, %v725_v24  ;;  %v742_v27 = vpack.c.bf16 %v726_v19, %v726_v19 }
 0x360   :  { %752 = vst.msk [vmem:[%s1535_s4 + $0x18] sm:$0xf] %vm745_vm7, %v735_v14  ;;  %v743_v28 = vpack.c.bf16 %v727_v55, %v727_v55  ;;  %v744_v7 = vpack.c.bf16 %v728_v23, %v728_v23 }
 0x361   :  { %753 = vst.msk [vmem:[%s1535_s4 + $0x1c] sm:$0xf] %vm745_vm7, %v736_v17 }
 0x362   :  { %754 = vst.msk [vmem:[%s1535_s4 + $0x20] sm:$0xf] %vm745_vm7, %v737_v56 }
 0x363   :  { %755 = vst.msk [vmem:[%s1535_s4 + $0x24] sm:$0xf] %vm745_vm7, %v738_v21 }
 0x364   :  { %756 = vst.msk [vmem:[%s1535_s4 + $0x28] sm:$0xf] %vm745_vm7, %v739_v57 }
 0x365   :  { %757 = vst.msk [vmem:[%s1535_s4 + $0x2c] sm:$0xf] %vm745_vm7, %v740_v0 }
 0x366   :  { %758 = vst.msk [vmem:[%s1535_s4 + $0x30] sm:$0xf] %vm745_vm7, %v741_v25 }
 0x367   :  { %759 = vst.msk [vmem:[%s1535_s4 + $0x34] sm:$0xf] %vm745_vm7, %v742_v27 }
 0x368   :  { %760 = vst.msk [vmem:[%s1535_s4 + $0x38] sm:$0xf] %vm745_vm7, %v743_v28 }
 0x369   :  { %761 = vst.msk [vmem:[%s1535_s4 + $0x3c] sm:$0xf] %vm745_vm7, %v744_v7 }

// kernel: generator_forward.8
= control target key start
LH: loop header
LB: loop body
LE: loop exit
PB: predicated region body
PF: predicated region fallthrough
CT: control target
= control target key end

     0   :  { %vm442_vm0 = vcmask 130048   ;;  %vm877_vm1 = vcmask 261120   ;;  %s2101_s20 = smov 120   ;;  %s2102_s21 = smov 112   ;;  %vm1035_vm2 = vcmask 64512   ;;  %vm1038_vm3 = vcmask 195584   ;;  %s3837_s1 = inlined_call_operand.vmem [shape: bf16[144,32], index: 1, kind: input, shape index: {}]   ;;  %s3838_s0 = inlined_call_operand.vmem [shape: bf16[512,144], index: 0, kind: input, shape index: {}]   ;;  %s3839_s2 = inlined_call_operand.vmem [shape: f32[1,8], index: 2, kind: input, shape index: {}]   ;;  %s3840_s3 = inlined_call_operand.vmem [shape: f32[1,8], index: 3, kind: input, shape index: {}]   ;;  %s3841_s4 = inlined_call_operand.vmem [shape: bf16[512,32], index: 4, kind: output, shape index: {}]  }
   0x1   :  { %v2080_v0 = vld [vmem:[%s3837_s1 + $0x38] sm:$0xff]  ;;  %v2081_v1 = vld [vmem:[%s3837_s1 + $0x40] sm:$0xff]  ;;  %v1689_v3 = vld [vmem:[%s3838_s0 + $0x8] sm:$0xf0]  ;;  %s2103_s22 = smov 16   ;;  %s2105_s23 = smov 24  }
   0x2   :  { %v2009_v2 = vld [vmem:[%s3838_s0 + $0x4] sm:$0xf]  ;;  %539 = vmatpush.bf16.msra.mxu0 %v2080_v0  ;;  %715 = vmatpush.bf16.msra.mxu1 %v2081_v1  ;;  %v2079_v5 = vld [vmem:[%s3837_s1 + $0x30] sm:$0xff]  ;;  %v2078_v6 = vld [vmem:[%s3837_s1 + $0x28] sm:$0xff]  ;;  %vm1616_vm7 = vcmask 257024  }
   0x3   :  { %v1692_v4 = vor.u32 %v2009_v2, %v1689_v3  ;;  %2082 = vmatpush.bf16.msra.mxu2 %v2080_v0  ;;  %2090 = vmatpush.bf16.msra.mxu3 %v2081_v1  ;;  %v2077_v7 = vld [vmem:[%s3837_s1 + $0x20] sm:$0xff]  ;;  %v2076_v8 = vld [vmem:[%s3837_s1 + $0x18] sm:$0xff]  ;;  %v2011_v9 = vld [vmem:[%s3838_s0 + $0x14] sm:$0xf] }
   0x4   :  { %v1697_v10 = vld [vmem:[%s3838_s0 + $0x18] sm:$0xf0]  ;;  %v2075_v12 = vld [vmem:[%s3837_s1 + $0x10] sm:$0xff]  ;;  %v2074_v13 = vld [vmem:[%s3837_s1 + $0x8] sm:$0xff] }
   0x5   :  { %1977 = vmatmul.msk.bf16.vlgmr.msra.gmra.mxu1 %vm442_vm0, %v1692_v4  ;;  %v1700_v11 = vor.u32 %v2011_v9, %v1697_v10  ;;  %v2073_v14 = vld [vmem:[%s3837_s1] sm:$0xff]  ;;  %v2010_v16 = vld [vmem:[%s3838_s0 + $0x4] sm:$0xf0]  ;;  %v1705_v19 = vld [vmem:[%s3838_s0 + $0x28] sm:$0xf0]  ;;  %s2104_s1 = smov 8  }
   0x6   :  { %540 = vmatpush.bf16.msra.mxu0 %v2079_v5  ;;  %v1687_v15 = vld [vmem:[%s3838_s0] sm:$0xf]  ;;  %v2013_v18 = vld [vmem:[%s3838_s0 + $0x24] sm:$0xf]  ;;  %v1695_v21 = vld [vmem:[%s3838_s0 + $0x10] sm:$0xf] }
   0x7   :  { %2083 = vmatpush.bf16.msra.mxu2 %v2079_v5  ;;  %v1688_v17 = vor.u32 %v2010_v16, %v1687_v15  ;;  %v1708_v20 = vor.u32 %v2013_v18, %v1705_v19  ;;  %v2012_v22 = vld [vmem:[%s3838_s0 + $0x14] sm:$0xf0]  ;;  %v2015_v24 = vld [vmem:[%s3838_s0 + $0x34] sm:$0xf]  ;;  %v1713_v25 = vld [vmem:[%s3838_s0 + $0x38] sm:$0xf0] }
   0x8   :  { %v1696_v23 = vor.u32 %v2012_v22, %v1695_v21  ;;  %v1815_v26 = vld [vmem:[%s3838_s0 + $0x100] sm:$0xf]  ;;  %v2042_v27 = vld [vmem:[%s3838_s0 + $0x104] sm:$0xf0]  ;;  %v1716_v28 = vor.u32 %v2015_v24, %v1713_v25  ;;  %v2017_v33 = vld [vmem:[%s3838_s0 + $0x44] sm:$0xf] }
   0x9   :  { %v1816_v29 = vor.u32 %v2042_v27, %v1815_v26  ;;  %v1703_v30 = vld [vmem:[%s3838_s0 + $0x20] sm:$0xf]  ;;  %v2014_v31 = vld [vmem:[%s3838_s0 + $0x24] sm:$0xf0]  ;;  %v1721_v34 = vld [vmem:[%s3838_s0 + $0x48] sm:$0xf0] }
   0xa   :  { %541 = vmatpush.bf16.msra.mxu0 %v2078_v6  ;;  %v1704_v32 = vor.u32 %v2014_v31, %v1703_v30  ;;  %v1823_v35 = vld [vmem:[%s3838_s0 + $0x110] sm:$0xf]  ;;  %v2044_v36 = vld [vmem:[%s3838_s0 + $0x114] sm:$0xf0]  ;;  %v2043_v37 = vld [vmem:[%s3838_s0 + $0x114] sm:$0xf]  ;;  %v1724_v38 = vor.u32 %v2017_v33, %v1721_v34 }
   0xb   :  { %2084 = vmatpush.bf16.msra.mxu2 %v2078_v6  ;;  %v1824_v39 = vor.u32 %v2044_v36, %v1823_v35  ;;  %v1825_v40 = vld [vmem:[%s3838_s0 + $0x118] sm:$0xf0]  ;;  %v1711_v42 = vld [vmem:[%s3838_s0 + $0x30] sm:$0xf]  ;;  %v2016_v43 = vld [vmem:[%s3838_s0 + $0x34] sm:$0xf0] }
   0xc   :  { %v1828_v41 = vor.u32 %v2043_v37, %v1825_v40  ;;  %v1712_v44 = vor.u32 %v2016_v43, %v1711_v42  ;;  %v2019_v45 = vld [vmem:[%s3838_s0 + $0x54] sm:$0xf]  ;;  %v1729_v46 = vld [vmem:[%s3838_s0 + $0x58] sm:$0xf0]  ;;  %v1831_v47 = vld [vmem:[%s3838_s0 + $0x120] sm:$0xf] }
   0xd   :  { %v2046_v48 = vld [vmem:[%s3838_s0 + $0x124] sm:$0xf0]  ;;  %v2045_v49 = vld [vmem:[%s3838_s0 + $0x124] sm:$0xf]  ;;  %v1732_v50 = vor.u32 %v2019_v45, %v1729_v46  ;;  %v1833_v52 = vld [vmem:[%s3838_s0 + $0x128] sm:$0xf0] }
   0xe   :  { %542 = vmatpush.bf16.msra.mxu0 %v2077_v7  ;;  %1994 = vmatmul.msk.bf16.vlgmr.msra.gmra.mxu3 %vm442_vm0, %v1828_v41  ;;  %v1832_v51 = vor.u32 %v2046_v48, %v1831_v47  ;;  %v1836_v53 = vor.u32 %v2045_v49, %v1833_v52  ;;  %v1719_v54 = vld [vmem:[%s3838_s0 + $0x40] sm:$0xf]  ;;  %v2018_v55 = vld [vmem:[%s3838_s0 + $0x44] sm:$0xf0]  ;;  %v2021_v57 = vld [vmem:[%s3838_s0 + $0x64] sm:$0xf] }
   0xf   :  { %2085 = vmatpush.bf16.msra.mxu2 %v2077_v7  ;;  %v1720_v56 = vor.u32 %v2018_v55, %v1719_v54  ;;  %v1737_v58 = vld [vmem:[%s3838_s0 + $0x68] sm:$0xf0]  ;;  %v1839_v59 = vld [vmem:[%s3838_s0 + $0x130] sm:$0xf]  ;;  %v2048_v60 = vld [vmem:[%s3838_s0 + $0x134] sm:$0xf0] }
  0x10   :  { %v2047_v61 = vld [vmem:[%s3838_s0 + $0x134] sm:$0xf]  ;;  %v1740_v62 = vor.u32 %v2021_v57, %v1737_v58  ;;  %v1840_v63 = vor.u32 %v2048_v60, %v1839_v59  ;;  %v1841_v0 = vld [vmem:[%s3838_s0 + $0x138] sm:$0xf0]  ;;  %v1727_v2 = vld [vmem:[%s3838_s0 + $0x50] sm:$0xf] }
  0x11   :  { %v1844_v1 = vor.u32 %v2047_v61, %v1841_v0  ;;  %v2020_v3 = vld [vmem:[%s3838_s0 + $0x54] sm:$0xf0]  ;;  %v2023_v5 = vld [vmem:[%s3838_s0 + $0x74] sm:$0xf]  ;;  %v1745_v6 = vld [vmem:[%s3838_s0 + $0x78] sm:$0xf0] }
  0x12   :  { %543 = vmatpush.bf16.msra.mxu0 %v2076_v8  ;;  %v1728_v4 = vor.u32 %v2020_v3, %v1727_v2  ;;  %v1847_v7 = vld [vmem:[%s3838_s0 + $0x140] sm:$0xf]  ;;  %v2049_v9 = vld [vmem:[%s3838_s0 + $0x144] sm:$0xf]  ;;  %v1748_v10 = vor.u32 %v2023_v5, %v1745_v6  ;;  %v2022_v15 = vld [vmem:[%s3838_s0 + $0x64] sm:$0xf0] }
  0x13   :  { %2086 = vmatpush.bf16.msra.mxu2 %v2076_v8  ;;  %v2050_v8 = vld [vmem:[%s3838_s0 + $0x144] sm:$0xf0]  ;;  %v1753_v18 = vld [vmem:[%s3838_s0 + $0x88] sm:$0xf0]  ;;  %v1855_v19 = vld [vmem:[%s3838_s0 + $0x150] sm:$0xf] }
  0x14   :  { %v2051_v21 = vld [vmem:[%s3838_s0 + $0x154] sm:$0xf]  ;;  %v1857_v24 = vld [vmem:[%s3838_s0 + $0x158] sm:$0xf0]  ;;  %v1863_v33 = vld [vmem:[%s3838_s0 + $0x160] sm:$0xf] }
  0x15   :  { %1978 = vmatmul.msk.bf16.gmra.mxu1 %vm442_vm0, %v1700_v11  ;;  %v1848_v11 = vor.u32 %v2050_v8, %v1847_v7  ;;  %v1860_v26 = vor.u32 %v2051_v21, %v1857_v24  ;;  %v2027_v31 = vld [vmem:[%s3838_s0 + $0x94] sm:$0xf]  ;;  %v2054_v34 = vld [vmem:[%s3838_s0 + $0x164] sm:$0xf0]  ;;  %v2053_v35 = vld [vmem:[%s3838_s0 + $0x164] sm:$0xf] }
  0x16   :  { %544 = vmatpush.bf16.msra.mxu0 %v2075_v12  ;;  %v1864_v37 = vor.u32 %v2054_v34, %v1863_v33  ;;  %v1751_v42 = vld [vmem:[%s3838_s0 + $0x80] sm:$0xf]  ;;  %v2026_v43 = vld [vmem:[%s3838_s0 + $0x84] sm:$0xf0]  ;;  %v2029_v46 = vld [vmem:[%s3838_s0 + $0xa4] sm:$0xf] }
  0x17   :  { %2087 = vmatpush.bf16.msra.mxu2 %v2075_v12  ;;  %v1849_v12 = vld [vmem:[%s3838_s0 + $0x148] sm:$0xf0]  ;;  %v1871_v49 = vld [vmem:[%s3838_s0 + $0x170] sm:$0xf]  ;;  %v1873_v54 = vld [vmem:[%s3838_s0 + $0x178] sm:$0xf0] }
  0x18   :  { %v1769_v47 = vld [vmem:[%s3838_s0 + $0xa8] sm:$0xf0]  ;;  %v1759_v60 = vld [vmem:[%s3838_s0 + $0x90] sm:$0xf]  ;;  %v2028_v61 = vld [vmem:[%s3838_s0 + $0x94] sm:$0xf0] }
  0x19   :  { %v1772_v52 = vor.u32 %v2029_v46, %v1769_v47  ;;  %v2031_v0 = vld [vmem:[%s3838_s0 + $0xb4] sm:$0xf]  ;;  %v1879_v3 = vld [vmem:[%s3838_s0 + $0x180] sm:$0xf]  ;;  %v2057_v5 = vld [vmem:[%s3838_s0 + $0x184] sm:$0xf] }
  0x1a   :  { %545 = vmatpush.bf16.msra.mxu0 %v2074_v13  ;;  %v1881_v8 = vld [vmem:[%s3838_s0 + $0x188] sm:$0xf0]  ;;  %v2060_v24 = vld [vmem:[%s3838_s0 + $0x194] sm:$0xf0]  ;;  %v1895_v47 = vld [vmem:[%s3838_s0 + $0x1a0] sm:$0xf] }
  0x1b   :  { %2088 = vmatpush.bf16.msra.mxu2 %v2074_v13  ;;  %v1852_v13 = vor.u32 %v2049_v9, %v1849_v12 }
  0x1e   :  { %546 = vmatpush.bf16.msra.mxu0 %v2073_v14  ;;  %1995 = vmatmul.msk.bf16.gmra.mxu3 %vm442_vm0, %v1836_v53 }
  0x1f   :  { %2089 = vmatpush.bf16.msra.mxu2 %v2073_v14  ;;  %v1735_v14 = vld [vmem:[%s3838_s0 + $0x60] sm:$0xf] }
  0x20   :  { %v1736_v16 = vor.u32 %v2022_v15, %v1735_v14  ;;  %v1767_v15 = vld [vmem:[%s3838_s0 + $0xa0] sm:$0xf] }
  0x21   :  { %547 = vmatmul.bf16.vlgmr.msra.gmra.mxu0 %v1688_v17  ;;  %v2025_v17 = vld [vmem:[%s3838_s0 + $0x84] sm:$0xf] }
  0x22   :  { %627 = vmatmul.bf16.vlgmr.msra.gmra.mxu2 %v1816_v29  ;;  %v1756_v22 = vor.u32 %v2025_v17, %v1753_v18  ;;  %v2024_v29 = vld [vmem:[%s3838_s0 + $0x74] sm:$0xf0] }
  0x25   :  { %1979 = vmatmul.msk.bf16.gmra.mxu1 %vm442_vm0, %v1708_v20  ;;  %v2052_v20 = vld [vmem:[%s3838_s0 + $0x154] sm:$0xf0] }
  0x2e   :  { %1996 = vmatmul.msk.bf16.gmra.mxu3 %vm442_vm0, %v1844_v1  ;;  %v1777_v1 = vld [vmem:[%s3838_s0 + $0xb8] sm:$0xf0] }
  0x2f   :  { %v1780_v6 = vor.u32 %v2031_v0, %v1777_v1 }
  0x31   :  { %552 = vmatmul.bf16.gmra.mxu0 %v1696_v23  ;;  %v1856_v23 = vor.u32 %v2052_v20, %v1855_v19  ;;  %v2033_v19 = vld [vmem:[%s3838_s0 + $0xc4] sm:$0xf]  ;;  %v1785_v20 = vld [vmem:[%s3838_s0 + $0xc8] sm:$0xf0] }
  0x32   :  { %632 = vmatmul.bf16.gmra.mxu2 %v1824_v39 }
  0x35   :  { %1980 = vmatmul.msk.bf16.gmra.mxu1 %vm442_vm0, %v1716_v28  ;;  %v1743_v28 = vld [vmem:[%s3838_s0 + $0x70] sm:$0xf] }
  0x36   :  { %v1744_v30 = vor.u32 %v2024_v29, %v1743_v28  ;;  %v1889_v28 = vld [vmem:[%s3838_s0 + $0x198] sm:$0xf0] }
  0x3e   :  { %1997 = vmatmul.msk.bf16.gmra.mxu3 %vm442_vm0, %v1852_v13 }
  0x41   :  { %557 = vmatmul.bf16.gmra.mxu0 %v1704_v32  ;;  %v1761_v32 = vld [vmem:[%s3838_s0 + $0x98] sm:$0xf0] }
  0x42   :  { %637 = vmatmul.bf16.gmra.mxu2 %v1832_v51  ;;  %v1764_v36 = vor.u32 %v2027_v31, %v1761_v32  ;;  %v2055_v51 = vld [vmem:[%s3838_s0 + $0x174] sm:$0xf] }
  0x45   :  { %1981 = vmatmul.msk.bf16.gmra.mxu1 %vm442_vm0, %v1724_v38  ;;  %v1865_v38 = vld [vmem:[%s3838_s0 + $0x168] sm:$0xf0] }
  0x46   :  { %v1868_v40 = vor.u32 %v2053_v35, %v1865_v38 }
  0x4e   :  { %1998 = vmatmul.msk.bf16.gmra.mxu3 %vm442_vm0, %v1860_v26  ;;  %v1788_v26 = vor.u32 %v2033_v19, %v1785_v20 }
  0x51   :  { %562 = vmatmul.bf16.gmra.mxu0 %v1712_v44  ;;  %v1752_v44 = vor.u32 %v2026_v43, %v1751_v42  ;;  %v1793_v42 = vld [vmem:[%s3838_s0 + $0xd8] sm:$0xf0] }
  0x52   :  { %642 = vmatmul.bf16.gmra.mxu2 %v1840_v63 }
  0x55   :  { %1982 = vmatmul.msk.bf16.gmra.mxu1 %vm442_vm0, %v1732_v50  ;;  %v2056_v50 = vld [vmem:[%s3838_s0 + $0x174] sm:$0xf0] }
  0x56   :  { %v1872_v53 = vor.u32 %v2056_v50, %v1871_v49  ;;  %v2062_v49 = vld [vmem:[%s3838_s0 + $0x1a4] sm:$0xf0]  ;;  %v2061_v50 = vld [vmem:[%s3838_s0 + $0x1a4] sm:$0xf] }
  0x5e   :  { %1999 = vmatmul.msk.bf16.gmra.mxu3 %vm442_vm0, %v1868_v40 }
  0x61   :  { %567 = vmatmul.bf16.gmra.mxu0 %v1720_v56  ;;  %v1876_v56 = vor.u32 %v2055_v51, %v1873_v54 }
  0x62   :  { %647 = vmatmul.bf16.gmra.mxu2 %v1848_v11 }
  0x65   :  { %1983 = vmatmul.msk.bf16.gmra.mxu1 %vm442_vm0, %v1740_v62  ;;  %v1760_v62 = vor.u32 %v2028_v61, %v1759_v60 }
  0x6e   :  { %2000 = vmatmul.msk.bf16.gmra.mxu3 %vm442_vm0, %v1876_v56 }
  0x71   :  { %572 = vmatmul.bf16.gmra.mxu0 %v1728_v4  ;;  %v2058_v4 = vld [vmem:[%s3838_s0 + $0x184] sm:$0xf0] }
  0x72   :  { %652 = vmatmul.bf16.gmra.mxu2 %v1856_v23  ;;  %v1880_v7 = vor.u32 %v2058_v4, %v1879_v3  ;;  %v1887_v23 = vld [vmem:[%s3838_s0 + $0x190] sm:$0xf]  ;;  %v2037_v4 = vld [vmem:[%s3838_s0 + $0xe4] sm:$0xf] }
  0x75   :  { %1984 = vmatmul.msk.bf16.gmra.mxu1 %vm442_vm0, %v1748_v10  ;;  %v1884_v10 = vor.u32 %v2057_v5, %v1881_v8  ;;  %v1801_v5 = vld [vmem:[%s3838_s0 + $0xe8] sm:$0xf0] }
  0x7e   :  { %2001 = vmatmul.msk.bf16.gmra.mxu3 %vm442_vm0, %v1884_v10  ;;  %v1903_v10 = vld [vmem:[%s3838_s0 + $0x1b0] sm:$0xf] }
  0x81   :  { %577 = vmatmul.bf16.gmra.mxu0 %v1736_v16  ;;  %v2030_v16 = vld [vmem:[%s3838_s0 + $0xa4] sm:$0xf0] }
  0x82   :  { %v717_v25 = vpop.f32.mrf.mxu1  ;;  %657 = vmatmul.bf16.gmra.mxu2 %v1864_v37  ;;  %v1768_v17 = vor.u32 %v2030_v16, %v1767_v15  ;;  %v2032_v37 = vld [vmem:[%s3838_s0 + $0xb4] sm:$0xf0]  ;;  %v1804_v15 = vor.u32 %v2037_v4, %v1801_v5 }
  0x85   :  { %1985 = vmatmul.msk.bf16.gmra.mxu1 %vm442_vm0, %v1756_v22 }
  0x8a   :  { %v719_v27 = vpop.f32.mrf.mxu1 }
  0x91   :  { %582 = vmatmul.bf16.gmra.mxu0 %v1744_v30  ;;  %v802_v34 = vpop.f32.mrf.mxu3 }
  0x92   :  { %v722_v39 = vpop.f32.mrf.mxu1  ;;  %662 = vmatmul.bf16.gmra.mxu2 %v1872_v53  ;;  %v1897_v53 = vld [vmem:[%s3838_s0 + $0x1a8] sm:$0xf0] }
  0x95   :  { %1986 = vmatmul.msk.bf16.gmra.mxu1 %vm442_vm0, %v1764_v36  ;;  %v1775_v36 = vld [vmem:[%s3838_s0 + $0xb0] sm:$0xf] }
  0x9a   :  { %v724_v41 = vpop.f32.mrf.mxu1 }
  0x9e   :  { %v548_v45 = vpop.f32.mrf.mxu0 }
  0x9f   :  { %v2372_v48 = vadd.f32 %v717_v25, %v548_v45  ;;  %v2059_v25 = vld [vmem:[%s3838_s0 + $0x194] sm:$0xf]  ;;  %v804_v45 = vpop.f32.mrf.mxu3 }
  0xa0   :  { %v1892_v30 = vor.u32 %v2059_v25, %v1889_v28  ;;  %v2036_v28 = vld [vmem:[%s3838_s0 + $0xd4] sm:$0xf0] }
  0xa1   :  { %587 = vmatmul.bf16.gmra.mxu0 %v1752_v44 }
  0xa2   :  { %v727_v55 = vpop.f32.mrf.mxu1  ;;  %667 = vmatmul.bf16.gmra.mxu2 %v1880_v7  ;;  %2002 = vmatmul.msk.bf16.gmra.mxu3 %vm442_vm0, %v1892_v30 }
  0xa5   :  { %1987 = vmatmul.msk.bf16.gmra.mxu1 %vm442_vm0, %v1772_v52  ;;  %v2418_v12 = vpop.f32.mrf.mxu2  ;;  %v1896_v52 = vor.u32 %v2062_v49, %v1895_v47  ;;  %v1913_v47 = vld [vmem:[%s3838_s0 + $0x1c8] sm:$0xf0] }
  0xa6   :  { %v550_v57 = vpop.f32.mrf.mxu0 }
  0xa7   :  { %v2388_v58 = vadd.f32 %v719_v27, %v550_v57  ;;  %v1888_v27 = vor.u32 %v2060_v24, %v1887_v23  ;;  %v807_v60 = vpop.f32.mrf.mxu3 }
  0xa9   :  { %3881 = vst [vmem:[#allocation2_spill] sm:$0xff] %v2388_v58 }
  0xaa   :  { %v729_v59 = vpop.f32.mrf.mxu1 }
  0xad   :  { %v2434_v21 = vpop.f32.mrf.mxu2 }
  0xae   :  { %v553_v63 = vpop.f32.mrf.mxu0 }
  0xaf   :  { %v2402_v2 = vadd.f32 %v722_v39, %v553_v63  ;;  %v1776_v39 = vor.u32 %v2032_v37, %v1775_v36  ;;  %v2034_v63 = vld [vmem:[%s3838_s0 + $0xc4] sm:$0xf0]  ;;  %v809_v8 = vpop.f32.mrf.mxu3 }
  0xb1   :  { %3882 = vst [vmem:[#allocation3_spill] sm:$0xff] %v2402_v2  ;;  %592 = vmatmul.bf16.gmra.mxu0 %v1760_v62  ;;  %v1783_v62 = vld [vmem:[%s3838_s0 + $0xc0] sm:$0xf] }
  0xb2   :  { %v732_v9 = vpop.f32.mrf.mxu1  ;;  %672 = vmatmul.bf16.gmra.mxu2 %v1888_v27  ;;  %v1784_v1 = vor.u32 %v2034_v63, %v1783_v62  ;;  %v1791_v27 = vld [vmem:[%s3838_s0 + $0xd0] sm:$0xf] }
  0xb3   :  { %v1792_v30 = vor.u32 %v2036_v28, %v1791_v27  ;;  %v1807_v28 = vld [vmem:[%s3838_s0 + $0xf0] sm:$0xf] }
  0xb5   :  { %1988 = vmatmul.msk.bf16.gmra.mxu1 %vm442_vm0, %v1780_v6  ;;  %v633_v32 = vpop.f32.mrf.mxu2 }
  0xb6   :  { %v555_v11 = vpop.f32.mrf.mxu0  ;;  %v2460_v38 = vadd.f32 %v802_v34, %v633_v32  ;;  %v2039_v32 = vld [vmem:[%s3838_s0 + $0xf4] sm:$0xf]  ;;  %v1809_v34 = vld [vmem:[%s3838_s0 + $0xf8] sm:$0xf0] }
  0xb7   :  { %v2420_v13 = vadd.f32 %v724_v41, %v555_v11  ;;  %v2035_v41 = vld [vmem:[%s3838_s0 + $0xd4] sm:$0xf]  ;;  %v2064_v11 = vld [vmem:[%s3838_s0 + $0x1b4] sm:$0xf0]  ;;  %v812_v25 = vpop.f32.mrf.mxu3 }
  0xb8   :  { %v1796_v51 = vor.u32 %v2035_v41, %v1793_v42  ;;  %v1904_v16 = vor.u32 %v2064_v11, %v1903_v10  ;;  %v2066_v41 = vld [vmem:[%s3838_s0 + $0x1c4] sm:$0xf0]  ;;  %v2065_v42 = vld [vmem:[%s3838_s0 + $0x1c4] sm:$0xf]  ;;  %v2068_v10 = vld [vmem:[%s3838_s0 + $0x1d4] sm:$0xf0] }
  0xb9   :  { %3883 = vst [vmem:[#allocation4_spill] sm:$0xff] %v2420_v13  ;;  %v2067_v11 = vld [vmem:[%s3838_s0 + $0x1d4] sm:$0xf] }
  0xba   :  { %v734_v14 = vpop.f32.mrf.mxu1 }
  0xbd   :  { %v635_v43 = vpop.f32.mrf.mxu2 }
  0xbe   :  { %v558_v18 = vpop.f32.mrf.mxu0  ;;  %v2470_v46 = vadd.f32 %v804_v45, %v635_v43  ;;  %v1812_v43 = vor.u32 %v2039_v32, %v1809_v34 }
  0xbf   :  { %v2436_v22 = vadd.f32 %v727_v55, %v558_v18  ;;  %v1900_v55 = vor.u32 %v2061_v50, %v1897_v53  ;;  %v814_v37 = vpop.f32.mrf.mxu3  ;;  %v1916_v50 = vor.u32 %v2065_v42, %v1913_v47  ;;  %v2070_v42 = vld [vmem:[%s3838_s0 + $0x1e4] sm:$0xf0]  ;;  %v1929_v47 = vld [vmem:[%s3838_s0 + $0x1e8] sm:$0xf0] }
  0xc1   :  { %597 = vmatmul.bf16.gmra.mxu0 %v1768_v17  ;;  %2003 = vmatmul.msk.bf16.gmra.mxu3 %vm442_vm0, %v1900_v55  ;;  %v1905_v17 = vld [vmem:[%s3838_s0 + $0x1b8] sm:$0xf0] }
  0xc2   :  { %v737_v29 = vpop.f32.mrf.mxu1  ;;  %677 = vmatmul.bf16.gmra.mxu2 %v1896_v52 }
  0xc5   :  { %1989 = vmatmul.msk.bf16.gmra.mxu1 %vm442_vm0, %v1788_v26  ;;  %v638_v57 = vpop.f32.mrf.mxu2 }
  0xc6   :  { %v560_v31 = vpop.f32.mrf.mxu0  ;;  %v2494_v0 = vadd.f32 %v807_v60, %v638_v57  ;;  %v2038_v57 = vld [vmem:[%s3838_s0 + $0xe4] sm:$0xf0] }
  0xc7   :  { %v2452_v33 = vadd.f32 %v729_v59, %v560_v31 }
  0xc9   :  { %3884 = vst [vmem:[#allocation5_spill] sm:$0xff] %v2452_v33 }
  0xca   :  { %v739_v35 = vpop.f32.mrf.mxu1 }
  0xcd   :  { %v640_v6 = vpop.f32.mrf.mxu2 }
  0xce   :  { %v563_v40 = vpop.f32.mrf.mxu0 }
  0xcf   :  { %v2468_v44 = vadd.f32 %v732_v9, %v563_v40  ;;  %v2504_v9 = vadd.f32 %v809_v8, %v640_v6  ;;  %v1911_v40 = vld [vmem:[%s3838_s0 + $0x1c0] sm:$0xf]  ;;  %v1919_v8 = vld [vmem:[%s3838_s0 + $0x1d0] sm:$0xf] }
  0xd0   :  { %v1912_v45 = vor.u32 %v2066_v41, %v1911_v40  ;;  %v1927_v41 = vld [vmem:[%s3838_s0 + $0x1e0] sm:$0xf] }
  0xd1   :  { %3885 = vst [vmem:[#allocation6_spill] sm:$0xff] %v2468_v44  ;;  %602 = vmatmul.bf16.gmra.mxu0 %v1776_v39 }
  0xd2   :  { %v742_v54 = vpop.f32.mrf.mxu1  ;;  %682 = vmatmul.bf16.gmra.mxu2 %v1904_v16  ;;  %v1921_v16 = vld [vmem:[%s3838_s0 + $0x1d8] sm:$0xf0] }
  0xd5   :  { %1990 = vmatmul.msk.bf16.gmra.mxu1 %vm442_vm0, %v1796_v51  ;;  %v643_v23 = vpop.f32.mrf.mxu2 }
  0xd6   :  { %v565_v56 = vpop.f32.mrf.mxu0 }
  0xd7   :  { %v2486_v59 = vadd.f32 %v734_v14, %v565_v56  ;;  %v2063_v14 = vld [vmem:[%s3838_s0 + $0x1b4] sm:$0xf]  ;;  %v1799_v56 = vld [vmem:[%s3838_s0 + $0xe0] sm:$0xf] }
  0xd8   :  { %v1908_v19 = vor.u32 %v2063_v14, %v1905_v17  ;;  %v1800_v62 = vor.u32 %v2038_v57, %v1799_v56 }
  0xda   :  { %v744_v61 = vpop.f32.mrf.mxu1  ;;  %2004 = vmatmul.msk.bf16.gmra.mxu3 %vm442_vm0, %v1908_v19 }
  0xde   :  { %v568_v3 = vpop.f32.mrf.mxu0 }
  0xdf   :  { %v2502_v7 = vadd.f32 %v737_v29, %v568_v3  ;;  %v2528_v29 = vadd.f32 %v812_v25, %v643_v23 }
  0xe1   :  { %3886 = vst [vmem:[#allocation7_spill] sm:$0xff] %v2502_v7  ;;  %607 = vmatmul.bf16.gmra.mxu0 %v1784_v1  ;;  %v2041_v1 = vld [vmem:[%s3838_s0 + $0x104] sm:$0xf] }
  0xe2   :  { %v747_v18 = vpop.f32.mrf.mxu1  ;;  %3888 = vst [vmem:[#allocation9_spill] sm:$0xff] %v2528_v29  ;;  %687 = vmatmul.bf16.gmra.mxu2 %v1912_v45  ;;  %v1928_v45 = vor.u32 %v2070_v42, %v1927_v41 }
  0xe5   :  { %1991 = vmatmul.msk.bf16.gmra.mxu1 %vm442_vm0, %v1804_v15  ;;  %v1920_v15 = vor.u32 %v2068_v10, %v1919_v8  ;;  %v1935_v8 = vld [vmem:[%s3838_s0 + $0x1f0] sm:$0xf]  ;;  %v2071_v10 = vld [vmem:[%s3838_s0 + $0x1f4] sm:$0xf] }
  0xe6   :  { %v570_v20 = vpop.f32.mrf.mxu0 }
  0xe7   :  { %v2520_v24 = vadd.f32 %v739_v35, %v570_v20  ;;  %v645_v35 = vpop.f32.mrf.mxu2 }
  0xe8   :  { %v2538_v39 = vadd.f32 %v814_v37, %v645_v35 }
  0xe9   :  { %3887 = vst [vmem:[#allocation8_spill] sm:$0xff] %v2520_v24 }
  0xea   :  { %v749_v26 = vpop.f32.mrf.mxu1  ;;  %3890 = vst [vmem:[#allocation11_spill] sm:$0xff] %v2538_v39  ;;  %2005 = vmatmul.msk.bf16.gmra.mxu3 %vm442_vm0, %v1916_v50 }
  0xee   :  { %v573_v31 = vpop.f32.mrf.mxu0 }
  0xef   :  { %v2536_v36 = vadd.f32 %v742_v54, %v573_v31  ;;  %v648_v52 = vpop.f32.mrf.mxu2  ;;  %v817_v54 = vpop.f32.mrf.mxu3 }
  0xf0   :  { %v2562_v60 = vadd.f32 %v817_v54, %v648_v52 }
  0xf1   :  { %3889 = vst [vmem:[#allocation10_spill] sm:$0xff] %v2536_v36  ;;  %612 = vmatmul.bf16.gmra.mxu0 %v1792_v30  ;;  %v2040_v30 = vld [vmem:[%s3838_s0 + $0xf4] sm:$0xf0] }
  0xf2   :  { %v752_v49 = vpop.f32.mrf.mxu1  ;;  %692 = vmatmul.bf16.gmra.mxu2 %v1920_v15  ;;  %v1808_v32 = vor.u32 %v2040_v30, %v1807_v28 }
  0xf5   :  { %1992 = vmatmul.msk.bf16.gmra.mxu1 %vm442_vm0, %v1812_v43  ;;  %v2069_v43 = vld [vmem:[%s3838_s0 + $0x1e4] sm:$0xf] }
  0xf6   :  { %v575_v51 = vpop.f32.mrf.mxu0  ;;  %v1932_v50 = vor.u32 %v2069_v43, %v1929_v47 }
  0xf7   :  { %v2554_v53 = vadd.f32 %v744_v61, %v575_v51  ;;  %v1817_v61 = vld [vmem:[%s3838_s0 + $0x108] sm:$0xf0]  ;;  %v650_v3 = vpop.f32.mrf.mxu2  ;;  %v819_v5 = vpop.f32.mrf.mxu3 }
  0xf8   :  { %v2572_v6 = vadd.f32 %v819_v5, %v650_v3  ;;  %v1820_v14 = vor.u32 %v2041_v1, %v1817_v61 }
  0xf9   :  { %3891 = vst [vmem:[#allocation12_spill] sm:$0xff] %v2554_v53 }
  0xfa   :  { %v754_v55 = vpop.f32.mrf.mxu1 }
  0xfe   :  { %v578_v63 = vpop.f32.mrf.mxu0 }
  0xff   :  { %v2570_v4 = vadd.f32 %v747_v18, %v578_v63  ;;  %v1924_v18 = vor.u32 %v2067_v11, %v1921_v16  ;;  %v653_v20 = vpop.f32.mrf.mxu2  ;;  %v822_v25 = vpop.f32.mrf.mxu3 }
 0x100   :  { %v2596_v31 = vadd.f32 %v822_v25, %v653_v20 }
 0x101   :  { %617 = vmatmul.bf16.gmra.mxu0 %v1800_v62  ;;  %2006 = vmatmul.msk.bf16.gmra.mxu3 %vm442_vm0, %v1924_v18 }
 0x102   :  { %v757_v17 = vpop.f32.mrf.mxu1  ;;  %697 = vmatmul.bf16.gmra.mxu2 %v1928_v45 }
 0x105   :  { %1993 = vmatmul.msk.bf16.gmra.mxu1 %vm442_vm0, %v1820_v14  ;;  %v1937_v14 = vld [vmem:[%s3838_s0 + $0x1f8] sm:$0xf0] }
 0x106   :  { %v580_v19 = vpop.f32.mrf.mxu0  ;;  %v1940_v16 = vor.u32 %v2071_v10, %v1937_v14 }
 0x107   :  { %v2588_v23 = vadd.f32 %v749_v26, %v580_v19  ;;  %v655_v35 = vpop.f32.mrf.mxu2  ;;  %v824_v40 = vpop.f32.mrf.mxu3 }
 0x108   :  { %v2600_v26 = vadd.f32 %v824_v40, %v655_v35 }
 0x10a   :  { %v759_v27 = vpop.f32.mrf.mxu1  ;;  %3893 = vst [vmem:[#allocation14_spill] sm:$0xff] %v2600_v26 }
 0x10e   :  { %v583_v34 = vpop.f32.mrf.mxu0 }
 0x10f   :  { %v2598_v37 = vadd.f32 %v752_v49, %v583_v34  ;;  %v658_v52 = vpop.f32.mrf.mxu2  ;;  %v827_v56 = vpop.f32.mrf.mxu3 }
 0x110   :  { %v2617_v62 = vadd.f32 %v827_v56, %v658_v52 }
 0x111   :  { %3892 = vst [vmem:[#allocation13_spill] sm:$0xff] %v2598_v37  ;;  %622 = vmatmul.bf16.gmra.mxu0 %v1808_v32  ;;  %2007 = vmatmul.msk.bf16.gmra.mxu3 %vm442_vm0, %v1932_v50 }
 0x112   :  { %v762_v49 = vpop.f32.mrf.mxu1  ;;  %3895 = vst [vmem:[#allocation16_spill] sm:$0xff] %v2617_v62 }
 0x116   :  { %v585_v51 = vpop.f32.mrf.mxu0 }
 0x117   :  { %v2615_v54 = vadd.f32 %v754_v55, %v585_v51  ;;  %v660_v1 = vpop.f32.mrf.mxu2  ;;  %v829_v3 = vpop.f32.mrf.mxu3  ;;  %v2072_v55 = vld [vmem:[%s3838_s0 + $0x1f4] sm:$0xf0]  ;;  %s2100_s0 = smov 104  }
 0x118   :  { %v2621_v5 = vadd.f32 %v829_v3, %v660_v1  ;;  %v1936_v11 = vor.u32 %v2072_v55, %v1935_v8 }
 0x119   :  { %3894 = vst [vmem:[#allocation15_spill] sm:$0xff] %v2615_v54 }
 0x11a   :  { %v764_v57 = vpop.f32.mrf.mxu1  ;;  %702 = vmatmul.bf16.gmra.mxu2 %v1936_v11 }
 0x11e   :  { %v588_v63 = vpop.f32.mrf.mxu0 }
 0x11f   :  { %v2619_v61 = vadd.f32 %v757_v17, %v588_v63  ;;  %v663_v18 = vpop.f32.mrf.mxu2  ;;  %v832_v20 = vpop.f32.mrf.mxu3 }
 0x120   :  { %v2640_v28 = vadd.f32 %v832_v20, %v663_v18 }
 0x121   :  { %2008 = vmatmul.msk.bf16.gmra.mxu3 %vm442_vm0, %v1940_v16 }
 0x122   :  { %v767_v15 = vpop.f32.mrf.mxu1 }
 0x126   :  { %v590_v17 = vpop.f32.mrf.mxu0 }
 0x127   :  { %v2636_v19 = vadd.f32 %v759_v27, %v590_v17  ;;  %v665_v32 = vpop.f32.mrf.mxu2  ;;  %v834_v35 = vpop.f32.mrf.mxu3 }
 0x128   :  { %v2644_v40 = vadd.f32 %v834_v35, %v665_v32 }
 0x12a   :  { %v2638_v25 = vpop.f32.mrf.mxu1 }
 0x12e   :  { %v593_v30 = vpop.f32.mrf.mxu0 }
 0x12f   :  { %v2642_v34 = vadd.f32 %v762_v49, %v593_v30  ;;  %v668_v43 = vpop.f32.mrf.mxu2  ;;  %v837_v27 = vpop.f32.mrf.mxu3 }
 0x130   :  { %v2652_v50 = vadd.f32 %v837_v27, %v668_v43  ;;  %v878_v43 = vsel %vm877_vm1, %v2372_v48, 0.0  ;;  %v881_v27 = vsel %vm877_vm1, %v2402_v2, 0.0 }
 0x132   :  { %v2646_v41 = vpop.f32.mrf.mxu1 }
 0x136   :  { %v595_v42 = vpop.f32.mrf.mxu0 }
 0x137   :  { %v2648_v45 = vadd.f32 %v764_v57, %v595_v42  ;;  %v670_v52 = vpop.f32.mrf.mxu2  ;;  %v839_v49 = vpop.f32.mrf.mxu3  ;;  %v879_v42 = vsel %vm877_vm1, %v2388_v58, 0.0  ;;  %v889_v58 = vsel %vm877_vm1, %v2468_v44, 0.0 }
 0x138   :  { %v2656_v63 = vadd.f32 %v839_v49, %v670_v52  ;;  %v883_v49 = vsel %vm877_vm1, %v2420_v13, 0.0 }
 0x139   :  { %3896 = vst [vmem:[#allocation17_spill] sm:$0xff] %v2648_v45 }
 0x13a   :  { %v2650_v47 = vpop.f32.mrf.mxu1 }
 0x13e   :  { %v598_v51 = vpop.f32.mrf.mxu0 }
 0x13f   :  { %v2654_v56 = vadd.f32 %v767_v15, %v598_v51  ;;  %v673_v8 = vpop.f32.mrf.mxu2  ;;  %v842_v55 = vpop.f32.mrf.mxu3  ;;  %v880_v51 = vadd.f32 %v879_v42, %v878_v43  ;;  %v891_v43 = vsel %vm877_vm1, %v2486_v59, 0.0 }
 0x140   :  { %v2664_v10 = vadd.f32 %v842_v55, %v673_v8  ;;  %v885_v55 = vsel %vm877_vm1, %v2436_v22, 0.0 }
 0x141   :  { %v882_v8 = vadd.f32 %v881_v27, %v880_v51  ;;  %v893_v27 = vsel %vm877_vm1, %v2502_v7, 0.0 }
 0x142   :  { %v2658_v1 = vpop.f32.mrf.mxu1 }
 0x146   :  { %v2660_v3 = vpop.f32.mrf.mxu0 }
 0x147   :  { %v675_v14 = vpop.f32.mrf.mxu2  ;;  %v844_v16 = vpop.f32.mrf.mxu3 }
 0x148   :  { %v2668_v17 = vadd.f32 %v844_v16, %v675_v14  ;;  %v884_v14 = vadd.f32 %v883_v49, %v882_v8  ;;  %v887_v16 = vsel %vm877_vm1, %v2452_v33, 0.0  ;;  %v895_v49 = vsel %vm877_vm1, %v2520_v24, 0.0 }
 0x14a   :  { %v2662_v57 = vpop.f32.mrf.mxu1 }
 0x14e   :  { %v2666_v11 = vpop.f32.mrf.mxu0 }
 0x14f   :  { %v678_v20 = vpop.f32.mrf.mxu2  ;;  %v847_v30 = vpop.f32.mrf.mxu3 }
 0x150   :  { %v2676_v35 = vadd.f32 %v847_v30, %v678_v20  ;;  %v886_v20 = vadd.f32 %v885_v55, %v884_v14  ;;  %v897_v55 = vsel %vm877_vm1, %v2536_v36, 0.0  ;;  %v905_v36 = vsel %vm877_vm1, %v2598_v37, 0.0 }
 0x152   :  { %v2670_v15 = vpop.f32.mrf.mxu1  ;;  %v888_v2 = vadd.f32 %v887_v16, %v886_v20 }
 0x154   :  { %v890_v13 = vadd.f32 %v889_v58, %v888_v2  ;;  %v899_v58 = vsel %vm877_vm1, %v2554_v53, 0.0 }
 0x156   :  { %v2672_v18 = vpop.f32.mrf.mxu0  ;;  %v892_v51 = vadd.f32 %v891_v43, %v890_v13  ;;  %v901_v13 = vsel %vm877_vm1, %v2570_v4, 0.0 }
 0x157   :  { %v2702_v14 = vpop.f32.mrf.mxu2  ;;  %v2704_v44 = vpop.f32.mrf.mxu3 }
 0x158   :  { %v894_v8 = vadd.f32 %v893_v27, %v892_v51  ;;  %v903_v27 = vsel %vm877_vm1, %v2588_v23, 0.0 }
 0x15a   :  { %v2674_v32 = vpop.f32.mrf.mxu1  ;;  %v896_v16 = vadd.f32 %v895_v49, %v894_v8  ;;  %v907_v49 = vsel %vm877_vm1, %v2615_v54, 0.0  ;;  %v915_v54 = vsel %vm877_vm1, %v2648_v45, 0.0 }
 0x15c   :  { %v898_v2 = vadd.f32 %v897_v55, %v896_v16 }
 0x15e   :  { %v608_v52 = vpop.f32.mrf.mxu0  ;;  %v900_v43 = vadd.f32 %v899_v58, %v898_v2  ;;  %v909_v58 = vsel %vm877_vm1, %v2619_v61, 0.0 }
 0x15f   :  { %v2716_v8 = vpop.f32.mrf.mxu2  ;;  %v2718_v53 = vpop.f32.mrf.mxu3 }
 0x160   :  { %v902_v51 = vadd.f32 %v901_v13, %v900_v43  ;;  %v911_v13 = vsel %vm877_vm1, %v2636_v19, 0.0 }
 0x162   :  { %v2690_v30 = vpop.f32.mrf.mxu1  ;;  %v904_v24 = vadd.f32 %v903_v27, %v902_v51  ;;  %v913_v27 = vsel %vm877_vm1, %v2642_v34, 0.0 }
 0x164   :  { %v906_v55 = vadd.f32 %v905_v36, %v904_v24  ;;  %v2730_v24 = vadd.f32 %v2638_v25, %v2660_v3  ;;  %v2746_v25 = vadd.f32 %v2650_v47, %v2672_v18 }
 0x166   :  { %v610_v42 = vpop.f32.mrf.mxu0  ;;  %v908_v2 = vadd.f32 %v907_v49, %v906_v55  ;;  %3897 = vst [vmem:[#allocation18_spill] sm:$0xff] %v2730_v24  ;;  %v917_v49 = vsel %vm877_vm1, %v2654_v56, 0.0  ;;  %v2736_v55 = vadd.f32 %v2646_v41, %v2666_v11  ;;  %v919_v45 = vsel %vm877_vm1, %v2730_v24, 0.0 }
 0x167   :  { %v2751_v41 = vadd.f32 %v2658_v1, %v608_v52 }
 0x168   :  { %v910_v43 = vadd.f32 %v909_v58, %v908_v2  ;;  %v2738_v58 = vpop.f32.mrf.mxu2  ;;  %v2740_v2 = vpop.f32.mrf.mxu3 }
 0x169   :  { %v925_v47 = vsel %vm877_vm1, %v2751_v41, 0.0 }
 0x16a   :  { %v789_v20 = vpop.f32.mrf.mxu1  ;;  %v912_v51 = vadd.f32 %v911_v13, %v910_v43 }
 0x16c   :  { %v914_v36 = vadd.f32 %v913_v27, %v912_v51  ;;  %v921_v27 = vsel %vm877_vm1, %v2736_v55, 0.0 }
 0x16e   :  { %v613_v33 = vpop.f32.mrf.mxu0  ;;  %v916_v13 = vadd.f32 %v915_v54, %v914_v36  ;;  %v923_v54 = vsel %vm877_vm1, %v2746_v25, 0.0  ;;  %v2756_v36 = vadd.f32 %v2662_v57, %v610_v42 }
 0x16f   :  { %v2761_v18 = vadd.f32 %v2670_v15, %v613_v33 }
 0x170   :  { %v918_v3 = vadd.f32 %v917_v49, %v916_v13  ;;  %v927_v1 = vsel %vm877_vm1, %v2756_v36, 0.0  ;;  %v2768_v52 = vpop.f32.mrf.mxu2  ;;  %v2770_v13 = vpop.f32.mrf.mxu3 }
 0x171   :  { %3898 = vst [vmem:[#allocation19_spill] sm:$0xff] %v2761_v18 }
 0x172   :  { %v792_v16 = vpop.f32.mrf.mxu1  ;;  %v920_v11 = vadd.f32 %v919_v45, %v918_v3  ;;  %v929_v3 = vsel %vm877_vm1, %v2761_v18, 0.0 }
 0x174   :  { %v922_v24 = vadd.f32 %v921_v27, %v920_v11 }
 0x176   :  { %v615_v7 = vpop.f32.mrf.mxu0  ;;  %v924_v49 = vadd.f32 %v923_v54, %v922_v24 }
 0x177   :  { %v2766_v45 = vadd.f32 %v2674_v32, %v615_v7 }
 0x178   :  { %v926_v57 = vadd.f32 %v925_v47, %v924_v49 }
 0x179   :  { %v931_v24 = vsel %vm877_vm1, %v2766_v45, 0.0 }
 0x17a   :  { %v794_v43 = vpop.f32.mrf.mxu1  ;;  %v928_v33 = vadd.f32 %v927_v1, %v926_v57  ;;  %v2791_v1 = vpop.f32.mrf.mxu3 }
 0x17c   :  { %v930_v7 = vadd.f32 %v929_v3, %v928_v33 }
 0x17e   :  { %v618_v37 = vpop.f32.mrf.mxu0  ;;  %v932_v47 = vadd.f32 %v931_v24, %v930_v7 }
 0x17f   :  { %v2775_v27 = vadd.f32 %v2690_v30, %v618_v37  ;;  %v2789_v30 = vpop.f32.mrf.mxu2 }
 0x181   :  { %v933_v32 = vsel %vm877_vm1, %v2775_v27, 0.0 }
 0x182   :  { %v797_v42 = vpop.f32.mrf.mxu1  ;;  %v934_v18 = vadd.f32 %v933_v32, %v932_v47 }
 0x183   :  { %v2794_v3 = vadd.f32 %v797_v42, %v2418_v12  ;;  %v945_v12 = vsel %vm877_vm1, %v2460_v38, 0.0 }
 0x185   :  { %v941_v32 = vsel %vm877_vm1, %v2794_v3, 0.0 }
 0x186   :  { %v620_v51 = vpop.f32.mrf.mxu0 }
 0x187   :  { %v2779_v11 = vadd.f32 %v789_v20, %v620_v51  ;;  %v693_v42 = vpop.f32.mrf.mxu2 }
 0x189   :  { %v935_v49 = vsel %vm877_vm1, %v2779_v11, 0.0 }
 0x18a   :  { %v936_v20 = vadd.f32 %v935_v49, %v934_v18  ;;  %v799_v51 = vpop.f32.mrf.mxu1 }
 0x18e   :  { %v623_v15 = vpop.f32.mrf.mxu0 }
 0x18f   :  { %v2783_v54 = vadd.f32 %v792_v16, %v623_v15  ;;  %v2799_v15 = vadd.f32 %v799_v51, %v2434_v21  ;;  %v947_v21 = vsel %vm877_vm1, %v2470_v46, 0.0  ;;  %v949_v51 = vsel %vm877_vm1, %v2494_v0, 0.0 }
 0x191   :  { %v937_v37 = vsel %vm877_vm1, %v2783_v54, 0.0  ;;  %v943_v18 = vsel %vm877_vm1, %v2799_v15, 0.0 }
 0x192   :  { %v938_v33 = vadd.f32 %v937_v37, %v936_v20  ;;  %v862_v37 = vpop.f32.mrf.mxu3 }
 0x196   :  { %v625_v57 = vpop.f32.mrf.mxu0 }
 0x197   :  { %v2796_v16 = vadd.f32 %v794_v43, %v625_v57 }
 0x199   :  { %v939_v24 = vsel %vm877_vm1, %v2796_v16, 0.0 }
 0x19a   :  { %v940_v7 = vadd.f32 %v939_v24, %v938_v33  ;;  %v951_v33 = vsel %vm877_vm1, %v2504_v9, 0.0 }
 0x19c   :  { %v942_v47 = vadd.f32 %v941_v32, %v940_v7  ;;  %v953_v7 = vsel %vm877_vm1, %v2528_v29, 0.0 }
 0x19e   :  { %v944_v49 = vadd.f32 %v943_v18, %v942_v47  ;;  %v955_v47 = vsel %vm877_vm1, %v2538_v39, 0.0 }
 0x1a0   :  { %v946_v43 = vadd.f32 %v945_v12, %v944_v49  ;;  %v695_v49 = vpop.f32.mrf.mxu2  ;;  %v864_v12 = vpop.f32.mrf.mxu3 }
 0x1a2   :  { %v948_v20 = vadd.f32 %v947_v21, %v946_v43  ;;  %v957_v43 = vsel %vm877_vm1, %v2562_v60, 0.0 }
 0x1a4   :  { %v950_v57 = vadd.f32 %v949_v51, %v948_v20  ;;  %v959_v20 = vsel %vm877_vm1, %v2572_v6, 0.0 }
 0x1a6   :  { %v952_v24 = vadd.f32 %v951_v33, %v950_v57  ;;  %v961_v57 = vsel %vm877_vm1, %v2596_v31, 0.0 }
 0x1a8   :  { %v954_v32 = vadd.f32 %v953_v7, %v952_v24  ;;  %v963_v24 = vsel %vm877_vm1, %v2600_v26, 0.0  ;;  %v698_v39 = vpop.f32.mrf.mxu2  ;;  %v867_v29 = vpop.f32.mrf.mxu3 }
 0x1aa   :  { %v956_v18 = vadd.f32 %v955_v47, %v954_v32  ;;  %v965_v32 = vsel %vm877_vm1, %v2617_v62, 0.0 }
 0x1ac   :  { %v958_v21 = vadd.f32 %v957_v43, %v956_v18  ;;  %v967_v18 = vsel %vm877_vm1, %v2621_v5, 0.0 }
 0x1ae   :  { %v960_v51 = vadd.f32 %v959_v20, %v958_v21  ;;  %v969_v21 = vsel %vm877_vm1, %v2640_v28, 0.0 }
 0x1b0   :  { %v962_v33 = vadd.f32 %v961_v57, %v960_v51  ;;  %v971_v51 = vsel %vm877_vm1, %v2644_v40, 0.0  ;;  %v700_v62 = vpop.f32.mrf.mxu2  ;;  %v869_v26 = vpop.f32.mrf.mxu3 }
 0x1b2   :  { %v964_v7 = vadd.f32 %v963_v24, %v962_v33  ;;  %v973_v33 = vsel %vm877_vm1, %v2652_v50, 0.0 }
 0x1b4   :  { %v966_v47 = vadd.f32 %v965_v32, %v964_v7  ;;  %v975_v7 = vsel %vm877_vm1, %v2656_v63, 0.0 }
 0x1b6   :  { %v968_v43 = vadd.f32 %v967_v18, %v966_v47  ;;  %v977_v47 = vsel %vm877_vm1, %v2664_v10, 0.0 }
 0x1b8   :  { %v970_v20 = vadd.f32 %v969_v21, %v968_v43  ;;  %v979_v43 = vsel %vm877_vm1, %v2668_v17, 0.0  ;;  %v2845_v21 = vadd.f32 %v2704_v44, %v2702_v14  ;;  %v2863_v14 = vadd.f32 %v2770_v13, %v2768_v52 }
 0x1b9   :  { %v2877_v13 = vadd.f32 %v864_v12, %v695_v49 }
 0x1ba   :  { %v972_v57 = vadd.f32 %v971_v51, %v970_v20  ;;  %v981_v51 = vsel %vm877_vm1, %v2676_v35, 0.0 }
 0x1bc   :  { %v974_v24 = vadd.f32 %v973_v33, %v972_v57  ;;  %v2851_v57 = vadd.f32 %v2718_v53, %v2716_v8  ;;  %v872_v53 = vpop.f32.mrf.mxu3 }
 0x1be   :  { %v976_v32 = vadd.f32 %v975_v7, %v974_v24  ;;  %v983_v24 = vsel %vm877_vm1, %v2845_v21, 0.0  ;;  %v2857_v7 = vadd.f32 %v2740_v2, %v2738_v58  ;;  %v985_v44 = vsel %vm877_vm1, %v2851_v57, 0.0 }
 0x1bf   :  { %v989_v2 = vsel %vm877_vm1, %v2863_v14, 0.0 }
 0x1c0   :  { %v978_v18 = vadd.f32 %v977_v47, %v976_v32  ;;  %v987_v8 = vsel %vm877_vm1, %v2857_v7, 0.0 }
 0x1c2   :  { %v980_v20 = vadd.f32 %v979_v43, %v978_v18  ;;  %v703_v18 = vpop.f32.mrf.mxu2  ;;  %v2869_v43 = vadd.f32 %v2791_v1, %v2789_v30  ;;  %v995_v1 = vsel %vm877_vm1, %v2877_v13, 0.0 }
 0x1c3   :  { %v2889_v49 = vadd.f32 %v872_v53, %v703_v18 }
 0x1c4   :  { %v982_v33 = vadd.f32 %v981_v51, %v980_v20  ;;  %v2873_v20 = vadd.f32 %v862_v37, %v693_v42  ;;  %v991_v52 = vsel %vm877_vm1, %v2869_v43, 0.0 }
 0x1c6   :  { %v984_v32 = vadd.f32 %v983_v24, %v982_v33  ;;  %v993_v24 = vsel %vm877_vm1, %v2873_v20, 0.0 }
 0x1c8   :  { %v986_v47 = vadd.f32 %v985_v44, %v984_v32  ;;  %v2881_v32 = vadd.f32 %v867_v29, %v698_v39  ;;  %v2885_v44 = vadd.f32 %v869_v26, %v700_v62 }
 0x1ca   :  { %v988_v58 = vadd.f32 %v987_v8, %v986_v47  ;;  %v705_v37 = vpop.f32.mrf.mxu2  ;;  %v874_v47 = vpop.f32.mrf.mxu3  ;;  %v997_v8 = vsel %vm877_vm1, %v2881_v32, 0.0 }
 0x1cb   :  { %v2893_v29 = vadd.f32 %v874_v47, %v705_v37 }
 0x1cc   :  { %v990_v51 = vadd.f32 %v989_v2, %v988_v58  ;;  %v999_v58 = vsel %vm877_vm1, %v2885_v44, 0.0  ;;  %v1001_v2 = vsel %vm877_vm1, %v2889_v49, 0.0 }
 0x1cd   :  { %v1003_v62 = vsel %vm877_vm1, %v2893_v29, 0.0 }
 0x1ce   :  { %v992_v33 = vadd.f32 %v991_v52, %v990_v51 }
 0x1d0   :  { %v994_v30 = vadd.f32 %v993_v24, %v992_v33 }
 0x1d2   :  { %v996_v42 = vadd.f32 %v995_v1, %v994_v30 }
 0x1d4   :  { %v998_v12 = vadd.f32 %v997_v8, %v996_v42 }
 0x1d6   :  { %v1000_v39 = vadd.f32 %v999_v58, %v998_v12 }
 0x1d8   :  { %v1002_v26 = vadd.f32 %v1001_v2, %v1000_v39 }
 0x1da   :  { %v1004_v51 = vadd.f32 %v1003_v62, %v1002_v26 }
 0x1dc   :  { %v1005_v52 = vrot.slane %v1004_v51, 4 }
 0x1de   :  { %v1006_v33 = vadd.f32 %v1005_v52, %v1004_v51 }
 0x1e0   :  { %v1007_v24 = vrot.slane %v1006_v33, 2 }
 0x1e2   :  { %v1008_v18 = vadd.f32 %v1007_v24, %v1006_v33 }
 0x1e4   :  { %v1009_v53 = vrot.slane %v1008_v18, 1 }
 0x1e6   :  { %v1010_v30 = vadd.f32 %v1009_v53, %v1008_v18  ;;  %v3899_v18 = vld [vmem:[#allocation2_spill] sm:$0xff] }
 0x1e8   :  { %1020 = vrot.lane.b32.xlu1 %v1010_v30, %s2100_s0  ;;  %1012 = vrot.lane.b32.xlu0 %v1010_v30, %s2101_s20 }
 0x1f0   :  { %1016 = vrot.lane.b32.xlu0 %v1010_v30, %s2102_s21 }
 0x25a   :  { %v1013_v1 = vpop.permute.xlu0 %1012  ;;  %v1021_v8 = vpop.permute.xlu1 %1020 }
 0x25b   :  { %v1015_v42 = vadd.f32 %v1013_v1, %v1010_v30  ;;  %v3900_v30 = vld [vmem:[#allocation3_spill] sm:$0xff] }
 0x262   :  { %v1017_v37 = vpop.permute.xlu0 %1016 }
 0x263   :  { %v1019_v47 = vadd.f32 %v1017_v37, %v1015_v42  ;;  %v3901_v42 = vld [vmem:[#allocation4_spill] sm:$0xff] }
 0x265   :  { %v1023_v12 = vadd.f32 %v1021_v8, %v1019_v47 }
 0x267   :  { %v1024_v58 = vmul.f32 0.00048828125, %v1023_v12 }
 0x269   :  { %1029 = vrot.lane.b32.xlu2 %v1024_v58, %s2103_s22  ;;  %1026 = vrot.lane.b32.xlu1 %v1024_v58, %s2104_s1 }
 0x271   :  { %1032 = vrot.lane.b32.xlu2 %v1024_v58, %s2105_s23 }
 0x2c3   :  { %v1030_v39 = vpop.permute.xlu2 %1029 }
 0x2cb   :  { %v1033_v51 = vpop.permute.xlu2 %1032 }
 0x2db   :  { %v1027_v2 = vpop.permute.xlu1 %1026 }
 0x2dc   :  { %v1036_v26 = vsel %vm1035_vm2, %v1024_v58, %v1027_v2  ;;  %v3903_v58 = vld [vmem:[#allocation5_spill] sm:$0xff] }
 0x2dd   :  { %v1037_v62 = vsel %vm442_vm0, %v1036_v26, %v1030_v39 }
 0x2de   :  { %v1039_v52 = vsel %vm1038_vm3, %v1037_v62, %v1033_v51 }
 0x2df   :  { %v2908_v33 = vperm.slane %v1039_v52, 0  ;;  %v3905_v52 = vld [vmem:[#allocation6_spill] sm:$0xff] }
 0x2e1   :  { %v2912_v24 = vsub.f32 %v2372_v48, %v2908_v33  ;;  %v2916_v53 = vsub.f32 %v3899_v18, %v2908_v33  ;;  %v2920_v1 = vsub.f32 %v3900_v30, %v2908_v33  ;;  %v2924_v37 = vsub.f32 %v3901_v42, %v2908_v33 }
 0x2e2   :  { %v2932_v48 = vsub.f32 %v2436_v22, %v2908_v33  ;;  %v2938_v39 = vsub.f32 %v3903_v58, %v2908_v33  ;;  %v2946_v18 = vsub.f32 %v3905_v52, %v2908_v33  ;;  %v2953_v58 = vsub.f32 %v2486_v59, %v2908_v33 }
 0x2e3   :  { %v1105_v47 = vmul.f32 %v2912_v24, %v2912_v24  ;;  %v1106_v8 = vmul.f32 %v2916_v53, %v2916_v53  ;;  %v1107_v12 = vmul.f32 %v2920_v1, %v2920_v1  ;;  %v1108_v2 = vmul.f32 %v2924_v37, %v2924_v37 }
 0x2e4   :  { %3902 = vst [vmem:[#allocation2_spill] sm:$0xff] %v2932_v48  ;;  %v1109_v22 = vmul.f32 %v2932_v48, %v2932_v48  ;;  %v1111_v48 = vmul.f32 %v2946_v18, %v2946_v18 }
 0x2e5   :  { %3904 = vst [vmem:[#allocation3_spill] sm:$0xff] %v2938_v39  ;;  %v1169_v26 = vsel %vm877_vm1, %v1105_v47, 0.0  ;;  %v1170_v62 = vsel %vm877_vm1, %v1106_v8, 0.0  ;;  %v1172_v30 = vsel %vm877_vm1, %v1107_v12, 0.0  ;;  %v1110_v47 = vmul.f32 %v2938_v39, %v2938_v39 }
 0x2e6   :  { %v1171_v51 = vadd.f32 %v1170_v62, %v1169_v26  ;;  %3906 = vst [vmem:[#allocation4_spill] sm:$0xff] %v2946_v18  ;;  %v1174_v8 = vsel %vm877_vm1, %v1108_v2, 0.0  ;;  %v3908_v62 = vld [vmem:[#allocation7_spill] sm:$0xff]  ;;  %v1176_v12 = vsel %vm877_vm1, %v1109_v22, 0.0  ;;  %v1112_v39 = vmul.f32 %v2953_v58, %v2953_v58 }
 0x2e7   :  { %3907 = vst [vmem:[#allocation5_spill] sm:$0xff] %v2953_v58  ;;  %v2960_v52 = vsub.f32 %v3908_v62, %v2908_v33  ;;  %v1178_v2 = vsel %vm877_vm1, %v1110_v47, 0.0  ;;  %v1180_v22 = vsel %vm877_vm1, %v1111_v48, 0.0 }
 0x2e8   :  { %v1173_v42 = vadd.f32 %v1172_v30, %v1171_v51  ;;  %v3909_v30 = vld [vmem:[#allocation8_spill] sm:$0xff]  ;;  %v1182_v47 = vsel %vm877_vm1, %v1112_v39, 0.0 }
 0x2e9   :  { %v2967_v59 = vsub.f32 %v3909_v30, %v2908_v33  ;;  %v1113_v18 = vmul.f32 %v2960_v52, %v2960_v52 }
 0x2ea   :  { %v1175_v26 = vadd.f32 %v1174_v8, %v1173_v42  ;;  %v3910_v8 = vld [vmem:[#allocation10_spill] sm:$0xff] }
 0x2eb   :  { %v2974_v62 = vsub.f32 %v3910_v8, %v2908_v33  ;;  %v1114_v58 = vmul.f32 %v2967_v59, %v2967_v59  ;;  %v1184_v48 = vsel %vm877_vm1, %v1113_v18, 0.0 }
 0x2ec   :  { %v1177_v51 = vadd.f32 %v1176_v12, %v1175_v26  ;;  %v3912_v12 = vld [vmem:[#allocation12_spill] sm:$0xff] }
 0x2ed   :  { %3911 = vst [vmem:[#allocation6_spill] sm:$0xff] %v2974_v62  ;;  %v2981_v30 = vsub.f32 %v3912_v12, %v2908_v33  ;;  %v1115_v8 = vmul.f32 %v2974_v62, %v2974_v62  ;;  %v1186_v39 = vsel %vm877_vm1, %v1114_v58, 0.0 }
 0x2ee   :  { %v1179_v42 = vadd.f32 %v1178_v2, %v1177_v51  ;;  %v2988_v2 = vsub.f32 %v2570_v4, %v2908_v33 }
 0x2ef   :  { %3913 = vst [vmem:[#allocation7_spill] sm:$0xff] %v2981_v30  ;;  %v1116_v12 = vmul.f32 %v2981_v30, %v2981_v30  ;;  %v1188_v18 = vsel %vm877_vm1, %v1115_v8, 0.0 }
 0x2f0   :  { %v1181_v26 = vadd.f32 %v1180_v22, %v1179_v42  ;;  %v2995_v22 = vsub.f32 %v2588_v23, %v2908_v33  ;;  %v1117_v62 = vmul.f32 %v2988_v2, %v2988_v2 }
 0x2f1   :  { %v1190_v58 = vsel %vm877_vm1, %v1116_v12, 0.0 }
 0x2f2   :  { %v1183_v51 = vadd.f32 %v1182_v47, %v1181_v26  ;;  %v3914_v47 = vld [vmem:[#allocation13_spill] sm:$0xff]  ;;  %v1118_v30 = vmul.f32 %v2995_v22, %v2995_v22  ;;  %v1192_v8 = vsel %vm877_vm1, %v1117_v62, 0.0 }
 0x2f3   :  { %v3002_v4 = vsub.f32 %v3914_v47, %v2908_v33 }
 0x2f4   :  { %v1185_v42 = vadd.f32 %v1184_v48, %v1183_v51  ;;  %v3915_v48 = vld [vmem:[#allocation15_spill] sm:$0xff]  ;;  %v1194_v12 = vsel %vm877_vm1, %v1118_v30, 0.0 }
 0x2f5   :  { %v3009_v23 = vsub.f32 %v3915_v48, %v2908_v33  ;;  %v1119_v47 = vmul.f32 %v3002_v4, %v3002_v4 }
 0x2f6   :  { %v1187_v26 = vadd.f32 %v1186_v39, %v1185_v42  ;;  %v3016_v39 = vsub.f32 %v2619_v61, %v2908_v33  ;;  %v3030_v61 = vsub.f32 %v2642_v34, %v2908_v33  ;;  %v3044_v34 = vsub.f32 %v2654_v56, %v2908_v33 }
 0x2f7   :  { %3916 = vst [vmem:[#allocation8_spill] sm:$0xff] %v3009_v23  ;;  %v1120_v48 = vmul.f32 %v3009_v23, %v3009_v23  ;;  %v1196_v62 = vsel %vm877_vm1, %v1119_v47, 0.0  ;;  %v3058_v56 = vsub.f32 %v2736_v55, %v2908_v33  ;;  %v3072_v55 = vsub.f32 %v2751_v41, %v2908_v33 }
 0x2f8   :  { %v1189_v51 = vadd.f32 %v1188_v18, %v1187_v26  ;;  %v3023_v18 = vsub.f32 %v2636_v19, %v2908_v33 }
 0x2f9   :  { %v1198_v30 = vsel %vm877_vm1, %v1120_v48, 0.0  ;;  %3920 = vst [vmem:[#allocation12_spill] sm:$0xff] %v3058_v56 }
 0x2fa   :  { %v1191_v42 = vadd.f32 %v1190_v58, %v1189_v51  ;;  %3917 = vst [vmem:[#allocation10_spill] sm:$0xff] %v3023_v18  ;;  %v1121_v58 = vmul.f32 %v3016_v39, %v3016_v39  ;;  %v1122_v23 = vmul.f32 %v3023_v18, %v3023_v18 }
 0x2fc   :  { %v1193_v26 = vadd.f32 %v1192_v8, %v1191_v42  ;;  %v3918_v8 = vld [vmem:[#allocation17_spill] sm:$0xff]  ;;  %v1200_v47 = vsel %vm877_vm1, %v1121_v58, 0.0  ;;  %v1202_v48 = vsel %vm877_vm1, %v1122_v23, 0.0 }
 0x2fd   :  { %v3037_v19 = vsub.f32 %v3918_v8, %v2908_v33 }
 0x2fe   :  { %v1195_v51 = vadd.f32 %v1194_v12, %v1193_v26  ;;  %v1123_v12 = vmul.f32 %v3030_v61, %v3030_v61 }
 0x2ff   :  { %v1124_v18 = vmul.f32 %v3037_v19, %v3037_v19 }
 0x300   :  { %v1197_v42 = vadd.f32 %v1196_v62, %v1195_v51  ;;  %v3919_v62 = vld [vmem:[#allocation18_spill] sm:$0xff]  ;;  %v1204_v58 = vsel %vm877_vm1, %v1123_v12, 0.0 }
 0x301   :  { %v3051_v8 = vsub.f32 %v3919_v62, %v2908_v33  ;;  %v1206_v23 = vsel %vm877_vm1, %v1124_v18, 0.0 }
 0x302   :  { %v1199_v26 = vadd.f32 %v1198_v30, %v1197_v42  ;;  %v1125_v30 = vmul.f32 %v3044_v34, %v3044_v34 }
 0x303   :  { %v1126_v62 = vmul.f32 %v3051_v8, %v3051_v8 }
 0x304   :  { %v1201_v51 = vadd.f32 %v1200_v47, %v1199_v26  ;;  %v3065_v47 = vsub.f32 %v2746_v25, %v2908_v33  ;;  %v1208_v12 = vsel %vm877_vm1, %v1125_v30, 0.0  ;;  %v3079_v25 = vsub.f32 %v2756_v36, %v2908_v33 }
 0x305   :  { %v1210_v18 = vsel %vm877_vm1, %v1126_v62, 0.0  ;;  %v3093_v36 = vsub.f32 %v2766_v45, %v2908_v33  ;;  %v3107_v45 = vsub.f32 %v2779_v11, %v2908_v33  ;;  %v3121_v11 = vsub.f32 %v2796_v16, %v2908_v33 }
 0x306   :  { %v1203_v42 = vadd.f32 %v1202_v48, %v1201_v51  ;;  %v1127_v48 = vmul.f32 %v3058_v56, %v3058_v56  ;;  %v1129_v56 = vmul.f32 %v3072_v55, %v3072_v55  ;;  %v3135_v16 = vsub.f32 %v2799_v15, %v2908_v33 }
 0x307   :  { %v3149_v15 = vsub.f32 %v2470_v46, %v2908_v33  ;;  %v3163_v46 = vsub.f32 %v2504_v9, %v2908_v33 }
 0x308   :  { %v1205_v26 = vadd.f32 %v1204_v58, %v1203_v42  ;;  %v1128_v58 = vmul.f32 %v3065_v47, %v3065_v47  ;;  %v1212_v30 = vsel %vm877_vm1, %v1127_v48, 0.0  ;;  %v1216_v48 = vsel %vm877_vm1, %v1129_v56, 0.0 }
 0x309   :  { %3923 = vst [vmem:[#allocation15_spill] sm:$0xff] %v3149_v15 }
 0x30a   :  { %v1207_v51 = vadd.f32 %v1206_v23, %v1205_v26  ;;  %v3921_v23 = vld [vmem:[#allocation19_spill] sm:$0xff]  ;;  %v1214_v62 = vsel %vm877_vm1, %v1128_v58, 0.0 }
 0x30b   :  { %v3086_v41 = vsub.f32 %v3921_v23, %v2908_v33 }
 0x30c   :  { %v1209_v42 = vadd.f32 %v1208_v12, %v1207_v51  ;;  %v1130_v12 = vmul.f32 %v3079_v25, %v3079_v25 }
 0x30d   :  { %v1131_v23 = vmul.f32 %v3086_v41, %v3086_v41 }
 0x30e   :  { %v1211_v26 = vadd.f32 %v1210_v18, %v1209_v42  ;;  %v3100_v18 = vsub.f32 %v2775_v27, %v2908_v33  ;;  %v1218_v58 = vsel %vm877_vm1, %v1130_v12, 0.0  ;;  %v3114_v27 = vsub.f32 %v2783_v54, %v2908_v33 }
 0x30f   :  { %v1220_v56 = vsel %vm877_vm1, %v1131_v23, 0.0  ;;  %v3128_v54 = vsub.f32 %v2794_v3, %v2908_v33  ;;  %v3142_v3 = vsub.f32 %v2460_v38, %v2908_v33  ;;  %v3156_v38 = vsub.f32 %v2494_v0, %v2908_v33 }
 0x310   :  { %v1213_v51 = vadd.f32 %v1212_v30, %v1211_v26  ;;  %v1132_v30 = vmul.f32 %v3093_v36, %v3093_v36 }
 0x311   :  { %3922 = vst [vmem:[#allocation13_spill] sm:$0xff] %v3142_v3 }
 0x312   :  { %v1215_v42 = vadd.f32 %v1214_v62, %v1213_v51  ;;  %v1133_v62 = vmul.f32 %v3100_v18, %v3100_v18  ;;  %v1222_v12 = vsel %vm877_vm1, %v1132_v30, 0.0 }
 0x314   :  { %v1217_v26 = vadd.f32 %v1216_v48, %v1215_v42  ;;  %v1134_v48 = vmul.f32 %v3107_v45, %v3107_v45  ;;  %v1224_v23 = vsel %vm877_vm1, %v1133_v62, 0.0 }
 0x316   :  { %v1219_v51 = vadd.f32 %v1218_v58, %v1217_v26  ;;  %v1135_v58 = vmul.f32 %v3114_v27, %v3114_v27  ;;  %v1226_v30 = vsel %vm877_vm1, %v1134_v48, 0.0 }
 0x318   :  { %v1221_v42 = vadd.f32 %v1220_v56, %v1219_v51  ;;  %v1136_v56 = vmul.f32 %v3121_v11, %v3121_v11  ;;  %v1228_v62 = vsel %vm877_vm1, %v1135_v58, 0.0 }
 0x31a   :  { %v1223_v26 = vadd.f32 %v1222_v12, %v1221_v42  ;;  %v1137_v12 = vmul.f32 %v3128_v54, %v3128_v54  ;;  %v1230_v48 = vsel %vm877_vm1, %v1136_v56, 0.0 }
 0x31c   :  { %v1225_v51 = vadd.f32 %v1224_v23, %v1223_v26  ;;  %v1138_v23 = vmul.f32 %v3135_v16, %v3135_v16  ;;  %v1232_v58 = vsel %vm877_vm1, %v1137_v12, 0.0 }
 0x31e   :  { %v1227_v42 = vadd.f32 %v1226_v30, %v1225_v51  ;;  %v1139_v30 = vmul.f32 %v3142_v3, %v3142_v3  ;;  %v1234_v56 = vsel %vm877_vm1, %v1138_v23, 0.0  ;;  %v1141_v3 = vmul.f32 %v3156_v38, %v3156_v38 }
 0x320   :  { %v1229_v26 = vadd.f32 %v1228_v62, %v1227_v42  ;;  %v1140_v62 = vmul.f32 %v3149_v15, %v3149_v15  ;;  %v1236_v12 = vsel %vm877_vm1, %v1139_v30, 0.0  ;;  %v1142_v15 = vmul.f32 %v3163_v46, %v3163_v46 }
 0x321   :  { %v1240_v30 = vsel %vm877_vm1, %v1141_v3, 0.0 }
 0x322   :  { %v1231_v51 = vadd.f32 %v1230_v48, %v1229_v26  ;;  %v3924_v48 = vld [vmem:[#allocation9_spill] sm:$0xff]  ;;  %v1238_v23 = vsel %vm877_vm1, %v1140_v62, 0.0  ;;  %v1242_v62 = vsel %vm877_vm1, %v1142_v15, 0.0 }
 0x323   :  { %v3170_v0 = vsub.f32 %v3924_v48, %v2908_v33 }
 0x324   :  { %v1233_v42 = vadd.f32 %v1232_v58, %v1231_v51  ;;  %v3925_v58 = vld [vmem:[#allocation11_spill] sm:$0xff] }
 0x325   :  { %v3177_v9 = vsub.f32 %v3925_v58, %v2908_v33  ;;  %v1143_v48 = vmul.f32 %v3170_v0, %v3170_v0 }
 0x326   :  { %v1235_v26 = vadd.f32 %v1234_v56, %v1233_v42  ;;  %v3184_v56 = vsub.f32 %v2562_v60, %v2908_v33  ;;  %v3198_v60 = vsub.f32 %v2596_v31, %v2908_v33 }
 0x327   :  { %3926 = vst [vmem:[#allocation17_spill] sm:$0xff] %v3177_v9  ;;  %v1144_v58 = vmul.f32 %v3177_v9, %v3177_v9  ;;  %v1244_v3 = vsel %vm877_vm1, %v1143_v48, 0.0 }
 0x328   :  { %v1237_v51 = vadd.f32 %v1236_v12, %v1235_v26  ;;  %3927 = vst [vmem:[#allocation18_spill] sm:$0xff] %v3184_v56  ;;  %v3191_v12 = vsub.f32 %v2572_v6, %v2908_v33 }
 0x329   :  { %v1246_v15 = vsel %vm877_vm1, %v1144_v58, 0.0 }
 0x32a   :  { %v1239_v42 = vadd.f32 %v1238_v23, %v1237_v51  ;;  %v1145_v23 = vmul.f32 %v3184_v56, %v3184_v56  ;;  %v1146_v9 = vmul.f32 %v3191_v12, %v3191_v12  ;;  %v1147_v56 = vmul.f32 %v3198_v60, %v3198_v60 }
 0x32c   :  { %v1241_v26 = vadd.f32 %v1240_v30, %v1239_v42  ;;  %v3928_v30 = vld [vmem:[#allocation14_spill] sm:$0xff]  ;;  %v1248_v48 = vsel %vm877_vm1, %v1145_v23, 0.0  ;;  %v1250_v58 = vsel %vm877_vm1, %v1146_v9, 0.0  ;;  %v1252_v23 = vsel %vm877_vm1, %v1147_v56, 0.0 }
 0x32d   :  { %v3205_v6 = vsub.f32 %v3928_v30, %v2908_v33 }
 0x32e   :  { %v1243_v51 = vadd.f32 %v1242_v62, %v1241_v26  ;;  %v3929_v62 = vld [vmem:[#allocation16_spill] sm:$0xff] }
 0x32f   :  { %v3212_v31 = vsub.f32 %v3929_v62, %v2908_v33  ;;  %v1148_v30 = vmul.f32 %v3205_v6, %v3205_v6 }
 0x330   :  { %v1245_v42 = vadd.f32 %v1244_v3, %v1243_v51  ;;  %v3219_v3 = vsub.f32 %v2621_v5, %v2908_v33  ;;  %v3233_v5 = vsub.f32 %v2644_v40, %v2908_v33  ;;  %v3247_v40 = vsub.f32 %v2656_v63, %v2908_v33 }
 0x331   :  { %v1149_v62 = vmul.f32 %v3212_v31, %v3212_v31  ;;  %v1254_v9 = vsel %vm877_vm1, %v1148_v30, 0.0  ;;  %v3261_v63 = vsub.f32 %v2668_v17, %v2908_v33  ;;  %v3275_v17 = vsub.f32 %v2845_v21, %v2908_v33 }
 0x332   :  { %v1247_v26 = vadd.f32 %v1246_v15, %v1245_v42  ;;  %v3226_v15 = vsub.f32 %v2640_v28, %v2908_v33  ;;  %v3240_v28 = vsub.f32 %v2652_v50, %v2908_v33  ;;  %v3254_v50 = vsub.f32 %v2664_v10, %v2908_v33 }
 0x333   :  { %v1256_v56 = vsel %vm877_vm1, %v1149_v62, 0.0  ;;  %v3268_v10 = vsub.f32 %v2676_v35, %v2908_v33  ;;  %v3282_v35 = vsub.f32 %v2851_v57, %v2908_v33  ;;  %v3289_v21 = vsub.f32 %v2857_v7, %v2908_v33 }
 0x334   :  { %v1249_v51 = vadd.f32 %v1248_v48, %v1247_v26  ;;  %v1150_v48 = vmul.f32 %v3219_v3, %v3219_v3  ;;  %v3296_v57 = vsub.f32 %v2863_v14, %v2908_v33  ;;  %v3303_v7 = vsub.f32 %v2869_v43, %v2908_v33 }
 0x335   :  { %3930 = vst [vmem:[#allocation19_spill] sm:$0xff] %v3289_v21  ;;  %v3310_v14 = vsub.f32 %v2873_v20, %v2908_v33  ;;  %v3317_v43 = vsub.f32 %v2877_v13, %v2908_v33  ;;  %v3324_v20 = vsub.f32 %v2881_v32, %v2908_v33  ;;  %v3331_v13 = vsub.f32 %v2885_v44, %v2908_v33 }
 0x336   :  { %v1251_v42 = vadd.f32 %v1250_v58, %v1249_v51  ;;  %v1151_v58 = vmul.f32 %v3226_v15, %v3226_v15  ;;  %v1258_v30 = vsel %vm877_vm1, %v1150_v48, 0.0  ;;  %3931 = vst [vmem:[#allocation9_spill] sm:$0xff] %v3296_v57  ;;  %v3338_v32 = vsub.f32 %v2889_v49, %v2908_v33 }
 0x337   :  { %3932 = vst [vmem:[#allocation11_spill] sm:$0xff] %v3303_v7  ;;  %v3345_v44 = vsub.f32 %v2893_v29, %v2908_v33 }
 0x338   :  { %v1253_v26 = vadd.f32 %v1252_v23, %v1251_v42  ;;  %v1152_v23 = vmul.f32 %v3233_v5, %v3233_v5  ;;  %v1260_v62 = vsel %vm877_vm1, %v1151_v58, 0.0  ;;  %3933 = vst [vmem:[#allocation14_spill] sm:$0xff] %v3310_v14  ;;  %v1167_v49 = vmul.f32 %v3338_v32, %v3338_v32 }
 0x339   :  { %3934 = vst [vmem:[#allocation16_spill] sm:$0xff] %v3317_v43 }
 0x33a   :  { %v1255_v51 = vadd.f32 %v1254_v9, %v1253_v26  ;;  %v1153_v9 = vmul.f32 %v3240_v28, %v3240_v28  ;;  %v1262_v48 = vsel %vm877_vm1, %v1152_v23, 0.0  ;;  %3935 = vst [vmem:[#allocation20_spill] sm:$0xff] %v3324_v20  ;;  %v1292_v29 = vsel %vm877_vm1, %v1167_v49, 0.0 }
 0x33b   :  { %3936 = vst [vmem:[#allocation21_spill] sm:$0xff] %v3331_v13 }
 0x33c   :  { %v1257_v42 = vadd.f32 %v1256_v56, %v1255_v51  ;;  %v1154_v56 = vmul.f32 %v3247_v40, %v3247_v40  ;;  %v1264_v58 = vsel %vm877_vm1, %v1153_v9, 0.0  ;;  %3937 = vst [vmem:[#allocation22_spill] sm:$0xff] %v3338_v32 }
 0x33e   :  { %v1259_v26 = vadd.f32 %v1258_v30, %v1257_v42  ;;  %v1155_v30 = vmul.f32 %v3254_v50, %v3254_v50  ;;  %v1266_v23 = vsel %vm877_vm1, %v1154_v56, 0.0 }
 0x340   :  { %v1261_v51 = vadd.f32 %v1260_v62, %v1259_v26  ;;  %v1156_v62 = vmul.f32 %v3261_v63, %v3261_v63  ;;  %v1268_v9 = vsel %vm877_vm1, %v1155_v30, 0.0 }
 0x342   :  { %v1263_v42 = vadd.f32 %v1262_v48, %v1261_v51  ;;  %v1157_v48 = vmul.f32 %v3268_v10, %v3268_v10  ;;  %v1270_v56 = vsel %vm877_vm1, %v1156_v62, 0.0 }
 0x344   :  { %v1265_v26 = vadd.f32 %v1264_v58, %v1263_v42  ;;  %v1158_v58 = vmul.f32 %v3275_v17, %v3275_v17  ;;  %v1272_v30 = vsel %vm877_vm1, %v1157_v48, 0.0 }
 0x346   :  { %v1267_v51 = vadd.f32 %v1266_v23, %v1265_v26  ;;  %v1159_v23 = vmul.f32 %v3282_v35, %v3282_v35  ;;  %v1274_v62 = vsel %vm877_vm1, %v1158_v58, 0.0 }
 0x348   :  { %v1269_v42 = vadd.f32 %v1268_v9, %v1267_v51  ;;  %v1160_v9 = vmul.f32 %v3289_v21, %v3289_v21  ;;  %v1276_v48 = vsel %vm877_vm1, %v1159_v23, 0.0 }
 0x34a   :  { %v1271_v26 = vadd.f32 %v1270_v56, %v1269_v42  ;;  %v1161_v56 = vmul.f32 %v3296_v57, %v3296_v57  ;;  %v1278_v58 = vsel %vm877_vm1, %v1160_v9, 0.0 }
 0x34c   :  { %v1273_v51 = vadd.f32 %v1272_v30, %v1271_v26  ;;  %v1162_v30 = vmul.f32 %v3303_v7, %v3303_v7  ;;  %v1280_v23 = vsel %vm877_vm1, %v1161_v56, 0.0 }
 0x34e   :  { %v1275_v42 = vadd.f32 %v1274_v62, %v1273_v51  ;;  %v1163_v62 = vmul.f32 %v3310_v14, %v3310_v14  ;;  %v1282_v9 = vsel %vm877_vm1, %v1162_v30, 0.0 }
 0x350   :  { %v1277_v26 = vadd.f32 %v1276_v48, %v1275_v42  ;;  %v1164_v48 = vmul.f32 %v3317_v43, %v3317_v43  ;;  %v1284_v56 = vsel %vm877_vm1, %v1163_v62, 0.0  ;;  %v1168_v62 = vmul.f32 %v3345_v44, %v3345_v44 }
 0x352   :  { %v1279_v51 = vadd.f32 %v1278_v58, %v1277_v26  ;;  %v1165_v58 = vmul.f32 %v3324_v20, %v3324_v20  ;;  %v1286_v30 = vsel %vm877_vm1, %v1164_v48, 0.0 }
 0x354   :  { %v1281_v42 = vadd.f32 %v1280_v23, %v1279_v51  ;;  %v1166_v23 = vmul.f32 %v3331_v13, %v3331_v13  ;;  %v1294_v13 = vsel %vm877_vm1, %v1168_v62, 0.0 }
 0x356   :  { %v1283_v26 = vadd.f32 %v1282_v9, %v1281_v42  ;;  %v1288_v9 = vsel %vm877_vm1, %v1165_v58, 0.0 }
 0x358   :  { %v1285_v51 = vadd.f32 %v1284_v56, %v1283_v26  ;;  %v1290_v26 = vsel %vm877_vm1, %v1166_v23, 0.0 }
 0x35a   :  { %v1287_v42 = vadd.f32 %v1286_v30, %v1285_v51 }
 0x35c   :  { %v1289_v43 = vadd.f32 %v1288_v9, %v1287_v42 }
 0x35e   :  { %v1291_v56 = vadd.f32 %v1290_v26, %v1289_v43 }
 0x360   :  { %v1293_v33 = vadd.f32 %v1292_v29, %v1291_v56 }
 0x362   :  { %v1295_v20 = vadd.f32 %v1294_v13, %v1293_v33 }
 0x364   :  { %v1296_v48 = vrot.slane %v1295_v20, 4 }
 0x366   :  { %v1297_v51 = vadd.f32 %v1296_v48, %v1295_v20 }
 0x368   :  { %v1298_v30 = vrot.slane %v1297_v51, 2 }
 0x36a   :  { %v1299_v14 = vadd.f32 %v1298_v30, %v1297_v51  ;;  %v2097_v30 = vld [vmem:[%s3840_s3] ss:$0 sm:$0xff] }
 0x36c   :  { %v1300_v32 = vrot.slane %v1299_v14, 1 }
 0x36e   :  { %v1301_v7 = vadd.f32 %v1300_v32, %v1299_v14  ;;  %v1316_v32 = vld [vmem:[%s3839_s2] sm:$0x1] }
 0x370   :  { %1311 = vrot.lane.b32.xlu2 %v1301_v7, %s2100_s0  ;;  %1307 = vrot.lane.b32.xlu1 %v1301_v7, %s2102_s21 }
 0x371   :  { %1303 = vrot.lane.b32.xlu0 %v1301_v7, %s2101_s20 }
 0x3ca   :  { %v1312_v49 = vpop.permute.xlu2 %1311 }
 0x3e2   :  { %v1308_v23 = vpop.permute.xlu1 %1307 }
 0x3e3   :  { %v1304_v58 = vpop.permute.xlu0 %1303 }
 0x3e4   :  { %v1306_v43 = vadd.f32 %v1304_v58, %v1301_v7 }
 0x3e6   :  { %v1310_v42 = vadd.f32 %v1308_v23, %v1306_v43 }
 0x3e8   :  { %v1314_v9 = vadd.f32 %v1312_v49, %v1310_v42  ;;  %v1343_v42 = vld [vmem:[%s3840_s3] sm:$0x1] }
 0x3ea   :  { %v1315_v62 = vmul.f32 0.00048828125, %v1314_v9 }
 0x3ec   :  { %v1317_v13 = vadd.f32 1e-05, %v1315_v62 }
 0x3ee   :  { %2098 = vrsqrt.f32 %v1317_v13  ;;  %vm1324_vm5 = vweird.f32 %v1317_v13 }
 0x3f4   :  { %v2099_v20 = vpop.eup %2098 }
 0x3f5   :  { %v1319_v26 = vmul.f32 %v2099_v20, %v1317_v13  ;;  %vm1325_vm4 = vweird.f32 %v2099_v20 }
 0x3f6   :  { %vm1326_vm6 = vmor %vm1324_vm5, %vm1325_vm4 }
 0x3f7   :  { %v1320_v56 = vmul.f32 %v2099_v20, %v1319_v26 }
 0x3f9   :  { %v1321_v29 = vmul.f32 0.5, %v1320_v56 }
 0x3fb   :  { %v1322_v14 = vsub.f32 1.5, %v1321_v29 }
 0x3fd   :  { %v1323_v33 = vmul.f32 %v2099_v20, %v1322_v14 }
 0x3ff   :  { %v1327_v7 = vsel %vm1326_vm6, %v2099_v20, %v1323_v33 }
 0x400   :  { %v1328_v48 = vmul.f32 %v1327_v7, %v1316_v32 }
 0x402   :  { %v1330_v51 = vperm.slane %v1328_v48, 0 }
 0x404   :  { %1337 = vrot.lane.b32.xlu2 %v1330_v51, %s2105_s23  ;;  %1334 = vrot.lane.b32.xlu1 %v1330_v51, %s2103_s22 }
 0x405   :  { %1331 = vrot.lane.b32.xlu0 %v1330_v51, %s2104_s1 }
 0x40c   :  { %1349 = vrot.lane.b32.xlu1 %v2097_v30, %s2103_s22  ;;  %1352 = vrot.lane.b32.xlu2 %v2097_v30, %s2105_s23 }
 0x40d   :  { %1346 = vrot.lane.b32.xlu0 %v2097_v30, %s2104_s1 }
 0x45e   :  { %v1338_v23 = vpop.permute.xlu2 %1337 }
 0x466   :  { %v1353_v56 = vpop.permute.xlu2 %1352 }
 0x476   :  { %v1335_v43 = vpop.permute.xlu1 %1334 }
 0x477   :  { %v1332_v58 = vpop.permute.xlu0 %1331 }
 0x478   :  { %v1340_v9 = vsel %vm1035_vm2, %v1328_v48, %v1332_v58 }
 0x479   :  { %v1341_v20 = vsel %vm442_vm0, %v1340_v9, %v1335_v43 }
 0x47a   :  { %v1342_v29 = vsel %vm1038_vm3, %v1341_v20, %v1338_v23  ;;  %v3939_v23 = vld [vmem:[#allocation2_spill] sm:$0xff] }
 0x47b   :  { %v3382_v32 = vperm.slane %v1342_v29, 0 }
 0x47d   :  { %v1422_v7 = vmul.f32 %v3382_v32, %v3345_v44  ;;  %v1359_v51 = vmul.f32 %v3382_v32, %v2912_v24  ;;  %v1360_v30 = vmul.f32 %v3382_v32, %v2916_v53  ;;  %v1361_v58 = vmul.f32 %v3382_v32, %v2920_v1 }
 0x47e   :  { %v1350_v13 = vpop.permute.xlu1 %1349  ;;  %v1362_v43 = vmul.f32 %v3382_v32, %v2924_v37  ;;  %v3942_v37 = vld [vmem:[#allocation5_spill] sm:$0xff] }
 0x47f   :  { %v1347_v49 = vpop.permute.xlu0 %1346 }
 0x480   :  { %v1355_v62 = vsel %vm1035_vm2, %v1343_v42, %v1347_v49  ;;  %v1363_v42 = vmul.f32 %v3382_v32, %v3939_v23 }
 0x481   :  { %v1356_v26 = vsel %vm442_vm0, %v1355_v62, %v1350_v13  ;;  %v3940_v62 = vld [vmem:[#allocation3_spill] sm:$0xff]  ;;  %v3941_v13 = vld [vmem:[#allocation4_spill] sm:$0xff] }
 0x482   :  { %v1357_v14 = vsel %vm1038_vm3, %v1356_v26, %v1353_v56  ;;  %v1364_v24 = vmul.f32 %v3382_v32, %v3940_v62  ;;  %v1365_v1 = vmul.f32 %v3382_v32, %v3941_v13  ;;  %v1366_v26 = vmul.f32 %v3382_v32, %v3942_v37  ;;  %v3944_v13 = vld [vmem:[#allocation7_spill] sm:$0xff] }
 0x483   :  { %v3384_v33 = vperm.slane %v1357_v14, 0  ;;  %v1367_v56 = vmul.f32 %v3382_v32, %v2960_v52  ;;  %v1370_v52 = vmul.f32 %v3382_v32, %v3944_v13 }
 0x485   :  { %v3389_v48 = vadd.f32 %v3384_v33, %v1422_v7  ;;  %v1424_v44 = vadd.f32 %v3384_v33, %v1359_v51  ;;  %v1425_v49 = vadd.f32 %v3384_v33, %v1360_v30  ;;  %v1426_v9 = vadd.f32 %v3384_v33, %v1361_v58 }
 0x486   :  { %v1427_v53 = vadd.f32 %v3384_v33, %v1362_v43  ;;  %v1428_v20 = vadd.f32 %v3384_v33, %v1363_v42  ;;  %v1429_v29 = vadd.f32 %v3384_v33, %v1364_v24  ;;  %v1430_v14 = vadd.f32 %v3384_v33, %v1365_v1  ;;  %v3943_v43 = vld [vmem:[#allocation6_spill] sm:$0xff] }
 0x487   :  { %3938 = vst [vmem:[#allocation23_spill] sm:$0xff] %v3389_v48  ;;  %v1488_v7 = vmax.f32 %v1424_v44, 0.0  ;;  %v1489_v51 = vmax.f32 %v1425_v49, 0.0  ;;  %v1490_v30 = vmax.f32 %v1426_v9, 0.0  ;;  %v1368_v58 = vmul.f32 %v3382_v32, %v2967_v59 }
 0x488   :  { %v1369_v23 = vmul.f32 %v3382_v32, %v3943_v43  ;;  %v1431_v42 = vadd.f32 %v3384_v33, %v1366_v26  ;;  %v1491_v62 = vmax.f32 %v1427_v53, 0.0  ;;  %v1432_v24 = vadd.f32 %v3384_v33, %v1367_v56 }
 0x489   :  { %v1492_v37 = vmax.f32 %v1428_v20, 0.0  ;;  %v1371_v44 = vmul.f32 %v3382_v32, %v2988_v2  ;;  %v1433_v49 = vadd.f32 %v3384_v33, %v1368_v58  ;;  %v1493_v9 = vmax.f32 %v1429_v29, 0.0  ;;  %v3945_v29 = vld [vmem:[#allocation8_spill] sm:$0xff] }
 0x48a   :  { %v1434_v59 = vadd.f32 %v3384_v33, %v1369_v23  ;;  %v1494_v1 = vmax.f32 %v1430_v14, 0.0  ;;  %v1552_v43 = vpack.c.bf16 %v1488_v7, %v1488_v7  ;;  %v1553_v48 = vpack.c.bf16 %v1489_v51, %v1489_v51 }
 0x48b   :  { %v1554_v26 = vpack.c.bf16 %v1490_v30, %v1490_v30  ;;  %v1372_v53 = vmul.f32 %v3382_v32, %v2995_v22  ;;  %v1435_v13 = vadd.f32 %v3384_v33, %v1370_v52  ;;  %v1495_v57 = vmax.f32 %v1431_v42, 0.0 }
 0x48c   :  { %v1555_v56 = vpack.c.bf16 %v1491_v62, %v1491_v62  ;;  %v1373_v20 = vmul.f32 %v3382_v32, %v3002_v4  ;;  %v1436_v2 = vadd.f32 %v3384_v33, %v1371_v44  ;;  %v1496_v58 = vmax.f32 %v1432_v24, 0.0  ;;  %1617 = vst.msk [vmem:[%s3841_s4] sm:$0xf] %vm1616_vm7, %v1552_v43  ;;  %v3946_v62 = vld [vmem:[#allocation10_spill] sm:$0xff] }
 0x48d   :  { %v1556_v21 = vpack.c.bf16 %v1492_v37, %v1492_v37  ;;  %v1374_v14 = vmul.f32 %v3382_v32, %v3945_v29  ;;  %v1437_v22 = vadd.f32 %v3384_v33, %v1372_v53  ;;  %v1497_v7 = vmax.f32 %v1433_v49, 0.0  ;;  %1618 = vst.msk [vmem:[%s3841_s4 + $0x4] sm:$0xf] %vm1616_vm7, %v1553_v48 }
 0x48e   :  { %v1557_v51 = vpack.c.bf16 %v1493_v9, %v1493_v9  ;;  %v1375_v4 = vmul.f32 %v3382_v32, %v3016_v39  ;;  %v1438_v30 = vadd.f32 %v3384_v33, %v1373_v20  ;;  %v1498_v23 = vmax.f32 %v1434_v59, 0.0  ;;  %1619 = vst.msk [vmem:[%s3841_s4 + $0x8] sm:$0xf] %vm1616_vm7, %v1554_v26 }
 0x48f   :  { %v1558_v42 = vpack.c.bf16 %v1494_v1, %v1494_v1  ;;  %v1376_v52 = vmul.f32 %v3382_v32, %v3946_v62  ;;  %v1439_v24 = vadd.f32 %v3384_v33, %v1374_v14  ;;  %v1499_v37 = vmax.f32 %v1435_v13, 0.0  ;;  %1620 = vst.msk [vmem:[%s3841_s4 + $0xc] sm:$0xf] %vm1616_vm7, %v1555_v56 }
 0x490   :  { %v1559_v44 = vpack.c.bf16 %v1495_v57, %v1495_v57  ;;  %v1377_v39 = vmul.f32 %v3382_v32, %v3030_v61  ;;  %v1440_v48 = vadd.f32 %v3384_v33, %v1375_v4  ;;  %v1500_v49 = vmax.f32 %v1436_v2, 0.0  ;;  %1621 = vst.msk [vmem:[%s3841_s4 + $0x10] sm:$0xf] %vm1616_vm7, %v1556_v21 }
 0x491   :  { %v1560_v59 = vpack.c.bf16 %v1496_v58, %v1496_v58  ;;  %v1378_v57 = vmul.f32 %v3382_v32, %v3037_v19  ;;  %v1441_v9 = vadd.f32 %v3384_v33, %v1376_v52  ;;  %v1501_v1 = vmax.f32 %v1437_v22, 0.0  ;;  %1622 = vst.msk [vmem:[%s3841_s4 + $0x14] sm:$0xf] %vm1616_vm7, %v1557_v51 }
 0x492   :  { %v1561_v43 = vpack.c.bf16 %v1497_v7, %v1497_v7  ;;  %v1379_v61 = vmul.f32 %v3382_v32, %v3044_v34  ;;  %v1442_v26 = vadd.f32 %v3384_v33, %v1377_v39  ;;  %v1502_v53 = vmax.f32 %v1438_v30, 0.0  ;;  %1623 = vst.msk [vmem:[%s3841_s4 + $0x18] sm:$0xf] %vm1616_vm7, %v1558_v42  ;;  %v3947_v34 = vld [vmem:[#allocation12_spill] sm:$0xff] }
 0x493   :  { %v1562_v13 = vpack.c.bf16 %v1498_v23, %v1498_v23  ;;  %v1380_v19 = vmul.f32 %v3382_v32, %v3051_v8  ;;  %v1443_v21 = vadd.f32 %v3384_v33, %v1378_v57  ;;  %v1503_v56 = vmax.f32 %v1439_v24, 0.0  ;;  %1624 = vst.msk [vmem:[%s3841_s4 + $0x1c] sm:$0xf] %vm1616_vm7, %v1559_v44 }
 0x494   :  { %v1563_v20 = vpack.c.bf16 %v1499_v37, %v1499_v37  ;;  %v1381_v2 = vmul.f32 %v3382_v32, %v3947_v34  ;;  %v1444_v58 = vadd.f32 %v3384_v33, %v1379_v61  ;;  %v1504_v29 = vmax.f32 %v1440_v48, 0.0  ;;  %1625 = vst.msk [vmem:[%s3841_s4 + $0x20] sm:$0xf] %vm1616_vm7, %v1560_v59 }
 0x495   :  { %v1564_v14 = vpack.c.bf16 %v1500_v49, %v1500_v49  ;;  %v1382_v8 = vmul.f32 %v3382_v32, %v3065_v47  ;;  %v1445_v22 = vadd.f32 %v3384_v33, %v1380_v19  ;;  %v1505_v7 = vmax.f32 %v1441_v9, 0.0  ;;  %1626 = vst.msk [vmem:[%s3841_s4 + $0x24] sm:$0xf] %vm1616_vm7, %v1561_v43 }
 0x496   :  { %v1565_v51 = vpack.c.bf16 %v1501_v1, %v1501_v1  ;;  %v1383_v4 = vmul.f32 %v3382_v32, %v3072_v55  ;;  %v1446_v30 = vadd.f32 %v3384_v33, %v1381_v2  ;;  %v1506_v23 = vmax.f32 %v1442_v26, 0.0  ;;  %1627 = vst.msk [vmem:[%s3841_s4 + $0x28] sm:$0xf] %vm1616_vm7, %v1562_v13 }
 0x497   :  { %v1566_v42 = vpack.c.bf16 %v1502_v53, %v1502_v53  ;;  %v1384_v47 = vmul.f32 %v3382_v32, %v3079_v25  ;;  %v1447_v62 = vadd.f32 %v3384_v33, %v1382_v8  ;;  %v1507_v52 = vmax.f32 %v1443_v21, 0.0  ;;  %1628 = vst.msk [vmem:[%s3841_s4 + $0x2c] sm:$0xf] %vm1616_vm7, %v1563_v20 }
 0x498   :  { %v1567_v24 = vpack.c.bf16 %v1503_v56, %v1503_v56  ;;  %v1385_v55 = vmul.f32 %v3382_v32, %v3086_v41  ;;  %v1448_v37 = vadd.f32 %v3384_v33, %v1383_v4  ;;  %v1508_v44 = vmax.f32 %v1444_v58, 0.0  ;;  %1629 = vst.msk [vmem:[%s3841_s4 + $0x30] sm:$0xf] %vm1616_vm7, %v1564_v14 }
 0x499   :  { %v1568_v39 = vpack.c.bf16 %v1504_v29, %v1504_v29  ;;  %v1386_v25 = vmul.f32 %v3382_v32, %v3093_v36  ;;  %v1449_v48 = vadd.f32 %v3384_v33, %v1384_v47  ;;  %v1509_v49 = vmax.f32 %v1445_v22, 0.0  ;;  %1630 = vst.msk [vmem:[%s3841_s4 + $0x34] sm:$0xf] %vm1616_vm7, %v1565_v51 }
 0x49a   :  { %v1569_v59 = vpack.c.bf16 %v1505_v7, %v1505_v7  ;;  %v1387_v41 = vmul.f32 %v3382_v32, %v3100_v18  ;;  %v1450_v57 = vadd.f32 %v3384_v33, %v1385_v55  ;;  %v1510_v9 = vmax.f32 %v1446_v30, 0.0  ;;  %1631 = vst.msk [vmem:[%s3841_s4 + $0x38] sm:$0xf] %vm1616_vm7, %v1566_v42 }
 0x49b   :  { %v1570_v1 = vpack.c.bf16 %v1506_v23, %v1506_v23  ;;  %v1388_v36 = vmul.f32 %v3382_v32, %v3107_v45  ;;  %v1451_v43 = vadd.f32 %v3384_v33, %v1386_v25  ;;  %v1511_v61 = vmax.f32 %v1447_v62, 0.0  ;;  %1632 = vst.msk [vmem:[%s3841_s4 + $0x3c] sm:$0xf] %vm1616_vm7, %v1567_v24 }
 0x49c   :  { %v1571_v26 = vpack.c.bf16 %v1507_v52, %v1507_v52  ;;  %v1389_v18 = vmul.f32 %v3382_v32, %v3114_v27  ;;  %v1452_v53 = vadd.f32 %v3384_v33, %v1387_v41  ;;  %v1512_v13 = vmax.f32 %v1448_v37, 0.0  ;;  %1633 = vst.msk [vmem:[%s3841_s4 + $0x40] sm:$0xf] %vm1616_vm7, %v1568_v39 }
 0x49d   :  { %v1572_v19 = vpack.c.bf16 %v1508_v44, %v1508_v44  ;;  %v1390_v45 = vmul.f32 %v3382_v32, %v3121_v11  ;;  %v1453_v21 = vadd.f32 %v3384_v33, %v1388_v36  ;;  %v1513_v56 = vmax.f32 %v1449_v48, 0.0  ;;  %1634 = vst.msk [vmem:[%s3841_s4 + $0x44] sm:$0xf] %vm1616_vm7, %v1569_v59 }
 0x49e   :  { %v1573_v20 = vpack.c.bf16 %v1509_v49, %v1509_v49  ;;  %v1391_v27 = vmul.f32 %v3382_v32, %v3128_v54  ;;  %v1454_v34 = vadd.f32 %v3384_v33, %v1389_v18  ;;  %v1514_v2 = vmax.f32 %v1450_v57, 0.0  ;;  %1635 = vst.msk [vmem:[%s3841_s4 + $0x48] sm:$0xf] %vm1616_vm7, %v1570_v1  ;;  %v3948_v54 = vld [vmem:[#allocation13_spill] sm:$0xff] }
 0x49f   :  { %v1574_v58 = vpack.c.bf16 %v1510_v9, %v1510_v9  ;;  %v1392_v11 = vmul.f32 %v3382_v32, %v3135_v16  ;;  %v1455_v29 = vadd.f32 %v3384_v33, %v1390_v45  ;;  %v1515_v14 = vmax.f32 %v1451_v43, 0.0  ;;  %1636 = vst.msk [vmem:[%s3841_s4 + $0x4c] sm:$0xf] %vm1616_vm7, %v1571_v26  ;;  %v3949_v16 = vld [vmem:[#allocation15_spill] sm:$0xff] }
 0x4a0   :  { %v1575_v8 = vpack.c.bf16 %v1511_v61, %v1511_v61  ;;  %v1393_v22 = vmul.f32 %v3382_v32, %v3948_v54  ;;  %v1456_v7 = vadd.f32 %v3384_v33, %v1391_v27  ;;  %v1516_v51 = vmax.f32 %v1452_v53, 0.0  ;;  %1637 = vst.msk [vmem:[%s3841_s4 + $0x50] sm:$0xf] %vm1616_vm7, %v1572_v19 }
 0x4a1   :  { %v1576_v4 = vpack.c.bf16 %v1512_v13, %v1512_v13  ;;  %v1394_v30 = vmul.f32 %v3382_v32, %v3949_v16  ;;  %v1457_v23 = vadd.f32 %v3384_v33, %v1392_v11  ;;  %v1517_v42 = vmax.f32 %v1453_v21, 0.0  ;;  %1638 = vst.msk [vmem:[%s3841_s4 + $0x54] sm:$0xf] %vm1616_vm7, %v1573_v20 }
 0x4a2   :  { %v1577_v47 = vpack.c.bf16 %v1513_v56, %v1513_v56  ;;  %v1395_v62 = vmul.f32 %v3382_v32, %v3156_v38  ;;  %v1458_v52 = vadd.f32 %v3384_v33, %v1393_v22  ;;  %v1518_v24 = vmax.f32 %v1454_v34, 0.0  ;;  %1639 = vst.msk [vmem:[%s3841_s4 + $0x58] sm:$0xf] %vm1616_vm7, %v1574_v58 }
 0x4a3   :  { %v1578_v55 = vpack.c.bf16 %v1514_v2, %v1514_v2  ;;  %v1396_v37 = vmul.f32 %v3382_v32, %v3163_v46  ;;  %v1459_v44 = vadd.f32 %v3384_v33, %v1394_v30  ;;  %v1519_v39 = vmax.f32 %v1455_v29, 0.0  ;;  %1640 = vst.msk [vmem:[%s3841_s4 + $0x5c] sm:$0xf] %vm1616_vm7, %v1575_v8  ;;  %v3950_v46 = vld [vmem:[#allocation17_spill] sm:$0xff] }
 0x4a4   :  { %v1579_v25 = vpack.c.bf16 %v1515_v14, %v1515_v14  ;;  %v1397_v38 = vmul.f32 %v3382_v32, %v3170_v0  ;;  %v1460_v48 = vadd.f32 %v3384_v33, %v1395_v62  ;;  %v1520_v49 = vmax.f32 %v1456_v7, 0.0  ;;  %1641 = vst.msk [vmem:[%s3841_s4 + $0x60] sm:$0xf] %vm1616_vm7, %v1576_v4  ;;  %v3951_v0 = vld [vmem:[#allocation18_spill] sm:$0xff] }
 0x4a5   :  { %v1580_v59 = vpack.c.bf16 %v1516_v51, %v1516_v51  ;;  %v1398_v41 = vmul.f32 %v3382_v32, %v3950_v46  ;;  %v1461_v57 = vadd.f32 %v3384_v33, %v1396_v37  ;;  %v1521_v9 = vmax.f32 %v1457_v23, 0.0  ;;  %1642 = vst.msk [vmem:[%s3841_s4 + $0x64] sm:$0xf] %vm1616_vm7, %v1577_v47 }
 0x4a6   :  { %v1581_v1 = vpack.c.bf16 %v1517_v42, %v1517_v42  ;;  %v1399_v36 = vmul.f32 %v3382_v32, %v3951_v0  ;;  %v1462_v43 = vadd.f32 %v3384_v33, %v1397_v38  ;;  %v1522_v61 = vmax.f32 %v1458_v52, 0.0  ;;  %1643 = vst.msk [vmem:[%s3841_s4 + $0x68] sm:$0xf] %vm1616_vm7, %v1578_v55 }
 0x4a7   :  { %v1582_v26 = vpack.c.bf16 %v1518_v24, %v1518_v24  ;;  %v1400_v18 = vmul.f32 %v3382_v32, %v3191_v12  ;;  %v1463_v53 = vadd.f32 %v3384_v33, %v1398_v41  ;;  %v1523_v13 = vmax.f32 %v1459_v44, 0.0  ;;  %1644 = vst.msk [vmem:[%s3841_s4 + $0x6c] sm:$0xf] %vm1616_vm7, %v1579_v25 }
 0x4a8   :  { %v1583_v19 = vpack.c.bf16 %v1519_v39, %v1519_v39  ;;  %v1401_v45 = vmul.f32 %v3382_v32, %v3198_v60  ;;  %v1464_v21 = vadd.f32 %v3384_v33, %v1399_v36  ;;  %v1524_v56 = vmax.f32 %v1460_v48, 0.0  ;;  %1645 = vst.msk [vmem:[%s3841_s4 + $0x70] sm:$0xf] %vm1616_vm7, %v1580_v59 }
 0x4a9   :  { %v1584_v20 = vpack.c.bf16 %v1520_v49, %v1520_v49  ;;  %v1402_v12 = vmul.f32 %v3382_v32, %v3205_v6  ;;  %v1465_v27 = vadd.f32 %v3384_v33, %v1400_v18  ;;  %v1525_v34 = vmax.f32 %v1461_v57, 0.0  ;;  %1646 = vst.msk [vmem:[%s3841_s4 + $0x74] sm:$0xf] %vm1616_vm7, %v1581_v1 }
 0x4aa   :  { %v1585_v2 = vpack.c.bf16 %v1521_v9, %v1521_v9  ;;  %v1403_v60 = vmul.f32 %v3382_v32, %v3212_v31  ;;  %v1466_v58 = vadd.f32 %v3384_v33, %v1401_v45  ;;  %v1526_v11 = vmax.f32 %v1462_v43, 0.0  ;;  %1647 = vst.msk [vmem:[%s3841_s4 + $0x78] sm:$0xf] %vm1616_vm7, %v1582_v26  ;;  %v3954_v45 = vld [vmem:[#allocation11_spill] sm:$0xff] }
 0x4ab   :  { %v1586_v29 = vpack.c.bf16 %v1522_v61, %v1522_v61  ;;  %v1404_v6 = vmul.f32 %v3382_v32, %v3219_v3  ;;  %v1467_v14 = vadd.f32 %v3384_v33, %v1402_v12  ;;  %v1527_v8 = vmax.f32 %v1463_v53, 0.0  ;;  %1648 = vst.msk [vmem:[%s3841_s4 + $0x7c] sm:$0xf] %vm1616_vm7, %v1583_v19 }
 0x4ac   :  { %v1587_v54 = vpack.c.bf16 %v1523_v13, %v1523_v13  ;;  %v1405_v31 = vmul.f32 %v3382_v32, %v3226_v15  ;;  %v1468_v22 = vadd.f32 %v3384_v33, %v1403_v60  ;;  %v1528_v7 = vmax.f32 %v1464_v21, 0.0  ;;  %1649 = vst.msk [vmem:[%s3841_s4 + $0x80] sm:$0xf] %vm1616_vm7, %v1584_v20 }
 0x4ad   :  { %v1588_v51 = vpack.c.bf16 %v1524_v56, %v1524_v56  ;;  %v1406_v3 = vmul.f32 %v3382_v32, %v3233_v5  ;;  %v1469_v4 = vadd.f32 %v3384_v33, %v1404_v6  ;;  %v1529_v16 = vmax.f32 %v1465_v27, 0.0  ;;  %1650 = vst.msk [vmem:[%s3841_s4 + $0x84] sm:$0xf] %vm1616_vm7, %v1585_v2  ;;  %v3955_v27 = vld [vmem:[#allocation14_spill] sm:$0xff] }
 0x4ae   :  { %v1589_v30 = vpack.c.bf16 %v1525_v34, %v1525_v34  ;;  %v1407_v15 = vmul.f32 %v3382_v32, %v3240_v28  ;;  %v1470_v23 = vadd.f32 %v3384_v33, %v1405_v31  ;;  %v1530_v42 = vmax.f32 %v1466_v58, 0.0  ;;  %1651 = vst.msk [vmem:[%s3841_s4 + $0x88] sm:$0xf] %vm1616_vm7, %v1586_v29 }
 0x4af   :  { %v1590_v47 = vpack.c.bf16 %v1526_v11, %v1526_v11  ;;  %v1408_v5 = vmul.f32 %v3382_v32, %v3247_v40  ;;  %v1471_v62 = vadd.f32 %v3384_v33, %v1406_v3  ;;  %v1531_v52 = vmax.f32 %v1467_v14, 0.0  ;;  %1652 = vst.msk [vmem:[%s3841_s4 + $0x8c] sm:$0xf] %vm1616_vm7, %v1587_v54  ;;  %v3956_v11 = vld [vmem:[#allocation16_spill] sm:$0xff]  ;;  %v3958_v3 = vld [vmem:[#allocation21_spill] sm:$0xff] }
 0x4b0   :  { %v1591_v24 = vpack.c.bf16 %v1527_v8, %v1527_v8  ;;  %v1409_v28 = vmul.f32 %v3382_v32, %v3254_v50  ;;  %v1472_v55 = vadd.f32 %v3384_v33, %v1407_v15  ;;  %v1532_v37 = vmax.f32 %v1468_v22, 0.0  ;;  %1653 = vst.msk [vmem:[%s3841_s4 + $0x90] sm:$0xf] %vm1616_vm7, %v1588_v51  ;;  %v3957_v54 = vld [vmem:[#allocation20_spill] sm:$0xff] }
 0x4b1   :  { %v1592_v44 = vpack.c.bf16 %v1528_v7, %v1528_v7  ;;  %v1410_v40 = vmul.f32 %v3382_v32, %v3261_v63  ;;  %v1473_v39 = vadd.f32 %v3384_v33, %v1408_v5  ;;  %v1533_v25 = vmax.f32 %v1469_v4, 0.0  ;;  %1654 = vst.msk [vmem:[%s3841_s4 + $0x94] sm:$0xf] %vm1616_vm7, %v1589_v30 }
 0x4b2   :  { %v1593_v38 = vpack.c.bf16 %v1529_v16, %v1529_v16  ;;  %v1411_v50 = vmul.f32 %v3382_v32, %v3268_v10  ;;  %v1474_v48 = vadd.f32 %v3384_v33, %v1409_v28  ;;  %v1534_v49 = vmax.f32 %v1470_v23, 0.0  ;;  %1655 = vst.msk [vmem:[%s3841_s4 + $0x98] sm:$0xf] %vm1616_vm7, %v1590_v47  ;;  %v3959_v23 = vld [vmem:[#allocation22_spill] sm:$0xff] }
 0x4b3   :  { %v1594_v59 = vpack.c.bf16 %v1530_v42, %v1530_v42  ;;  %v1412_v63 = vmul.f32 %v3382_v32, %v3275_v17  ;;  %v1475_v46 = vadd.f32 %v3384_v33, %v1410_v40  ;;  %v1535_v41 = vmax.f32 %v1471_v62, 0.0  ;;  %1656 = vst.msk [vmem:[%s3841_s4 + $0x9c] sm:$0xf] %vm1616_vm7, %v1591_v24  ;;  %v3952_v17 = vld [vmem:[#allocation19_spill] sm:$0xff] }
 0x4b4   :  { %v1595_v57 = vpack.c.bf16 %v1531_v52, %v1531_v52  ;;  %v1413_v10 = vmul.f32 %v3382_v32, %v3282_v35  ;;  %v1476_v9 = vadd.f32 %v3384_v33, %v1411_v50  ;;  %v1536_v1 = vmax.f32 %v1472_v55, 0.0  ;;  %1657 = vst.msk [vmem:[%s3841_s4 + $0xa0] sm:$0xf] %vm1616_vm7, %v1592_v44  ;;  %v3953_v35 = vld [vmem:[#allocation9_spill] sm:$0xff] }
 0x4b5   :  { %v1596_v0 = vpack.c.bf16 %v1532_v37, %v1532_v37  ;;  %v1414_v36 = vmul.f32 %v3382_v32, %v3952_v17  ;;  %v1477_v43 = vadd.f32 %v3384_v33, %v1412_v63  ;;  %v1537_v61 = vmax.f32 %v1473_v39, 0.0  ;;  %1658 = vst.msk [vmem:[%s3841_s4 + $0xa4] sm:$0xf] %vm1616_vm7, %v1593_v38 }
 0x4b6   :  { %v1597_v26 = vpack.c.bf16 %v1533_v25, %v1533_v25  ;;  %v1415_v18 = vmul.f32 %v3382_v32, %v3953_v35  ;;  %v1478_v53 = vadd.f32 %v3384_v33, %v1413_v10  ;;  %v1538_v13 = vmax.f32 %v1474_v48, 0.0  ;;  %1659 = vst.msk [vmem:[%s3841_s4 + $0xa8] sm:$0xf] %vm1616_vm7, %v1594_v59 }
 0x4b7   :  { %v1598_v19 = vpack.c.bf16 %v1534_v49, %v1534_v49  ;;  %v1416_v21 = vmul.f32 %v3382_v32, %v3954_v45  ;;  %v1479_v56 = vadd.f32 %v3384_v33, %v1414_v36  ;;  %v1539_v20 = vmax.f32 %v1475_v46, 0.0  ;;  %1660 = vst.msk [vmem:[%s3841_s4 + $0xac] sm:$0xf] %vm1616_vm7, %v1595_v57  ;;  %v3960_v49 = vld [vmem:[#allocation23_spill] sm:$0xff] }
 0x4b8   :  { %v1599_v12 = vpack.c.bf16 %v1535_v41, %v1535_v41  ;;  %v1417_v34 = vmul.f32 %v3382_v32, %v3955_v27  ;;  %v1480_v2 = vadd.f32 %v3384_v33, %v1415_v18  ;;  %v1540_v60 = vmax.f32 %v1476_v9, 0.0  ;;  %1661 = vst.msk [vmem:[%s3841_s4 + $0xb0] sm:$0xf] %vm1616_vm7, %v1596_v0 }
 0x4b9   :  { %v1600_v58 = vpack.c.bf16 %v1536_v1, %v1536_v1  ;;  %v1418_v29 = vmul.f32 %v3382_v32, %v3956_v11  ;;  %v1481_v6 = vadd.f32 %v3384_v33, %v1416_v21  ;;  %v1541_v14 = vmax.f32 %v1477_v43, 0.0  ;;  %1662 = vst.msk [vmem:[%s3841_s4 + $0xb4] sm:$0xf] %vm1616_vm7, %v1597_v26 }
 0x4ba   :  { %v1601_v8 = vpack.c.bf16 %v1537_v61, %v1537_v61  ;;  %v1419_v31 = vmul.f32 %v3382_v32, %v3957_v54  ;;  %v1482_v22 = vadd.f32 %v3384_v33, %v1417_v34  ;;  %v1542_v7 = vmax.f32 %v1478_v53, 0.0  ;;  %1663 = vst.msk [vmem:[%s3841_s4 + $0xb8] sm:$0xf] %vm1616_vm7, %v1598_v19 }
 0x4bb   :  { %v1602_v51 = vpack.c.bf16 %v1538_v13, %v1538_v13  ;;  %v1420_v4 = vmul.f32 %v3382_v32, %v3958_v3  ;;  %v1483_v16 = vadd.f32 %v3384_v33, %v1418_v29  ;;  %v1543_v30 = vmax.f32 %v1479_v56, 0.0  ;;  %1664 = vst.msk [vmem:[%s3841_s4 + $0xbc] sm:$0xf] %vm1616_vm7, %v1599_v12 }
 0x4bc   :  { %v1603_v15 = vpack.c.bf16 %v1539_v20, %v1539_v20  ;;  %v1421_v42 = vmul.f32 %v3382_v32, %v3959_v23  ;;  %v1484_v47 = vadd.f32 %v3384_v33, %v1419_v31  ;;  %v1544_v5 = vmax.f32 %v1480_v2, 0.0  ;;  %1665 = vst.msk [vmem:[%s3841_s4 + $0xc0] sm:$0xf] %vm1616_vm7, %v1600_v58 }
 0x4bd   :  { %v1604_v62 = vpack.c.bf16 %v1540_v60, %v1540_v60  ;;  %v1485_v52 = vadd.f32 %v3384_v33, %v1420_v4  ;;  %v1545_v24 = vmax.f32 %v1481_v6, 0.0  ;;  %v1605_v28 = vpack.c.bf16 %v1541_v14, %v1541_v14  ;;  %1666 = vst.msk [vmem:[%s3841_s4 + $0xc4] sm:$0xf] %vm1616_vm7, %v1601_v8 }
 0x4be   :  { %v1486_v32 = vadd.f32 %v3384_v33, %v1421_v42  ;;  %v1546_v55 = vmax.f32 %v1482_v22, 0.0  ;;  %v1606_v37 = vpack.c.bf16 %v1542_v7, %v1542_v7  ;;  %1667 = vst.msk [vmem:[%s3841_s4 + $0xc8] sm:$0xf] %vm1616_vm7, %v1602_v51  ;;  %v1547_v44 = vmax.f32 %v1483_v16, 0.0 }
 0x4bf   :  { %v1607_v40 = vpack.c.bf16 %v1543_v30, %v1543_v30  ;;  %1668 = vst.msk [vmem:[%s3841_s4 + $0xcc] sm:$0xf] %vm1616_vm7, %v1603_v15  ;;  %v1548_v39 = vmax.f32 %v1484_v47, 0.0  ;;  %v1608_v25 = vpack.c.bf16 %v1544_v5, %v1544_v5  ;;  %v1549_v33 = vmax.f32 %v1485_v52, 0.0 }
 0x4c0   :  { %1669 = vst.msk [vmem:[%s3841_s4 + $0xd0] sm:$0xf] %vm1616_vm7, %v1604_v62  ;;  %v1609_v38 = vpack.c.bf16 %v1545_v24, %v1545_v24  ;;  %v1550_v50 = vmax.f32 %v1486_v32, 0.0  ;;  %v1610_v48 = vpack.c.bf16 %v1546_v55, %v1546_v55  ;;  %v1551_v59 = vmax.f32 %v3960_v49, 0.0 }
 0x4c1   :  { %1670 = vst.msk [vmem:[%s3841_s4 + $0xd4] sm:$0xf] %vm1616_vm7, %v1605_v28  ;;  %v1611_v63 = vpack.c.bf16 %v1547_v44, %v1547_v44  ;;  %v1612_v46 = vpack.c.bf16 %v1548_v39, %v1548_v39  ;;  %v1613_v41 = vpack.c.bf16 %v1549_v33, %v1549_v33 }
 0x4c2   :  { %1671 = vst.msk [vmem:[%s3841_s4 + $0xd8] sm:$0xf] %vm1616_vm7, %v1606_v37  ;;  %v1614_v57 = vpack.c.bf16 %v1550_v50, %v1550_v50  ;;  %v1615_v10 = vpack.c.bf16 %v1551_v59, %v1551_v59 }
 0x4c3   :  { %1672 = vst.msk [vmem:[%s3841_s4 + $0xdc] sm:$0xf] %vm1616_vm7, %v1607_v40 }
 0x4c4   :  { %1673 = vst.msk [vmem:[%s3841_s4 + $0xe0] sm:$0xf] %vm1616_vm7, %v1608_v25 }
 0x4c5   :  { %1674 = vst.msk [vmem:[%s3841_s4 + $0xe4] sm:$0xf] %vm1616_vm7, %v1609_v38 }
 0x4c6   :  { %1675 = vst.msk [vmem:[%s3841_s4 + $0xe8] sm:$0xf] %vm1616_vm7, %v1610_v48 }
 0x4c7   :  { %1676 = vst.msk [vmem:[%s3841_s4 + $0xec] sm:$0xf] %vm1616_vm7, %v1611_v63 }
 0x4c8   :  { %1677 = vst.msk [vmem:[%s3841_s4 + $0xf0] sm:$0xf] %vm1616_vm7, %v1612_v46 }
 0x4c9   :  { %1678 = vst.msk [vmem:[%s3841_s4 + $0xf4] sm:$0xf] %vm1616_vm7, %v1613_v41 }
 0x4ca   :  { %1679 = vst.msk [vmem:[%s3841_s4 + $0xf8] sm:$0xf] %vm1616_vm7, %v1614_v57 }
 0x4cb   :  { %1680 = vst.msk [vmem:[%s3841_s4 + $0xfc] sm:$0xf] %vm1616_vm7, %v1615_v10 }

// kernel: generator_forward.9
= control target key start
LH: loop header
LB: loop body
LE: loop exit
PB: predicated region body
PF: predicated region fallthrough
CT: control target
= control target key end

     0   :  { %vm1336_vm0 = vcmask 1043456   ;;  %vm951_vm1 = vcmask 588800   ;;  %s5409_s1 = inlined_call_operand.vmem [shape: bf16[72,128], index: 1, kind: input, shape index: {}]   ;;  %s5410_s2 = inlined_call_operand.vmem [shape: f32[1,128], index: 2, kind: input, shape index: {}]   ;;  %s5411_s0 = inlined_call_operand.vmem [shape: bf16[2048,72], index: 0, kind: input, shape index: {}]   ;;  %s5412_s3 = inlined_call_operand.vmem [shape: f32[2048,128], index: 3, kind: output, shape index: {}]  }
   0x1   :  { %v279_v0 = vld [vmem:[%s5409_s1 + $0x20] sm:$0xf]  ;;  %v3292_v4 = vld [vmem:[%s5409_s1 + $0x18] sm:$0xff]  ;;  %v3291_v5 = vld [vmem:[%s5409_s1 + $0x10] sm:$0xff] }
   0x2   :  { %v941_v1 = vunpack.c.l.b16 %v279_v0  ;;  %v3290_v6 = vld [vmem:[%s5409_s1 + $0x8] sm:$0xff]  ;;  %v3289_v7 = vld [vmem:[%s5409_s1] sm:$0xff]  ;;  %v3163_v16 = vld [vmem:[%s5411_s0 + $0x10] sm:$0xff] }
   0x3   :  { %v3161_v8 = vld [vmem:[%s5411_s0] sm:$0xff]  ;;  %v3162_v12 = vld [vmem:[%s5411_s0 + $0x8] sm:$0xff]  ;;  %v3195_v17 = vld [vmem:[%s5411_s0 + $0x110] sm:$0xff] }
   0x4   :  { %v946_v2 = vpack.c.b16 %v941_v1, %v941_v1  ;;  %v3193_v9 = vld [vmem:[%s5411_s0 + $0x100] sm:$0xff]  ;;  %v3194_v13 = vld [vmem:[%s5411_s0 + $0x108] sm:$0xff]  ;;  %v3227_v18 = vld [vmem:[%s5411_s0 + $0x210] sm:$0xff] }
   0x5   :  { %v3225_v10 = vld [vmem:[%s5411_s0 + $0x200] sm:$0xff]  ;;  %v3226_v14 = vld [vmem:[%s5411_s0 + $0x208] sm:$0xff]  ;;  %v3259_v19 = vld [vmem:[%s5411_s0 + $0x310] sm:$0xff] }
   0x6   :  { %v1338_v3 = vsel %vm1336_vm0, %v946_v2, 0  ;;  %v3257_v11 = vld [vmem:[%s5411_s0 + $0x300] sm:$0xff]  ;;  %v3258_v15 = vld [vmem:[%s5411_s0 + $0x308] sm:$0xff]  ;;  %v3164_v20 = vld [vmem:[%s5411_s0 + $0x18] sm:$0xff] }
   0x7   :  { %1343 = vmatpush.bf16.msra.mxu0 %v1338_v3  ;;  %3293 = vmatpush.bf16.msra.mxu1 %v1338_v3  ;;  %v3196_v21 = vld [vmem:[%s5411_s0 + $0x118] sm:$0xff]  ;;  %v3165_v24 = vld [vmem:[%s5411_s0 + $0x20] sm:$0xff]  ;;  %v3166_v28 = vld [vmem:[%s5411_s0 + $0x28] sm:$0xff] }
   0x8   :  { %3294 = vmatpush.bf16.msra.mxu2 %v1338_v3  ;;  %3295 = vmatpush.bf16.msra.mxu3 %v1338_v3  ;;  %v3228_v22 = vld [vmem:[%s5411_s0 + $0x218] sm:$0xff]  ;;  %v3197_v25 = vld [vmem:[%s5411_s0 + $0x120] sm:$0xff]  ;;  %v3198_v29 = vld [vmem:[%s5411_s0 + $0x128] sm:$0xff] }
   0x9   :  { %v3260_v23 = vld [vmem:[%s5411_s0 + $0x318] sm:$0xff]  ;;  %v3229_v26 = vld [vmem:[%s5411_s0 + $0x220] sm:$0xff]  ;;  %v3230_v30 = vld [vmem:[%s5411_s0 + $0x228] sm:$0xff] }
   0xa   :  { %v3261_v27 = vld [vmem:[%s5411_s0 + $0x320] sm:$0xff]  ;;  %v3262_v31 = vld [vmem:[%s5411_s0 + $0x328] sm:$0xff]  ;;  %v3167_v32 = vld [vmem:[%s5411_s0 + $0x30] sm:$0xff] }
   0xb   :  { %1344 = vmatpush.bf16.msra.mxu0 %v3292_v4  ;;  %3296 = vmatpush.bf16.msra.mxu1 %v3292_v4  ;;  %v3199_v33 = vld [vmem:[%s5411_s0 + $0x130] sm:$0xff]  ;;  %v3168_v36 = vld [vmem:[%s5411_s0 + $0x38] sm:$0xff]  ;;  %v3989_v40 = vld [vmem:[%s5410_s2] ss:$0 sm:$0xff] }
   0xc   :  { %3297 = vmatpush.bf16.msra.mxu2 %v3292_v4  ;;  %3298 = vmatpush.bf16.msra.mxu3 %v3292_v4  ;;  %v3231_v34 = vld [vmem:[%s5411_s0 + $0x230] sm:$0xff]  ;;  %v3200_v37 = vld [vmem:[%s5411_s0 + $0x138] sm:$0xff]  ;;  %v3169_v41 = vld [vmem:[%s5411_s0 + $0x40] sm:$0xff] }
   0xd   :  { %v3263_v35 = vld [vmem:[%s5411_s0 + $0x330] sm:$0xff]  ;;  %v3232_v38 = vld [vmem:[%s5411_s0 + $0x238] sm:$0xff]  ;;  %v3201_v42 = vld [vmem:[%s5411_s0 + $0x140] sm:$0xff] }
   0xe   :  { %v3264_v39 = vld [vmem:[%s5411_s0 + $0x338] sm:$0xff]  ;;  %v3233_v45 = vld [vmem:[%s5411_s0 + $0x240] sm:$0xff]  ;;  %v3170_v61 = vld [vmem:[%s5411_s0 + $0x48] sm:$0xff] }
   0xf   :  { %1345 = vmatpush.bf16.msra.mxu0 %v3291_v5  ;;  %3299 = vmatpush.bf16.msra.mxu1 %v3291_v5  ;;  %v3265_v46 = vld [vmem:[%s5411_s0 + $0x340] sm:$0xff]  ;;  %v3202_v62 = vld [vmem:[%s5411_s0 + $0x148] sm:$0xff] }
  0x10   :  { %3300 = vmatpush.bf16.msra.mxu2 %v3291_v5  ;;  %3301 = vmatpush.bf16.msra.mxu3 %v3291_v5  ;;  %v3234_v4 = vld [vmem:[%s5411_s0 + $0x248] sm:$0xff] }
  0x11   :  { %v3266_v5 = vld [vmem:[%s5411_s0 + $0x348] sm:$0xff] }
  0x13   :  { %1346 = vmatpush.bf16.msra.mxu0 %v3290_v6  ;;  %3302 = vmatpush.bf16.msra.mxu1 %v3290_v6 }
  0x14   :  { %3303 = vmatpush.bf16.msra.mxu2 %v3290_v6  ;;  %3304 = vmatpush.bf16.msra.mxu3 %v3290_v6 }
  0x17   :  { %1347 = vmatpush.bf16.msra.mxu0 %v3289_v7  ;;  %3305 = vmatpush.bf16.msra.mxu1 %v3289_v7 }
  0x18   :  { %3306 = vmatpush.bf16.msra.mxu2 %v3289_v7  ;;  %3307 = vmatpush.bf16.msra.mxu3 %v3289_v7 }
  0x1a   :  { %3033 = vmatmul.msk.bf16.vlgmr.msra.gmra.mxu0 %vm951_vm1, %v3161_v8  ;;  %3065 = vmatmul.msk.bf16.vlgmr.msra.gmra.mxu1 %vm951_vm1, %v3193_v9 }
  0x1b   :  { %3097 = vmatmul.msk.bf16.vlgmr.msra.gmra.mxu2 %vm951_vm1, %v3225_v10  ;;  %3129 = vmatmul.msk.bf16.vlgmr.msra.gmra.mxu3 %vm951_vm1, %v3257_v11 }
  0x2a   :  { %3034 = vmatmul.msk.bf16.gmra.mxu0 %vm951_vm1, %v3162_v12  ;;  %3066 = vmatmul.msk.bf16.gmra.mxu1 %vm951_vm1, %v3194_v13 }
  0x2b   :  { %3098 = vmatmul.msk.bf16.gmra.mxu2 %vm951_vm1, %v3226_v14  ;;  %3130 = vmatmul.msk.bf16.gmra.mxu3 %vm951_vm1, %v3258_v15 }
  0x3a   :  { %3035 = vmatmul.msk.bf16.gmra.mxu0 %vm951_vm1, %v3163_v16  ;;  %3067 = vmatmul.msk.bf16.gmra.mxu1 %vm951_vm1, %v3195_v17 }
  0x3b   :  { %3099 = vmatmul.msk.bf16.gmra.mxu2 %vm951_vm1, %v3227_v18  ;;  %3131 = vmatmul.msk.bf16.gmra.mxu3 %vm951_vm1, %v3259_v19 }
  0x4a   :  { %3036 = vmatmul.msk.bf16.gmra.mxu0 %vm951_vm1, %v3164_v20  ;;  %3068 = vmatmul.msk.bf16.gmra.mxu1 %vm951_vm1, %v3196_v21 }
  0x4b   :  { %3100 = vmatmul.msk.bf16.gmra.mxu2 %vm951_vm1, %v3228_v22  ;;  %3132 = vmatmul.msk.bf16.gmra.mxu3 %vm951_vm1, %v3260_v23 }
  0x5a   :  { %3037 = vmatmul.msk.bf16.gmra.mxu0 %vm951_vm1, %v3165_v24  ;;  %3069 = vmatmul.msk.bf16.gmra.mxu1 %vm951_vm1, %v3197_v25  ;;  %v3171_v25 = vld [vmem:[%s5411_s0 + $0x50] sm:$0xff] }
  0x5b   :  { %3101 = vmatmul.msk.bf16.gmra.mxu2 %vm951_vm1, %v3229_v26  ;;  %3133 = vmatmul.msk.bf16.gmra.mxu3 %vm951_vm1, %v3261_v27  ;;  %v3203_v26 = vld [vmem:[%s5411_s0 + $0x150] sm:$0xff] }
  0x6a   :  { %3038 = vmatmul.msk.bf16.gmra.mxu0 %vm951_vm1, %v3166_v28  ;;  %3070 = vmatmul.msk.bf16.gmra.mxu1 %vm951_vm1, %v3198_v29 }
  0x6b   :  { %3102 = vmatmul.msk.bf16.gmra.mxu2 %vm951_vm1, %v3230_v30  ;;  %3134 = vmatmul.msk.bf16.gmra.mxu3 %vm951_vm1, %v3262_v31 }
  0x7a   :  { %3039 = vmatmul.msk.bf16.gmra.mxu0 %vm951_vm1, %v3167_v32  ;;  %3071 = vmatmul.msk.bf16.gmra.mxu1 %vm951_vm1, %v3199_v33  ;;  %v3235_v32 = vld [vmem:[%s5411_s0 + $0x250] sm:$0xff] }
  0x7b   :  { %3103 = vmatmul.msk.bf16.gmra.mxu2 %vm951_vm1, %v3231_v34  ;;  %3135 = vmatmul.msk.bf16.gmra.mxu3 %vm951_vm1, %v3263_v35  ;;  %v3267_v33 = vld [vmem:[%s5411_s0 + $0x350] sm:$0xff] }
  0x8a   :  { %3040 = vmatmul.msk.bf16.gmra.mxu0 %vm951_vm1, %v3168_v36  ;;  %3072 = vmatmul.msk.bf16.gmra.mxu1 %vm951_vm1, %v3200_v37 }
  0x8b   :  { %3104 = vmatmul.msk.bf16.gmra.mxu2 %vm951_vm1, %v3232_v38  ;;  %3136 = vmatmul.msk.bf16.gmra.mxu3 %vm951_vm1, %v3264_v39 }
  0x97   :  { %v1349_v43 = vpop.f32.mrf.mxu0  ;;  %v1509_v44 = vpop.f32.mrf.mxu1 }
  0x98   :  { %v1350_v47 = vadd.f32 %v3989_v40, %v1349_v43  ;;  %v1510_v48 = vadd.f32 %v3989_v40, %v1509_v44 }
  0x9a   :  { %3309 = vtanh.f32 %v1350_v47  ;;  %3041 = vmatmul.msk.bf16.gmra.mxu0 %vm951_vm1, %v3169_v41  ;;  %3073 = vmatmul.msk.bf16.gmra.mxu1 %vm951_vm1, %v3201_v42 }
  0x9b   :  { %3311 = vtanh.f32 %v1510_v48  ;;  %3105 = vmatmul.msk.bf16.gmra.mxu2 %vm951_vm1, %v3233_v45  ;;  %3137 = vmatmul.msk.bf16.gmra.mxu3 %vm951_vm1, %v3265_v46 }
  0x9e   :  { %v1669_v49 = vpop.f32.mrf.mxu2  ;;  %v1829_v50 = vpop.f32.mrf.mxu3 }
  0x9f   :  { %v1670_v51 = vadd.f32 %v3989_v40, %v1669_v49  ;;  %v1830_v52 = vadd.f32 %v3989_v40, %v1829_v50  ;;  %v1351_v53 = vpop.f32.mrf.mxu0  ;;  %v1511_v54 = vpop.f32.mrf.mxu1 }
  0xa0   :  { %v3310_v55 = vpop.eup %3309  ;;  %v1352_v56 = vadd.f32 %v3989_v40, %v1351_v53  ;;  %v1512_v57 = vadd.f32 %v3989_v40, %v1511_v54  ;;  %v3172_v54 = vld [vmem:[%s5411_s0 + $0x58] sm:$0xff] }
  0xa1   :  { %v3312_v58 = vpop.eup %3311  ;;  %2245 = vst [vmem:[%s5412_s3] sm:$0xff] %v3310_v55  ;;  %3313 = vtanh.f32 %v1670_v51  ;;  %v3204_v55 = vld [vmem:[%s5411_s0 + $0x158] sm:$0xff] }
  0xa2   :  { %2309 = vst [vmem:[%s5412_s3 + $0x200] sm:$0xff] %v3312_v58  ;;  %3315 = vtanh.f32 %v1830_v52 }
  0xa3   :  { %3317 = vtanh.f32 %v1352_v56 }
  0xa4   :  { %3319 = vtanh.f32 %v1512_v57 }
  0xa6   :  { %v1671_v59 = vpop.f32.mrf.mxu2  ;;  %v1831_v60 = vpop.f32.mrf.mxu3 }
  0xa7   :  { %v3314_v63 = vpop.eup %3313  ;;  %v1672_v0 = vadd.f32 %v3989_v40, %v1671_v59  ;;  %v1832_v1 = vadd.f32 %v3989_v40, %v1831_v60  ;;  %v1354_v2 = vpop.f32.mrf.mxu0 }
  0xa8   :  { %v1514_v3 = vpop.f32.mrf.mxu1  ;;  %v3316_v6 = vpop.eup %3315  ;;  %2373 = vst [vmem:[%s5412_s3 + $0x400] sm:$0xff] %v3314_v63  ;;  %v1355_v7 = vadd.f32 %v3989_v40, %v1354_v2 }
  0xa9   :  { %v1515_v8 = vadd.f32 %v3989_v40, %v1514_v3  ;;  %v3318_v9 = vpop.eup %3317  ;;  %2437 = vst [vmem:[%s5412_s3 + $0x600] sm:$0xff] %v3316_v6  ;;  %3321 = vtanh.f32 %v1672_v0 }
  0xaa   :  { %v3320_v10 = vpop.eup %3319  ;;  %2246 = vst [vmem:[%s5412_s3 + $0x8] sm:$0xff] %v3318_v9  ;;  %3323 = vtanh.f32 %v1832_v1  ;;  %3042 = vmatmul.msk.bf16.gmra.mxu0 %vm951_vm1, %v3170_v61  ;;  %3074 = vmatmul.msk.bf16.gmra.mxu1 %vm951_vm1, %v3202_v62  ;;  %v3236_v61 = vld [vmem:[%s5411_s0 + $0x258] sm:$0xff] }
  0xab   :  { %2310 = vst [vmem:[%s5412_s3 + $0x208] sm:$0xff] %v3320_v10  ;;  %3325 = vtanh.f32 %v1355_v7  ;;  %3106 = vmatmul.msk.bf16.gmra.mxu2 %vm951_vm1, %v3234_v4  ;;  %3138 = vmatmul.msk.bf16.gmra.mxu3 %vm951_vm1, %v3266_v5  ;;  %v3268_v62 = vld [vmem:[%s5411_s0 + $0x358] sm:$0xff] }
  0xac   :  { %3327 = vtanh.f32 %v1515_v8 }
  0xae   :  { %v1674_v11 = vpop.f32.mrf.mxu2  ;;  %v1834_v12 = vpop.f32.mrf.mxu3 }
  0xaf   :  { %v3322_v13 = vpop.eup %3321  ;;  %v1675_v14 = vadd.f32 %v3989_v40, %v1674_v11  ;;  %v1835_v15 = vadd.f32 %v3989_v40, %v1834_v12  ;;  %v1356_v16 = vpop.f32.mrf.mxu0 }
  0xb0   :  { %v1516_v17 = vpop.f32.mrf.mxu1  ;;  %v3324_v18 = vpop.eup %3323  ;;  %2374 = vst [vmem:[%s5412_s3 + $0x408] sm:$0xff] %v3322_v13  ;;  %v1357_v19 = vadd.f32 %v3989_v40, %v1356_v16 }
  0xb1   :  { %v1517_v20 = vadd.f32 %v3989_v40, %v1516_v17  ;;  %v3326_v21 = vpop.eup %3325  ;;  %2438 = vst [vmem:[%s5412_s3 + $0x608] sm:$0xff] %v3324_v18  ;;  %3329 = vtanh.f32 %v1675_v14  ;;  %v3173_v18 = vld [vmem:[%s5411_s0 + $0x60] sm:$0xff] }
  0xb2   :  { %v3328_v22 = vpop.eup %3327  ;;  %2247 = vst [vmem:[%s5412_s3 + $0x10] sm:$0xff] %v3326_v21  ;;  %3331 = vtanh.f32 %v1835_v15 }
  0xb3   :  { %2311 = vst [vmem:[%s5412_s3 + $0x210] sm:$0xff] %v3328_v22  ;;  %3333 = vtanh.f32 %v1357_v19  ;;  %v3205_v19 = vld [vmem:[%s5411_s0 + $0x160] sm:$0xff] }
  0xb4   :  { %3335 = vtanh.f32 %v1517_v20 }
  0xb6   :  { %v1676_v23 = vpop.f32.mrf.mxu2  ;;  %v1836_v24 = vpop.f32.mrf.mxu3 }
  0xb7   :  { %v3330_v27 = vpop.eup %3329  ;;  %v1677_v28 = vadd.f32 %v3989_v40, %v1676_v23  ;;  %v1837_v29 = vadd.f32 %v3989_v40, %v1836_v24  ;;  %v1359_v30 = vpop.f32.mrf.mxu0 }
  0xb8   :  { %v1519_v31 = vpop.f32.mrf.mxu1  ;;  %v3332_v34 = vpop.eup %3331  ;;  %2375 = vst [vmem:[%s5412_s3 + $0x410] sm:$0xff] %v3330_v27  ;;  %v1360_v35 = vadd.f32 %v3989_v40, %v1359_v30 }
  0xb9   :  { %v1520_v36 = vadd.f32 %v3989_v40, %v1519_v31  ;;  %v3334_v37 = vpop.eup %3333  ;;  %2439 = vst [vmem:[%s5412_s3 + $0x610] sm:$0xff] %v3332_v34  ;;  %3337 = vtanh.f32 %v1677_v28 }
  0xba   :  { %v3336_v38 = vpop.eup %3335  ;;  %2248 = vst [vmem:[%s5412_s3 + $0x18] sm:$0xff] %v3334_v37  ;;  %3339 = vtanh.f32 %v1837_v29  ;;  %3043 = vmatmul.msk.bf16.gmra.mxu0 %vm951_vm1, %v3171_v25  ;;  %3075 = vmatmul.msk.bf16.gmra.mxu1 %vm951_vm1, %v3203_v26  ;;  %v3237_v25 = vld [vmem:[%s5411_s0 + $0x260] sm:$0xff] }
  0xbb   :  { %2312 = vst [vmem:[%s5412_s3 + $0x218] sm:$0xff] %v3336_v38  ;;  %3341 = vtanh.f32 %v1360_v35  ;;  %3107 = vmatmul.msk.bf16.gmra.mxu2 %vm951_vm1, %v3235_v32  ;;  %3139 = vmatmul.msk.bf16.gmra.mxu3 %vm951_vm1, %v3267_v33  ;;  %v3269_v26 = vld [vmem:[%s5411_s0 + $0x360] sm:$0xff] }
  0xbc   :  { %3343 = vtanh.f32 %v1520_v36 }
  0xbe   :  { %v1679_v39 = vpop.f32.mrf.mxu2  ;;  %v1839_v41 = vpop.f32.mrf.mxu3 }
  0xbf   :  { %v3338_v42 = vpop.eup %3337  ;;  %v1680_v43 = vadd.f32 %v3989_v40, %v1679_v39  ;;  %v1840_v44 = vadd.f32 %v3989_v40, %v1839_v41  ;;  %v1361_v45 = vpop.f32.mrf.mxu0 }
  0xc0   :  { %v1521_v46 = vpop.f32.mrf.mxu1  ;;  %v3340_v47 = vpop.eup %3339  ;;  %2376 = vst [vmem:[%s5412_s3 + $0x418] sm:$0xff] %v3338_v42  ;;  %v1362_v48 = vadd.f32 %v3989_v40, %v1361_v45 }
  0xc1   :  { %v1522_v49 = vadd.f32 %v3989_v40, %v1521_v46  ;;  %v3342_v50 = vpop.eup %3341  ;;  %2440 = vst [vmem:[%s5412_s3 + $0x618] sm:$0xff] %v3340_v47  ;;  %3345 = vtanh.f32 %v1680_v43  ;;  %v3174_v47 = vld [vmem:[%s5411_s0 + $0x68] sm:$0xff] }
  0xc2   :  { %v3344_v51 = vpop.eup %3343  ;;  %2249 = vst [vmem:[%s5412_s3 + $0x20] sm:$0xff] %v3342_v50  ;;  %3347 = vtanh.f32 %v1840_v44 }
  0xc3   :  { %2313 = vst [vmem:[%s5412_s3 + $0x220] sm:$0xff] %v3344_v51  ;;  %3349 = vtanh.f32 %v1362_v48  ;;  %v3206_v48 = vld [vmem:[%s5411_s0 + $0x168] sm:$0xff] }
  0xc4   :  { %3351 = vtanh.f32 %v1522_v49 }
  0xc6   :  { %v1681_v52 = vpop.f32.mrf.mxu2  ;;  %v1841_v53 = vpop.f32.mrf.mxu3 }
  0xc7   :  { %v3346_v56 = vpop.eup %3345  ;;  %v1682_v57 = vadd.f32 %v3989_v40, %v1681_v52  ;;  %v1842_v58 = vadd.f32 %v3989_v40, %v1841_v53  ;;  %v1364_v59 = vpop.f32.mrf.mxu0 }
  0xc8   :  { %v1524_v60 = vpop.f32.mrf.mxu1  ;;  %v3348_v63 = vpop.eup %3347  ;;  %2377 = vst [vmem:[%s5412_s3 + $0x420] sm:$0xff] %v3346_v56  ;;  %v1365_v0 = vadd.f32 %v3989_v40, %v1364_v59 }
  0xc9   :  { %v1525_v1 = vadd.f32 %v3989_v40, %v1524_v60  ;;  %v3350_v2 = vpop.eup %3349  ;;  %2441 = vst [vmem:[%s5412_s3 + $0x620] sm:$0xff] %v3348_v63  ;;  %3353 = vtanh.f32 %v1682_v57 }
  0xca   :  { %v3352_v3 = vpop.eup %3351  ;;  %2250 = vst [vmem:[%s5412_s3 + $0x28] sm:$0xff] %v3350_v2  ;;  %3355 = vtanh.f32 %v1842_v58  ;;  %3044 = vmatmul.msk.bf16.gmra.mxu0 %vm951_vm1, %v3172_v54  ;;  %3076 = vmatmul.msk.bf16.gmra.mxu1 %vm951_vm1, %v3204_v55  ;;  %v3238_v54 = vld [vmem:[%s5411_s0 + $0x268] sm:$0xff] }
  0xcb   :  { %2314 = vst [vmem:[%s5412_s3 + $0x228] sm:$0xff] %v3352_v3  ;;  %3357 = vtanh.f32 %v1365_v0  ;;  %3108 = vmatmul.msk.bf16.gmra.mxu2 %vm951_vm1, %v3236_v61  ;;  %3140 = vmatmul.msk.bf16.gmra.mxu3 %vm951_vm1, %v3268_v62  ;;  %v3270_v55 = vld [vmem:[%s5411_s0 + $0x368] sm:$0xff] }
  0xcc   :  { %3359 = vtanh.f32 %v1525_v1 }
  0xce   :  { %v1684_v4 = vpop.f32.mrf.mxu2  ;;  %v1844_v5 = vpop.f32.mrf.mxu3 }
  0xcf   :  { %v3354_v6 = vpop.eup %3353  ;;  %v1685_v7 = vadd.f32 %v3989_v40, %v1684_v4  ;;  %v1845_v8 = vadd.f32 %v3989_v40, %v1844_v5  ;;  %v1366_v9 = vpop.f32.mrf.mxu0 }
  0xd0   :  { %v1526_v10 = vpop.f32.mrf.mxu1  ;;  %v3356_v11 = vpop.eup %3355  ;;  %2378 = vst [vmem:[%s5412_s3 + $0x428] sm:$0xff] %v3354_v6  ;;  %v1367_v12 = vadd.f32 %v3989_v40, %v1366_v9 }
  0xd1   :  { %v1527_v13 = vadd.f32 %v3989_v40, %v1526_v10  ;;  %v3358_v14 = vpop.eup %3357  ;;  %2442 = vst [vmem:[%s5412_s3 + $0x628] sm:$0xff] %v3356_v11  ;;  %3361 = vtanh.f32 %v1685_v7  ;;  %v3175_v11 = vld [vmem:[%s5411_s0 + $0x70] sm:$0xff] }
  0xd2   :  { %v3360_v15 = vpop.eup %3359  ;;  %2251 = vst [vmem:[%s5412_s3 + $0x30] sm:$0xff] %v3358_v14  ;;  %3363 = vtanh.f32 %v1845_v8 }
  0xd3   :  { %2315 = vst [vmem:[%s5412_s3 + $0x230] sm:$0xff] %v3360_v15  ;;  %3365 = vtanh.f32 %v1367_v12  ;;  %v3207_v12 = vld [vmem:[%s5411_s0 + $0x170] sm:$0xff] }
  0xd4   :  { %3367 = vtanh.f32 %v1527_v13 }
  0xd6   :  { %v1686_v16 = vpop.f32.mrf.mxu2  ;;  %v1846_v17 = vpop.f32.mrf.mxu3 }
  0xd7   :  { %v3362_v20 = vpop.eup %3361  ;;  %v1687_v21 = vadd.f32 %v3989_v40, %v1686_v16  ;;  %v1847_v22 = vadd.f32 %v3989_v40, %v1846_v17  ;;  %v1369_v23 = vpop.f32.mrf.mxu0 }
  0xd8   :  { %v1529_v24 = vpop.f32.mrf.mxu1  ;;  %v3364_v27 = vpop.eup %3363  ;;  %2379 = vst [vmem:[%s5412_s3 + $0x430] sm:$0xff] %v3362_v20  ;;  %v1370_v28 = vadd.f32 %v3989_v40, %v1369_v23 }
  0xd9   :  { %v1530_v29 = vadd.f32 %v3989_v40, %v1529_v24  ;;  %v3366_v30 = vpop.eup %3365  ;;  %2443 = vst [vmem:[%s5412_s3 + $0x630] sm:$0xff] %v3364_v27  ;;  %3369 = vtanh.f32 %v1687_v21 }
  0xda   :  { %v3368_v31 = vpop.eup %3367  ;;  %2252 = vst [vmem:[%s5412_s3 + $0x38] sm:$0xff] %v3366_v30  ;;  %3371 = vtanh.f32 %v1847_v22  ;;  %3045 = vmatmul.msk.bf16.gmra.mxu0 %vm951_vm1, %v3173_v18  ;;  %3077 = vmatmul.msk.bf16.gmra.mxu1 %vm951_vm1, %v3205_v19  ;;  %v3239_v18 = vld [vmem:[%s5411_s0 + $0x270] sm:$0xff] }
  0xdb   :  { %2316 = vst [vmem:[%s5412_s3 + $0x238] sm:$0xff] %v3368_v31  ;;  %3373 = vtanh.f32 %v1370_v28  ;;  %3109 = vmatmul.msk.bf16.gmra.mxu2 %vm951_vm1, %v3237_v25  ;;  %3141 = vmatmul.msk.bf16.gmra.mxu3 %vm951_vm1, %v3269_v26  ;;  %v3271_v19 = vld [vmem:[%s5411_s0 + $0x370] sm:$0xff] }
  0xdc   :  { %3375 = vtanh.f32 %v1530_v29 }
  0xde   :  { %v1689_v32 = vpop.f32.mrf.mxu2  ;;  %v1849_v33 = vpop.f32.mrf.mxu3 }
  0xdf   :  { %v3370_v34 = vpop.eup %3369  ;;  %v1690_v35 = vadd.f32 %v3989_v40, %v1689_v32  ;;  %v1850_v36 = vadd.f32 %v3989_v40, %v1849_v33  ;;  %v1371_v37 = vpop.f32.mrf.mxu0 }
  0xe0   :  { %v1531_v38 = vpop.f32.mrf.mxu1  ;;  %v3372_v39 = vpop.eup %3371  ;;  %2380 = vst [vmem:[%s5412_s3 + $0x438] sm:$0xff] %v3370_v34  ;;  %v1372_v41 = vadd.f32 %v3989_v40, %v1371_v37 }
  0xe1   :  { %v1532_v42 = vadd.f32 %v3989_v40, %v1531_v38  ;;  %v3374_v43 = vpop.eup %3373  ;;  %2444 = vst [vmem:[%s5412_s3 + $0x638] sm:$0xff] %v3372_v39  ;;  %3377 = vtanh.f32 %v1690_v35  ;;  %v3176_v39 = vld [vmem:[%s5411_s0 + $0x78] sm:$0xff] }
  0xe2   :  { %v3376_v44 = vpop.eup %3375  ;;  %2253 = vst [vmem:[%s5412_s3 + $0x40] sm:$0xff] %v3374_v43  ;;  %3379 = vtanh.f32 %v1850_v36 }
  0xe3   :  { %2317 = vst [vmem:[%s5412_s3 + $0x240] sm:$0xff] %v3376_v44  ;;  %3381 = vtanh.f32 %v1372_v41  ;;  %v3208_v41 = vld [vmem:[%s5411_s0 + $0x178] sm:$0xff] }
  0xe4   :  { %3383 = vtanh.f32 %v1532_v42 }
  0xe6   :  { %v1691_v45 = vpop.f32.mrf.mxu2  ;;  %v1851_v46 = vpop.f32.mrf.mxu3 }
  0xe7   :  { %v3378_v49 = vpop.eup %3377  ;;  %v1692_v50 = vadd.f32 %v3989_v40, %v1691_v45  ;;  %v1852_v51 = vadd.f32 %v3989_v40, %v1851_v46  ;;  %v1374_v52 = vpop.f32.mrf.mxu0 }
  0xe8   :  { %v1534_v53 = vpop.f32.mrf.mxu1  ;;  %v3380_v56 = vpop.eup %3379  ;;  %2381 = vst [vmem:[%s5412_s3 + $0x440] sm:$0xff] %v3378_v49  ;;  %v1375_v57 = vadd.f32 %v3989_v40, %v1374_v52 }
  0xe9   :  { %v1535_v58 = vadd.f32 %v3989_v40, %v1534_v53  ;;  %v3382_v59 = vpop.eup %3381  ;;  %2445 = vst [vmem:[%s5412_s3 + $0x640] sm:$0xff] %v3380_v56  ;;  %3385 = vtanh.f32 %v1692_v50 }
  0xea   :  { %v3384_v60 = vpop.eup %3383  ;;  %2254 = vst [vmem:[%s5412_s3 + $0x48] sm:$0xff] %v3382_v59  ;;  %3387 = vtanh.f32 %v1852_v51  ;;  %3046 = vmatmul.msk.bf16.gmra.mxu0 %vm951_vm1, %v3174_v47  ;;  %3078 = vmatmul.msk.bf16.gmra.mxu1 %vm951_vm1, %v3206_v48  ;;  %v3240_v47 = vld [vmem:[%s5411_s0 + $0x278] sm:$0xff] }
  0xeb   :  { %2318 = vst [vmem:[%s5412_s3 + $0x248] sm:$0xff] %v3384_v60  ;;  %3389 = vtanh.f32 %v1375_v57  ;;  %3110 = vmatmul.msk.bf16.gmra.mxu2 %vm951_vm1, %v3238_v54  ;;  %3142 = vmatmul.msk.bf16.gmra.mxu3 %vm951_vm1, %v3270_v55  ;;  %v3272_v48 = vld [vmem:[%s5411_s0 + $0x378] sm:$0xff] }
  0xec   :  { %3391 = vtanh.f32 %v1535_v58 }
  0xee   :  { %v1694_v61 = vpop.f32.mrf.mxu2  ;;  %v1854_v62 = vpop.f32.mrf.mxu3 }
  0xef   :  { %v3386_v63 = vpop.eup %3385  ;;  %v1695_v0 = vadd.f32 %v3989_v40, %v1694_v61  ;;  %v1855_v1 = vadd.f32 %v3989_v40, %v1854_v62  ;;  %v1376_v2 = vpop.f32.mrf.mxu0 }
  0xf0   :  { %v1536_v3 = vpop.f32.mrf.mxu1  ;;  %v3388_v4 = vpop.eup %3387  ;;  %2382 = vst [vmem:[%s5412_s3 + $0x448] sm:$0xff] %v3386_v63  ;;  %v1377_v5 = vadd.f32 %v3989_v40, %v1376_v2 }
  0xf1   :  { %v1537_v6 = vadd.f32 %v3989_v40, %v1536_v3  ;;  %v3390_v7 = vpop.eup %3389  ;;  %2446 = vst [vmem:[%s5412_s3 + $0x648] sm:$0xff] %v3388_v4  ;;  %3393 = vtanh.f32 %v1695_v0  ;;  %v3177_v4 = vld [vmem:[%s5411_s0 + $0x80] sm:$0xff] }
  0xf2   :  { %v3392_v8 = vpop.eup %3391  ;;  %2255 = vst [vmem:[%s5412_s3 + $0x50] sm:$0xff] %v3390_v7  ;;  %3395 = vtanh.f32 %v1855_v1 }
  0xf3   :  { %2319 = vst [vmem:[%s5412_s3 + $0x250] sm:$0xff] %v3392_v8  ;;  %3397 = vtanh.f32 %v1377_v5  ;;  %v3209_v5 = vld [vmem:[%s5411_s0 + $0x180] sm:$0xff] }
  0xf4   :  { %3399 = vtanh.f32 %v1537_v6 }
  0xf6   :  { %v1696_v9 = vpop.f32.mrf.mxu2  ;;  %v1856_v10 = vpop.f32.mrf.mxu3 }
  0xf7   :  { %v3394_v13 = vpop.eup %3393  ;;  %v1697_v14 = vadd.f32 %v3989_v40, %v1696_v9  ;;  %v1857_v15 = vadd.f32 %v3989_v40, %v1856_v10  ;;  %v1379_v16 = vpop.f32.mrf.mxu0 }
  0xf8   :  { %v1539_v17 = vpop.f32.mrf.mxu1  ;;  %v3396_v20 = vpop.eup %3395  ;;  %2383 = vst [vmem:[%s5412_s3 + $0x450] sm:$0xff] %v3394_v13  ;;  %v1380_v21 = vadd.f32 %v3989_v40, %v1379_v16 }
  0xf9   :  { %v1540_v22 = vadd.f32 %v3989_v40, %v1539_v17  ;;  %v3398_v23 = vpop.eup %3397  ;;  %2447 = vst [vmem:[%s5412_s3 + $0x650] sm:$0xff] %v3396_v20  ;;  %3401 = vtanh.f32 %v1697_v14 }
  0xfa   :  { %v3400_v24 = vpop.eup %3399  ;;  %2256 = vst [vmem:[%s5412_s3 + $0x58] sm:$0xff] %v3398_v23  ;;  %3403 = vtanh.f32 %v1857_v15  ;;  %3047 = vmatmul.msk.bf16.gmra.mxu0 %vm951_vm1, %v3175_v11  ;;  %3079 = vmatmul.msk.bf16.gmra.mxu1 %vm951_vm1, %v3207_v12  ;;  %v3241_v11 = vld [vmem:[%s5411_s0 + $0x280] sm:$0xff] }
  0xfb   :  { %2320 = vst [vmem:[%s5412_s3 + $0x258] sm:$0xff] %v3400_v24  ;;  %3405 = vtanh.f32 %v1380_v21  ;;  %3111 = vmatmul.msk.bf16.gmra.mxu2 %vm951_vm1, %v3239_v18  ;;  %3143 = vmatmul.msk.bf16.gmra.mxu3 %vm951_vm1, %v3271_v19  ;;  %v3273_v12 = vld [vmem:[%s5411_s0 + $0x380] sm:$0xff] }
  0xfc   :  { %3407 = vtanh.f32 %v1540_v22 }
  0xfe   :  { %v1699_v25 = vpop.f32.mrf.mxu2  ;;  %v1859_v26 = vpop.f32.mrf.mxu3 }
  0xff   :  { %v3402_v27 = vpop.eup %3401  ;;  %v1700_v28 = vadd.f32 %v3989_v40, %v1699_v25  ;;  %v1860_v29 = vadd.f32 %v3989_v40, %v1859_v26  ;;  %v1381_v30 = vpop.f32.mrf.mxu0 }
 0x100   :  { %v1541_v31 = vpop.f32.mrf.mxu1  ;;  %v3404_v32 = vpop.eup %3403  ;;  %2384 = vst [vmem:[%s5412_s3 + $0x458] sm:$0xff] %v3402_v27  ;;  %v1382_v33 = vadd.f32 %v3989_v40, %v1381_v30 }
 0x101   :  { %v1542_v34 = vadd.f32 %v3989_v40, %v1541_v31  ;;  %v3406_v35 = vpop.eup %3405  ;;  %2448 = vst [vmem:[%s5412_s3 + $0x658] sm:$0xff] %v3404_v32  ;;  %3409 = vtanh.f32 %v1700_v28  ;;  %v3178_v32 = vld [vmem:[%s5411_s0 + $0x88] sm:$0xff] }
 0x102   :  { %v3408_v36 = vpop.eup %3407  ;;  %2257 = vst [vmem:[%s5412_s3 + $0x60] sm:$0xff] %v3406_v35  ;;  %3411 = vtanh.f32 %v1860_v29 }
 0x103   :  { %2321 = vst [vmem:[%s5412_s3 + $0x260] sm:$0xff] %v3408_v36  ;;  %3413 = vtanh.f32 %v1382_v33  ;;  %v3210_v33 = vld [vmem:[%s5411_s0 + $0x188] sm:$0xff] }
 0x104   :  { %3415 = vtanh.f32 %v1542_v34 }
 0x106   :  { %v1701_v37 = vpop.f32.mrf.mxu2  ;;  %v1861_v38 = vpop.f32.mrf.mxu3 }
 0x107   :  { %v3410_v42 = vpop.eup %3409  ;;  %v1702_v43 = vadd.f32 %v3989_v40, %v1701_v37  ;;  %v1862_v44 = vadd.f32 %v3989_v40, %v1861_v38  ;;  %v1384_v45 = vpop.f32.mrf.mxu0 }
 0x108   :  { %v1544_v46 = vpop.f32.mrf.mxu1  ;;  %v3412_v49 = vpop.eup %3411  ;;  %2385 = vst [vmem:[%s5412_s3 + $0x460] sm:$0xff] %v3410_v42  ;;  %v1385_v50 = vadd.f32 %v3989_v40, %v1384_v45 }
 0x109   :  { %v1545_v51 = vadd.f32 %v3989_v40, %v1544_v46  ;;  %v3414_v52 = vpop.eup %3413  ;;  %2449 = vst [vmem:[%s5412_s3 + $0x660] sm:$0xff] %v3412_v49  ;;  %3417 = vtanh.f32 %v1702_v43 }
 0x10a   :  { %v3416_v53 = vpop.eup %3415  ;;  %2258 = vst [vmem:[%s5412_s3 + $0x68] sm:$0xff] %v3414_v52  ;;  %3419 = vtanh.f32 %v1862_v44  ;;  %3048 = vmatmul.msk.bf16.gmra.mxu0 %vm951_vm1, %v3176_v39  ;;  %3080 = vmatmul.msk.bf16.gmra.mxu1 %vm951_vm1, %v3208_v41  ;;  %v3242_v39 = vld [vmem:[%s5411_s0 + $0x288] sm:$0xff] }
 0x10b   :  { %2322 = vst [vmem:[%s5412_s3 + $0x268] sm:$0xff] %v3416_v53  ;;  %3421 = vtanh.f32 %v1385_v50  ;;  %3112 = vmatmul.msk.bf16.gmra.mxu2 %vm951_vm1, %v3240_v47  ;;  %3144 = vmatmul.msk.bf16.gmra.mxu3 %vm951_vm1, %v3272_v48  ;;  %v3274_v41 = vld [vmem:[%s5411_s0 + $0x388] sm:$0xff] }
 0x10c   :  { %3423 = vtanh.f32 %v1545_v51 }
 0x10e   :  { %v1704_v54 = vpop.f32.mrf.mxu2  ;;  %v1864_v55 = vpop.f32.mrf.mxu3 }
 0x10f   :  { %v3418_v56 = vpop.eup %3417  ;;  %v1705_v57 = vadd.f32 %v3989_v40, %v1704_v54  ;;  %v1865_v58 = vadd.f32 %v3989_v40, %v1864_v55  ;;  %v1386_v59 = vpop.f32.mrf.mxu0 }
 0x110   :  { %v1546_v60 = vpop.f32.mrf.mxu1  ;;  %v3420_v61 = vpop.eup %3419  ;;  %2386 = vst [vmem:[%s5412_s3 + $0x468] sm:$0xff] %v3418_v56  ;;  %v1387_v62 = vadd.f32 %v3989_v40, %v1386_v59 }
 0x111   :  { %v1547_v63 = vadd.f32 %v3989_v40, %v1546_v60  ;;  %v3422_v0 = vpop.eup %3421  ;;  %2450 = vst [vmem:[%s5412_s3 + $0x668] sm:$0xff] %v3420_v61  ;;  %3425 = vtanh.f32 %v1705_v57  ;;  %v3179_v61 = vld [vmem:[%s5411_s0 + $0x90] sm:$0xff] }
 0x112   :  { %v3424_v1 = vpop.eup %3423  ;;  %2259 = vst [vmem:[%s5412_s3 + $0x70] sm:$0xff] %v3422_v0  ;;  %3427 = vtanh.f32 %v1865_v58 }
 0x113   :  { %2323 = vst [vmem:[%s5412_s3 + $0x270] sm:$0xff] %v3424_v1  ;;  %3429 = vtanh.f32 %v1387_v62  ;;  %v3211_v62 = vld [vmem:[%s5411_s0 + $0x190] sm:$0xff] }
 0x114   :  { %3431 = vtanh.f32 %v1547_v63 }
 0x116   :  { %v1706_v2 = vpop.f32.mrf.mxu2  ;;  %v1866_v3 = vpop.f32.mrf.mxu3 }
 0x117   :  { %v3426_v6 = vpop.eup %3425  ;;  %v1707_v7 = vadd.f32 %v3989_v40, %v1706_v2  ;;  %v1867_v8 = vadd.f32 %v3989_v40, %v1866_v3  ;;  %v1389_v9 = vpop.f32.mrf.mxu0 }
 0x118   :  { %v1549_v10 = vpop.f32.mrf.mxu1  ;;  %v3428_v13 = vpop.eup %3427  ;;  %2387 = vst [vmem:[%s5412_s3 + $0x470] sm:$0xff] %v3426_v6  ;;  %v1390_v14 = vadd.f32 %v3989_v40, %v1389_v9 }
 0x119   :  { %v1550_v15 = vadd.f32 %v3989_v40, %v1549_v10  ;;  %v3430_v16 = vpop.eup %3429  ;;  %2451 = vst [vmem:[%s5412_s3 + $0x670] sm:$0xff] %v3428_v13  ;;  %3433 = vtanh.f32 %v1707_v7 }
 0x11a   :  { %v3432_v17 = vpop.eup %3431  ;;  %2260 = vst [vmem:[%s5412_s3 + $0x78] sm:$0xff] %v3430_v16  ;;  %3435 = vtanh.f32 %v1867_v8  ;;  %3049 = vmatmul.msk.bf16.gmra.mxu0 %vm951_vm1, %v3177_v4  ;;  %3081 = vmatmul.msk.bf16.gmra.mxu1 %vm951_vm1, %v3209_v5  ;;  %v3243_v4 = vld [vmem:[%s5411_s0 + $0x290] sm:$0xff] }
 0x11b   :  { %2324 = vst [vmem:[%s5412_s3 + $0x278] sm:$0xff] %v3432_v17  ;;  %3437 = vtanh.f32 %v1390_v14  ;;  %3113 = vmatmul.msk.bf16.gmra.mxu2 %vm951_vm1, %v3241_v11  ;;  %3145 = vmatmul.msk.bf16.gmra.mxu3 %vm951_vm1, %v3273_v12  ;;  %v3275_v5 = vld [vmem:[%s5411_s0 + $0x390] sm:$0xff] }
 0x11c   :  { %3439 = vtanh.f32 %v1550_v15 }
 0x11e   :  { %v1709_v18 = vpop.f32.mrf.mxu2  ;;  %v1869_v19 = vpop.f32.mrf.mxu3 }
 0x11f   :  { %v3434_v20 = vpop.eup %3433  ;;  %v1710_v21 = vadd.f32 %v3989_v40, %v1709_v18  ;;  %v1870_v22 = vadd.f32 %v3989_v40, %v1869_v19  ;;  %v1391_v23 = vpop.f32.mrf.mxu0 }
 0x120   :  { %v1551_v24 = vpop.f32.mrf.mxu1  ;;  %v3436_v25 = vpop.eup %3435  ;;  %2388 = vst [vmem:[%s5412_s3 + $0x478] sm:$0xff] %v3434_v20  ;;  %v1392_v26 = vadd.f32 %v3989_v40, %v1391_v23 }
 0x121   :  { %v1552_v27 = vadd.f32 %v3989_v40, %v1551_v24  ;;  %v3438_v28 = vpop.eup %3437  ;;  %2452 = vst [vmem:[%s5412_s3 + $0x678] sm:$0xff] %v3436_v25  ;;  %3441 = vtanh.f32 %v1710_v21  ;;  %v3180_v24 = vld [vmem:[%s5411_s0 + $0x98] sm:$0xff] }
 0x122   :  { %v3440_v29 = vpop.eup %3439  ;;  %2261 = vst [vmem:[%s5412_s3 + $0x80] sm:$0xff] %v3438_v28  ;;  %3443 = vtanh.f32 %v1870_v22  ;;  %v3212_v25 = vld [vmem:[%s5411_s0 + $0x198] sm:$0xff] }
 0x123   :  { %2325 = vst [vmem:[%s5412_s3 + $0x280] sm:$0xff] %v3440_v29  ;;  %3445 = vtanh.f32 %v1392_v26 }
 0x124   :  { %3447 = vtanh.f32 %v1552_v27  ;;  %v4508_v27 = vld [vmem:[%s5410_s2] ss:$0 sm:$0xff] }
 0x126   :  { %v1711_v30 = vpop.f32.mrf.mxu2  ;;  %v1871_v31 = vpop.f32.mrf.mxu3 }
 0x127   :  { %v3442_v34 = vpop.eup %3441  ;;  %v1712_v35 = vadd.f32 %v3989_v40, %v1711_v30  ;;  %v1872_v36 = vadd.f32 %v3989_v40, %v1871_v31  ;;  %v1394_v37 = vpop.f32.mrf.mxu0 }
 0x128   :  { %v1554_v38 = vpop.f32.mrf.mxu1  ;;  %v3444_v42 = vpop.eup %3443  ;;  %2389 = vst [vmem:[%s5412_s3 + $0x480] sm:$0xff] %v3442_v34  ;;  %v1395_v43 = vadd.f32 %v3989_v40, %v1394_v37 }
 0x129   :  { %v1555_v44 = vadd.f32 %v3989_v40, %v1554_v38  ;;  %v3446_v45 = vpop.eup %3445  ;;  %2453 = vst [vmem:[%s5412_s3 + $0x680] sm:$0xff] %v3444_v42  ;;  %3449 = vtanh.f32 %v1712_v35 }
 0x12a   :  { %v3448_v46 = vpop.eup %3447  ;;  %2262 = vst [vmem:[%s5412_s3 + $0x88] sm:$0xff] %v3446_v45  ;;  %3451 = vtanh.f32 %v1872_v36  ;;  %3050 = vmatmul.msk.bf16.gmra.mxu0 %vm951_vm1, %v3178_v32  ;;  %3082 = vmatmul.msk.bf16.gmra.mxu1 %vm951_vm1, %v3210_v33  ;;  %v3244_v32 = vld [vmem:[%s5411_s0 + $0x298] sm:$0xff] }
 0x12b   :  { %2326 = vst [vmem:[%s5412_s3 + $0x288] sm:$0xff] %v3448_v46  ;;  %3453 = vtanh.f32 %v1395_v43  ;;  %3114 = vmatmul.msk.bf16.gmra.mxu2 %vm951_vm1, %v3242_v39  ;;  %3146 = vmatmul.msk.bf16.gmra.mxu3 %vm951_vm1, %v3274_v41  ;;  %v3276_v33 = vld [vmem:[%s5411_s0 + $0x398] sm:$0xff] }
 0x12c   :  { %3455 = vtanh.f32 %v1555_v44 }
 0x12e   :  { %v1714_v47 = vpop.f32.mrf.mxu2  ;;  %v1874_v48 = vpop.f32.mrf.mxu3 }
 0x12f   :  { %v3450_v49 = vpop.eup %3449  ;;  %v1715_v50 = vadd.f32 %v3989_v40, %v1714_v47  ;;  %v1875_v51 = vadd.f32 %v3989_v40, %v1874_v48  ;;  %v1396_v52 = vpop.f32.mrf.mxu0 }
 0x130   :  { %v1556_v53 = vpop.f32.mrf.mxu1  ;;  %v3452_v54 = vpop.eup %3451  ;;  %2390 = vst [vmem:[%s5412_s3 + $0x488] sm:$0xff] %v3450_v49  ;;  %v1397_v55 = vadd.f32 %v3989_v40, %v1396_v52 }
 0x131   :  { %v1557_v56 = vadd.f32 %v3989_v40, %v1556_v53  ;;  %v3454_v57 = vpop.eup %3453  ;;  %2454 = vst [vmem:[%s5412_s3 + $0x688] sm:$0xff] %v3452_v54  ;;  %3457 = vtanh.f32 %v1715_v50  ;;  %v3181_v54 = vld [vmem:[%s5411_s0 + $0xa0] sm:$0xff] }
 0x132   :  { %v3456_v58 = vpop.eup %3455  ;;  %2263 = vst [vmem:[%s5412_s3 + $0x90] sm:$0xff] %v3454_v57  ;;  %3459 = vtanh.f32 %v1875_v51 }
 0x133   :  { %2327 = vst [vmem:[%s5412_s3 + $0x290] sm:$0xff] %v3456_v58  ;;  %3461 = vtanh.f32 %v1397_v55  ;;  %v3213_v55 = vld [vmem:[%s5411_s0 + $0x1a0] sm:$0xff] }
 0x134   :  { %3463 = vtanh.f32 %v1557_v56 }
 0x136   :  { %v1716_v59 = vpop.f32.mrf.mxu2  ;;  %v1876_v60 = vpop.f32.mrf.mxu3 }
 0x137   :  { %v3458_v63 = vpop.eup %3457  ;;  %v1717_v0 = vadd.f32 %v3989_v40, %v1716_v59  ;;  %v1877_v1 = vadd.f32 %v3989_v40, %v1876_v60  ;;  %v1399_v2 = vpop.f32.mrf.mxu0 }
 0x138   :  { %v1559_v3 = vpop.f32.mrf.mxu1  ;;  %v3460_v6 = vpop.eup %3459  ;;  %2391 = vst [vmem:[%s5412_s3 + $0x490] sm:$0xff] %v3458_v63  ;;  %v1400_v7 = vadd.f32 %v3989_v40, %v1399_v2 }
 0x139   :  { %v1560_v8 = vadd.f32 %v3989_v40, %v1559_v3  ;;  %v3462_v9 = vpop.eup %3461  ;;  %2455 = vst [vmem:[%s5412_s3 + $0x690] sm:$0xff] %v3460_v6  ;;  %3465 = vtanh.f32 %v1717_v0 }
 0x13a   :  { %v3464_v10 = vpop.eup %3463  ;;  %2264 = vst [vmem:[%s5412_s3 + $0x98] sm:$0xff] %v3462_v9  ;;  %3467 = vtanh.f32 %v1877_v1  ;;  %3051 = vmatmul.msk.bf16.gmra.mxu0 %vm951_vm1, %v3179_v61  ;;  %3083 = vmatmul.msk.bf16.gmra.mxu1 %vm951_vm1, %v3211_v62  ;;  %v3245_v61 = vld [vmem:[%s5411_s0 + $0x2a0] sm:$0xff] }
 0x13b   :  { %2328 = vst [vmem:[%s5412_s3 + $0x298] sm:$0xff] %v3464_v10  ;;  %3469 = vtanh.f32 %v1400_v7  ;;  %3115 = vmatmul.msk.bf16.gmra.mxu2 %vm951_vm1, %v3243_v4  ;;  %3147 = vmatmul.msk.bf16.gmra.mxu3 %vm951_vm1, %v3275_v5  ;;  %v3277_v62 = vld [vmem:[%s5411_s0 + $0x3a0] sm:$0xff] }
 0x13c   :  { %3471 = vtanh.f32 %v1560_v8 }
 0x13e   :  { %v1719_v11 = vpop.f32.mrf.mxu2  ;;  %v1879_v12 = vpop.f32.mrf.mxu3 }
 0x13f   :  { %v3466_v13 = vpop.eup %3465  ;;  %v1720_v14 = vadd.f32 %v3989_v40, %v1719_v11  ;;  %v1880_v15 = vadd.f32 %v3989_v40, %v1879_v12  ;;  %v1401_v16 = vpop.f32.mrf.mxu0 }
 0x140   :  { %v1561_v17 = vpop.f32.mrf.mxu1  ;;  %v3468_v18 = vpop.eup %3467  ;;  %2392 = vst [vmem:[%s5412_s3 + $0x498] sm:$0xff] %v3466_v13  ;;  %v1402_v19 = vadd.f32 %v3989_v40, %v1401_v16 }
 0x141   :  { %v1562_v20 = vadd.f32 %v3989_v40, %v1561_v17  ;;  %v3470_v21 = vpop.eup %3469  ;;  %2456 = vst [vmem:[%s5412_s3 + $0x698] sm:$0xff] %v3468_v18  ;;  %3473 = vtanh.f32 %v1720_v14  ;;  %v3182_v18 = vld [vmem:[%s5411_s0 + $0xa8] sm:$0xff] }
 0x142   :  { %v3472_v22 = vpop.eup %3471  ;;  %2265 = vst [vmem:[%s5412_s3 + $0xa0] sm:$0xff] %v3470_v21  ;;  %3475 = vtanh.f32 %v1880_v15 }
 0x143   :  { %2329 = vst [vmem:[%s5412_s3 + $0x2a0] sm:$0xff] %v3472_v22  ;;  %3477 = vtanh.f32 %v1402_v19  ;;  %v3214_v19 = vld [vmem:[%s5411_s0 + $0x1a8] sm:$0xff] }
 0x144   :  { %3479 = vtanh.f32 %v1562_v20 }
 0x146   :  { %v1721_v23 = vpop.f32.mrf.mxu2  ;;  %v1881_v40 = vpop.f32.mrf.mxu3 }
 0x147   :  { %v3474_v26 = vpop.eup %3473  ;;  %v1722_v28 = vadd.f32 %v4508_v27, %v1721_v23  ;;  %v1882_v29 = vadd.f32 %v4508_v27, %v1881_v40  ;;  %v1404_v30 = vpop.f32.mrf.mxu0 }
 0x148   :  { %v1564_v31 = vpop.f32.mrf.mxu1  ;;  %v3476_v34 = vpop.eup %3475  ;;  %2393 = vst [vmem:[%s5412_s3 + $0x4a0] sm:$0xff] %v3474_v26  ;;  %v1405_v35 = vadd.f32 %v4508_v27, %v1404_v30 }
 0x149   :  { %v1565_v36 = vadd.f32 %v4508_v27, %v1564_v31  ;;  %v3478_v37 = vpop.eup %3477  ;;  %2457 = vst [vmem:[%s5412_s3 + $0x6a0] sm:$0xff] %v3476_v34  ;;  %3481 = vtanh.f32 %v1722_v28 }
 0x14a   :  { %v3480_v38 = vpop.eup %3479  ;;  %2266 = vst [vmem:[%s5412_s3 + $0xa8] sm:$0xff] %v3478_v37  ;;  %3483 = vtanh.f32 %v1882_v29  ;;  %3052 = vmatmul.msk.bf16.gmra.mxu0 %vm951_vm1, %v3180_v24  ;;  %3084 = vmatmul.msk.bf16.gmra.mxu1 %vm951_vm1, %v3212_v25  ;;  %v3246_v24 = vld [vmem:[%s5411_s0 + $0x2a8] sm:$0xff] }
 0x14b   :  { %2330 = vst [vmem:[%s5412_s3 + $0x2a8] sm:$0xff] %v3480_v38  ;;  %3485 = vtanh.f32 %v1405_v35  ;;  %3116 = vmatmul.msk.bf16.gmra.mxu2 %vm951_vm1, %v3244_v32  ;;  %3148 = vmatmul.msk.bf16.gmra.mxu3 %vm951_vm1, %v3276_v33  ;;  %v3278_v25 = vld [vmem:[%s5411_s0 + $0x3a8] sm:$0xff] }
 0x14c   :  { %3487 = vtanh.f32 %v1565_v36 }
 0x14e   :  { %v1724_v39 = vpop.f32.mrf.mxu2  ;;  %v1884_v41 = vpop.f32.mrf.mxu3 }
 0x14f   :  { %v3482_v42 = vpop.eup %3481  ;;  %v1725_v43 = vadd.f32 %v4508_v27, %v1724_v39  ;;  %v1885_v44 = vadd.f32 %v4508_v27, %v1884_v41  ;;  %v1406_v45 = vpop.f32.mrf.mxu0 }
 0x150   :  { %v1566_v46 = vpop.f32.mrf.mxu1  ;;  %v3484_v47 = vpop.eup %3483  ;;  %2394 = vst [vmem:[%s5412_s3 + $0x4a8] sm:$0xff] %v3482_v42  ;;  %v1407_v48 = vadd.f32 %v4508_v27, %v1406_v45 }
 0x151   :  { %v1567_v49 = vadd.f32 %v4508_v27, %v1566_v46  ;;  %v3486_v50 = vpop.eup %3485  ;;  %2458 = vst [vmem:[%s5412_s3 + $0x6a8] sm:$0xff] %v3484_v47  ;;  %3489 = vtanh.f32 %v1725_v43  ;;  %v3183_v47 = vld [vmem:[%s5411_s0 + $0xb0] sm:$0xff] }
 0x152   :  { %v3488_v51 = vpop.eup %3487  ;;  %2267 = vst [vmem:[%s5412_s3 + $0xb0] sm:$0xff] %v3486_v50  ;;  %3491 = vtanh.f32 %v1885_v44 }
 0x153   :  { %2331 = vst [vmem:[%s5412_s3 + $0x2b0] sm:$0xff] %v3488_v51  ;;  %3493 = vtanh.f32 %v1407_v48  ;;  %v3215_v48 = vld [vmem:[%s5411_s0 + $0x1b0] sm:$0xff] }
 0x154   :  { %3495 = vtanh.f32 %v1567_v49 }
 0x156   :  { %v1726_v52 = vpop.f32.mrf.mxu2  ;;  %v1886_v53 = vpop.f32.mrf.mxu3 }
 0x157   :  { %v3490_v56 = vpop.eup %3489  ;;  %v1727_v57 = vadd.f32 %v4508_v27, %v1726_v52  ;;  %v1887_v58 = vadd.f32 %v4508_v27, %v1886_v53  ;;  %v1409_v59 = vpop.f32.mrf.mxu0 }
 0x158   :  { %v1569_v60 = vpop.f32.mrf.mxu1  ;;  %v3492_v63 = vpop.eup %3491  ;;  %2395 = vst [vmem:[%s5412_s3 + $0x4b0] sm:$0xff] %v3490_v56  ;;  %v1410_v0 = vadd.f32 %v4508_v27, %v1409_v59 }
 0x159   :  { %v1570_v1 = vadd.f32 %v4508_v27, %v1569_v60  ;;  %v3494_v2 = vpop.eup %3493  ;;  %2459 = vst [vmem:[%s5412_s3 + $0x6b0] sm:$0xff] %v3492_v63  ;;  %3497 = vtanh.f32 %v1727_v57 }
 0x15a   :  { %v3496_v3 = vpop.eup %3495  ;;  %2268 = vst [vmem:[%s5412_s3 + $0xb8] sm:$0xff] %v3494_v2  ;;  %3499 = vtanh.f32 %v1887_v58  ;;  %3053 = vmatmul.msk.bf16.gmra.mxu0 %vm951_vm1, %v3181_v54  ;;  %3085 = vmatmul.msk.bf16.gmra.mxu1 %vm951_vm1, %v3213_v55  ;;  %v3247_v54 = vld [vmem:[%s5411_s0 + $0x2b0] sm:$0xff] }
 0x15b   :  { %2332 = vst [vmem:[%s5412_s3 + $0x2b8] sm:$0xff] %v3496_v3  ;;  %3501 = vtanh.f32 %v1410_v0  ;;  %3117 = vmatmul.msk.bf16.gmra.mxu2 %vm951_vm1, %v3245_v61  ;;  %3149 = vmatmul.msk.bf16.gmra.mxu3 %vm951_vm1, %v3277_v62  ;;  %v3279_v55 = vld [vmem:[%s5411_s0 + $0x3b0] sm:$0xff] }
 0x15c   :  { %3503 = vtanh.f32 %v1570_v1 }
 0x15e   :  { %v1729_v4 = vpop.f32.mrf.mxu2  ;;  %v1889_v5 = vpop.f32.mrf.mxu3 }
 0x15f   :  { %v3498_v6 = vpop.eup %3497  ;;  %v1730_v7 = vadd.f32 %v4508_v27, %v1729_v4  ;;  %v1890_v8 = vadd.f32 %v4508_v27, %v1889_v5  ;;  %v1411_v9 = vpop.f32.mrf.mxu0 }
 0x160   :  { %v1571_v10 = vpop.f32.mrf.mxu1  ;;  %v3500_v11 = vpop.eup %3499  ;;  %2396 = vst [vmem:[%s5412_s3 + $0x4b8] sm:$0xff] %v3498_v6  ;;  %v1412_v12 = vadd.f32 %v4508_v27, %v1411_v9 }
 0x161   :  { %v1572_v13 = vadd.f32 %v4508_v27, %v1571_v10  ;;  %v3502_v14 = vpop.eup %3501  ;;  %2460 = vst [vmem:[%s5412_s3 + $0x6b8] sm:$0xff] %v3500_v11  ;;  %3505 = vtanh.f32 %v1730_v7  ;;  %v3184_v11 = vld [vmem:[%s5411_s0 + $0xb8] sm:$0xff] }
 0x162   :  { %v3504_v15 = vpop.eup %3503  ;;  %2269 = vst [vmem:[%s5412_s3 + $0xc0] sm:$0xff] %v3502_v14  ;;  %3507 = vtanh.f32 %v1890_v8 }
 0x163   :  { %2333 = vst [vmem:[%s5412_s3 + $0x2c0] sm:$0xff] %v3504_v15  ;;  %3509 = vtanh.f32 %v1412_v12  ;;  %v3216_v12 = vld [vmem:[%s5411_s0 + $0x1b8] sm:$0xff] }
 0x164   :  { %3511 = vtanh.f32 %v1572_v13 }
 0x166   :  { %v1731_v16 = vpop.f32.mrf.mxu2  ;;  %v1891_v17 = vpop.f32.mrf.mxu3 }
 0x167   :  { %v3506_v20 = vpop.eup %3505  ;;  %v1732_v21 = vadd.f32 %v4508_v27, %v1731_v16  ;;  %v1892_v22 = vadd.f32 %v4508_v27, %v1891_v17  ;;  %v1414_v23 = vpop.f32.mrf.mxu0 }
 0x168   :  { %v1574_v40 = vpop.f32.mrf.mxu1  ;;  %v3508_v26 = vpop.eup %3507  ;;  %2397 = vst [vmem:[%s5412_s3 + $0x4c0] sm:$0xff] %v3506_v20  ;;  %v1415_v28 = vadd.f32 %v4508_v27, %v1414_v23 }
 0x169   :  { %v1575_v29 = vadd.f32 %v4508_v27, %v1574_v40  ;;  %v3510_v30 = vpop.eup %3509  ;;  %2461 = vst [vmem:[%s5412_s3 + $0x6c0] sm:$0xff] %v3508_v26  ;;  %3513 = vtanh.f32 %v1732_v21 }
 0x16a   :  { %v3512_v31 = vpop.eup %3511  ;;  %2270 = vst [vmem:[%s5412_s3 + $0xc8] sm:$0xff] %v3510_v30  ;;  %3515 = vtanh.f32 %v1892_v22  ;;  %3054 = vmatmul.msk.bf16.gmra.mxu0 %vm951_vm1, %v3182_v18  ;;  %3086 = vmatmul.msk.bf16.gmra.mxu1 %vm951_vm1, %v3214_v19  ;;  %v3248_v18 = vld [vmem:[%s5411_s0 + $0x2b8] sm:$0xff] }
 0x16b   :  { %2334 = vst [vmem:[%s5412_s3 + $0x2c8] sm:$0xff] %v3512_v31  ;;  %3517 = vtanh.f32 %v1415_v28  ;;  %3118 = vmatmul.msk.bf16.gmra.mxu2 %vm951_vm1, %v3246_v24  ;;  %3150 = vmatmul.msk.bf16.gmra.mxu3 %vm951_vm1, %v3278_v25  ;;  %v3280_v19 = vld [vmem:[%s5411_s0 + $0x3b8] sm:$0xff] }
 0x16c   :  { %3519 = vtanh.f32 %v1575_v29 }
 0x16e   :  { %v1734_v32 = vpop.f32.mrf.mxu2  ;;  %v1894_v33 = vpop.f32.mrf.mxu3 }
 0x16f   :  { %v3514_v34 = vpop.eup %3513  ;;  %v1735_v35 = vadd.f32 %v4508_v27, %v1734_v32  ;;  %v1895_v36 = vadd.f32 %v4508_v27, %v1894_v33  ;;  %v1416_v37 = vpop.f32.mrf.mxu0 }
 0x170   :  { %v1576_v38 = vpop.f32.mrf.mxu1  ;;  %v3516_v39 = vpop.eup %3515  ;;  %2398 = vst [vmem:[%s5412_s3 + $0x4c8] sm:$0xff] %v3514_v34  ;;  %v1417_v41 = vadd.f32 %v4508_v27, %v1416_v37 }
 0x171   :  { %v1577_v42 = vadd.f32 %v4508_v27, %v1576_v38  ;;  %v3518_v43 = vpop.eup %3517  ;;  %2462 = vst [vmem:[%s5412_s3 + $0x6c8] sm:$0xff] %v3516_v39  ;;  %3521 = vtanh.f32 %v1735_v35  ;;  %v3185_v39 = vld [vmem:[%s5411_s0 + $0xc0] sm:$0xff] }
 0x172   :  { %v3520_v44 = vpop.eup %3519  ;;  %2271 = vst [vmem:[%s5412_s3 + $0xd0] sm:$0xff] %v3518_v43  ;;  %3523 = vtanh.f32 %v1895_v36 }
 0x173   :  { %2335 = vst [vmem:[%s5412_s3 + $0x2d0] sm:$0xff] %v3520_v44  ;;  %3525 = vtanh.f32 %v1417_v41  ;;  %v3217_v41 = vld [vmem:[%s5411_s0 + $0x1c0] sm:$0xff] }
 0x174   :  { %3527 = vtanh.f32 %v1577_v42 }
 0x176   :  { %v1736_v45 = vpop.f32.mrf.mxu2  ;;  %v1896_v46 = vpop.f32.mrf.mxu3 }
 0x177   :  { %v3522_v49 = vpop.eup %3521  ;;  %v1737_v50 = vadd.f32 %v4508_v27, %v1736_v45  ;;  %v1897_v51 = vadd.f32 %v4508_v27, %v1896_v46  ;;  %v1419_v52 = vpop.f32.mrf.mxu0 }
 0x178   :  { %v1579_v53 = vpop.f32.mrf.mxu1  ;;  %v3524_v56 = vpop.eup %3523  ;;  %2399 = vst [vmem:[%s5412_s3 + $0x4d0] sm:$0xff] %v3522_v49  ;;  %v1420_v57 = vadd.f32 %v4508_v27, %v1419_v52 }
 0x179   :  { %v1580_v58 = vadd.f32 %v4508_v27, %v1579_v53  ;;  %v3526_v59 = vpop.eup %3525  ;;  %2463 = vst [vmem:[%s5412_s3 + $0x6d0] sm:$0xff] %v3524_v56  ;;  %3529 = vtanh.f32 %v1737_v50 }
 0x17a   :  { %v3528_v60 = vpop.eup %3527  ;;  %2272 = vst [vmem:[%s5412_s3 + $0xd8] sm:$0xff] %v3526_v59  ;;  %3531 = vtanh.f32 %v1897_v51  ;;  %3055 = vmatmul.msk.bf16.gmra.mxu0 %vm951_vm1, %v3183_v47  ;;  %3087 = vmatmul.msk.bf16.gmra.mxu1 %vm951_vm1, %v3215_v48  ;;  %v3249_v47 = vld [vmem:[%s5411_s0 + $0x2c0] sm:$0xff] }
 0x17b   :  { %2336 = vst [vmem:[%s5412_s3 + $0x2d8] sm:$0xff] %v3528_v60  ;;  %3533 = vtanh.f32 %v1420_v57  ;;  %3119 = vmatmul.msk.bf16.gmra.mxu2 %vm951_vm1, %v3247_v54  ;;  %3151 = vmatmul.msk.bf16.gmra.mxu3 %vm951_vm1, %v3279_v55  ;;  %v3281_v48 = vld [vmem:[%s5411_s0 + $0x3c0] sm:$0xff] }
 0x17c   :  { %3535 = vtanh.f32 %v1580_v58 }
 0x17e   :  { %v1739_v61 = vpop.f32.mrf.mxu2  ;;  %v1899_v62 = vpop.f32.mrf.mxu3 }
 0x17f   :  { %v3530_v63 = vpop.eup %3529  ;;  %v1740_v0 = vadd.f32 %v4508_v27, %v1739_v61  ;;  %v1900_v1 = vadd.f32 %v4508_v27, %v1899_v62  ;;  %v1421_v2 = vpop.f32.mrf.mxu0 }
 0x180   :  { %v1581_v3 = vpop.f32.mrf.mxu1  ;;  %v3532_v4 = vpop.eup %3531  ;;  %2400 = vst [vmem:[%s5412_s3 + $0x4d8] sm:$0xff] %v3530_v63  ;;  %v1422_v5 = vadd.f32 %v4508_v27, %v1421_v2 }
 0x181   :  { %v1582_v6 = vadd.f32 %v4508_v27, %v1581_v3  ;;  %v3534_v7 = vpop.eup %3533  ;;  %2464 = vst [vmem:[%s5412_s3 + $0x6d8] sm:$0xff] %v3532_v4  ;;  %3537 = vtanh.f32 %v1740_v0  ;;  %v3186_v4 = vld [vmem:[%s5411_s0 + $0xc8] sm:$0xff] }
 0x182   :  { %v3536_v8 = vpop.eup %3535  ;;  %2273 = vst [vmem:[%s5412_s3 + $0xe0] sm:$0xff] %v3534_v7  ;;  %3539 = vtanh.f32 %v1900_v1 }
 0x183   :  { %2337 = vst [vmem:[%s5412_s3 + $0x2e0] sm:$0xff] %v3536_v8  ;;  %3541 = vtanh.f32 %v1422_v5  ;;  %v3218_v5 = vld [vmem:[%s5411_s0 + $0x1c8] sm:$0xff] }
 0x184   :  { %3543 = vtanh.f32 %v1582_v6 }
 0x186   :  { %v1741_v9 = vpop.f32.mrf.mxu2  ;;  %v1901_v10 = vpop.f32.mrf.mxu3 }
 0x187   :  { %v3538_v13 = vpop.eup %3537  ;;  %v1742_v14 = vadd.f32 %v4508_v27, %v1741_v9  ;;  %v1902_v15 = vadd.f32 %v4508_v27, %v1901_v10  ;;  %v1424_v16 = vpop.f32.mrf.mxu0 }
 0x188   :  { %v1584_v17 = vpop.f32.mrf.mxu1  ;;  %v3540_v20 = vpop.eup %3539  ;;  %2401 = vst [vmem:[%s5412_s3 + $0x4e0] sm:$0xff] %v3538_v13  ;;  %v1425_v21 = vadd.f32 %v4508_v27, %v1424_v16 }
 0x189   :  { %v1585_v22 = vadd.f32 %v4508_v27, %v1584_v17  ;;  %v3542_v23 = vpop.eup %3541  ;;  %2465 = vst [vmem:[%s5412_s3 + $0x6e0] sm:$0xff] %v3540_v20  ;;  %3545 = vtanh.f32 %v1742_v14 }
 0x18a   :  { %v3544_v40 = vpop.eup %3543  ;;  %2274 = vst [vmem:[%s5412_s3 + $0xe8] sm:$0xff] %v3542_v23  ;;  %3547 = vtanh.f32 %v1902_v15  ;;  %3056 = vmatmul.msk.bf16.gmra.mxu0 %vm951_vm1, %v3184_v11  ;;  %3088 = vmatmul.msk.bf16.gmra.mxu1 %vm951_vm1, %v3216_v12  ;;  %v3250_v11 = vld [vmem:[%s5411_s0 + $0x2c8] sm:$0xff] }
 0x18b   :  { %2338 = vst [vmem:[%s5412_s3 + $0x2e8] sm:$0xff] %v3544_v40  ;;  %3549 = vtanh.f32 %v1425_v21  ;;  %3120 = vmatmul.msk.bf16.gmra.mxu2 %vm951_vm1, %v3248_v18  ;;  %3152 = vmatmul.msk.bf16.gmra.mxu3 %vm951_vm1, %v3280_v19  ;;  %v3282_v12 = vld [vmem:[%s5411_s0 + $0x3c8] sm:$0xff] }
 0x18c   :  { %3551 = vtanh.f32 %v1585_v22 }
 0x18e   :  { %v1744_v24 = vpop.f32.mrf.mxu2  ;;  %v1904_v25 = vpop.f32.mrf.mxu3 }
 0x18f   :  { %v3546_v26 = vpop.eup %3545  ;;  %v1745_v28 = vadd.f32 %v4508_v27, %v1744_v24  ;;  %v1905_v29 = vadd.f32 %v4508_v27, %v1904_v25  ;;  %v1426_v30 = vpop.f32.mrf.mxu0 }
 0x190   :  { %v1586_v31 = vpop.f32.mrf.mxu1  ;;  %v3548_v32 = vpop.eup %3547  ;;  %2402 = vst [vmem:[%s5412_s3 + $0x4e8] sm:$0xff] %v3546_v26  ;;  %v1427_v33 = vadd.f32 %v4508_v27, %v1426_v30 }
 0x191   :  { %v1587_v34 = vadd.f32 %v4508_v27, %v1586_v31  ;;  %v3550_v35 = vpop.eup %3549  ;;  %2466 = vst [vmem:[%s5412_s3 + $0x6e8] sm:$0xff] %v3548_v32  ;;  %3553 = vtanh.f32 %v1745_v28  ;;  %v3187_v32 = vld [vmem:[%s5411_s0 + $0xd0] sm:$0xff] }
 0x192   :  { %v3552_v36 = vpop.eup %3551  ;;  %2275 = vst [vmem:[%s5412_s3 + $0xf0] sm:$0xff] %v3550_v35  ;;  %3555 = vtanh.f32 %v1905_v29 }
 0x193   :  { %2339 = vst [vmem:[%s5412_s3 + $0x2f0] sm:$0xff] %v3552_v36  ;;  %3557 = vtanh.f32 %v1427_v33  ;;  %v3219_v33 = vld [vmem:[%s5411_s0 + $0x1d0] sm:$0xff] }
 0x194   :  { %3559 = vtanh.f32 %v1587_v34 }
 0x196   :  { %v1746_v37 = vpop.f32.mrf.mxu2  ;;  %v1906_v38 = vpop.f32.mrf.mxu3 }
 0x197   :  { %v3554_v42 = vpop.eup %3553  ;;  %v1747_v43 = vadd.f32 %v4508_v27, %v1746_v37  ;;  %v1907_v44 = vadd.f32 %v4508_v27, %v1906_v38  ;;  %v1429_v45 = vpop.f32.mrf.mxu0 }
 0x198   :  { %v1589_v46 = vpop.f32.mrf.mxu1  ;;  %v3556_v49 = vpop.eup %3555  ;;  %2403 = vst [vmem:[%s5412_s3 + $0x4f0] sm:$0xff] %v3554_v42  ;;  %v1430_v50 = vadd.f32 %v4508_v27, %v1429_v45 }
 0x199   :  { %v1590_v51 = vadd.f32 %v4508_v27, %v1589_v46  ;;  %v3558_v52 = vpop.eup %3557  ;;  %2467 = vst [vmem:[%s5412_s3 + $0x6f0] sm:$0xff] %v3556_v49  ;;  %3561 = vtanh.f32 %v1747_v43 }
 0x19a   :  { %v3560_v53 = vpop.eup %3559  ;;  %2276 = vst [vmem:[%s5412_s3 + $0xf8] sm:$0xff] %v3558_v52  ;;  %3563 = vtanh.f32 %v1907_v44  ;;  %3057 = vmatmul.msk.bf16.gmra.mxu0 %vm951_vm1, %v3185_v39  ;;  %3089 = vmatmul.msk.bf16.gmra.mxu1 %vm951_vm1, %v3217_v41  ;;  %v3251_v39 = vld [vmem:[%s5411_s0 + $0x2d0] sm:$0xff] }
 0x19b   :  { %2340 = vst [vmem:[%s5412_s3 + $0x2f8] sm:$0xff] %v3560_v53  ;;  %3565 = vtanh.f32 %v1430_v50  ;;  %3121 = vmatmul.msk.bf16.gmra.mxu2 %vm951_vm1, %v3249_v47  ;;  %3153 = vmatmul.msk.bf16.gmra.mxu3 %vm951_vm1, %v3281_v48  ;;  %v3283_v41 = vld [vmem:[%s5411_s0 + $0x3d0] sm:$0xff] }
 0x19c   :  { %3567 = vtanh.f32 %v1590_v51 }
 0x19e   :  { %v1749_v54 = vpop.f32.mrf.mxu2  ;;  %v1909_v55 = vpop.f32.mrf.mxu3 }
 0x19f   :  { %v3562_v56 = vpop.eup %3561  ;;  %v1750_v57 = vadd.f32 %v4508_v27, %v1749_v54  ;;  %v1910_v58 = vadd.f32 %v4508_v27, %v1909_v55  ;;  %v1431_v59 = vpop.f32.mrf.mxu0 }
 0x1a0   :  { %v1591_v60 = vpop.f32.mrf.mxu1  ;;  %v3564_v61 = vpop.eup %3563  ;;  %2404 = vst [vmem:[%s5412_s3 + $0x4f8] sm:$0xff] %v3562_v56  ;;  %v1432_v62 = vadd.f32 %v4508_v27, %v1431_v59 }
 0x1a1   :  { %v1592_v63 = vadd.f32 %v4508_v27, %v1591_v60  ;;  %v3566_v0 = vpop.eup %3565  ;;  %2468 = vst [vmem:[%s5412_s3 + $0x6f8] sm:$0xff] %v3564_v61  ;;  %3569 = vtanh.f32 %v1750_v57  ;;  %v3188_v61 = vld [vmem:[%s5411_s0 + $0xd8] sm:$0xff] }
 0x1a2   :  { %v3568_v1 = vpop.eup %3567  ;;  %2277 = vst [vmem:[%s5412_s3 + $0x100] sm:$0xff] %v3566_v0  ;;  %3571 = vtanh.f32 %v1910_v58 }
 0x1a3   :  { %2341 = vst [vmem:[%s5412_s3 + $0x300] sm:$0xff] %v3568_v1  ;;  %3573 = vtanh.f32 %v1432_v62  ;;  %v3220_v62 = vld [vmem:[%s5411_s0 + $0x1d8] sm:$0xff] }
 0x1a4   :  { %3575 = vtanh.f32 %v1592_v63 }
 0x1a6   :  { %v1751_v2 = vpop.f32.mrf.mxu2  ;;  %v1911_v3 = vpop.f32.mrf.mxu3 }
 0x1a7   :  { %v3570_v6 = vpop.eup %3569  ;;  %v1752_v7 = vadd.f32 %v4508_v27, %v1751_v2  ;;  %v1912_v8 = vadd.f32 %v4508_v27, %v1911_v3  ;;  %v1434_v9 = vpop.f32.mrf.mxu0 }
 0x1a8   :  { %v1594_v10 = vpop.f32.mrf.mxu1  ;;  %v3572_v13 = vpop.eup %3571  ;;  %2405 = vst [vmem:[%s5412_s3 + $0x500] sm:$0xff] %v3570_v6  ;;  %v1435_v14 = vadd.f32 %v4508_v27, %v1434_v9 }
 0x1a9   :  { %v1595_v15 = vadd.f32 %v4508_v27, %v1594_v10  ;;  %v3574_v16 = vpop.eup %3573  ;;  %2469 = vst [vmem:[%s5412_s3 + $0x700] sm:$0xff] %v3572_v13  ;;  %3577 = vtanh.f32 %v1752_v7 }
 0x1aa   :  { %v3576_v17 = vpop.eup %3575  ;;  %2278 = vst [vmem:[%s5412_s3 + $0x108] sm:$0xff] %v3574_v16  ;;  %3579 = vtanh.f32 %v1912_v8  ;;  %3058 = vmatmul.msk.bf16.gmra.mxu0 %vm951_vm1, %v3186_v4  ;;  %3090 = vmatmul.msk.bf16.gmra.mxu1 %vm951_vm1, %v3218_v5  ;;  %v3252_v4 = vld [vmem:[%s5411_s0 + $0x2d8] sm:$0xff] }
 0x1ab   :  { %2342 = vst [vmem:[%s5412_s3 + $0x308] sm:$0xff] %v3576_v17  ;;  %3581 = vtanh.f32 %v1435_v14  ;;  %3122 = vmatmul.msk.bf16.gmra.mxu2 %vm951_vm1, %v3250_v11  ;;  %3154 = vmatmul.msk.bf16.gmra.mxu3 %vm951_vm1, %v3282_v12  ;;  %v3284_v5 = vld [vmem:[%s5411_s0 + $0x3d8] sm:$0xff] }
 0x1ac   :  { %3583 = vtanh.f32 %v1595_v15 }
 0x1ae   :  { %v1754_v18 = vpop.f32.mrf.mxu2  ;;  %v1914_v19 = vpop.f32.mrf.mxu3 }
 0x1af   :  { %v3578_v20 = vpop.eup %3577  ;;  %v1755_v21 = vadd.f32 %v4508_v27, %v1754_v18  ;;  %v1915_v22 = vadd.f32 %v4508_v27, %v1914_v19  ;;  %v1436_v23 = vpop.f32.mrf.mxu0 }
 0x1b0   :  { %v1596_v40 = vpop.f32.mrf.mxu1  ;;  %v3580_v24 = vpop.eup %3579  ;;  %2406 = vst [vmem:[%s5412_s3 + $0x508] sm:$0xff] %v3578_v20  ;;  %v1437_v25 = vadd.f32 %v4508_v27, %v1436_v23 }
 0x1b1   :  { %v1597_v26 = vadd.f32 %v4508_v27, %v1596_v40  ;;  %v3582_v28 = vpop.eup %3581  ;;  %2470 = vst [vmem:[%s5412_s3 + $0x708] sm:$0xff] %v3580_v24  ;;  %3585 = vtanh.f32 %v1755_v21  ;;  %v3189_v24 = vld [vmem:[%s5411_s0 + $0xe0] sm:$0xff] }
 0x1b2   :  { %v3584_v29 = vpop.eup %3583  ;;  %2279 = vst [vmem:[%s5412_s3 + $0x110] sm:$0xff] %v3582_v28  ;;  %3587 = vtanh.f32 %v1915_v22 }
 0x1b3   :  { %2343 = vst [vmem:[%s5412_s3 + $0x310] sm:$0xff] %v3584_v29  ;;  %3589 = vtanh.f32 %v1437_v25  ;;  %v3221_v25 = vld [vmem:[%s5411_s0 + $0x1e0] sm:$0xff] }
 0x1b4   :  { %3591 = vtanh.f32 %v1597_v26 }
 0x1b6   :  { %v1756_v30 = vpop.f32.mrf.mxu2  ;;  %v1916_v31 = vpop.f32.mrf.mxu3 }
 0x1b7   :  { %v3586_v34 = vpop.eup %3585  ;;  %v1757_v35 = vadd.f32 %v4508_v27, %v1756_v30  ;;  %v1917_v36 = vadd.f32 %v4508_v27, %v1916_v31  ;;  %v1439_v37 = vpop.f32.mrf.mxu0 }
 0x1b8   :  { %v1599_v38 = vpop.f32.mrf.mxu1  ;;  %v3588_v42 = vpop.eup %3587  ;;  %2407 = vst [vmem:[%s5412_s3 + $0x510] sm:$0xff] %v3586_v34  ;;  %v1440_v43 = vadd.f32 %v4508_v27, %v1439_v37 }
 0x1b9   :  { %v1600_v44 = vadd.f32 %v4508_v27, %v1599_v38  ;;  %v3590_v45 = vpop.eup %3589  ;;  %2471 = vst [vmem:[%s5412_s3 + $0x710] sm:$0xff] %v3588_v42  ;;  %3593 = vtanh.f32 %v1757_v35 }
 0x1ba   :  { %v3592_v46 = vpop.eup %3591  ;;  %2280 = vst [vmem:[%s5412_s3 + $0x118] sm:$0xff] %v3590_v45  ;;  %3595 = vtanh.f32 %v1917_v36  ;;  %3059 = vmatmul.msk.bf16.gmra.mxu0 %vm951_vm1, %v3187_v32  ;;  %3091 = vmatmul.msk.bf16.gmra.mxu1 %vm951_vm1, %v3219_v33  ;;  %v3253_v32 = vld [vmem:[%s5411_s0 + $0x2e0] sm:$0xff] }
 0x1bb   :  { %2344 = vst [vmem:[%s5412_s3 + $0x318] sm:$0xff] %v3592_v46  ;;  %3597 = vtanh.f32 %v1440_v43  ;;  %3123 = vmatmul.msk.bf16.gmra.mxu2 %vm951_vm1, %v3251_v39  ;;  %3155 = vmatmul.msk.bf16.gmra.mxu3 %vm951_vm1, %v3283_v41  ;;  %v3285_v33 = vld [vmem:[%s5411_s0 + $0x3e0] sm:$0xff] }
 0x1bc   :  { %3599 = vtanh.f32 %v1600_v44 }
 0x1be   :  { %v1759_v47 = vpop.f32.mrf.mxu2  ;;  %v1919_v48 = vpop.f32.mrf.mxu3 }
 0x1bf   :  { %v3594_v49 = vpop.eup %3593  ;;  %v1760_v50 = vadd.f32 %v4508_v27, %v1759_v47  ;;  %v1920_v51 = vadd.f32 %v4508_v27, %v1919_v48  ;;  %v1441_v52 = vpop.f32.mrf.mxu0 }
 0x1c0   :  { %v1601_v53 = vpop.f32.mrf.mxu1  ;;  %v3596_v54 = vpop.eup %3595  ;;  %2408 = vst [vmem:[%s5412_s3 + $0x518] sm:$0xff] %v3594_v49  ;;  %v1442_v55 = vadd.f32 %v4508_v27, %v1441_v52 }
 0x1c1   :  { %v1602_v56 = vadd.f32 %v4508_v27, %v1601_v53  ;;  %v3598_v57 = vpop.eup %3597  ;;  %2472 = vst [vmem:[%s5412_s3 + $0x718] sm:$0xff] %v3596_v54  ;;  %3601 = vtanh.f32 %v1760_v50  ;;  %v3190_v54 = vld [vmem:[%s5411_s0 + $0xe8] sm:$0xff] }
 0x1c2   :  { %v3600_v58 = vpop.eup %3599  ;;  %2281 = vst [vmem:[%s5412_s3 + $0x120] sm:$0xff] %v3598_v57  ;;  %3603 = vtanh.f32 %v1920_v51 }
 0x1c3   :  { %2345 = vst [vmem:[%s5412_s3 + $0x320] sm:$0xff] %v3600_v58  ;;  %3605 = vtanh.f32 %v1442_v55  ;;  %v3222_v55 = vld [vmem:[%s5411_s0 + $0x1e8] sm:$0xff] }
 0x1c4   :  { %3607 = vtanh.f32 %v1602_v56 }
 0x1c6   :  { %v1761_v59 = vpop.f32.mrf.mxu2  ;;  %v1921_v60 = vpop.f32.mrf.mxu3 }
 0x1c7   :  { %v3602_v63 = vpop.eup %3601  ;;  %v1762_v0 = vadd.f32 %v4508_v27, %v1761_v59  ;;  %v1922_v1 = vadd.f32 %v4508_v27, %v1921_v60  ;;  %v1444_v2 = vpop.f32.mrf.mxu0 }
 0x1c8   :  { %v1604_v3 = vpop.f32.mrf.mxu1  ;;  %v3604_v6 = vpop.eup %3603  ;;  %2409 = vst [vmem:[%s5412_s3 + $0x520] sm:$0xff] %v3602_v63  ;;  %v1445_v7 = vadd.f32 %v4508_v27, %v1444_v2 }
 0x1c9   :  { %v1605_v8 = vadd.f32 %v4508_v27, %v1604_v3  ;;  %v3606_v9 = vpop.eup %3605  ;;  %2473 = vst [vmem:[%s5412_s3 + $0x720] sm:$0xff] %v3604_v6  ;;  %3609 = vtanh.f32 %v1762_v0 }
 0x1ca   :  { %v3608_v10 = vpop.eup %3607  ;;  %2282 = vst [vmem:[%s5412_s3 + $0x128] sm:$0xff] %v3606_v9  ;;  %3611 = vtanh.f32 %v1922_v1  ;;  %3060 = vmatmul.msk.bf16.gmra.mxu0 %vm951_vm1, %v3188_v61  ;;  %3092 = vmatmul.msk.bf16.gmra.mxu1 %vm951_vm1, %v3220_v62  ;;  %v3254_v61 = vld [vmem:[%s5411_s0 + $0x2e8] sm:$0xff] }
 0x1cb   :  { %2346 = vst [vmem:[%s5412_s3 + $0x328] sm:$0xff] %v3608_v10  ;;  %3613 = vtanh.f32 %v1445_v7  ;;  %3124 = vmatmul.msk.bf16.gmra.mxu2 %vm951_vm1, %v3252_v4  ;;  %3156 = vmatmul.msk.bf16.gmra.mxu3 %vm951_vm1, %v3284_v5  ;;  %v3286_v62 = vld [vmem:[%s5411_s0 + $0x3e8] sm:$0xff] }
 0x1cc   :  { %3615 = vtanh.f32 %v1605_v8 }
 0x1ce   :  { %v1764_v11 = vpop.f32.mrf.mxu2  ;;  %v1924_v12 = vpop.f32.mrf.mxu3 }
 0x1cf   :  { %v3610_v13 = vpop.eup %3609  ;;  %v1765_v14 = vadd.f32 %v4508_v27, %v1764_v11  ;;  %v1925_v15 = vadd.f32 %v4508_v27, %v1924_v12  ;;  %v1446_v16 = vpop.f32.mrf.mxu0  ;;  %v5024_v12 = vld [vmem:[%s5410_s2] ss:$0 sm:$0xff] }
 0x1d0   :  { %v1606_v17 = vpop.f32.mrf.mxu1  ;;  %v3612_v18 = vpop.eup %3611  ;;  %2410 = vst [vmem:[%s5412_s3 + $0x528] sm:$0xff] %v3610_v13  ;;  %v1447_v19 = vadd.f32 %v4508_v27, %v1446_v16 }
 0x1d1   :  { %v1607_v20 = vadd.f32 %v4508_v27, %v1606_v17  ;;  %v3614_v21 = vpop.eup %3613  ;;  %2474 = vst [vmem:[%s5412_s3 + $0x728] sm:$0xff] %v3612_v18  ;;  %3617 = vtanh.f32 %v1765_v14  ;;  %v3191_v18 = vld [vmem:[%s5411_s0 + $0xf0] sm:$0xff] }
 0x1d2   :  { %v3616_v22 = vpop.eup %3615  ;;  %2283 = vst [vmem:[%s5412_s3 + $0x130] sm:$0xff] %v3614_v21  ;;  %3619 = vtanh.f32 %v1925_v15 }
 0x1d3   :  { %2347 = vst [vmem:[%s5412_s3 + $0x330] sm:$0xff] %v3616_v22  ;;  %3621 = vtanh.f32 %v1447_v19  ;;  %v3223_v19 = vld [vmem:[%s5411_s0 + $0x1f0] sm:$0xff] }
 0x1d4   :  { %3623 = vtanh.f32 %v1607_v20 }
 0x1d6   :  { %v1766_v23 = vpop.f32.mrf.mxu2  ;;  %v1926_v40 = vpop.f32.mrf.mxu3 }
 0x1d7   :  { %v3618_v26 = vpop.eup %3617  ;;  %v1767_v28 = vadd.f32 %v4508_v27, %v1766_v23  ;;  %v1927_v29 = vadd.f32 %v4508_v27, %v1926_v40  ;;  %v1449_v30 = vpop.f32.mrf.mxu0 }
 0x1d8   :  { %v1609_v31 = vpop.f32.mrf.mxu1  ;;  %v3620_v34 = vpop.eup %3619  ;;  %2411 = vst [vmem:[%s5412_s3 + $0x530] sm:$0xff] %v3618_v26  ;;  %v1450_v35 = vadd.f32 %v4508_v27, %v1449_v30 }
 0x1d9   :  { %v1610_v36 = vadd.f32 %v4508_v27, %v1609_v31  ;;  %v3622_v37 = vpop.eup %3621  ;;  %2475 = vst [vmem:[%s5412_s3 + $0x730] sm:$0xff] %v3620_v34  ;;  %3625 = vtanh.f32 %v1767_v28 }
 0x1da   :  { %v3624_v38 = vpop.eup %3623  ;;  %2284 = vst [vmem:[%s5412_s3 + $0x138] sm:$0xff] %v3622_v37  ;;  %3627 = vtanh.f32 %v1927_v29  ;;  %3061 = vmatmul.msk.bf16.gmra.mxu0 %vm951_vm1, %v3189_v24  ;;  %3093 = vmatmul.msk.bf16.gmra.mxu1 %vm951_vm1, %v3221_v25  ;;  %v3255_v24 = vld [vmem:[%s5411_s0 + $0x2f0] sm:$0xff] }
 0x1db   :  { %2348 = vst [vmem:[%s5412_s3 + $0x338] sm:$0xff] %v3624_v38  ;;  %3629 = vtanh.f32 %v1450_v35  ;;  %3125 = vmatmul.msk.bf16.gmra.mxu2 %vm951_vm1, %v3253_v32  ;;  %3157 = vmatmul.msk.bf16.gmra.mxu3 %vm951_vm1, %v3285_v33  ;;  %v3287_v25 = vld [vmem:[%s5411_s0 + $0x3f0] sm:$0xff] }
 0x1dc   :  { %3631 = vtanh.f32 %v1610_v36 }
 0x1de   :  { %v1769_v39 = vpop.f32.mrf.mxu2  ;;  %v1929_v41 = vpop.f32.mrf.mxu3 }
 0x1df   :  { %v3626_v42 = vpop.eup %3625  ;;  %v1770_v43 = vadd.f32 %v4508_v27, %v1769_v39  ;;  %v1930_v44 = vadd.f32 %v4508_v27, %v1929_v41  ;;  %v1451_v45 = vpop.f32.mrf.mxu0 }
 0x1e0   :  { %v1611_v46 = vpop.f32.mrf.mxu1  ;;  %v3628_v47 = vpop.eup %3627  ;;  %2412 = vst [vmem:[%s5412_s3 + $0x538] sm:$0xff] %v3626_v42  ;;  %v1452_v48 = vadd.f32 %v4508_v27, %v1451_v45 }
 0x1e1   :  { %v1612_v49 = vadd.f32 %v4508_v27, %v1611_v46  ;;  %v3630_v50 = vpop.eup %3629  ;;  %2476 = vst [vmem:[%s5412_s3 + $0x738] sm:$0xff] %v3628_v47  ;;  %3633 = vtanh.f32 %v1770_v43  ;;  %v3192_v47 = vld [vmem:[%s5411_s0 + $0xf8] sm:$0xff] }
 0x1e2   :  { %v3632_v51 = vpop.eup %3631  ;;  %2285 = vst [vmem:[%s5412_s3 + $0x140] sm:$0xff] %v3630_v50  ;;  %3635 = vtanh.f32 %v1930_v44 }
 0x1e3   :  { %2349 = vst [vmem:[%s5412_s3 + $0x340] sm:$0xff] %v3632_v51  ;;  %3637 = vtanh.f32 %v1452_v48  ;;  %v3224_v48 = vld [vmem:[%s5411_s0 + $0x1f8] sm:$0xff] }
 0x1e4   :  { %3639 = vtanh.f32 %v1612_v49 }
 0x1e6   :  { %v1771_v52 = vpop.f32.mrf.mxu2  ;;  %v1931_v53 = vpop.f32.mrf.mxu3 }
 0x1e7   :  { %v3634_v56 = vpop.eup %3633  ;;  %v1772_v57 = vadd.f32 %v4508_v27, %v1771_v52  ;;  %v1932_v58 = vadd.f32 %v4508_v27, %v1931_v53  ;;  %v1454_v59 = vpop.f32.mrf.mxu0 }
 0x1e8   :  { %v1614_v60 = vpop.f32.mrf.mxu1  ;;  %v3636_v63 = vpop.eup %3635  ;;  %2413 = vst [vmem:[%s5412_s3 + $0x540] sm:$0xff] %v3634_v56  ;;  %v1455_v0 = vadd.f32 %v4508_v27, %v1454_v59 }
 0x1e9   :  { %v1615_v1 = vadd.f32 %v4508_v27, %v1614_v60  ;;  %v3638_v2 = vpop.eup %3637  ;;  %2477 = vst [vmem:[%s5412_s3 + $0x740] sm:$0xff] %v3636_v63  ;;  %3641 = vtanh.f32 %v1772_v57 }
 0x1ea   :  { %v3640_v3 = vpop.eup %3639  ;;  %2286 = vst [vmem:[%s5412_s3 + $0x148] sm:$0xff] %v3638_v2  ;;  %3643 = vtanh.f32 %v1932_v58  ;;  %3062 = vmatmul.msk.bf16.gmra.mxu0 %vm951_vm1, %v3190_v54  ;;  %3094 = vmatmul.msk.bf16.gmra.mxu1 %vm951_vm1, %v3222_v55  ;;  %v3256_v54 = vld [vmem:[%s5411_s0 + $0x2f8] sm:$0xff] }
 0x1eb   :  { %2350 = vst [vmem:[%s5412_s3 + $0x348] sm:$0xff] %v3640_v3  ;;  %3645 = vtanh.f32 %v1455_v0  ;;  %3126 = vmatmul.msk.bf16.gmra.mxu2 %vm951_vm1, %v3254_v61  ;;  %3158 = vmatmul.msk.bf16.gmra.mxu3 %vm951_vm1, %v3286_v62  ;;  %v3288_v55 = vld [vmem:[%s5411_s0 + $0x3f8] sm:$0xff] }
 0x1ec   :  { %3647 = vtanh.f32 %v1615_v1 }
 0x1ee   :  { %v1774_v4 = vpop.f32.mrf.mxu2  ;;  %v1934_v5 = vpop.f32.mrf.mxu3 }
 0x1ef   :  { %v3642_v6 = vpop.eup %3641  ;;  %v1775_v7 = vadd.f32 %v4508_v27, %v1774_v4  ;;  %v1935_v8 = vadd.f32 %v4508_v27, %v1934_v5  ;;  %v1456_v9 = vpop.f32.mrf.mxu0 }
 0x1f0   :  { %v1616_v10 = vpop.f32.mrf.mxu1  ;;  %v3644_v11 = vpop.eup %3643  ;;  %2414 = vst [vmem:[%s5412_s3 + $0x548] sm:$0xff] %v3642_v6  ;;  %v1457_v13 = vadd.f32 %v5024_v12, %v1456_v9 }
 0x1f1   :  { %v1617_v14 = vadd.f32 %v5024_v12, %v1616_v10  ;;  %v3646_v15 = vpop.eup %3645  ;;  %2478 = vst [vmem:[%s5412_s3 + $0x748] sm:$0xff] %v3644_v11  ;;  %3649 = vtanh.f32 %v1775_v7 }
 0x1f2   :  { %v3648_v27 = vpop.eup %3647  ;;  %2287 = vst [vmem:[%s5412_s3 + $0x150] sm:$0xff] %v3646_v15  ;;  %3651 = vtanh.f32 %v1935_v8 }
 0x1f3   :  { %2351 = vst [vmem:[%s5412_s3 + $0x350] sm:$0xff] %v3648_v27  ;;  %3653 = vtanh.f32 %v1457_v13 }
 0x1f4   :  { %3655 = vtanh.f32 %v1617_v14 }
 0x1f6   :  { %v1776_v16 = vpop.f32.mrf.mxu2  ;;  %v1936_v17 = vpop.f32.mrf.mxu3 }
 0x1f7   :  { %v3650_v20 = vpop.eup %3649  ;;  %v1777_v21 = vadd.f32 %v5024_v12, %v1776_v16  ;;  %v1937_v22 = vadd.f32 %v5024_v12, %v1936_v17  ;;  %v1459_v23 = vpop.f32.mrf.mxu0 }
 0x1f8   :  { %v1619_v40 = vpop.f32.mrf.mxu1  ;;  %v3652_v26 = vpop.eup %3651  ;;  %2415 = vst [vmem:[%s5412_s3 + $0x550] sm:$0xff] %v3650_v20  ;;  %v1460_v28 = vadd.f32 %v5024_v12, %v1459_v23 }
 0x1f9   :  { %v1620_v29 = vadd.f32 %v5024_v12, %v1619_v40  ;;  %v3654_v30 = vpop.eup %3653  ;;  %2479 = vst [vmem:[%s5412_s3 + $0x750] sm:$0xff] %v3652_v26  ;;  %3657 = vtanh.f32 %v1777_v21 }
 0x1fa   :  { %v3656_v31 = vpop.eup %3655  ;;  %2288 = vst [vmem:[%s5412_s3 + $0x158] sm:$0xff] %v3654_v30  ;;  %3659 = vtanh.f32 %v1937_v22  ;;  %3063 = vmatmul.msk.bf16.gmra.mxu0 %vm951_vm1, %v3191_v18  ;;  %3095 = vmatmul.msk.bf16.gmra.mxu1 %vm951_vm1, %v3223_v19 }
 0x1fb   :  { %2352 = vst [vmem:[%s5412_s3 + $0x358] sm:$0xff] %v3656_v31  ;;  %3661 = vtanh.f32 %v1460_v28  ;;  %3127 = vmatmul.msk.bf16.gmra.mxu2 %vm951_vm1, %v3255_v24  ;;  %3159 = vmatmul.msk.bf16.gmra.mxu3 %vm951_vm1, %v3287_v25 }
 0x1fc   :  { %3663 = vtanh.f32 %v1620_v29 }
 0x1fe   :  { %v1779_v32 = vpop.f32.mrf.mxu2  ;;  %v1939_v33 = vpop.f32.mrf.mxu3 }
 0x1ff   :  { %v3658_v34 = vpop.eup %3657  ;;  %v1780_v35 = vadd.f32 %v5024_v12, %v1779_v32  ;;  %v1940_v36 = vadd.f32 %v5024_v12, %v1939_v33  ;;  %v1461_v37 = vpop.f32.mrf.mxu0 }
 0x200   :  { %v1621_v38 = vpop.f32.mrf.mxu1  ;;  %v3660_v39 = vpop.eup %3659  ;;  %2416 = vst [vmem:[%s5412_s3 + $0x558] sm:$0xff] %v3658_v34  ;;  %v1462_v41 = vadd.f32 %v5024_v12, %v1461_v37 }
 0x201   :  { %v1622_v42 = vadd.f32 %v5024_v12, %v1621_v38  ;;  %v3662_v43 = vpop.eup %3661  ;;  %2480 = vst [vmem:[%s5412_s3 + $0x758] sm:$0xff] %v3660_v39  ;;  %3665 = vtanh.f32 %v1780_v35 }
 0x202   :  { %v3664_v44 = vpop.eup %3663  ;;  %2289 = vst [vmem:[%s5412_s3 + $0x160] sm:$0xff] %v3662_v43  ;;  %3667 = vtanh.f32 %v1940_v36 }
 0x203   :  { %2353 = vst [vmem:[%s5412_s3 + $0x360] sm:$0xff] %v3664_v44  ;;  %3669 = vtanh.f32 %v1462_v41 }
 0x204   :  { %3671 = vtanh.f32 %v1622_v42 }
 0x206   :  { %v1781_v45 = vpop.f32.mrf.mxu2  ;;  %v1941_v46 = vpop.f32.mrf.mxu3 }
 0x207   :  { %v3666_v49 = vpop.eup %3665  ;;  %v1782_v50 = vadd.f32 %v5024_v12, %v1781_v45  ;;  %v1942_v51 = vadd.f32 %v5024_v12, %v1941_v46  ;;  %v1464_v52 = vpop.f32.mrf.mxu0 }
 0x208   :  { %v1624_v53 = vpop.f32.mrf.mxu1  ;;  %v3668_v56 = vpop.eup %3667  ;;  %2417 = vst [vmem:[%s5412_s3 + $0x560] sm:$0xff] %v3666_v49  ;;  %v1465_v57 = vadd.f32 %v5024_v12, %v1464_v52 }
 0x209   :  { %v1625_v58 = vadd.f32 %v5024_v12, %v1624_v53  ;;  %v3670_v59 = vpop.eup %3669  ;;  %2481 = vst [vmem:[%s5412_s3 + $0x760] sm:$0xff] %v3668_v56  ;;  %3673 = vtanh.f32 %v1782_v50 }
 0x20a   :  { %v3672_v60 = vpop.eup %3671  ;;  %2290 = vst [vmem:[%s5412_s3 + $0x168] sm:$0xff] %v3670_v59  ;;  %3675 = vtanh.f32 %v1942_v51  ;;  %3064 = vmatmul.msk.bf16.gmra.mxu0 %vm951_vm1, %v3192_v47  ;;  %3096 = vmatmul.msk.bf16.gmra.mxu1 %vm951_vm1, %v3224_v48 }
 0x20b   :  { %2354 = vst [vmem:[%s5412_s3 + $0x368] sm:$0xff] %v3672_v60  ;;  %3677 = vtanh.f32 %v1465_v57  ;;  %3128 = vmatmul.msk.bf16.gmra.mxu2 %vm951_vm1, %v3256_v54  ;;  %3160 = vmatmul.msk.bf16.gmra.mxu3 %vm951_vm1, %v3288_v55 }
 0x20c   :  { %3679 = vtanh.f32 %v1625_v58 }
 0x20e   :  { %v1784_v61 = vpop.f32.mrf.mxu2  ;;  %v1944_v62 = vpop.f32.mrf.mxu3 }
 0x20f   :  { %v3674_v63 = vpop.eup %3673  ;;  %v1785_v0 = vadd.f32 %v5024_v12, %v1784_v61  ;;  %v1945_v1 = vadd.f32 %v5024_v12, %v1944_v62  ;;  %v1466_v2 = vpop.f32.mrf.mxu0 }
 0x210   :  { %v1626_v3 = vpop.f32.mrf.mxu1  ;;  %v3676_v4 = vpop.eup %3675  ;;  %2418 = vst [vmem:[%s5412_s3 + $0x568] sm:$0xff] %v3674_v63  ;;  %v1467_v5 = vadd.f32 %v5024_v12, %v1466_v2 }
 0x211   :  { %v1627_v6 = vadd.f32 %v5024_v12, %v1626_v3  ;;  %v3678_v7 = vpop.eup %3677  ;;  %2482 = vst [vmem:[%s5412_s3 + $0x768] sm:$0xff] %v3676_v4  ;;  %3681 = vtanh.f32 %v1785_v0 }
 0x212   :  { %v3680_v8 = vpop.eup %3679  ;;  %2291 = vst [vmem:[%s5412_s3 + $0x170] sm:$0xff] %v3678_v7  ;;  %3683 = vtanh.f32 %v1945_v1 }
 0x213   :  { %2355 = vst [vmem:[%s5412_s3 + $0x370] sm:$0xff] %v3680_v8  ;;  %3685 = vtanh.f32 %v1467_v5 }
 0x214   :  { %3687 = vtanh.f32 %v1627_v6 }
 0x216   :  { %v1786_v9 = vpop.f32.mrf.mxu2  ;;  %v1946_v10 = vpop.f32.mrf.mxu3 }
 0x217   :  { %v3682_v11 = vpop.eup %3681  ;;  %v1787_v13 = vadd.f32 %v5024_v12, %v1786_v9  ;;  %v1947_v14 = vadd.f32 %v5024_v12, %v1946_v10  ;;  %v1469_v15 = vpop.f32.mrf.mxu0 }
 0x218   :  { %v1629_v27 = vpop.f32.mrf.mxu1  ;;  %v3684_v16 = vpop.eup %3683  ;;  %2419 = vst [vmem:[%s5412_s3 + $0x570] sm:$0xff] %v3682_v11  ;;  %v1470_v17 = vadd.f32 %v5024_v12, %v1469_v15 }
 0x219   :  { %v1630_v18 = vadd.f32 %v5024_v12, %v1629_v27  ;;  %v3686_v19 = vpop.eup %3685  ;;  %2483 = vst [vmem:[%s5412_s3 + $0x770] sm:$0xff] %v3684_v16  ;;  %3689 = vtanh.f32 %v1787_v13 }
 0x21a   :  { %v3688_v20 = vpop.eup %3687  ;;  %2292 = vst [vmem:[%s5412_s3 + $0x178] sm:$0xff] %v3686_v19  ;;  %3691 = vtanh.f32 %v1947_v14 }
 0x21b   :  { %2356 = vst [vmem:[%s5412_s3 + $0x378] sm:$0xff] %v3688_v20  ;;  %3693 = vtanh.f32 %v1470_v17 }
 0x21c   :  { %3695 = vtanh.f32 %v1630_v18 }
 0x21e   :  { %v1789_v21 = vpop.f32.mrf.mxu2  ;;  %v1949_v22 = vpop.f32.mrf.mxu3 }
 0x21f   :  { %v3690_v23 = vpop.eup %3689  ;;  %v1790_v40 = vadd.f32 %v5024_v12, %v1789_v21  ;;  %v1950_v24 = vadd.f32 %v5024_v12, %v1949_v22  ;;  %v1471_v25 = vpop.f32.mrf.mxu0 }
 0x220   :  { %v1631_v26 = vpop.f32.mrf.mxu1  ;;  %v3692_v28 = vpop.eup %3691  ;;  %2420 = vst [vmem:[%s5412_s3 + $0x578] sm:$0xff] %v3690_v23  ;;  %v1472_v29 = vadd.f32 %v5024_v12, %v1471_v25 }
 0x221   :  { %v1632_v30 = vadd.f32 %v5024_v12, %v1631_v26  ;;  %v3694_v31 = vpop.eup %3693  ;;  %2484 = vst [vmem:[%s5412_s3 + $0x778] sm:$0xff] %v3692_v28  ;;  %3697 = vtanh.f32 %v1790_v40 }
 0x222   :  { %v3696_v32 = vpop.eup %3695  ;;  %2293 = vst [vmem:[%s5412_s3 + $0x180] sm:$0xff] %v3694_v31  ;;  %3699 = vtanh.f32 %v1950_v24 }
 0x223   :  { %2357 = vst [vmem:[%s5412_s3 + $0x380] sm:$0xff] %v3696_v32  ;;  %3701 = vtanh.f32 %v1472_v29 }
 0x224   :  { %3703 = vtanh.f32 %v1632_v30 }
 0x226   :  { %v1791_v33 = vpop.f32.mrf.mxu2  ;;  %v1951_v34 = vpop.f32.mrf.mxu3 }
 0x227   :  { %v3698_v35 = vpop.eup %3697  ;;  %v1792_v36 = vadd.f32 %v5024_v12, %v1791_v33  ;;  %v1952_v37 = vadd.f32 %v5024_v12, %v1951_v34  ;;  %v1474_v38 = vpop.f32.mrf.mxu0 }
 0x228   :  { %v1634_v39 = vpop.f32.mrf.mxu1  ;;  %v3700_v41 = vpop.eup %3699  ;;  %2421 = vst [vmem:[%s5412_s3 + $0x580] sm:$0xff] %v3698_v35  ;;  %v1475_v42 = vadd.f32 %v5024_v12, %v1474_v38 }
 0x229   :  { %v1635_v43 = vadd.f32 %v5024_v12, %v1634_v39  ;;  %v3702_v44 = vpop.eup %3701  ;;  %2485 = vst [vmem:[%s5412_s3 + $0x780] sm:$0xff] %v3700_v41  ;;  %3705 = vtanh.f32 %v1792_v36 }
 0x22a   :  { %v3704_v45 = vpop.eup %3703  ;;  %2294 = vst [vmem:[%s5412_s3 + $0x188] sm:$0xff] %v3702_v44  ;;  %3707 = vtanh.f32 %v1952_v37 }
 0x22b   :  { %2358 = vst [vmem:[%s5412_s3 + $0x388] sm:$0xff] %v3704_v45  ;;  %3709 = vtanh.f32 %v1475_v42 }
 0x22c   :  { %3711 = vtanh.f32 %v1635_v43 }
 0x22e   :  { %v1794_v46 = vpop.f32.mrf.mxu2  ;;  %v1954_v47 = vpop.f32.mrf.mxu3 }
 0x22f   :  { %v3706_v48 = vpop.eup %3705  ;;  %v1795_v49 = vadd.f32 %v5024_v12, %v1794_v46  ;;  %v1955_v50 = vadd.f32 %v5024_v12, %v1954_v47  ;;  %v1476_v51 = vpop.f32.mrf.mxu0 }
 0x230   :  { %v1636_v52 = vpop.f32.mrf.mxu1  ;;  %v3708_v53 = vpop.eup %3707  ;;  %2422 = vst [vmem:[%s5412_s3 + $0x588] sm:$0xff] %v3706_v48  ;;  %v1477_v54 = vadd.f32 %v5024_v12, %v1476_v51 }
 0x231   :  { %v1637_v55 = vadd.f32 %v5024_v12, %v1636_v52  ;;  %v3710_v56 = vpop.eup %3709  ;;  %2486 = vst [vmem:[%s5412_s3 + $0x788] sm:$0xff] %v3708_v53  ;;  %3713 = vtanh.f32 %v1795_v49 }
 0x232   :  { %v3712_v57 = vpop.eup %3711  ;;  %2295 = vst [vmem:[%s5412_s3 + $0x190] sm:$0xff] %v3710_v56  ;;  %3715 = vtanh.f32 %v1955_v50 }
 0x233   :  { %2359 = vst [vmem:[%s5412_s3 + $0x390] sm:$0xff] %v3712_v57  ;;  %3717 = vtanh.f32 %v1477_v54 }
 0x234   :  { %3719 = vtanh.f32 %v1637_v55 }
 0x236   :  { %v1796_v58 = vpop.f32.mrf.mxu2  ;;  %v1956_v59 = vpop.f32.mrf.mxu3 }
 0x237   :  { %v3714_v60 = vpop.eup %3713  ;;  %v1797_v61 = vadd.f32 %v5024_v12, %v1796_v58  ;;  %v1957_v62 = vadd.f32 %v5024_v12, %v1956_v59  ;;  %v1479_v63 = vpop.f32.mrf.mxu0 }
 0x238   :  { %v1639_v0 = vpop.f32.mrf.mxu1  ;;  %v3716_v1 = vpop.eup %3715  ;;  %2423 = vst [vmem:[%s5412_s3 + $0x590] sm:$0xff] %v3714_v60  ;;  %v1480_v2 = vadd.f32 %v5024_v12, %v1479_v63 }
 0x239   :  { %v1640_v3 = vadd.f32 %v5024_v12, %v1639_v0  ;;  %v3718_v4 = vpop.eup %3717  ;;  %2487 = vst [vmem:[%s5412_s3 + $0x790] sm:$0xff] %v3716_v1  ;;  %3721 = vtanh.f32 %v1797_v61 }
 0x23a   :  { %v3720_v5 = vpop.eup %3719  ;;  %2296 = vst [vmem:[%s5412_s3 + $0x198] sm:$0xff] %v3718_v4  ;;  %3723 = vtanh.f32 %v1957_v62 }
 0x23b   :  { %2360 = vst [vmem:[%s5412_s3 + $0x398] sm:$0xff] %v3720_v5  ;;  %3725 = vtanh.f32 %v1480_v2 }
 0x23c   :  { %3727 = vtanh.f32 %v1640_v3 }
 0x23e   :  { %v1799_v6 = vpop.f32.mrf.mxu2  ;;  %v1959_v7 = vpop.f32.mrf.mxu3 }
 0x23f   :  { %v3722_v8 = vpop.eup %3721  ;;  %v1800_v9 = vadd.f32 %v5024_v12, %v1799_v6  ;;  %v1960_v10 = vadd.f32 %v5024_v12, %v1959_v7  ;;  %v1481_v11 = vpop.f32.mrf.mxu0 }
 0x240   :  { %v1641_v13 = vpop.f32.mrf.mxu1  ;;  %v3724_v14 = vpop.eup %3723  ;;  %2424 = vst [vmem:[%s5412_s3 + $0x598] sm:$0xff] %v3722_v8  ;;  %v1482_v15 = vadd.f32 %v5024_v12, %v1481_v11 }
 0x241   :  { %v1642_v27 = vadd.f32 %v5024_v12, %v1641_v13  ;;  %v3726_v16 = vpop.eup %3725  ;;  %2488 = vst [vmem:[%s5412_s3 + $0x798] sm:$0xff] %v3724_v14  ;;  %3729 = vtanh.f32 %v1800_v9 }
 0x242   :  { %v3728_v17 = vpop.eup %3727  ;;  %2297 = vst [vmem:[%s5412_s3 + $0x1a0] sm:$0xff] %v3726_v16  ;;  %3731 = vtanh.f32 %v1960_v10 }
 0x243   :  { %2361 = vst [vmem:[%s5412_s3 + $0x3a0] sm:$0xff] %v3728_v17  ;;  %3733 = vtanh.f32 %v1482_v15 }
 0x244   :  { %3735 = vtanh.f32 %v1642_v27 }
 0x246   :  { %v1801_v18 = vpop.f32.mrf.mxu2  ;;  %v1961_v19 = vpop.f32.mrf.mxu3 }
 0x247   :  { %v3730_v20 = vpop.eup %3729  ;;  %v1802_v21 = vadd.f32 %v5024_v12, %v1801_v18  ;;  %v1962_v22 = vadd.f32 %v5024_v12, %v1961_v19  ;;  %v1484_v23 = vpop.f32.mrf.mxu0 }
 0x248   :  { %v1644_v40 = vpop.f32.mrf.mxu1  ;;  %v3732_v24 = vpop.eup %3731  ;;  %2425 = vst [vmem:[%s5412_s3 + $0x5a0] sm:$0xff] %v3730_v20  ;;  %v1485_v25 = vadd.f32 %v5024_v12, %v1484_v23 }
 0x249   :  { %v1645_v26 = vadd.f32 %v5024_v12, %v1644_v40  ;;  %v3734_v28 = vpop.eup %3733  ;;  %2489 = vst [vmem:[%s5412_s3 + $0x7a0] sm:$0xff] %v3732_v24  ;;  %3737 = vtanh.f32 %v1802_v21 }
 0x24a   :  { %v3736_v29 = vpop.eup %3735  ;;  %2298 = vst [vmem:[%s5412_s3 + $0x1a8] sm:$0xff] %v3734_v28  ;;  %3739 = vtanh.f32 %v1962_v22 }
 0x24b   :  { %2362 = vst [vmem:[%s5412_s3 + $0x3a8] sm:$0xff] %v3736_v29  ;;  %3741 = vtanh.f32 %v1485_v25 }
 0x24c   :  { %3743 = vtanh.f32 %v1645_v26 }
 0x24e   :  { %v1804_v30 = vpop.f32.mrf.mxu2  ;;  %v1964_v31 = vpop.f32.mrf.mxu3 }
 0x24f   :  { %v3738_v32 = vpop.eup %3737  ;;  %v1805_v33 = vadd.f32 %v5024_v12, %v1804_v30  ;;  %v1965_v34 = vadd.f32 %v5024_v12, %v1964_v31  ;;  %v1486_v35 = vpop.f32.mrf.mxu0 }
 0x250   :  { %v1646_v36 = vpop.f32.mrf.mxu1  ;;  %v3740_v37 = vpop.eup %3739  ;;  %2426 = vst [vmem:[%s5412_s3 + $0x5a8] sm:$0xff] %v3738_v32  ;;  %v1487_v38 = vadd.f32 %v5024_v12, %v1486_v35 }
 0x251   :  { %v1647_v39 = vadd.f32 %v5024_v12, %v1646_v36  ;;  %v3742_v41 = vpop.eup %3741  ;;  %2490 = vst [vmem:[%s5412_s3 + $0x7a8] sm:$0xff] %v3740_v37  ;;  %3745 = vtanh.f32 %v1805_v33 }
 0x252   :  { %v3744_v42 = vpop.eup %3743  ;;  %2299 = vst [vmem:[%s5412_s3 + $0x1b0] sm:$0xff] %v3742_v41  ;;  %3747 = vtanh.f32 %v1965_v34 }
 0x253   :  { %2363 = vst [vmem:[%s5412_s3 + $0x3b0] sm:$0xff] %v3744_v42  ;;  %3749 = vtanh.f32 %v1487_v38 }
 0x254   :  { %3751 = vtanh.f32 %v1647_v39 }
 0x256   :  { %v1806_v43 = vpop.f32.mrf.mxu2  ;;  %v1966_v44 = vpop.f32.mrf.mxu3 }
 0x257   :  { %v3746_v45 = vpop.eup %3745  ;;  %v1807_v46 = vadd.f32 %v5024_v12, %v1806_v43  ;;  %v1967_v47 = vadd.f32 %v5024_v12, %v1966_v44  ;;  %v1489_v48 = vpop.f32.mrf.mxu0 }
 0x258   :  { %v1649_v49 = vpop.f32.mrf.mxu1  ;;  %v3748_v50 = vpop.eup %3747  ;;  %2427 = vst [vmem:[%s5412_s3 + $0x5b0] sm:$0xff] %v3746_v45  ;;  %v1490_v51 = vadd.f32 %v5024_v12, %v1489_v48 }
 0x259   :  { %v1650_v52 = vadd.f32 %v5024_v12, %v1649_v49  ;;  %v3750_v53 = vpop.eup %3749  ;;  %2491 = vst [vmem:[%s5412_s3 + $0x7b0] sm:$0xff] %v3748_v50  ;;  %3753 = vtanh.f32 %v1807_v46 }
 0x25a   :  { %v3752_v54 = vpop.eup %3751  ;;  %2300 = vst [vmem:[%s5412_s3 + $0x1b8] sm:$0xff] %v3750_v53  ;;  %3755 = vtanh.f32 %v1967_v47 }
 0x25b   :  { %2364 = vst [vmem:[%s5412_s3 + $0x3b8] sm:$0xff] %v3752_v54  ;;  %3757 = vtanh.f32 %v1490_v51 }
 0x25c   :  { %3759 = vtanh.f32 %v1650_v52 }
 0x25e   :  { %v1809_v55 = vpop.f32.mrf.mxu2  ;;  %v1969_v56 = vpop.f32.mrf.mxu3 }
 0x25f   :  { %v3754_v57 = vpop.eup %3753  ;;  %v1810_v58 = vadd.f32 %v5024_v12, %v1809_v55  ;;  %v1970_v59 = vadd.f32 %v5024_v12, %v1969_v56  ;;  %v1491_v60 = vpop.f32.mrf.mxu0 }
 0x260   :  { %v1651_v61 = vpop.f32.mrf.mxu1  ;;  %v3756_v62 = vpop.eup %3755  ;;  %2428 = vst [vmem:[%s5412_s3 + $0x5b8] sm:$0xff] %v3754_v57  ;;  %v1492_v63 = vadd.f32 %v5024_v12, %v1491_v60 }
 0x261   :  { %v1652_v0 = vadd.f32 %v5024_v12, %v1651_v61  ;;  %v3758_v1 = vpop.eup %3757  ;;  %2492 = vst [vmem:[%s5412_s3 + $0x7b8] sm:$0xff] %v3756_v62  ;;  %3761 = vtanh.f32 %v1810_v58 }
 0x262   :  { %v3760_v2 = vpop.eup %3759  ;;  %2301 = vst [vmem:[%s5412_s3 + $0x1c0] sm:$0xff] %v3758_v1  ;;  %3763 = vtanh.f32 %v1970_v59 }
 0x263   :  { %2365 = vst [vmem:[%s5412_s3 + $0x3c0] sm:$0xff] %v3760_v2  ;;  %3765 = vtanh.f32 %v1492_v63 }
 0x264   :  { %3767 = vtanh.f32 %v1652_v0 }
 0x266   :  { %v1811_v3 = vpop.f32.mrf.mxu2  ;;  %v1971_v4 = vpop.f32.mrf.mxu3 }
 0x267   :  { %v3762_v5 = vpop.eup %3761  ;;  %v1812_v6 = vadd.f32 %v5024_v12, %v1811_v3  ;;  %v1972_v7 = vadd.f32 %v5024_v12, %v1971_v4  ;;  %v1494_v8 = vpop.f32.mrf.mxu0 }
 0x268   :  { %v1654_v9 = vpop.f32.mrf.mxu1  ;;  %v3764_v10 = vpop.eup %3763  ;;  %2429 = vst [vmem:[%s5412_s3 + $0x5c0] sm:$0xff] %v3762_v5  ;;  %v1495_v11 = vadd.f32 %v5024_v12, %v1494_v8 }
 0x269   :  { %v1655_v13 = vadd.f32 %v5024_v12, %v1654_v9  ;;  %v3766_v14 = vpop.eup %3765  ;;  %2493 = vst [vmem:[%s5412_s3 + $0x7c0] sm:$0xff] %v3764_v10  ;;  %3769 = vtanh.f32 %v1812_v6 }
 0x26a   :  { %v3768_v15 = vpop.eup %3767  ;;  %2302 = vst [vmem:[%s5412_s3 + $0x1c8] sm:$0xff] %v3766_v14  ;;  %3771 = vtanh.f32 %v1972_v7 }
 0x26b   :  { %2366 = vst [vmem:[%s5412_s3 + $0x3c8] sm:$0xff] %v3768_v15  ;;  %3773 = vtanh.f32 %v1495_v11 }
 0x26c   :  { %3775 = vtanh.f32 %v1655_v13 }
 0x26e   :  { %v1814_v27 = vpop.f32.mrf.mxu2  ;;  %v1974_v16 = vpop.f32.mrf.mxu3 }
 0x26f   :  { %v3770_v17 = vpop.eup %3769  ;;  %v1815_v18 = vadd.f32 %v5024_v12, %v1814_v27  ;;  %v1975_v19 = vadd.f32 %v5024_v12, %v1974_v16  ;;  %v1496_v20 = vpop.f32.mrf.mxu0 }
 0x270   :  { %v1656_v21 = vpop.f32.mrf.mxu1  ;;  %v3772_v22 = vpop.eup %3771  ;;  %2430 = vst [vmem:[%s5412_s3 + $0x5c8] sm:$0xff] %v3770_v17  ;;  %v1497_v23 = vadd.f32 %v5024_v12, %v1496_v20 }
 0x271   :  { %v1657_v40 = vadd.f32 %v5024_v12, %v1656_v21  ;;  %v3774_v24 = vpop.eup %3773  ;;  %2494 = vst [vmem:[%s5412_s3 + $0x7c8] sm:$0xff] %v3772_v22  ;;  %3777 = vtanh.f32 %v1815_v18 }
 0x272   :  { %v3776_v25 = vpop.eup %3775  ;;  %2303 = vst [vmem:[%s5412_s3 + $0x1d0] sm:$0xff] %v3774_v24  ;;  %3779 = vtanh.f32 %v1975_v19 }
 0x273   :  { %2367 = vst [vmem:[%s5412_s3 + $0x3d0] sm:$0xff] %v3776_v25  ;;  %3781 = vtanh.f32 %v1497_v23 }
 0x274   :  { %3783 = vtanh.f32 %v1657_v40 }
 0x276   :  { %v1816_v26 = vpop.f32.mrf.mxu2  ;;  %v1976_v28 = vpop.f32.mrf.mxu3 }
 0x277   :  { %v3778_v29 = vpop.eup %3777  ;;  %v1817_v30 = vadd.f32 %v5024_v12, %v1816_v26  ;;  %v1977_v31 = vadd.f32 %v5024_v12, %v1976_v28  ;;  %v1499_v32 = vpop.f32.mrf.mxu0 }
 0x278   :  { %v1659_v33 = vpop.f32.mrf.mxu1  ;;  %v3780_v34 = vpop.eup %3779  ;;  %2431 = vst [vmem:[%s5412_s3 + $0x5d0] sm:$0xff] %v3778_v29  ;;  %v1500_v35 = vadd.f32 %v5024_v12, %v1499_v32 }
 0x279   :  { %v1660_v36 = vadd.f32 %v5024_v12, %v1659_v33  ;;  %v3782_v37 = vpop.eup %3781  ;;  %2495 = vst [vmem:[%s5412_s3 + $0x7d0] sm:$0xff] %v3780_v34  ;;  %3785 = vtanh.f32 %v1817_v30 }
 0x27a   :  { %v3784_v38 = vpop.eup %3783  ;;  %2304 = vst [vmem:[%s5412_s3 + $0x1d8] sm:$0xff] %v3782_v37  ;;  %3787 = vtanh.f32 %v1977_v31 }
 0x27b   :  { %2368 = vst [vmem:[%s5412_s3 + $0x3d8] sm:$0xff] %v3784_v38  ;;  %3789 = vtanh.f32 %v1500_v35 }
 0x27c   :  { %3791 = vtanh.f32 %v1660_v36 }
 0x27e   :  { %v1819_v39 = vpop.f32.mrf.mxu2  ;;  %v1979_v41 = vpop.f32.mrf.mxu3 }
 0x27f   :  { %v3786_v42 = vpop.eup %3785  ;;  %v1820_v43 = vadd.f32 %v5024_v12, %v1819_v39  ;;  %v1980_v44 = vadd.f32 %v5024_v12, %v1979_v41  ;;  %v1501_v45 = vpop.f32.mrf.mxu0 }
 0x280   :  { %v1661_v46 = vpop.f32.mrf.mxu1  ;;  %v3788_v47 = vpop.eup %3787  ;;  %2432 = vst [vmem:[%s5412_s3 + $0x5d8] sm:$0xff] %v3786_v42  ;;  %v1502_v48 = vadd.f32 %v5024_v12, %v1501_v45 }
 0x281   :  { %v1662_v49 = vadd.f32 %v5024_v12, %v1661_v46  ;;  %v3790_v50 = vpop.eup %3789  ;;  %2496 = vst [vmem:[%s5412_s3 + $0x7d8] sm:$0xff] %v3788_v47  ;;  %3793 = vtanh.f32 %v1820_v43 }
 0x282   :  { %v3792_v51 = vpop.eup %3791  ;;  %2305 = vst [vmem:[%s5412_s3 + $0x1e0] sm:$0xff] %v3790_v50  ;;  %3795 = vtanh.f32 %v1980_v44 }
 0x283   :  { %2369 = vst [vmem:[%s5412_s3 + $0x3e0] sm:$0xff] %v3792_v51  ;;  %3797 = vtanh.f32 %v1502_v48 }
 0x284   :  { %3799 = vtanh.f32 %v1662_v49 }
 0x286   :  { %v1821_v52 = vpop.f32.mrf.mxu2  ;;  %v1981_v53 = vpop.f32.mrf.mxu3 }
 0x287   :  { %v3794_v54 = vpop.eup %3793  ;;  %v1822_v55 = vadd.f32 %v5024_v12, %v1821_v52  ;;  %v1982_v56 = vadd.f32 %v5024_v12, %v1981_v53  ;;  %v1504_v57 = vpop.f32.mrf.mxu0 }
 0x288   :  { %v1664_v58 = vpop.f32.mrf.mxu1  ;;  %v3796_v59 = vpop.eup %3795  ;;  %2433 = vst [vmem:[%s5412_s3 + $0x5e0] sm:$0xff] %v3794_v54  ;;  %v1505_v60 = vadd.f32 %v5024_v12, %v1504_v57 }
 0x289   :  { %v1665_v61 = vadd.f32 %v5024_v12, %v1664_v58  ;;  %v3798_v62 = vpop.eup %3797  ;;  %2497 = vst [vmem:[%s5412_s3 + $0x7e0] sm:$0xff] %v3796_v59  ;;  %3801 = vtanh.f32 %v1822_v55 }
 0x28a   :  { %v3800_v63 = vpop.eup %3799  ;;  %2306 = vst [vmem:[%s5412_s3 + $0x1e8] sm:$0xff] %v3798_v62  ;;  %3803 = vtanh.f32 %v1982_v56 }
 0x28b   :  { %2370 = vst [vmem:[%s5412_s3 + $0x3e8] sm:$0xff] %v3800_v63  ;;  %3805 = vtanh.f32 %v1505_v60 }
 0x28c   :  { %3807 = vtanh.f32 %v1665_v61 }
 0x28e   :  { %v1824_v0 = vpop.f32.mrf.mxu2  ;;  %v1984_v1 = vpop.f32.mrf.mxu3 }
 0x28f   :  { %v3802_v2 = vpop.eup %3801  ;;  %v1825_v3 = vadd.f32 %v5024_v12, %v1824_v0  ;;  %v1985_v4 = vadd.f32 %v5024_v12, %v1984_v1  ;;  %v1506_v5 = vpop.f32.mrf.mxu0 }
 0x290   :  { %v1666_v6 = vpop.f32.mrf.mxu1  ;;  %v3804_v7 = vpop.eup %3803  ;;  %2434 = vst [vmem:[%s5412_s3 + $0x5e8] sm:$0xff] %v3802_v2  ;;  %v1507_v8 = vadd.f32 %v5024_v12, %v1506_v5 }
 0x291   :  { %v1667_v9 = vadd.f32 %v5024_v12, %v1666_v6  ;;  %v3806_v10 = vpop.eup %3805  ;;  %2498 = vst [vmem:[%s5412_s3 + $0x7e8] sm:$0xff] %v3804_v7  ;;  %3809 = vtanh.f32 %v1825_v3 }
 0x292   :  { %v3808_v11 = vpop.eup %3807  ;;  %2307 = vst [vmem:[%s5412_s3 + $0x1f0] sm:$0xff] %v3806_v10  ;;  %3811 = vtanh.f32 %v1985_v4 }
 0x293   :  { %2371 = vst [vmem:[%s5412_s3 + $0x3f0] sm:$0xff] %v3808_v11  ;;  %3813 = vtanh.f32 %v1507_v8 }
 0x294   :  { %3815 = vtanh.f32 %v1667_v9 }
 0x296   :  { %v1826_v13 = vpop.f32.mrf.mxu2  ;;  %v1986_v14 = vpop.f32.mrf.mxu3 }
 0x297   :  { %v3810_v15 = vpop.eup %3809  ;;  %v1827_v27 = vadd.f32 %v5024_v12, %v1826_v13  ;;  %v1987_v16 = vadd.f32 %v5024_v12, %v1986_v14 }
 0x298   :  { %v3812_v17 = vpop.eup %3811  ;;  %2435 = vst [vmem:[%s5412_s3 + $0x5f0] sm:$0xff] %v3810_v15 }
 0x299   :  { %v3814_v18 = vpop.eup %3813  ;;  %2499 = vst [vmem:[%s5412_s3 + $0x7f0] sm:$0xff] %v3812_v17  ;;  %3817 = vtanh.f32 %v1827_v27 }
 0x29a   :  { %v3816_v19 = vpop.eup %3815  ;;  %2308 = vst [vmem:[%s5412_s3 + $0x1f8] sm:$0xff] %v3814_v18  ;;  %3819 = vtanh.f32 %v1987_v16 }
 0x29b   :  { %2372 = vst [vmem:[%s5412_s3 + $0x3f8] sm:$0xff] %v3816_v19 }
 0x29f   :  { %v3818_v12 = vpop.eup %3817 }
 0x2a0   :  { %v3820_v20 = vpop.eup %3819  ;;  %2436 = vst [vmem:[%s5412_s3 + $0x5f8] sm:$0xff] %v3818_v12 }
 0x2a1   :  { %2500 = vst [vmem:[%s5412_s3 + $0x7f8] sm:$0xff] %v3820_v20 }

</bundles_post_ra>
